<compile_context>
chip_gen: v5e
topology: v5e:2x2
jax: 0.10.0
libtpu: 0.0.40
codegen_flags: <defaults>
</compile_context>

<pallas_src>
import functools

import jax
import jax.numpy as jnp
from jax.experimental import pallas as pl
from jax.experimental.pallas import tpu as pltpu


# ---------------------------------------------------------------------------
# In-kernel helpers (operate on values + VMEM scratch refs).
# ---------------------------------------------------------------------------
def _conv3x3_im2col(x_hwc, w, b, pad_ref, patch_ref, *, relu_in, relu_out):
    """3x3 conv, stride 1, pad 1, as one im2col MXU matmul.

    x_hwc    : (H, W, Cin) f32 value
    w        : (9*Cin, Cout) value (bf16), tap-major (kh, kw, cin) ordering
    b        : (1, Cout) f32 value
    pad_ref  : VMEM scratch (H+2, W+2, Cin) f32, border already zero
    patch_ref: VMEM scratch (H*W, 9*Cin) in the MXU dtype
    """
    H, W, Cin = x_hwc.shape
    Cout = w.shape[-1]

    if relu_in:
        x_hwc = jnp.maximum(x_hwc, 0.0)          # relu BEFORE padding (exact)

    # In-kernel zero padding: only the interior is (re)written per conv.
    pad_ref[1:H + 1, 1:W + 1, :] = x_hwc
    xp = pad_ref[...]                            # (H+2, W+2, Cin)

    # im2col: 9 shifted copies -> (H*W, 9*Cin) patch matrix in VMEM scratch.
    for kh in range(3):
        for kw in range(3):
            c0 = (kh * 3 + kw) * Cin
            piece = xp[kh:kh + H, kw:kw + W, :].reshape(H * W, Cin)
            patch_ref[:, c0:c0 + Cin] = piece.astype(patch_ref.dtype)

    # Single MXU matmul with K = 9*Cin, f32 accumulation.
    acc = jnp.dot(patch_ref[...], w, preferred_element_type=jnp.float32)
    acc = acc + b                                # (1, Cout) broadcast, f32
    if relu_out:
        acc = jnp.maximum(acc, 0.0)
    return acc.reshape(H, W, Cout)


def _maxpool3x3_s2(y, cm_ref):
    """3x3 max-pool, stride 2, pad 1 (PyTorch semantics), computed at stride 2.

    y      : (H, W, C) f32 value (H, W even)
    cm_ref : VMEM scratch (H, W//2, C) f32 for the per-column maxima
    returns: (H//2, W//2, C) f32
    """
    H, W, C = y.shape
    Ho, Wo = H // 2, W // 2

    # --- W direction (window cols 2j-1, 2j, 2j+1; left edge clamped) ---
    cm_ref[:, 0:1, :] = jnp.maximum(y[:, 0:1, :], y[:, 1:2, :])
    for j in range(1, Wo):
        m = jnp.maximum(y[:, 2 * j - 1:2 * j, :], y[:, 2 * j:2 * j + 1, :])
        m = jnp.maximum(m, y[:, 2 * j + 1:2 * j + 2, :])
        cm_ref[:, j:j + 1, :] = m
    cm = cm_ref[...]                             # (H, Wo, C)

    # --- H direction (window rows 2i-1, 2i, 2i+1; top edge clamped) ---
    a = cm.reshape(Ho, 2, Wo, C)                 # split of the major axis only
    r01 = jnp.maximum(a[:, 0], a[:, 1])          # rows 2i, 2i+1
    prev = a[:, 1]                               # rows 2i+1
    shifted = jnp.concatenate(                   # rows 2i-1 (none for i == 0)
        [jnp.full((1, Wo, C), -jnp.inf, cm.dtype), prev[:Ho - 1]], axis=0)
    return jnp.maximum(r01, shifted)


# ---------------------------------------------------------------------------
# Fused ConvBlock kernel: conv1 -> maxpool(3,2,1) -> ResBlock -> ResBlock.
# One batch image per grid step; everything stays in VMEM.
# ---------------------------------------------------------------------------
def _convblock_kernel(x_ref, w1_ref, b1_ref, wr_ref, br_ref, o_ref,
                      pad1_ref, padr_ref, patch1_ref, patchr_ref, cm_ref):
    # Zero the pad buffers once per step; conv calls only rewrite the interior,
    # so the zero border is preserved across the four residual convs.
    pad1_ref[...] = jnp.zeros(pad1_ref.shape, pad1_ref.dtype)
    padr_ref[...] = jnp.zeros(padr_ref.shape, padr_ref.dtype)

    x = x_ref[0]                                                   # (H, W, Cin)

    # conv1 (no activation)
    y = _conv3x3_im2col(x, w1_ref[...], b1_ref[...], pad1_ref, patch1_ref,
                        relu_in=False, relu_out=False)             # (H, W, Cb)

    # max-pool 3x3, stride 2, pad 1
    y = _maxpool3x3_s2(y, cm_ref)                                  # (Ho, Wo, Cb)

    # two ResBlocks: y = y + conv_b(relu(conv_a(relu(y))))
    for i in range(2):
        t = _conv3x3_im2col(y, wr_ref[2 * i], br_ref[2 * i],
                            padr_ref, patchr_ref,
                            relu_in=True, relu_out=True)
        d = _conv3x3_im2col(t, wr_ref[2 * i + 1], br_ref[2 * i + 1],
                            padr_ref, patchr_ref,
                            relu_in=False, relu_out=False)
        y = y + d

    o_ref[0] = y


def convblock_pallas(x_nchw, params, *, mxu_dtype=jnp.bfloat16):
    """ConvBlock forward.  x_nchw: (N, Cin, H, W) f32 (PyTorch layout)."""
    N, Cin, H, W = x_nchw.shape
    assert H % 2 == 0 and W % 2 == 0
    Cb = params["b1"].shape[0]
    Ho, Wo = H // 2, W // 2

    x = jnp.transpose(x_nchw, (0, 2, 3, 1)).astype(jnp.float32)    # NHWC

    # Weights reshaped for im2col (tap-major (kh, kw, cin) ordering) and cast
    # to the MXU dtype; biases stay f32 for the epilogue.
    w1 = params["w1"].reshape(9 * Cin, Cb).astype(mxu_dtype)
    b1 = params["b1"].reshape(1, Cb).astype(jnp.float32)
    wr = jnp.stack([params[k].reshape(9 * Cb, Cb)
                    for k in ("r1a_w", "r1b_w", "r2a_w", "r2b_w")]
                   ).astype(mxu_dtype)                             # (4, 9Cb, Cb)
    br = jnp.stack([params[k].reshape(1, Cb)
                    for k in ("r1a_b", "r1b_b", "r2a_b", "r2b_b")]
                   ).astype(jnp.float32)                           # (4, 1, Cb)

    out_nhwc = pl.pallas_call(
        _convblock_kernel,
        out_shape=jax.ShapeDtypeStruct((N, Ho, Wo, Cb), jnp.float32),
        grid=(N,),
        in_specs=[
            pl.BlockSpec((1, H, W, Cin), lambda n: (n, 0, 0, 0)),   # x
            pl.BlockSpec((9 * Cin, Cb), lambda n: (0, 0)),          # w1
            pl.BlockSpec((1, Cb), lambda n: (0, 0)),                # b1
            pl.BlockSpec((4, 9 * Cb, Cb), lambda n: (0, 0, 0)),     # res weights
            pl.BlockSpec((4, 1, Cb), lambda n: (0, 0, 0)),          # res biases
        ],
        out_specs=pl.BlockSpec((1, Ho, Wo, Cb), lambda n: (n, 0, 0, 0)),
        scratch_shapes=[
            pltpu.VMEM((H + 2, W + 2, Cin), jnp.float32),      # conv1 pad
            pltpu.VMEM((Ho + 2, Wo + 2, Cb), jnp.float32),     # res-conv pad
            pltpu.VMEM((H * W, 9 * Cin), mxu_dtype),           # conv1 im2col
            pltpu.VMEM((Ho * Wo, 9 * Cb), mxu_dtype),          # res im2col
            pltpu.VMEM((H, Wo, Cb), jnp.float32),              # pool col-max
        ],
        compiler_params=pltpu.CompilerParams(
            dimension_semantics=("parallel",)),
    )(x, w1, b1, wr, br)

    return jnp.transpose(out_nhwc, (0, 3, 1, 2))                   # NHWC -> NCHW


# ---------------------------------------------------------------------------
# Pure-JAX reference (XLA conv / reduce_window) for correctness checking.
# mxu_dtype quantizes the conv operands the same way the kernel does.
# ---------------------------------------------------------------------------
def _ref_conv(x, w, b, mxu_dtype):
    xq = x.astype(mxu_dtype).astype(jnp.float32)
    wq = w.astype(mxu_dtype).astype(jnp.float32)
    y = jax.lax.conv_general_dilated(
        xq, wq, window_strides=(1, 1), padding=((1, 1), (1, 1)),
        dimension_numbers=("NHWC", "HWIO", "NHWC"))
    return y + b


def _ref_maxpool(x):
    return jax.lax.reduce_window(
        x, -jnp.inf, jax.lax.max,
        window_dimensions=(1, 3, 3, 1), window_strides=(1, 2, 2, 1),
        padding=((0, 0), (1, 1), (1, 1), (0, 0)))


def convblock_ref(x_nchw, params, *, mxu_dtype=jnp.float32):
    x = jnp.transpose(x_nchw, (0, 2, 3, 1)).astype(jnp.float32)
    y = _ref_maxpool(_ref_conv(x, params["w1"], params["b1"], mxu_dtype))
    for p in ("r1", "r2"):
        z = jnp.maximum(y, 0.0)
        z = jnp.maximum(
            _ref_conv(z, params[p + "a_w"], params[p + "a_b"], mxu_dtype), 0.0)
        z = _ref_conv(z, params[p + "b_w"], params[p + "b_b"], mxu_dtype)
        y = y + z
    return jnp.transpose(y, (0, 3, 1, 2))


# ---------------------------------------------------------------------------
# Deterministic parameter init (shapes from the nn.Module __init__).
# ---------------------------------------------------------------------------
def init_params(key, in_channels, block_channels):
    def conv_init(k, cin, cout):
        kw_, kb_ = jax.random.split(k)
        bound = 1.0 / jnp.sqrt(cin * 9.0)
        w = jax.random.uniform(kw_, (3, 3, cin, cout), jnp.float32, -bound, bound)
        b = jax.random.uniform(kb_, (cout,), jnp.float32, -bound, bound)
        return w, b

    keys = jax.random.split(key, 5)
    params = {}
    params["w1"], params["b1"] = conv_init(keys[0], in_channels, block_channels)
    params["r1a_w"], params["r1a_b"] = conv_init(keys[1], block_channels, block_channels)
    params["r1b_w"], params["r1b_b"] = conv_init(keys[2], block_channels, block_channels)
    params["r2a_w"], params["r2a_b"] = conv_init(keys[3], block_channels, block_channels)
    params["r2b_w"], params["r2b_b"] = conv_init(keys[4], block_channels, block_channels)
    return params


if __name__ == "__main__":
    N, Cin, H, W = 2, 4, 16, 16
    Cb = 8

    key = jax.random.PRNGKey(0)
    kx, kp = jax.random.split(key)
    x = jax.random.normal(kx, (N, Cin, H, W), jnp.float32)   # NCHW, like PyTorch
    params = init_params(kp, Cin, Cb)

    fwd = jax.jit(functools.partial(convblock_pallas, mxu_dtype=jnp.bfloat16))
    out = jax.block_until_ready(fwd(x, params))
    assert out.shape == (N, Cb, H // 2, W // 2)

    # Primary check: reference with identically bf16-quantized conv operands
    # (f32 accumulation) -> differences are accumulation-order noise only.
    ref = jax.block_until_ready(convblock_ref(x, params, mxu_dtype=jnp.bfloat16))
    err = float(jnp.max(jnp.abs(out - ref)))
    assert err < 1e-3, f"mismatch vs bf16-operand reference: {err}"

    # Sanity check vs full-f32 math (loose tolerance: bf16 MXU operands).
    ref32 = jax.block_until_ready(convblock_ref(x, params, mxu_dtype=jnp.float32))
    err32 = float(jnp.max(jnp.abs(out - ref32)))
    assert err32 < 5e-2, f"mismatch vs f32 reference: {err32}"

    print("KERNEL_OK")
</pallas_src>

<mosaic_0001>
module attributes {stable_mosaic.version = 11 : i64} {
  func.func @_convblock_kernel(%arg0: i32, %arg1: memref<1x16x16x4xf32, #tpu.memory_space<vmem>>, %arg2: memref<36x8xbf16, #tpu.memory_space<vmem>>, %arg3: memref<1x8xf32, #tpu.memory_space<vmem>>, %arg4: memref<4x72x8xbf16, #tpu.memory_space<vmem>>, %arg5: memref<4x1x8xf32, #tpu.memory_space<vmem>>, %arg6: memref<1x8x8x8xf32, #tpu.memory_space<vmem>>, %arg7: memref<18x18x4xf32, #tpu.memory_space<vmem>>, %arg8: memref<10x10x8xf32, #tpu.memory_space<vmem>>, %arg9: memref<256x36xbf16, #tpu.memory_space<vmem>>, %arg10: memref<64x72xbf16, #tpu.memory_space<vmem>>, %arg11: memref<16x8x8xf32, #tpu.memory_space<vmem>>) attributes {dimension_semantics = [#tpu.dimension_semantics<parallel>], iteration_bounds = array<i64: 2>, scalar_prefetch = 0 : i64, scratch_operands = 5 : i64, tpu.core_type = #tpu.core_type<tc>, window_params = [{transform_indices = @transform_0, window_bounds = array<i64: 1, 16, 16, 4>}, {pipeline_mode = #tpu.pipeline_mode<synchronous>, transform_indices = @transform_1, window_bounds = array<i64: 36, 8>}, {pipeline_mode = #tpu.pipeline_mode<synchronous>, transform_indices = @transform_2, window_bounds = array<i64: 1, 8>}, {pipeline_mode = #tpu.pipeline_mode<synchronous>, transform_indices = @transform_3, window_bounds = array<i64: 4, 72, 8>}, {pipeline_mode = #tpu.pipeline_mode<synchronous>, transform_indices = @transform_4, window_bounds = array<i64: 4, 1, 8>}, {transform_indices = @transform_5, window_bounds = array<i64: 1, 8, 8, 8>}]} {
    %cst = arith.constant 0.000000e+00 : f32
    %0 = vector.broadcast %cst : f32 to vector<18x18x4xf32>
    %c0 = arith.constant 0 : index
    %c0_0 = arith.constant 0 : index
    %c0_1 = arith.constant 0 : index
    %1 = vector.load %arg7[%c0, %c0_0, %c0_1] : memref<18x18x4xf32, #tpu.memory_space<vmem>>, vector<18x18x4xf32>
    tpu.vector_store %arg7[%c0, %c0_0, %c0_1], %0 {strides = array<i32>} : memref<18x18x4xf32, #tpu.memory_space<vmem>>, vector<18x18x4xf32>,
    %cst_2 = arith.constant 0.000000e+00 : f32
    %2 = vector.broadcast %cst_2 : f32 to vector<10x10x8xf32>
    %c0_3 = arith.constant 0 : index
    %c0_4 = arith.constant 0 : index
    %c0_5 = arith.constant 0 : index
    %3 = vector.load %arg8[%c0_3, %c0_4, %c0_5] : memref<10x10x8xf32, #tpu.memory_space<vmem>>, vector<10x10x8xf32>
    tpu.vector_store %arg8[%c0_3, %c0_4, %c0_5], %2 {strides = array<i32>} : memref<10x10x8xf32, #tpu.memory_space<vmem>>, vector<10x10x8xf32>,
    %c0_6 = arith.constant 0 : index
    %c0_7 = arith.constant 0 : index
    %c0_8 = arith.constant 0 : index
    %c0_9 = arith.constant 0 : index
    %4 = vector.load %arg1[%c0_6, %c0_7, %c0_8, %c0_9] : memref<1x16x16x4xf32, #tpu.memory_space<vmem>>, vector<1x16x16x4xf32>
    %5 = vector.shape_cast %4 : vector<1x16x16x4xf32> to vector<16x16x4xf32>
    %c0_10 = arith.constant 0 : index
    %c0_11 = arith.constant 0 : index
    %6 = vector.load %arg2[%c0_10, %c0_11] : memref<36x8xbf16, #tpu.memory_space<vmem>>, vector<36x8xbf16>
    %c0_12 = arith.constant 0 : index
    %c0_13 = arith.constant 0 : index
    %7 = vector.load %arg3[%c0_12, %c0_13] : memref<1x8xf32, #tpu.memory_space<vmem>>, vector<1x8xf32>
    %c1 = arith.constant 1 : index
    %c1_14 = arith.constant 1 : index
    %c0_15 = arith.constant 0 : index
    %8 = vector.load %arg7[%c1, %c1_14, %c0_15] : memref<18x18x4xf32, #tpu.memory_space<vmem>>, vector<16x16x4xf32>
    tpu.vector_store %arg7[%c1, %c1_14, %c0_15], %5 {strides = array<i32>} : memref<18x18x4xf32, #tpu.memory_space<vmem>>, vector<16x16x4xf32>,
    %c0_16 = arith.constant 0 : index
    %c0_17 = arith.constant 0 : index
    %c0_18 = arith.constant 0 : index
    %9 = vector.load %arg7[%c0_16, %c0_17, %c0_18] : memref<18x18x4xf32, #tpu.memory_space<vmem>>, vector<18x18x4xf32>
    %10 = vector.extract_strided_slice %9 {offsets = [0, 0, 0], sizes = [16, 16, 4], strides = [1, 1, 1]} : vector<18x18x4xf32> to vector<16x16x4xf32>
    %11 = vector.shape_cast %10 : vector<16x16x4xf32> to vector<256x4xf32>
    %12 = arith.truncf %11 : vector<256x4xf32> to vector<256x4xbf16>
    %c0_19 = arith.constant 0 : index
    %c0_20 = arith.constant 0 : index
    %13 = vector.load %arg9[%c0_19, %c0_20] : memref<256x36xbf16, #tpu.memory_space<vmem>>, vector<256x4xbf16>
    tpu.vector_store %arg9[%c0_19, %c0_20], %12 {strides = array<i32>} : memref<256x36xbf16, #tpu.memory_space<vmem>>, vector<256x4xbf16>,
    %14 = vector.extract_strided_slice %9 {offsets = [0, 1, 0], sizes = [16, 16, 4], strides = [1, 1, 1]} : vector<18x18x4xf32> to vector<16x16x4xf32>
    %15 = vector.shape_cast %14 : vector<16x16x4xf32> to vector<256x4xf32>
    %16 = arith.truncf %15 : vector<256x4xf32> to vector<256x4xbf16>
    %c0_21 = arith.constant 0 : index
    %c4 = arith.constant 4 : index
    %17 = vector.load %arg9[%c0_21, %c4] : memref<256x36xbf16, #tpu.memory_space<vmem>>, vector<256x4xbf16>
    tpu.vector_store %arg9[%c0_21, %c4], %16 {strides = array<i32>} : memref<256x36xbf16, #tpu.memory_space<vmem>>, vector<256x4xbf16>,
    %18 = vector.extract_strided_slice %9 {offsets = [0, 2, 0], sizes = [16, 16, 4], strides = [1, 1, 1]} : vector<18x18x4xf32> to vector<16x16x4xf32>
    %19 = vector.shape_cast %18 : vector<16x16x4xf32> to vector<256x4xf32>
    %20 = arith.truncf %19 : vector<256x4xf32> to vector<256x4xbf16>
    %c0_22 = arith.constant 0 : index
    %c8 = arith.constant 8 : index
    %21 = vector.load %arg9[%c0_22, %c8] : memref<256x36xbf16, #tpu.memory_space<vmem>>, vector<256x4xbf16>
    tpu.vector_store %arg9[%c0_22, %c8], %20 {strides = array<i32>} : memref<256x36xbf16, #tpu.memory_space<vmem>>, vector<256x4xbf16>,
    %22 = vector.extract_strided_slice %9 {offsets = [1, 0, 0], sizes = [16, 16, 4], strides = [1, 1, 1]} : vector<18x18x4xf32> to vector<16x16x4xf32>
    %23 = vector.shape_cast %22 : vector<16x16x4xf32> to vector<256x4xf32>
    %24 = arith.truncf %23 : vector<256x4xf32> to vector<256x4xbf16>
    %c0_23 = arith.constant 0 : index
    %c12 = arith.constant 12 : index
    %25 = vector.load %arg9[%c0_23, %c12] : memref<256x36xbf16, #tpu.memory_space<vmem>>, vector<256x4xbf16>
    tpu.vector_store %arg9[%c0_23, %c12], %24 {strides = array<i32>} : memref<256x36xbf16, #tpu.memory_space<vmem>>, vector<256x4xbf16>,
    %26 = vector.extract_strided_slice %9 {offsets = [1, 1, 0], sizes = [16, 16, 4], strides = [1, 1, 1]} : vector<18x18x4xf32> to vector<16x16x4xf32>
    %27 = vector.shape_cast %26 : vector<16x16x4xf32> to vector<256x4xf32>
    %28 = arith.truncf %27 : vector<256x4xf32> to vector<256x4xbf16>
    %c0_24 = arith.constant 0 : index
    %c16 = arith.constant 16 : index
    %29 = vector.load %arg9[%c0_24, %c16] : memref<256x36xbf16, #tpu.memory_space<vmem>>, vector<256x4xbf16>
    tpu.vector_store %arg9[%c0_24, %c16], %28 {strides = array<i32>} : memref<256x36xbf16, #tpu.memory_space<vmem>>, vector<256x4xbf16>,
    %30 = vector.extract_strided_slice %9 {offsets = [1, 2, 0], sizes = [16, 16, 4], strides = [1, 1, 1]} : vector<18x18x4xf32> to vector<16x16x4xf32>
    %31 = vector.shape_cast %30 : vector<16x16x4xf32> to vector<256x4xf32>
    %32 = arith.truncf %31 : vector<256x4xf32> to vector<256x4xbf16>
    %c0_25 = arith.constant 0 : index
    %c20 = arith.constant 20 : index
    %33 = vector.load %arg9[%c0_25, %c20] : memref<256x36xbf16, #tpu.memory_space<vmem>>, vector<256x4xbf16>
    tpu.vector_store %arg9[%c0_25, %c20], %32 {strides = array<i32>} : memref<256x36xbf16, #tpu.memory_space<vmem>>, vector<256x4xbf16>,
    %34 = vector.extract_strided_slice %9 {offsets = [2, 0, 0], sizes = [16, 16, 4], strides = [1, 1, 1]} : vector<18x18x4xf32> to vector<16x16x4xf32>
    %35 = vector.shape_cast %34 : vector<16x16x4xf32> to vector<256x4xf32>
    %36 = arith.truncf %35 : vector<256x4xf32> to vector<256x4xbf16>
    %c0_26 = arith.constant 0 : index
    %c24 = arith.constant 24 : index
    %37 = vector.load %arg9[%c0_26, %c24] : memref<256x36xbf16, #tpu.memory_space<vmem>>, vector<256x4xbf16>
    tpu.vector_store %arg9[%c0_26, %c24], %36 {strides = array<i32>} : memref<256x36xbf16, #tpu.memory_space<vmem>>, vector<256x4xbf16>,
    %38 = vector.extract_strided_slice %9 {offsets = [2, 1, 0], sizes = [16, 16, 4], strides = [1, 1, 1]} : vector<18x18x4xf32> to vector<16x16x4xf32>
    %39 = vector.shape_cast %38 : vector<16x16x4xf32> to vector<256x4xf32>
    %40 = arith.truncf %39 : vector<256x4xf32> to vector<256x4xbf16>
    %c0_27 = arith.constant 0 : index
    %c28 = arith.constant 28 : index
    %41 = vector.load %arg9[%c0_27, %c28] : memref<256x36xbf16, #tpu.memory_space<vmem>>, vector<256x4xbf16>
    tpu.vector_store %arg9[%c0_27, %c28], %40 {strides = array<i32>} : memref<256x36xbf16, #tpu.memory_space<vmem>>, vector<256x4xbf16>,
    %42 = vector.extract_strided_slice %9 {offsets = [2, 2, 0], sizes = [16, 16, 4], strides = [1, 1, 1]} : vector<18x18x4xf32> to vector<16x16x4xf32>
    %43 = vector.shape_cast %42 : vector<16x16x4xf32> to vector<256x4xf32>
    %44 = arith.truncf %43 : vector<256x4xf32> to vector<256x4xbf16>
    %c0_28 = arith.constant 0 : index
    %c32 = arith.constant 32 : index
    %45 = vector.load %arg9[%c0_28, %c32] : memref<256x36xbf16, #tpu.memory_space<vmem>>, vector<256x4xbf16>
    tpu.vector_store %arg9[%c0_28, %c32], %44 {strides = array<i32>} : memref<256x36xbf16, #tpu.memory_space<vmem>>, vector<256x4xbf16>,
    %c0_29 = arith.constant 0 : index
    %c0_30 = arith.constant 0 : index
    %46 = vector.load %arg9[%c0_29, %c0_30] : memref<256x36xbf16, #tpu.memory_space<vmem>>, vector<256x36xbf16>
    %cst_31 = arith.constant dense<0.000000e+00> : vector<256x8xf32>
    %47 = tpu.matmul %46, %6, %cst_31 {dimension_numbers = #tpu.dot_dimension_numbers<[1], [0], [0], [1], [0, 0, 1, 1], [], []>} : vector<256x36xbf16>, vector<36x8xbf16>, vector<256x8xf32> -> vector<256x8xf32>
    %48 = vector.broadcast %7 : vector<1x8xf32> to vector<256x8xf32>
    %49 = arith.addf %47, %48 : vector<256x8xf32>
    %50 = vector.shape_cast %49 : vector<256x8xf32> to vector<16x16x8xf32>
    %51 = vector.extract_strided_slice %50 {offsets = [0, 0, 0], sizes = [16, 1, 8], strides = [1, 1, 1]} : vector<16x16x8xf32> to vector<16x1x8xf32>
    %52 = vector.extract_strided_slice %50 {offsets = [0, 1, 0], sizes = [16, 1, 8], strides = [1, 1, 1]} : vector<16x16x8xf32> to vector<16x1x8xf32>
    %53 = arith.maximumf %51, %52 : vector<16x1x8xf32>
    %c0_32 = arith.constant 0 : index
    %c0_33 = arith.constant 0 : index
    %c0_34 = arith.constant 0 : index
    %54 = vector.load %arg11[%c0_32, %c0_33, %c0_34] : memref<16x8x8xf32, #tpu.memory_space<vmem>>, vector<16x1x8xf32>
    tpu.vector_store %arg11[%c0_32, %c0_33, %c0_34], %53 {strides = array<i32>} : memref<16x8x8xf32, #tpu.memory_space<vmem>>, vector<16x1x8xf32>,
    %55 = vector.extract_strided_slice %50 {offsets = [0, 1, 0], sizes = [16, 1, 8], strides = [1, 1, 1]} : vector<16x16x8xf32> to vector<16x1x8xf32>
    %56 = vector.extract_strided_slice %50 {offsets = [0, 2, 0], sizes = [16, 1, 8], strides = [1, 1, 1]} : vector<16x16x8xf32> to vector<16x1x8xf32>
    %57 = arith.maximumf %55, %56 : vector<16x1x8xf32>
    %58 = vector.extract_strided_slice %50 {offsets = [0, 3, 0], sizes = [16, 1, 8], strides = [1, 1, 1]} : vector<16x16x8xf32> to vector<16x1x8xf32>
    %59 = arith.maximumf %57, %58 : vector<16x1x8xf32>
    %c0_35 = arith.constant 0 : index
    %c1_36 = arith.constant 1 : index
    %c0_37 = arith.constant 0 : index
    %60 = vector.load %arg11[%c0_35, %c1_36, %c0_37] : memref<16x8x8xf32, #tpu.memory_space<vmem>>, vector<16x1x8xf32>
    tpu.vector_store %arg11[%c0_35, %c1_36, %c0_37], %59 {strides = array<i32>} : memref<16x8x8xf32, #tpu.memory_space<vmem>>, vector<16x1x8xf32>,
    %61 = vector.extract_strided_slice %50 {offsets = [0, 3, 0], sizes = [16, 1, 8], strides = [1, 1, 1]} : vector<16x16x8xf32> to vector<16x1x8xf32>
    %62 = vector.extract_strided_slice %50 {offsets = [0, 4, 0], sizes = [16, 1, 8], strides = [1, 1, 1]} : vector<16x16x8xf32> to vector<16x1x8xf32>
    %63 = arith.maximumf %61, %62 : vector<16x1x8xf32>
    %64 = vector.extract_strided_slice %50 {offsets = [0, 5, 0], sizes = [16, 1, 8], strides = [1, 1, 1]} : vector<16x16x8xf32> to vector<16x1x8xf32>
    %65 = arith.maximumf %63, %64 : vector<16x1x8xf32>
    %c0_38 = arith.constant 0 : index
    %c2 = arith.constant 2 : index
    %c0_39 = arith.constant 0 : index
    %66 = vector.load %arg11[%c0_38, %c2, %c0_39] : memref<16x8x8xf32, #tpu.memory_space<vmem>>, vector<16x1x8xf32>
    tpu.vector_store %arg11[%c0_38, %c2, %c0_39], %65 {strides = array<i32>} : memref<16x8x8xf32, #tpu.memory_space<vmem>>, vector<16x1x8xf32>,
    %67 = vector.extract_strided_slice %50 {offsets = [0, 5, 0], sizes = [16, 1, 8], strides = [1, 1, 1]} : vector<16x16x8xf32> to vector<16x1x8xf32>
    %68 = vector.extract_strided_slice %50 {offsets = [0, 6, 0], sizes = [16, 1, 8], strides = [1, 1, 1]} : vector<16x16x8xf32> to vector<16x1x8xf32>
    %69 = arith.maximumf %67, %68 : vector<16x1x8xf32>
    %70 = vector.extract_strided_slice %50 {offsets = [0, 7, 0], sizes = [16, 1, 8], strides = [1, 1, 1]} : vector<16x16x8xf32> to vector<16x1x8xf32>
    %71 = arith.maximumf %69, %70 : vector<16x1x8xf32>
    %c0_40 = arith.constant 0 : index
    %c3 = arith.constant 3 : index
    %c0_41 = arith.constant 0 : index
    %72 = vector.load %arg11[%c0_40, %c3, %c0_41] : memref<16x8x8xf32, #tpu.memory_space<vmem>>, vector<16x1x8xf32>
    tpu.vector_store %arg11[%c0_40, %c3, %c0_41], %71 {strides = array<i32>} : memref<16x8x8xf32, #tpu.memory_space<vmem>>, vector<16x1x8xf32>,
    %73 = vector.extract_strided_slice %50 {offsets = [0, 7, 0], sizes = [16, 1, 8], strides = [1, 1, 1]} : vector<16x16x8xf32> to vector<16x1x8xf32>
    %74 = vector.extract_strided_slice %50 {offsets = [0, 8, 0], sizes = [16, 1, 8], strides = [1, 1, 1]} : vector<16x16x8xf32> to vector<16x1x8xf32>
    %75 = arith.maximumf %73, %74 : vector<16x1x8xf32>
    %76 = vector.extract_strided_slice %50 {offsets = [0, 9, 0], sizes = [16, 1, 8], strides = [1, 1, 1]} : vector<16x16x8xf32> to vector<16x1x8xf32>
    %77 = arith.maximumf %75, %76 : vector<16x1x8xf32>
    %c0_42 = arith.constant 0 : index
    %c4_43 = arith.constant 4 : index
    %c0_44 = arith.constant 0 : index
    %78 = vector.load %arg11[%c0_42, %c4_43, %c0_44] : memref<16x8x8xf32, #tpu.memory_space<vmem>>, vector<16x1x8xf32>
    tpu.vector_store %arg11[%c0_42, %c4_43, %c0_44], %77 {strides = array<i32>} : memref<16x8x8xf32, #tpu.memory_space<vmem>>, vector<16x1x8xf32>,
    %79 = vector.extract_strided_slice %50 {offsets = [0, 9, 0], sizes = [16, 1, 8], strides = [1, 1, 1]} : vector<16x16x8xf32> to vector<16x1x8xf32>
    %80 = vector.extract_strided_slice %50 {offsets = [0, 10, 0], sizes = [16, 1, 8], strides = [1, 1, 1]} : vector<16x16x8xf32> to vector<16x1x8xf32>
    %81 = arith.maximumf %79, %80 : vector<16x1x8xf32>
    %82 = vector.extract_strided_slice %50 {offsets = [0, 11, 0], sizes = [16, 1, 8], strides = [1, 1, 1]} : vector<16x16x8xf32> to vector<16x1x8xf32>
    %83 = arith.maximumf %81, %82 : vector<16x1x8xf32>
    %c0_45 = arith.constant 0 : index
    %c5 = arith.constant 5 : index
    %c0_46 = arith.constant 0 : index
    %84 = vector.load %arg11[%c0_45, %c5, %c0_46] : memref<16x8x8xf32, #tpu.memory_space<vmem>>, vector<16x1x8xf32>
    tpu.vector_store %arg11[%c0_45, %c5, %c0_46], %83 {strides = array<i32>} : memref<16x8x8xf32, #tpu.memory_space<vmem>>, vector<16x1x8xf32>,
    %85 = vector.extract_strided_slice %50 {offsets = [0, 11, 0], sizes = [16, 1, 8], strides = [1, 1, 1]} : vector<16x16x8xf32> to vector<16x1x8xf32>
    %86 = vector.extract_strided_slice %50 {offsets = [0, 12, 0], sizes = [16, 1, 8], strides = [1, 1, 1]} : vector<16x16x8xf32> to vector<16x1x8xf32>
    %87 = arith.maximumf %85, %86 : vector<16x1x8xf32>
    %88 = vector.extract_strided_slice %50 {offsets = [0, 13, 0], sizes = [16, 1, 8], strides = [1, 1, 1]} : vector<16x16x8xf32> to vector<16x1x8xf32>
    %89 = arith.maximumf %87, %88 : vector<16x1x8xf32>
    %c0_47 = arith.constant 0 : index
    %c6 = arith.constant 6 : index
    %c0_48 = arith.constant 0 : index
    %90 = vector.load %arg11[%c0_47, %c6, %c0_48] : memref<16x8x8xf32, #tpu.memory_space<vmem>>, vector<16x1x8xf32>
    tpu.vector_store %arg11[%c0_47, %c6, %c0_48], %89 {strides = array<i32>} : memref<16x8x8xf32, #tpu.memory_space<vmem>>, vector<16x1x8xf32>,
    %91 = vector.extract_strided_slice %50 {offsets = [0, 13, 0], sizes = [16, 1, 8], strides = [1, 1, 1]} : vector<16x16x8xf32> to vector<16x1x8xf32>
    %92 = vector.extract_strided_slice %50 {offsets = [0, 14, 0], sizes = [16, 1, 8], strides = [1, 1, 1]} : vector<16x16x8xf32> to vector<16x1x8xf32>
    %93 = arith.maximumf %91, %92 : vector<16x1x8xf32>
    %94 = vector.extract_strided_slice %50 {offsets = [0, 15, 0], sizes = [16, 1, 8], strides = [1, 1, 1]} : vector<16x16x8xf32> to vector<16x1x8xf32>
    %95 = arith.maximumf %93, %94 : vector<16x1x8xf32>
    %c0_49 = arith.constant 0 : index
    %c7 = arith.constant 7 : index
    %c0_50 = arith.constant 0 : index
    %96 = vector.load %arg11[%c0_49, %c7, %c0_50] : memref<16x8x8xf32, #tpu.memory_space<vmem>>, vector<16x1x8xf32>
    tpu.vector_store %arg11[%c0_49, %c7, %c0_50], %95 {strides = array<i32>} : memref<16x8x8xf32, #tpu.memory_space<vmem>>, vector<16x1x8xf32>,
    %c0_51 = arith.constant 0 : index
    %c0_52 = arith.constant 0 : index
    %c0_53 = arith.constant 0 : index
    %97 = vector.load %arg11[%c0_51, %c0_52, %c0_53] : memref<16x8x8xf32, #tpu.memory_space<vmem>>, vector<16x8x8xf32>
    %98 = vector.shape_cast %97 : vector<16x8x8xf32> to vector<8x2x8x8xf32>
    %99 = vector.extract_strided_slice %98 {offsets = [0, 0, 0, 0], sizes = [8, 1, 8, 8], strides = [1, 1, 1, 1]} : vector<8x2x8x8xf32> to vector<8x1x8x8xf32>
    %100 = vector.shape_cast %99 : vector<8x1x8x8xf32> to vector<8x8x8xf32>
    %101 = vector.extract_strided_slice %98 {offsets = [0, 1, 0, 0], sizes = [8, 1, 8, 8], strides = [1, 1, 1, 1]} : vector<8x2x8x8xf32> to vector<8x1x8x8xf32>
    %102 = vector.shape_cast %101 : vector<8x1x8x8xf32> to vector<8x8x8xf32>
    %103 = arith.maximumf %100, %102 : vector<8x8x8xf32>
    %104 = vector.extract_strided_slice %98 {offsets = [0, 1, 0, 0], sizes = [8, 1, 8, 8], strides = [1, 1, 1, 1]} : vector<8x2x8x8xf32> to vector<8x1x8x8xf32>
    %105 = vector.shape_cast %104 : vector<8x1x8x8xf32> to vector<8x8x8xf32>
    %cst_54 = arith.constant 0xFF800000 : f32
    %106 = vector.broadcast %cst_54 : f32 to vector<1x8x8xf32>
    %107 = vector.extract_strided_slice %105 {offsets = [0, 0, 0], sizes = [7, 8, 8], strides = [1, 1, 1]} : vector<8x8x8xf32> to vector<7x8x8xf32>
    %108 = tpu.concatenate %106, %107 in 0 : vector<1x8x8xf32>, vector<7x8x8xf32> -> vector<8x8x8xf32>
    %109 = arith.maximumf %103, %108 : vector<8x8x8xf32>
    %c0_55 = arith.constant 0 : index
    %c0_56 = arith.constant 0 : index
    %c0_57 = arith.constant 0 : index
    %110 = vector.load %arg4[%c0_55, %c0_56, %c0_57] : memref<4x72x8xbf16, #tpu.memory_space<vmem>>, vector<1x72x8xbf16>
    %111 = vector.shape_cast %110 : vector<1x72x8xbf16> to vector<72x8xbf16>
    %c0_58 = arith.constant 0 : index
    %c0_59 = arith.constant 0 : index
    %c0_60 = arith.constant 0 : index
    %112 = vector.load %arg5[%c0_58, %c0_59, %c0_60] : memref<4x1x8xf32, #tpu.memory_space<vmem>>, vector<1x1x8xf32>
    %113 = vector.shape_cast %112 : vector<1x1x8xf32> to vector<1x8xf32>
    %cst_61 = arith.constant 0.000000e+00 : f32
    %114 = vector.broadcast %cst_61 : f32 to vector<8x8x8xf32>
    %115 = arith.maximumf %109, %114 : vector<8x8x8xf32>
    %c1_62 = arith.constant 1 : index
    %c1_63 = arith.constant 1 : index
    %c0_64 = arith.constant 0 : index
    %116 = vector.load %arg8[%c1_62, %c1_63, %c0_64] : memref<10x10x8xf32, #tpu.memory_space<vmem>>, vector<8x8x8xf32>
    tpu.vector_store %arg8[%c1_62, %c1_63, %c0_64], %115 {strides = array<i32>} : memref<10x10x8xf32, #tpu.memory_space<vmem>>, vector<8x8x8xf32>,
    %c0_65 = arith.constant 0 : index
    %c0_66 = arith.constant 0 : index
    %c0_67 = arith.constant 0 : index
    %117 = vector.load %arg8[%c0_65, %c0_66, %c0_67] : memref<10x10x8xf32, #tpu.memory_space<vmem>>, vector<10x10x8xf32>
    %118 = vector.extract_strided_slice %117 {offsets = [0, 0, 0], sizes = [8, 8, 8], strides = [1, 1, 1]} : vector<10x10x8xf32> to vector<8x8x8xf32>
    %119 = vector.shape_cast %118 : vector<8x8x8xf32> to vector<64x8xf32>
    %120 = arith.truncf %119 : vector<64x8xf32> to vector<64x8xbf16>
    %c0_68 = arith.constant 0 : index
    %c0_69 = arith.constant 0 : index
    %121 = vector.load %arg10[%c0_68, %c0_69] : memref<64x72xbf16, #tpu.memory_space<vmem>>, vector<64x8xbf16>
    tpu.vector_store %arg10[%c0_68, %c0_69], %120 {strides = array<i32>} : memref<64x72xbf16, #tpu.memory_space<vmem>>, vector<64x8xbf16>,
    %122 = vector.extract_strided_slice %117 {offsets = [0, 1, 0], sizes = [8, 8, 8], strides = [1, 1, 1]} : vector<10x10x8xf32> to vector<8x8x8xf32>
    %123 = vector.shape_cast %122 : vector<8x8x8xf32> to vector<64x8xf32>
    %124 = arith.truncf %123 : vector<64x8xf32> to vector<64x8xbf16>
    %c0_70 = arith.constant 0 : index
    %c8_71 = arith.constant 8 : index
    %125 = vector.load %arg10[%c0_70, %c8_71] : memref<64x72xbf16, #tpu.memory_space<vmem>>, vector<64x8xbf16>
    tpu.vector_store %arg10[%c0_70, %c8_71], %124 {strides = array<i32>} : memref<64x72xbf16, #tpu.memory_space<vmem>>, vector<64x8xbf16>,
    %126 = vector.extract_strided_slice %117 {offsets = [0, 2, 0], sizes = [8, 8, 8], strides = [1, 1, 1]} : vector<10x10x8xf32> to vector<8x8x8xf32>
    %127 = vector.shape_cast %126 : vector<8x8x8xf32> to vector<64x8xf32>
    %128 = arith.truncf %127 : vector<64x8xf32> to vector<64x8xbf16>
    %c0_72 = arith.constant 0 : index
    %c16_73 = arith.constant 16 : index
    %129 = vector.load %arg10[%c0_72, %c16_73] : memref<64x72xbf16, #tpu.memory_space<vmem>>, vector<64x8xbf16>
    tpu.vector_store %arg10[%c0_72, %c16_73], %128 {strides = array<i32>} : memref<64x72xbf16, #tpu.memory_space<vmem>>, vector<64x8xbf16>,
    %130 = vector.extract_strided_slice %117 {offsets = [1, 0, 0], sizes = [8, 8, 8], strides = [1, 1, 1]} : vector<10x10x8xf32> to vector<8x8x8xf32>
    %131 = vector.shape_cast %130 : vector<8x8x8xf32> to vector<64x8xf32>
    %132 = arith.truncf %131 : vector<64x8xf32> to vector<64x8xbf16>
    %c0_74 = arith.constant 0 : index
    %c24_75 = arith.constant 24 : index
    %133 = vector.load %arg10[%c0_74, %c24_75] : memref<64x72xbf16, #tpu.memory_space<vmem>>, vector<64x8xbf16>
    tpu.vector_store %arg10[%c0_74, %c24_75], %132 {strides = array<i32>} : memref<64x72xbf16, #tpu.memory_space<vmem>>, vector<64x8xbf16>,
    %134 = vector.extract_strided_slice %117 {offsets = [1, 1, 0], sizes = [8, 8, 8], strides = [1, 1, 1]} : vector<10x10x8xf32> to vector<8x8x8xf32>
    %135 = vector.shape_cast %134 : vector<8x8x8xf32> to vector<64x8xf32>
    %136 = arith.truncf %135 : vector<64x8xf32> to vector<64x8xbf16>
    %c0_76 = arith.constant 0 : index
    %c32_77 = arith.constant 32 : index
    %137 = vector.load %arg10[%c0_76, %c32_77] : memref<64x72xbf16, #tpu.memory_space<vmem>>, vector<64x8xbf16>
    tpu.vector_store %arg10[%c0_76, %c32_77], %136 {strides = array<i32>} : memref<64x72xbf16, #tpu.memory_space<vmem>>, vector<64x8xbf16>,
    %138 = vector.extract_strided_slice %117 {offsets = [1, 2, 0], sizes = [8, 8, 8], strides = [1, 1, 1]} : vector<10x10x8xf32> to vector<8x8x8xf32>
    %139 = vector.shape_cast %138 : vector<8x8x8xf32> to vector<64x8xf32>
    %140 = arith.truncf %139 : vector<64x8xf32> to vector<64x8xbf16>
    %c0_78 = arith.constant 0 : index
    %c40 = arith.constant 40 : index
    %141 = vector.load %arg10[%c0_78, %c40] : memref<64x72xbf16, #tpu.memory_space<vmem>>, vector<64x8xbf16>
    tpu.vector_store %arg10[%c0_78, %c40], %140 {strides = array<i32>} : memref<64x72xbf16, #tpu.memory_space<vmem>>, vector<64x8xbf16>,
    %142 = vector.extract_strided_slice %117 {offsets = [2, 0, 0], sizes = [8, 8, 8], strides = [1, 1, 1]} : vector<10x10x8xf32> to vector<8x8x8xf32>
    %143 = vector.shape_cast %142 : vector<8x8x8xf32> to vector<64x8xf32>
    %144 = arith.truncf %143 : vector<64x8xf32> to vector<64x8xbf16>
    %c0_79 = arith.constant 0 : index
    %c48 = arith.constant 48 : index
    %145 = vector.load %arg10[%c0_79, %c48] : memref<64x72xbf16, #tpu.memory_space<vmem>>, vector<64x8xbf16>
    tpu.vector_store %arg10[%c0_79, %c48], %144 {strides = array<i32>} : memref<64x72xbf16, #tpu.memory_space<vmem>>, vector<64x8xbf16>,
    %146 = vector.extract_strided_slice %117 {offsets = [2, 1, 0], sizes = [8, 8, 8], strides = [1, 1, 1]} : vector<10x10x8xf32> to vector<8x8x8xf32>
    %147 = vector.shape_cast %146 : vector<8x8x8xf32> to vector<64x8xf32>
    %148 = arith.truncf %147 : vector<64x8xf32> to vector<64x8xbf16>
    %c0_80 = arith.constant 0 : index
    %c56 = arith.constant 56 : index
    %149 = vector.load %arg10[%c0_80, %c56] : memref<64x72xbf16, #tpu.memory_space<vmem>>, vector<64x8xbf16>
    tpu.vector_store %arg10[%c0_80, %c56], %148 {strides = array<i32>} : memref<64x72xbf16, #tpu.memory_space<vmem>>, vector<64x8xbf16>,
    %150 = vector.extract_strided_slice %117 {offsets = [2, 2, 0], sizes = [8, 8, 8], strides = [1, 1, 1]} : vector<10x10x8xf32> to vector<8x8x8xf32>
    %151 = vector.shape_cast %150 : vector<8x8x8xf32> to vector<64x8xf32>
    %152 = arith.truncf %151 : vector<64x8xf32> to vector<64x8xbf16>
    %c0_81 = arith.constant 0 : index
    %c64 = arith.constant 64 : index
    %153 = vector.load %arg10[%c0_81, %c64] : memref<64x72xbf16, #tpu.memory_space<vmem>>, vector<64x8xbf16>
    tpu.vector_store %arg10[%c0_81, %c64], %152 {strides = array<i32>} : memref<64x72xbf16, #tpu.memory_space<vmem>>, vector<64x8xbf16>,
    %c0_82 = arith.constant 0 : index
    %c0_83 = arith.constant 0 : index
    %154 = vector.load %arg10[%c0_82, %c0_83] : memref<64x72xbf16, #tpu.memory_space<vmem>>, vector<64x72xbf16>
    %cst_84 = arith.constant dense<0.000000e+00> : vector<64x8xf32>
    %155 = tpu.matmul %154, %111, %cst_84 {dimension_numbers = #tpu.dot_dimension_numbers<[1], [0], [0], [1], [0, 0, 1, 1], [], []>} : vector<64x72xbf16>, vector<72x8xbf16>, vector<64x8xf32> -> vector<64x8xf32>
    %156 = vector.broadcast %113 : vector<1x8xf32> to vector<64x8xf32>
    %157 = arith.addf %155, %156 : vector<64x8xf32>
    %cst_85 = arith.constant 0.000000e+00 : f32
    %158 = vector.broadcast %cst_85 : f32 to vector<64x8xf32>
    %159 = arith.maximumf %157, %158 : vector<64x8xf32>
    %160 = vector.shape_cast %159 : vector<64x8xf32> to vector<8x8x8xf32>
    %c1_86 = arith.constant 1 : index
    %c0_87 = arith.constant 0 : index
    %c0_88 = arith.constant 0 : index
    %161 = vector.load %arg4[%c1_86, %c0_87, %c0_88] : memref<4x72x8xbf16, #tpu.memory_space<vmem>>, vector<1x72x8xbf16>
    %162 = vector.shape_cast %161 : vector<1x72x8xbf16> to vector<72x8xbf16>
    %c1_89 = arith.constant 1 : index
    %c0_90 = arith.constant 0 : index
    %c0_91 = arith.constant 0 : index
    %163 = vector.load %arg5[%c1_89, %c0_90, %c0_91] : memref<4x1x8xf32, #tpu.memory_space<vmem>>, vector<1x1x8xf32>
    %164 = vector.shape_cast %163 : vector<1x1x8xf32> to vector<1x8xf32>
    %c1_92 = arith.constant 1 : index
    %c1_93 = arith.constant 1 : index
    %c0_94 = arith.constant 0 : index
    %165 = vector.load %arg8[%c1_92, %c1_93, %c0_94] : memref<10x10x8xf32, #tpu.memory_space<vmem>>, vector<8x8x8xf32>
    tpu.vector_store %arg8[%c1_92, %c1_93, %c0_94], %160 {strides = array<i32>} : memref<10x10x8xf32, #tpu.memory_space<vmem>>, vector<8x8x8xf32>,
    %c0_95 = arith.constant 0 : index
    %c0_96 = arith.constant 0 : index
    %c0_97 = arith.constant 0 : index
    %166 = vector.load %arg8[%c0_95, %c0_96, %c0_97] : memref<10x10x8xf32, #tpu.memory_space<vmem>>, vector<10x10x8xf32>
    %167 = vector.extract_strided_slice %166 {offsets = [0, 0, 0], sizes = [8, 8, 8], strides = [1, 1, 1]} : vector<10x10x8xf32> to vector<8x8x8xf32>
    %168 = vector.shape_cast %167 : vector<8x8x8xf32> to vector<64x8xf32>
    %169 = arith.truncf %168 : vector<64x8xf32> to vector<64x8xbf16>
    %c0_98 = arith.constant 0 : index
    %c0_99 = arith.constant 0 : index
    %170 = vector.load %arg10[%c0_98, %c0_99] : memref<64x72xbf16, #tpu.memory_space<vmem>>, vector<64x8xbf16>
    tpu.vector_store %arg10[%c0_98, %c0_99], %169 {strides = array<i32>} : memref<64x72xbf16, #tpu.memory_space<vmem>>, vector<64x8xbf16>,
    %171 = vector.extract_strided_slice %166 {offsets = [0, 1, 0], sizes = [8, 8, 8], strides = [1, 1, 1]} : vector<10x10x8xf32> to vector<8x8x8xf32>
    %172 = vector.shape_cast %171 : vector<8x8x8xf32> to vector<64x8xf32>
    %173 = arith.truncf %172 : vector<64x8xf32> to vector<64x8xbf16>
    %c0_100 = arith.constant 0 : index
    %c8_101 = arith.constant 8 : index
    %174 = vector.load %arg10[%c0_100, %c8_101] : memref<64x72xbf16, #tpu.memory_space<vmem>>, vector<64x8xbf16>
    tpu.vector_store %arg10[%c0_100, %c8_101], %173 {strides = array<i32>} : memref<64x72xbf16, #tpu.memory_space<vmem>>, vector<64x8xbf16>,
    %175 = vector.extract_strided_slice %166 {offsets = [0, 2, 0], sizes = [8, 8, 8], strides = [1, 1, 1]} : vector<10x10x8xf32> to vector<8x8x8xf32>
    %176 = vector.shape_cast %175 : vector<8x8x8xf32> to vector<64x8xf32>
    %177 = arith.truncf %176 : vector<64x8xf32> to vector<64x8xbf16>
    %c0_102 = arith.constant 0 : index
    %c16_103 = arith.constant 16 : index
    %178 = vector.load %arg10[%c0_102, %c16_103] : memref<64x72xbf16, #tpu.memory_space<vmem>>, vector<64x8xbf16>
    tpu.vector_store %arg10[%c0_102, %c16_103], %177 {strides = array<i32>} : memref<64x72xbf16, #tpu.memory_space<vmem>>, vector<64x8xbf16>,
    %179 = vector.extract_strided_slice %166 {offsets = [1, 0, 0], sizes = [8, 8, 8], strides = [1, 1, 1]} : vector<10x10x8xf32> to vector<8x8x8xf32>
    %180 = vector.shape_cast %179 : vector<8x8x8xf32> to vector<64x8xf32>
    %181 = arith.truncf %180 : vector<64x8xf32> to vector<64x8xbf16>
    %c0_104 = arith.constant 0 : index
    %c24_105 = arith.constant 24 : index
    %182 = vector.load %arg10[%c0_104, %c24_105] : memref<64x72xbf16, #tpu.memory_space<vmem>>, vector<64x8xbf16>
    tpu.vector_store %arg10[%c0_104, %c24_105], %181 {strides = array<i32>} : memref<64x72xbf16, #tpu.memory_space<vmem>>, vector<64x8xbf16>,
    %183 = vector.extract_strided_slice %166 {offsets = [1, 1, 0], sizes = [8, 8, 8], strides = [1, 1, 1]} : vector<10x10x8xf32> to vector<8x8x8xf32>
    %184 = vector.shape_cast %183 : vector<8x8x8xf32> to vector<64x8xf32>
    %185 = arith.truncf %184 : vector<64x8xf32> to vector<64x8xbf16>
    %c0_106 = arith.constant 0 : index
    %c32_107 = arith.constant 32 : index
    %186 = vector.load %arg10[%c0_106, %c32_107] : memref<64x72xbf16, #tpu.memory_space<vmem>>, vector<64x8xbf16>
    tpu.vector_store %arg10[%c0_106, %c32_107], %185 {strides = array<i32>} : memref<64x72xbf16, #tpu.memory_space<vmem>>, vector<64x8xbf16>,
    %187 = vector.extract_strided_slice %166 {offsets = [1, 2, 0], sizes = [8, 8, 8], strides = [1, 1, 1]} : vector<10x10x8xf32> to vector<8x8x8xf32>
    %188 = vector.shape_cast %187 : vector<8x8x8xf32> to vector<64x8xf32>
    %189 = arith.truncf %188 : vector<64x8xf32> to vector<64x8xbf16>
    %c0_108 = arith.constant 0 : index
    %c40_109 = arith.constant 40 : index
    %190 = vector.load %arg10[%c0_108, %c40_109] : memref<64x72xbf16, #tpu.memory_space<vmem>>, vector<64x8xbf16>
    tpu.vector_store %arg10[%c0_108, %c40_109], %189 {strides = array<i32>} : memref<64x72xbf16, #tpu.memory_space<vmem>>, vector<64x8xbf16>,
    %191 = vector.extract_strided_slice %166 {offsets = [2, 0, 0], sizes = [8, 8, 8], strides = [1, 1, 1]} : vector<10x10x8xf32> to vector<8x8x8xf32>
    %192 = vector.shape_cast %191 : vector<8x8x8xf32> to vector<64x8xf32>
    %193 = arith.truncf %192 : vector<64x8xf32> to vector<64x8xbf16>
    %c0_110 = arith.constant 0 : index
    %c48_111 = arith.constant 48 : index
    %194 = vector.load %arg10[%c0_110, %c48_111] : memref<64x72xbf16, #tpu.memory_space<vmem>>, vector<64x8xbf16>
    tpu.vector_store %arg10[%c0_110, %c48_111], %193 {strides = array<i32>} : memref<64x72xbf16, #tpu.memory_space<vmem>>, vector<64x8xbf16>,
    %195 = vector.extract_strided_slice %166 {offsets = [2, 1, 0], sizes = [8, 8, 8], strides = [1, 1, 1]} : vector<10x10x8xf32> to vector<8x8x8xf32>
    %196 = vector.shape_cast %195 : vector<8x8x8xf32> to vector<64x8xf32>
    %197 = arith.truncf %196 : vector<64x8xf32> to vector<64x8xbf16>
    %c0_112 = arith.constant 0 : index
    %c56_113 = arith.constant 56 : index
    %198 = vector.load %arg10[%c0_112, %c56_113] : memref<64x72xbf16, #tpu.memory_space<vmem>>, vector<64x8xbf16>
    tpu.vector_store %arg10[%c0_112, %c56_113], %197 {strides = array<i32>} : memref<64x72xbf16, #tpu.memory_space<vmem>>, vector<64x8xbf16>,
    %199 = vector.extract_strided_slice %166 {offsets = [2, 2, 0], sizes = [8, 8, 8], strides = [1, 1, 1]} : vector<10x10x8xf32> to vector<8x8x8xf32>
    %200 = vector.shape_cast %199 : vector<8x8x8xf32> to vector<64x8xf32>
    %201 = arith.truncf %200 : vector<64x8xf32> to vector<64x8xbf16>
    %c0_114 = arith.constant 0 : index
    %c64_115 = arith.constant 64 : index
    %202 = vector.load %arg10[%c0_114, %c64_115] : memref<64x72xbf16, #tpu.memory_space<vmem>>, vector<64x8xbf16>
    tpu.vector_store %arg10[%c0_114, %c64_115], %201 {strides = array<i32>} : memref<64x72xbf16, #tpu.memory_space<vmem>>, vector<64x8xbf16>,
    %c0_116 = arith.constant 0 : index
    %c0_117 = arith.constant 0 : index
    %203 = vector.load %arg10[%c0_116, %c0_117] : memref<64x72xbf16, #tpu.memory_space<vmem>>, vector<64x72xbf16>
    %cst_118 = arith.constant dense<0.000000e+00> : vector<64x8xf32>
    %204 = tpu.matmul %203, %162, %cst_118 {dimension_numbers = #tpu.dot_dimension_numbers<[1], [0], [0], [1], [0, 0, 1, 1], [], []>} : vector<64x72xbf16>, vector<72x8xbf16>, vector<64x8xf32> -> vector<64x8xf32>
    %205 = vector.broadcast %164 : vector<1x8xf32> to vector<64x8xf32>
    %206 = arith.addf %204, %205 : vector<64x8xf32>
    %207 = vector.shape_cast %206 : vector<64x8xf32> to vector<8x8x8xf32>
    %208 = arith.addf %109, %207 : vector<8x8x8xf32>
    %c2_119 = arith.constant 2 : index
    %c0_120 = arith.constant 0 : index
    %c0_121 = arith.constant 0 : index
    %209 = vector.load %arg4[%c2_119, %c0_120, %c0_121] : memref<4x72x8xbf16, #tpu.memory_space<vmem>>, vector<1x72x8xbf16>
    %210 = vector.shape_cast %209 : vector<1x72x8xbf16> to vector<72x8xbf16>
    %c2_122 = arith.constant 2 : index
    %c0_123 = arith.constant 0 : index
    %c0_124 = arith.constant 0 : index
    %211 = vector.load %arg5[%c2_122, %c0_123, %c0_124] : memref<4x1x8xf32, #tpu.memory_space<vmem>>, vector<1x1x8xf32>
    %212 = vector.shape_cast %211 : vector<1x1x8xf32> to vector<1x8xf32>
    %cst_125 = arith.constant 0.000000e+00 : f32
    %213 = vector.broadcast %cst_125 : f32 to vector<8x8x8xf32>
    %214 = arith.maximumf %208, %213 : vector<8x8x8xf32>
    %c1_126 = arith.constant 1 : index
    %c1_127 = arith.constant 1 : index
    %c0_128 = arith.constant 0 : index
    %215 = vector.load %arg8[%c1_126, %c1_127, %c0_128] : memref<10x10x8xf32, #tpu.memory_space<vmem>>, vector<8x8x8xf32>
    tpu.vector_store %arg8[%c1_126, %c1_127, %c0_128], %214 {strides = array<i32>} : memref<10x10x8xf32, #tpu.memory_space<vmem>>, vector<8x8x8xf32>,
    %c0_129 = arith.constant 0 : index
    %c0_130 = arith.constant 0 : index
    %c0_131 = arith.constant 0 : index
    %216 = vector.load %arg8[%c0_129, %c0_130, %c0_131] : memref<10x10x8xf32, #tpu.memory_space<vmem>>, vector<10x10x8xf32>
    %217 = vector.extract_strided_slice %216 {offsets = [0, 0, 0], sizes = [8, 8, 8], strides = [1, 1, 1]} : vector<10x10x8xf32> to vector<8x8x8xf32>
    %218 = vector.shape_cast %217 : vector<8x8x8xf32> to vector<64x8xf32>
    %219 = arith.truncf %218 : vector<64x8xf32> to vector<64x8xbf16>
    %c0_132 = arith.constant 0 : index
    %c0_133 = arith.constant 0 : index
    %220 = vector.load %arg10[%c0_132, %c0_133] : memref<64x72xbf16, #tpu.memory_space<vmem>>, vector<64x8xbf16>
    tpu.vector_store %arg10[%c0_132, %c0_133], %219 {strides = array<i32>} : memref<64x72xbf16, #tpu.memory_space<vmem>>, vector<64x8xbf16>,
    %221 = vector.extract_strided_slice %216 {offsets = [0, 1, 0], sizes = [8, 8, 8], strides = [1, 1, 1]} : vector<10x10x8xf32> to vector<8x8x8xf32>
    %222 = vector.shape_cast %221 : vector<8x8x8xf32> to vector<64x8xf32>
    %223 = arith.truncf %222 : vector<64x8xf32> to vector<64x8xbf16>
    %c0_134 = arith.constant 0 : index
    %c8_135 = arith.constant 8 : index
    %224 = vector.load %arg10[%c0_134, %c8_135] : memref<64x72xbf16, #tpu.memory_space<vmem>>, vector<64x8xbf16>
    tpu.vector_store %arg10[%c0_134, %c8_135], %223 {strides = array<i32>} : memref<64x72xbf16, #tpu.memory_space<vmem>>, vector<64x8xbf16>,
    %225 = vector.extract_strided_slice %216 {offsets = [0, 2, 0], sizes = [8, 8, 8], strides = [1, 1, 1]} : vector<10x10x8xf32> to vector<8x8x8xf32>
    %226 = vector.shape_cast %225 : vector<8x8x8xf32> to vector<64x8xf32>
    %227 = arith.truncf %226 : vector<64x8xf32> to vector<64x8xbf16>
    %c0_136 = arith.constant 0 : index
    %c16_137 = arith.constant 16 : index
    %228 = vector.load %arg10[%c0_136, %c16_137] : memref<64x72xbf16, #tpu.memory_space<vmem>>, vector<64x8xbf16>
    tpu.vector_store %arg10[%c0_136, %c16_137], %227 {strides = array<i32>} : memref<64x72xbf16, #tpu.memory_space<vmem>>, vector<64x8xbf16>,
    %229 = vector.extract_strided_slice %216 {offsets = [1, 0, 0], sizes = [8, 8, 8], strides = [1, 1, 1]} : vector<10x10x8xf32> to vector<8x8x8xf32>
    %230 = vector.shape_cast %229 : vector<8x8x8xf32> to vector<64x8xf32>
    %231 = arith.truncf %230 : vector<64x8xf32> to vector<64x8xbf16>
    %c0_138 = arith.constant 0 : index
    %c24_139 = arith.constant 24 : index
    %232 = vector.load %arg10[%c0_138, %c24_139] : memref<64x72xbf16, #tpu.memory_space<vmem>>, vector<64x8xbf16>
    tpu.vector_store %arg10[%c0_138, %c24_139], %231 {strides = array<i32>} : memref<64x72xbf16, #tpu.memory_space<vmem>>, vector<64x8xbf16>,
    %233 = vector.extract_strided_slice %216 {offsets = [1, 1, 0], sizes = [8, 8, 8], strides = [1, 1, 1]} : vector<10x10x8xf32> to vector<8x8x8xf32>
    %234 = vector.shape_cast %233 : vector<8x8x8xf32> to vector<64x8xf32>
    %235 = arith.truncf %234 : vector<64x8xf32> to vector<64x8xbf16>
    %c0_140 = arith.constant 0 : index
    %c32_141 = arith.constant 32 : index
    %236 = vector.load %arg10[%c0_140, %c32_141] : memref<64x72xbf16, #tpu.memory_space<vmem>>, vector<64x8xbf16>
    tpu.vector_store %arg10[%c0_140, %c32_141], %235 {strides = array<i32>} : memref<64x72xbf16, #tpu.memory_space<vmem>>, vector<64x8xbf16>,
    %237 = vector.extract_strided_slice %216 {offsets = [1, 2, 0], sizes = [8, 8, 8], strides = [1, 1, 1]} : vector<10x10x8xf32> to vector<8x8x8xf32>
    %238 = vector.shape_cast %237 : vector<8x8x8xf32> to vector<64x8xf32>
    %239 = arith.truncf %238 : vector<64x8xf32> to vector<64x8xbf16>
    %c0_142 = arith.constant 0 : index
    %c40_143 = arith.constant 40 : index
    %240 = vector.load %arg10[%c0_142, %c40_143] : memref<64x72xbf16, #tpu.memory_space<vmem>>, vector<64x8xbf16>
    tpu.vector_store %arg10[%c0_142, %c40_143], %239 {strides = array<i32>} : memref<64x72xbf16, #tpu.memory_space<vmem>>, vector<64x8xbf16>,
    %241 = vector.extract_strided_slice %216 {offsets = [2, 0, 0], sizes = [8, 8, 8], strides = [1, 1, 1]} : vector<10x10x8xf32> to vector<8x8x8xf32>
    %242 = vector.shape_cast %241 : vector<8x8x8xf32> to vector<64x8xf32>
    %243 = arith.truncf %242 : vector<64x8xf32> to vector<64x8xbf16>
    %c0_144 = arith.constant 0 : index
    %c48_145 = arith.constant 48 : index
    %244 = vector.load %arg10[%c0_144, %c48_145] : memref<64x72xbf16, #tpu.memory_space<vmem>>, vector<64x8xbf16>
    tpu.vector_store %arg10[%c0_144, %c48_145], %243 {strides = array<i32>} : memref<64x72xbf16, #tpu.memory_space<vmem>>, vector<64x8xbf16>,
    %245 = vector.extract_strided_slice %216 {offsets = [2, 1, 0], sizes = [8, 8, 8], strides = [1, 1, 1]} : vector<10x10x8xf32> to vector<8x8x8xf32>
    %246 = vector.shape_cast %245 : vector<8x8x8xf32> to vector<64x8xf32>
    %247 = arith.truncf %246 : vector<64x8xf32> to vector<64x8xbf16>
    %c0_146 = arith.constant 0 : index
    %c56_147 = arith.constant 56 : index
    %248 = vector.load %arg10[%c0_146, %c56_147] : memref<64x72xbf16, #tpu.memory_space<vmem>>, vector<64x8xbf16>
    tpu.vector_store %arg10[%c0_146, %c56_147], %247 {strides = array<i32>} : memref<64x72xbf16, #tpu.memory_space<vmem>>, vector<64x8xbf16>,
    %249 = vector.extract_strided_slice %216 {offsets = [2, 2, 0], sizes = [8, 8, 8], strides = [1, 1, 1]} : vector<10x10x8xf32> to vector<8x8x8xf32>
    %250 = vector.shape_cast %249 : vector<8x8x8xf32> to vector<64x8xf32>
    %251 = arith.truncf %250 : vector<64x8xf32> to vector<64x8xbf16>
    %c0_148 = arith.constant 0 : index
    %c64_149 = arith.constant 64 : index
    %252 = vector.load %arg10[%c0_148, %c64_149] : memref<64x72xbf16, #tpu.memory_space<vmem>>, vector<64x8xbf16>
    tpu.vector_store %arg10[%c0_148, %c64_149], %251 {strides = array<i32>} : memref<64x72xbf16, #tpu.memory_space<vmem>>, vector<64x8xbf16>,
    %c0_150 = arith.constant 0 : index
    %c0_151 = arith.constant 0 : index
    %253 = vector.load %arg10[%c0_150, %c0_151] : memref<64x72xbf16, #tpu.memory_space<vmem>>, vector<64x72xbf16>
    %cst_152 = arith.constant dense<0.000000e+00> : vector<64x8xf32>
    %254 = tpu.matmul %253, %210, %cst_152 {dimension_numbers = #tpu.dot_dimension_numbers<[1], [0], [0], [1], [0, 0, 1, 1], [], []>} : vector<64x72xbf16>, vector<72x8xbf16>, vector<64x8xf32> -> vector<64x8xf32>
    %255 = vector.broadcast %212 : vector<1x8xf32> to vector<64x8xf32>
    %256 = arith.addf %254, %255 : vector<64x8xf32>
    %cst_153 = arith.constant 0.000000e+00 : f32
    %257 = vector.broadcast %cst_153 : f32 to vector<64x8xf32>
    %258 = arith.maximumf %256, %257 : vector<64x8xf32>
    %259 = vector.shape_cast %258 : vector<64x8xf32> to vector<8x8x8xf32>
    %c3_154 = arith.constant 3 : index
    %c0_155 = arith.constant 0 : index
    %c0_156 = arith.constant 0 : index
    %260 = vector.load %arg4[%c3_154, %c0_155, %c0_156] : memref<4x72x8xbf16, #tpu.memory_space<vmem>>, vector<1x72x8xbf16>
    %261 = vector.shape_cast %260 : vector<1x72x8xbf16> to vector<72x8xbf16>
    %c3_157 = arith.constant 3 : index
    %c0_158 = arith.constant 0 : index
    %c0_159 = arith.constant 0 : index
    %262 = vector.load %arg5[%c3_157, %c0_158, %c0_159] : memref<4x1x8xf32, #tpu.memory_space<vmem>>, vector<1x1x8xf32>
    %263 = vector.shape_cast %262 : vector<1x1x8xf32> to vector<1x8xf32>
    %c1_160 = arith.constant 1 : index
    %c1_161 = arith.constant 1 : index
    %c0_162 = arith.constant 0 : index
    %264 = vector.load %arg8[%c1_160, %c1_161, %c0_162] : memref<10x10x8xf32, #tpu.memory_space<vmem>>, vector<8x8x8xf32>
    tpu.vector_store %arg8[%c1_160, %c1_161, %c0_162], %259 {strides = array<i32>} : memref<10x10x8xf32, #tpu.memory_space<vmem>>, vector<8x8x8xf32>,
    %c0_163 = arith.constant 0 : index
    %c0_164 = arith.constant 0 : index
    %c0_165 = arith.constant 0 : index
    %265 = vector.load %arg8[%c0_163, %c0_164, %c0_165] : memref<10x10x8xf32, #tpu.memory_space<vmem>>, vector<10x10x8xf32>
    %266 = vector.extract_strided_slice %265 {offsets = [0, 0, 0], sizes = [8, 8, 8], strides = [1, 1, 1]} : vector<10x10x8xf32> to vector<8x8x8xf32>
    %267 = vector.shape_cast %266 : vector<8x8x8xf32> to vector<64x8xf32>
    %268 = arith.truncf %267 : vector<64x8xf32> to vector<64x8xbf16>
    %c0_166 = arith.constant 0 : index
    %c0_167 = arith.constant 0 : index
    %269 = vector.load %arg10[%c0_166, %c0_167] : memref<64x72xbf16, #tpu.memory_space<vmem>>, vector<64x8xbf16>
    tpu.vector_store %arg10[%c0_166, %c0_167], %268 {strides = array<i32>} : memref<64x72xbf16, #tpu.memory_space<vmem>>, vector<64x8xbf16>,
    %270 = vector.extract_strided_slice %265 {offsets = [0, 1, 0], sizes = [8, 8, 8], strides = [1, 1, 1]} : vector<10x10x8xf32> to vector<8x8x8xf32>
    %271 = vector.shape_cast %270 : vector<8x8x8xf32> to vector<64x8xf32>
    %272 = arith.truncf %271 : vector<64x8xf32> to vector<64x8xbf16>
    %c0_168 = arith.constant 0 : index
    %c8_169 = arith.constant 8 : index
    %273 = vector.load %arg10[%c0_168, %c8_169] : memref<64x72xbf16, #tpu.memory_space<vmem>>, vector<64x8xbf16>
    tpu.vector_store %arg10[%c0_168, %c8_169], %272 {strides = array<i32>} : memref<64x72xbf16, #tpu.memory_space<vmem>>, vector<64x8xbf16>,
    %274 = vector.extract_strided_slice %265 {offsets = [0, 2, 0], sizes = [8, 8, 8], strides = [1, 1, 1]} : vector<10x10x8xf32> to vector<8x8x8xf32>
    %275 = vector.shape_cast %274 : vector<8x8x8xf32> to vector<64x8xf32>
    %276 = arith.truncf %275 : vector<64x8xf32> to vector<64x8xbf16>
    %c0_170 = arith.constant 0 : index
    %c16_171 = arith.constant 16 : index
    %277 = vector.load %arg10[%c0_170, %c16_171] : memref<64x72xbf16, #tpu.memory_space<vmem>>, vector<64x8xbf16>
    tpu.vector_store %arg10[%c0_170, %c16_171], %276 {strides = array<i32>} : memref<64x72xbf16, #tpu.memory_space<vmem>>, vector<64x8xbf16>,
    %278 = vector.extract_strided_slice %265 {offsets = [1, 0, 0], sizes = [8, 8, 8], strides = [1, 1, 1]} : vector<10x10x8xf32> to vector<8x8x8xf32>
    %279 = vector.shape_cast %278 : vector<8x8x8xf32> to vector<64x8xf32>
    %280 = arith.truncf %279 : vector<64x8xf32> to vector<64x8xbf16>
    %c0_172 = arith.constant 0 : index
    %c24_173 = arith.constant 24 : index
    %281 = vector.load %arg10[%c0_172, %c24_173] : memref<64x72xbf16, #tpu.memory_space<vmem>>, vector<64x8xbf16>
    tpu.vector_store %arg10[%c0_172, %c24_173], %280 {strides = array<i32>} : memref<64x72xbf16, #tpu.memory_space<vmem>>, vector<64x8xbf16>,
    %282 = vector.extract_strided_slice %265 {offsets = [1, 1, 0], sizes = [8, 8, 8], strides = [1, 1, 1]} : vector<10x10x8xf32> to vector<8x8x8xf32>
    %283 = vector.shape_cast %282 : vector<8x8x8xf32> to vector<64x8xf32>
    %284 = arith.truncf %283 : vector<64x8xf32> to vector<64x8xbf16>
    %c0_174 = arith.constant 0 : index
    %c32_175 = arith.constant 32 : index
    %285 = vector.load %arg10[%c0_174, %c32_175] : memref<64x72xbf16, #tpu.memory_space<vmem>>, vector<64x8xbf16>
    tpu.vector_store %arg10[%c0_174, %c32_175], %284 {strides = array<i32>} : memref<64x72xbf16, #tpu.memory_space<vmem>>, vector<64x8xbf16>,
    %286 = vector.extract_strided_slice %265 {offsets = [1, 2, 0], sizes = [8, 8, 8], strides = [1, 1, 1]} : vector<10x10x8xf32> to vector<8x8x8xf32>
    %287 = vector.shape_cast %286 : vector<8x8x8xf32> to vector<64x8xf32>
    %288 = arith.truncf %287 : vector<64x8xf32> to vector<64x8xbf16>
    %c0_176 = arith.constant 0 : index
    %c40_177 = arith.constant 40 : index
    %289 = vector.load %arg10[%c0_176, %c40_177] : memref<64x72xbf16, #tpu.memory_space<vmem>>, vector<64x8xbf16>
    tpu.vector_store %arg10[%c0_176, %c40_177], %288 {strides = array<i32>} : memref<64x72xbf16, #tpu.memory_space<vmem>>, vector<64x8xbf16>,
    %290 = vector.extract_strided_slice %265 {offsets = [2, 0, 0], sizes = [8, 8, 8], strides = [1, 1, 1]} : vector<10x10x8xf32> to vector<8x8x8xf32>
    %291 = vector.shape_cast %290 : vector<8x8x8xf32> to vector<64x8xf32>
    %292 = arith.truncf %291 : vector<64x8xf32> to vector<64x8xbf16>
    %c0_178 = arith.constant 0 : index
    %c48_179 = arith.constant 48 : index
    %293 = vector.load %arg10[%c0_178, %c48_179] : memref<64x72xbf16, #tpu.memory_space<vmem>>, vector<64x8xbf16>
    tpu.vector_store %arg10[%c0_178, %c48_179], %292 {strides = array<i32>} : memref<64x72xbf16, #tpu.memory_space<vmem>>, vector<64x8xbf16>,
    %294 = vector.extract_strided_slice %265 {offsets = [2, 1, 0], sizes = [8, 8, 8], strides = [1, 1, 1]} : vector<10x10x8xf32> to vector<8x8x8xf32>
    %295 = vector.shape_cast %294 : vector<8x8x8xf32> to vector<64x8xf32>
    %296 = arith.truncf %295 : vector<64x8xf32> to vector<64x8xbf16>
    %c0_180 = arith.constant 0 : index
    %c56_181 = arith.constant 56 : index
    %297 = vector.load %arg10[%c0_180, %c56_181] : memref<64x72xbf16, #tpu.memory_space<vmem>>, vector<64x8xbf16>
    tpu.vector_store %arg10[%c0_180, %c56_181], %296 {strides = array<i32>} : memref<64x72xbf16, #tpu.memory_space<vmem>>, vector<64x8xbf16>,
    %298 = vector.extract_strided_slice %265 {offsets = [2, 2, 0], sizes = [8, 8, 8], strides = [1, 1, 1]} : vector<10x10x8xf32> to vector<8x8x8xf32>
    %299 = vector.shape_cast %298 : vector<8x8x8xf32> to vector<64x8xf32>
    %300 = arith.truncf %299 : vector<64x8xf32> to vector<64x8xbf16>
    %c0_182 = arith.constant 0 : index
    %c64_183 = arith.constant 64 : index
    %301 = vector.load %arg10[%c0_182, %c64_183] : memref<64x72xbf16, #tpu.memory_space<vmem>>, vector<64x8xbf16>
    tpu.vector_store %arg10[%c0_182, %c64_183], %300 {strides = array<i32>} : memref<64x72xbf16, #tpu.memory_space<vmem>>, vector<64x8xbf16>,
    %c0_184 = arith.constant 0 : index
    %c0_185 = arith.constant 0 : index
    %302 = vector.load %arg10[%c0_184, %c0_185] : memref<64x72xbf16, #tpu.memory_space<vmem>>, vector<64x72xbf16>
    %cst_186 = arith.constant dense<0.000000e+00> : vector<64x8xf32>
    %303 = tpu.matmul %302, %261, %cst_186 {dimension_numbers = #tpu.dot_dimension_numbers<[1], [0], [0], [1], [0, 0, 1, 1], [], []>} : vector<64x72xbf16>, vector<72x8xbf16>, vector<64x8xf32> -> vector<64x8xf32>
    %304 = vector.broadcast %263 : vector<1x8xf32> to vector<64x8xf32>
    %305 = arith.addf %303, %304 : vector<64x8xf32>
    %306 = vector.shape_cast %305 : vector<64x8xf32> to vector<8x8x8xf32>
    %307 = arith.addf %208, %306 : vector<8x8x8xf32>
    %c0_187 = arith.constant 0 : index
    %c0_188 = arith.constant 0 : index
    %c0_189 = arith.constant 0 : index
    %c0_190 = arith.constant 0 : index
    %308 = vector.load %arg6[%c0_187, %c0_188, %c0_189, %c0_190] : memref<1x8x8x8xf32, #tpu.memory_space<vmem>>, vector<1x8x8x8xf32>
    %309 = vector.shape_cast %308 : vector<1x8x8x8xf32> to vector<8x8x8xf32>
    %310 = vector.shape_cast %307 : vector<8x8x8xf32> to vector<1x8x8x8xf32>
    tpu.vector_store %arg6[%c0_187, %c0_188, %c0_189, %c0_190], %310 {strides = array<i32>} : memref<1x8x8x8xf32, #tpu.memory_space<vmem>>, vector<1x8x8x8xf32>,
    return
  }
  func.func @transform_0(%arg0: i32) -> (i32, i32, i32, i32) {
    %c0_i32 = arith.constant 0 : i32
    %c0_i32_0 = arith.constant 0 : i32
    %c0_i32_1 = arith.constant 0 : i32
    %c0_i32_2 = arith.constant 0 : i32
    return %arg0, %c0_i32, %c0_i32_0, %c0_i32_1 : i32, i32, i32, i32
  }
  func.func @transform_1(%arg0: i32) -> (i32, i32) {
    %c0_i32 = arith.constant 0 : i32
    %c0_i32_0 = arith.constant 0 : i32
    %c0_i32_1 = arith.constant 0 : i32
    return %c0_i32, %c0_i32_0 : i32, i32
  }
  func.func @transform_2(%arg0: i32) -> (i32, i32) {
    %c0_i32 = arith.constant 0 : i32
    %c0_i32_0 = arith.constant 0 : i32
    %c0_i32_1 = arith.constant 0 : i32
    return %c0_i32, %c0_i32_0 : i32, i32
  }
  func.func @transform_3(%arg0: i32) -> (i32, i32, i32) {
    %c0_i32 = arith.constant 0 : i32
    %c0_i32_0 = arith.constant 0 : i32
    %c0_i32_1 = arith.constant 0 : i32
    %c0_i32_2 = arith.constant 0 : i32
    return %c0_i32, %c0_i32_0, %c0_i32_1 : i32, i32, i32
  }
  func.func @transform_4(%arg0: i32) -> (i32, i32, i32) {
    %c0_i32 = arith.constant 0 : i32
    %c0_i32_0 = arith.constant 0 : i32
    %c0_i32_1 = arith.constant 0 : i32
    %c0_i32_2 = arith.constant 0 : i32
    return %c0_i32, %c0_i32_0, %c0_i32_1 : i32, i32, i32
  }
  func.func @transform_5(%arg0: i32) -> (i32, i32, i32, i32) {
    %c0_i32 = arith.constant 0 : i32
    %c0_i32_0 = arith.constant 0 : i32
    %c0_i32_1 = arith.constant 0 : i32
    %c0_i32_2 = arith.constant 0 : i32
    return %arg0, %c0_i32, %c0_i32_0, %c0_i32_1 : i32, i32, i32, i32
  }
}

</mosaic_0001>

<bundles_post_ra>
// kernel: convblock_pallas.1
= control target key start
LH: loop header
LB: loop body
LE: loop exit
PB: predicated region body
PF: predicated region fallthrough
CT: control target
= control target key end

     0   :  { %s5503_s18 = smov 0   ;;  %s8382_s0 = inlined_call_operand.vmem [shape: f32[2,16,16,4], index: 0, kind: input, shape index: {}]   ;;  %s8383_s1 = inlined_call_operand.vmem [shape: bf16[36,8], index: 1, kind: input, shape index: {}]   ;;  %s8384_s2 = inlined_call_operand.vmem [shape: f32[1,8], index: 2, kind: input, shape index: {}]   ;;  %s8385_s3 = inlined_call_operand.vmem [shape: bf16[4,72,8], index: 3, kind: input, shape index: {}]   ;;  %s8386_s4 = inlined_call_operand.vmem [shape: f32[4,1,8], index: 4, kind: input, shape index: {}]   ;;  %s8387_s5 = inlined_call_operand.vmem [shape: f32[2,8,8,8], index: 5, kind: output, shape index: {}]  }
   0x1 LB: > { %s5089_s19 = sadd.s32 4294967295, %s5458_s18   ;;  %p5093_p0 = scmp.ge.s32.totalorder %s5458_s18, 1  ;;  %s5458_s18 = sphi %s5503_s18, %s15_s18  }
   0x2   : > { %p187_p1 = scmp.lt.s32.totalorder %s5458_s18, 3 }
   0x4   : > { %p188_p2 = pnand %p5093_p0, %p187_p1 }
   0x6   : > { %191 = sbr.rel (%p188_p2) target bundleno = 2313 (0x909), region = 40 }
   0xb   : > { %vm226_vm0 = vcmask 31744   ;;  %v8388_v0 = vmov 0.0   ;;  %vm542_vm1 = vcmask 1046528   ;;  %s5461_s20 = smov 4   ;;  %p215_p3 = scmp.lt.s32.totalorder %s5089_s19, 1  ;;  %vm229_vm2 = vcmask 25600  }
   0xc   : > { %227 = vst.msk [vmem:[#allocation2] sm:$0xff] %vm226_vm0, %v8388_v0  ;;  %vm461_vm3 = vcmask 27648   ;;  %vm848_vm4 = vcmask 1045504   ;;  %s5462_s25 = smov 8   ;;  %vm815_vm5 = vcmask 60448   ;;  %s5463_s26 = smov 12  }
   0xd   : > { %228 = vst.msk [vmem:[#allocation2 + $0x8] sm:$0xff] %vm226_vm0, %v8388_v0  ;;  %s8604_s19 = smov (!%p215_p3, %s5089_s19), 1  ;;  %vm1121_vm6 = vcmask 93248   ;;  %s5464_s27 = smov 16   ;;  %vm1284_vm7 = vcmask 126048   ;;  %vm1427_vm8 = vcmask 158848  }
   0xe   : > { %231 = vst.msk [vmem:[#allocation2 + $0x18] sm:$0xff] %vm226_vm0, %v8388_v0  ;;  %s5362_s21 = sshll.u32 %s8604_s19, 8  ;;  %s5465_s28 = smov 20   ;;  %vm1567_vm9 = vcmask 191648   ;;  %vm2195_vm10 = vcmask 1041408   ;;  %vm1700_vm11 = vcmask 224448  }
   0xf   : > { %232 = vst.msk [vmem:[#allocation2 + $0x20] sm:$0xff] %vm226_vm0, %v8388_v0  ;;  %s5595_s24 = scalar_lea.vmem %s8382_s0, %s5362_s21  ;;  %s5466_s29 = smov 24   ;;  %vm1843_vm12 = vcmask 257248   ;;  %vm1983_vm13 = vcmask 290048   ;;  %vm2146_vm14 = vcmask 293888   ;;  %vm2352_vm15 = vcmask 57344  }
  0x10   : > { %234 = vst.msk [vmem:[#allocation2 + $0x30] sm:$0xff] %vm226_vm0, %v8388_v0  ;;  %v306_v7 = vld [vmem:[%s5595_s24 + $0x10] sm:$0xff]  ;;  %v307_v8 = vld [vmem:[%s5595_s24 + $0x18] sm:$0xff]  ;;  %v304_v22 = vld [vmem:[%s5595_s24] sm:$0xff]  ;;  %s5467_s30 = smov 28   ;;  %s5468_s6 = smov 32  }
  0x11   : > { %235 = vst.msk [vmem:[#allocation2 + $0x38] sm:$0xff] %vm226_vm0, %v8388_v0  ;;  %v305_v23 = vld [vmem:[%s5595_s24 + $0x8] sm:$0xff]  ;;  %v308_v25 = vld [vmem:[%s5595_s24 + $0x20] sm:$0xff]  ;;  %v310_v27 = vld [vmem:[%s5595_s24 + $0x30] sm:$0xff]  ;;  %s5469_s15 = smov 40   ;;  %s5470_s16 = smov 48  }
  0x12   : > { %237 = vst.msk [vmem:[#allocation2 + $0x48] sm:$0xff] %vm226_vm0, %v8388_v0  ;;  %v309_v26 = vld [vmem:[%s5595_s24 + $0x28] sm:$0xff]  ;;  %v311_v28 = vld [vmem:[%s5595_s24 + $0x38] sm:$0xff]  ;;  %v312_v29 = vld [vmem:[%s5595_s24 + $0x40] sm:$0xff]  ;;  %s5471_s17 = smov 56   ;;  %s5472_s22 = smov 64  }
  0x13   : > { %v5525_v1 = vld [vmem:[#allocation2] sm:$0xff]  ;;  %238 = vst.msk [vmem:[#allocation2 + $0x50] sm:$0xff] %vm226_vm0, %v8388_v0  ;;  %v313_v30 = vld [vmem:[%s5595_s24 + $0x48] sm:$0xff]  ;;  %v314_v31 = vld [vmem:[%s5595_s24 + $0x50] sm:$0xff] }
  0x14   : > { %v5529_v2 = vld [vmem:[#allocation2 + $0x8] sm:$0xff]  ;;  %v543_v3 = vrot.slane %v5525_v1, 1  ;;  %240 = vst.msk [vmem:[#allocation2 + $0x60] sm:$0xff] %vm226_vm0, %v8388_v0  ;;  %v315_v32 = vld [vmem:[%s5595_s24 + $0x58] sm:$0xff]  ;;  %v316_v34 = vld [vmem:[%s5595_s24 + $0x60] sm:$0xff] }
  0x15   : > { %v544_v4 = vrot.slane %v5529_v2, 1  ;;  %241 = vst.msk [vmem:[#allocation2 + $0x68] sm:$0xff] %vm226_vm0, %v8388_v0  ;;  %v317_v38 = vld [vmem:[%s5595_s24 + $0x68] sm:$0xff]  ;;  %v318_v41 = vld [vmem:[%s5595_s24 + $0x70] sm:$0xff]  ;;  %v319_v44 = vld [vmem:[%s5595_s24 + $0x78] sm:$0xff] }
  0x16   : > { %243 = vst.msk [vmem:[#allocation2 + $0x78] sm:$0xff] %vm226_vm0, %v8388_v0  ;;  %v320_v49 = vld [vmem:[%s5595_s24 + $0x80] sm:$0xff]  ;;  %v321_v54 = vld [vmem:[%s5595_s24 + $0x88] sm:$0xff] }
  0x17   : > { %v545_v5 = vsel %vm542_vm1, %v543_v3, %v544_v4  ;;  %244 = vst.msk [vmem:[#allocation2 + $0x80] sm:$0xff] %vm226_vm0, %v8388_v0 }
  0x18   : > { %v655_v6 = vpack.c.bf16 %v545_v5, %v545_v5  ;;  %246 = vst.msk [vmem:[#allocation2 + $0x90] sm:$0xff] %vm226_vm0, %v8388_v0 }
  0x19   : > { %247 = vst.msk [vmem:[#allocation2 + $0x98] sm:$0xff] %vm226_vm0, %v8388_v0 }
  0x1a   : > { %719 = vrot.lane.b32.xlu0 %v655_v6, %s5461_s20  ;;  %249 = vst.msk [vmem:[#allocation2 + $0xa8] sm:$0xff] %vm226_vm0, %v8388_v0  ;;  %v322_v6 = vld [vmem:[%s5595_s24 + $0x90] sm:$0xff] }
  0x1b   : > { %250 = vst.msk [vmem:[#allocation2 + $0xb0] sm:$0xff] %vm226_vm0, %v8388_v0 }
  0x1c   : > { %252 = vst.msk [vmem:[#allocation2 + $0xc0] sm:$0xff] %vm226_vm0, %v8388_v0 }
  0x1d   : > { %253 = vst.msk [vmem:[#allocation2 + $0xc8] sm:$0xff] %vm226_vm0, %v8388_v0 }
  0x1e   : > { %255 = vst.msk [vmem:[#allocation2 + $0xd8] sm:$0xff] %vm226_vm0, %v8388_v0 }
  0x1f   : > { %256 = vst.msk [vmem:[#allocation2 + $0xe0] sm:$0xff] %vm226_vm0, %v8388_v0 }
  0x20   : > { %258 = vst.msk [vmem:[#allocation2 + $0xf0] sm:$0xff] %vm226_vm0, %v8388_v0 }
  0x21   : > { %259 = vst.msk [vmem:[#allocation2 + $0xf8] sm:$0xff] %vm226_vm0, %v8388_v0 }
  0x22   : > { %261 = vst.msk [vmem:[#allocation2 + $0x108] sm:$0xff] %vm226_vm0, %v8388_v0 }
  0x23   : > { %262 = vst.msk [vmem:[#allocation2 + $0x110] sm:$0xff] %vm226_vm0, %v8388_v0 }
  0x24   : > { %264 = vst.msk [vmem:[#allocation2 + $0x120] sm:$0xff] %vm226_vm0, %v8388_v0 }
  0x25   : > { %265 = vst.msk [vmem:[#allocation2 + $0x128] sm:$0xff] %vm226_vm0, %v8388_v0 }
  0x26   : > { %267 = vst.msk [vmem:[#allocation2 + $0x138] sm:$0xff] %vm226_vm0, %v8388_v0 }
  0x27   : > { %268 = vst.msk [vmem:[#allocation2 + $0x140] sm:$0xff] %vm226_vm0, %v8388_v0 }
  0x28   : > { %270 = vst.msk [vmem:[#allocation2 + $0x150] sm:$0xff] %vm226_vm0, %v8388_v0 }
  0x29   : > { %271 = vst.msk [vmem:[#allocation2 + $0x158] sm:$0xff] %vm226_vm0, %v8388_v0 }
  0x2a   : > { %273 = vst.msk [vmem:[#allocation2 + $0x168] sm:$0xff] %vm226_vm0, %v8388_v0 }
  0x2b   : > { %274 = vst.msk [vmem:[#allocation2 + $0x170] sm:$0xff] %vm226_vm0, %v8388_v0 }
  0x2c   : > { %276 = vst.msk [vmem:[#allocation2 + $0x180] sm:$0xff] %vm226_vm0, %v8388_v0 }
  0x2d   : > { %277 = vst.msk [vmem:[#allocation2 + $0x188] sm:$0xff] %vm226_vm0, %v8388_v0 }
  0x2e   : > { %279 = vst.msk [vmem:[#allocation2 + $0x198] sm:$0xff] %vm226_vm0, %v8388_v0 }
  0x2f   : > { %280 = vst.msk [vmem:[#allocation2 + $0x1a0] sm:$0xff] %vm226_vm0, %v8388_v0 }
  0x30   : > { %236 = vst.msk [vmem:[#allocation2 + $0x40] sm:$0x3] %vm229_vm2, %v8388_v0 }
  0x31   : > { %345 = vst.msk [vmem:[#allocation2 + $0x31] sm:$0xff] %vm226_vm0, %v306_v7 }
  0x32   : > { %346 = vst.msk [vmem:[#allocation2 + $0x39] sm:$0xff] %vm226_vm0, %v307_v8  ;;  %v323_v8 = vld [vmem:[%s5595_s24 + $0x98] sm:$0xff] }
  0x33   : > { %230 = vst.msk [vmem:[#allocation2 + $0x10] sm:$0x3] %vm229_vm2, %v8388_v0 }
  0x34   : > { %233 = vst.msk [vmem:[#allocation2 + $0x28] sm:$0x3] %vm229_vm2, %v8388_v0 }
  0x35   : > { %239 = vst.msk [vmem:[#allocation2 + $0x58] sm:$0x3] %vm229_vm2, %v8388_v0 }
  0x36   : > { %242 = vst.msk [vmem:[#allocation2 + $0x70] sm:$0x3] %vm229_vm2, %v8388_v0 }
  0x37   : > { %245 = vst.msk [vmem:[#allocation2 + $0x88] sm:$0x3] %vm229_vm2, %v8388_v0 }
  0x38   : > { %v5621_v9 = vld [vmem:[#allocation2 + $0x30] sm:$0xff]  ;;  %248 = vst.msk [vmem:[#allocation2 + $0xa0] sm:$0x3] %vm229_vm2, %v8388_v0 }
  0x39   : > { %v5625_v10 = vld [vmem:[#allocation2 + $0x38] sm:$0xff]  ;;  %v553_v11 = vrot.slane %v5621_v9, 1  ;;  %251 = vst.msk [vmem:[#allocation2 + $0xb8] sm:$0x3] %vm229_vm2, %v8388_v0  ;;  %v5630_v12 = vld [vmem:[#allocation2 + $0x40] sm:$0x3] }
  0x3a   : > { %v554_v13 = vrot.slane %v5625_v10, 1  ;;  %254 = vst.msk [vmem:[#allocation2 + $0xd0] sm:$0x3] %vm229_vm2, %v8388_v0  ;;  %v5635_v14 = vld [vmem:[#allocation2 + $0x10] sm:$0x3]  ;;  %v556_v17 = vrot.slane %v5630_v12, 1 }
  0x3b   : > { %257 = vst.msk [vmem:[#allocation2 + $0xe8] sm:$0x3] %vm229_vm2, %v8388_v0  ;;  %v546_v15 = vrot.slane %v5635_v14, 1 }
  0x3c   : > { %v555_v16 = vsel %vm542_vm1, %v553_v11, %v554_v13  ;;  %260 = vst.msk [vmem:[#allocation2 + $0x100] sm:$0x3] %vm229_vm2, %v8388_v0  ;;  %v557_v21 = vsel %vm542_vm1, %v554_v13, %v556_v17 }
  0x3d   : > { %v5644_v18 = vpack.c.bf16 %v555_v16, %v555_v16  ;;  %263 = vst.msk [vmem:[#allocation2 + $0x118] sm:$0x3] %vm229_vm2, %v8388_v0  ;;  %v547_v19 = vsel %vm542_vm1, %v544_v4, %v546_v15  ;;  %v5669_v24 = vpack.c.bf16 %v557_v21, %v557_v21 }
  0x3e   : > { %266 = vst.msk [vmem:[#allocation2 + $0x130] sm:$0x3] %vm229_vm2, %v8388_v0  ;;  %v656_v20 = vpack.c.bf16 %v547_v19, %v547_v19 }
  0x3f   : > { %8469 = vst [vmem:[#allocation7_spill] sm:$0xff] %v5644_v18  ;;  %727 = vrot.lane.b32.xlu2 %v5644_v18, %s5461_s20 }
  0x40   : > { %269 = vst.msk [vmem:[#allocation2 + $0x148] sm:$0x3] %vm229_vm2, %v8388_v0  ;;  %721 = vrot.lane.b32.xlu0 %v656_v20, %s5461_s20 }
  0x41   : > { %272 = vst.msk [vmem:[#allocation2 + $0x160] sm:$0x3] %vm229_vm2, %v8388_v0 }
  0x42   : > { %275 = vst.msk [vmem:[#allocation2 + $0x178] sm:$0x3] %vm229_vm2, %v8388_v0 }
  0x43   : > { %278 = vst.msk [vmem:[#allocation2 + $0x190] sm:$0x3] %vm229_vm2, %v8388_v0 }
  0x44   : > { %281 = vst.msk [vmem:[#allocation2 + $0x1a8] sm:$0x3] %vm229_vm2, %v8388_v0  ;;  %vm2434_vm2 = vcmask 60419  }
  0x45   : > { %8470 = vst [vmem:[#allocation8_spill] sm:$0xff] %v5669_v24 }
  0x46   : > { %343 = vst.msk [vmem:[#allocation2 + $0x19] sm:$0xff] %vm226_vm0, %v304_v22 }
  0x47   : > { %344 = vst.msk [vmem:[#allocation2 + $0x21] sm:$0xff] %vm226_vm0, %v305_v23  ;;  %729 = vrot.lane.b32.xlu2 %v5669_v24, %s5461_s20 }
  0x48   : > { %347 = vst.msk [vmem:[#allocation2 + $0x49] sm:$0xff] %vm226_vm0, %v308_v25 }
  0x49   : > { %348 = vst.msk [vmem:[#allocation2 + $0x51] sm:$0xff] %vm226_vm0, %v309_v26 }
  0x4a   : > { %349 = vst.msk [vmem:[#allocation2 + $0x61] sm:$0xff] %vm226_vm0, %v310_v27 }
  0x4b   : > { %350 = vst.msk [vmem:[#allocation2 + $0x69] sm:$0xff] %vm226_vm0, %v311_v28 }
  0x4c   : > { %351 = vst.msk [vmem:[#allocation2 + $0x79] sm:$0xff] %vm226_vm0, %v312_v29 }
  0x4d   : > { %v5688_v33 = vld [vmem:[#allocation2 + $0x18] sm:$0xff]  ;;  %352 = vst.msk [vmem:[#allocation2 + $0x81] sm:$0xff] %vm226_vm0, %v313_v30  ;;  %v324_v30 = vld [vmem:[%s5595_s24 + $0xa0] sm:$0xff] }
  0x4e   : > { %v5692_v35 = vld [vmem:[#allocation2 + $0x20] sm:$0xff]  ;;  %v548_v36 = vrot.slane %v5688_v33, 1  ;;  %v5695_v37 = vld [vmem:[#allocation2 + $0x28] sm:$0x3]  ;;  %353 = vst.msk [vmem:[#allocation2 + $0x91] sm:$0xff] %vm226_vm0, %v314_v31 }
  0x4f   : > { %v549_v39 = vrot.slane %v5692_v35, 1  ;;  %v5700_v40 = vld [vmem:[#allocation2 + $0x48] sm:$0xff]  ;;  %354 = vst.msk [vmem:[#allocation2 + $0x99] sm:$0xff] %vm226_vm0, %v315_v32  ;;  %v551_v46 = vrot.slane %v5695_v37, 1  ;;  %v857_v18 = vrot.slane %v5695_v37, 2 }
  0x50   : > { %v5704_v42 = vld [vmem:[#allocation2 + $0x50] sm:$0xff]  ;;  %v558_v43 = vrot.slane %v5700_v40, 1  ;;  %355 = vst.msk [vmem:[#allocation2 + $0xa9] sm:$0xff] %vm226_vm0, %v316_v34  ;;  %v5747_v5 = vld [vmem:[#allocation2 + $0x58] sm:$0x3]  ;;  %v325_v31 = vld [vmem:[%s5595_s24 + $0xa8] sm:$0xff] }
  0x51   : > { %v550_v45 = vsel %vm542_vm1, %v548_v36, %v549_v39  ;;  %v559_v47 = vrot.slane %v5704_v42, 1  ;;  %v5712_v48 = vld [vmem:[#allocation2 + $0x60] sm:$0xff]  ;;  %356 = vst.msk [vmem:[#allocation2 + $0xb1] sm:$0xff] %vm226_vm0, %v317_v38  ;;  %v552_v61 = vsel %vm542_vm1, %v549_v39, %v551_v46  ;;  %v561_v16 = vrot.slane %v5747_v5, 1  ;;  %v326_v38 = vld [vmem:[%s5595_s24 + $0xb0] sm:$0xff]  ;;  %v327_v39 = vld [vmem:[%s5595_s24 + $0xb8] sm:$0xff] }
  0x52   : > { %v5716_v50 = vpack.c.bf16 %v550_v45, %v550_v45  ;;  %v5718_v51 = vld [vmem:[#allocation2 + $0x68] sm:$0xff]  ;;  %v563_v52 = vrot.slane %v5712_v48, 1  ;;  %v5721_v53 = vld [vmem:[#allocation2 + $0x70] sm:$0x3]  ;;  %357 = vst.msk [vmem:[#allocation2 + $0xc1] sm:$0xff] %vm226_vm0, %v318_v41  ;;  %v5753_v11 = vpack.c.bf16 %v552_v61, %v552_v61 }
  0x53   : > { %v560_v55 = vsel %vm542_vm1, %v558_v43, %v559_v47  ;;  %v564_v56 = vrot.slane %v5718_v51, 1  ;;  %v566_v57 = vrot.slane %v5721_v53, 1  ;;  %358 = vst.msk [vmem:[#allocation2 + $0xc9] sm:$0xff] %vm226_vm0, %v319_v44  ;;  %v562_v26 = vsel %vm542_vm1, %v559_v47, %v561_v16  ;;  %v5781_v29 = vld [vmem:[#allocation2 + $0x78] sm:$0xff]  ;;  %v329_v61 = vld [vmem:[%s5595_s24 + $0xc8] sm:$0xff] }
  0x54   : > { %723 = vrot.lane.b32.xlu1 %v5716_v50, %s5461_s20  ;;  %v5731_v58 = vpack.c.bf16 %v560_v55, %v560_v55  ;;  %v5733_v59 = vld [vmem:[#allocation2 + $0x80] sm:$0xff]  ;;  %v5735_v60 = vld [vmem:[#allocation2 + $0x88] sm:$0x3]  ;;  %359 = vst.msk [vmem:[#allocation2 + $0xd9] sm:$0xff] %vm226_vm0, %v320_v49  ;;  %v5787_v34 = vpack.c.bf16 %v562_v26, %v562_v26  ;;  %v568_v41 = vrot.slane %v5781_v29, 1 }
  0x55   : > { %v565_v62 = vsel %vm542_vm1, %v563_v52, %v564_v56  ;;  %v569_v63 = vrot.slane %v5733_v59, 1  ;;  %v571_v3 = vrot.slane %v5735_v60, 1  ;;  %360 = vst.msk [vmem:[#allocation2 + $0xe1] sm:$0xff] %vm226_vm0, %v321_v54  ;;  %v567_v7 = vsel %vm542_vm1, %v564_v56, %v566_v57  ;;  %v5757_v13 = vld [vmem:[#allocation2 + $0x90] sm:$0xff]  ;;  %v328_v57 = vld [vmem:[%s5595_s24 + $0xc0] sm:$0xff] }
  0x56   : > { %8471 = vst [vmem:[#allocation9_spill] sm:$0xff] %v5731_v58  ;;  %731 = vrot.lane.b32.xlu0 %v5731_v58, %s5461_s20  ;;  %v5745_v4 = vpack.c.bf16 %v565_v62, %v565_v62  ;;  %v5759_v15 = vld [vmem:[#allocation2 + $0x98] sm:$0xff]  ;;  %v5764_v19 = vpack.c.bf16 %v567_v7, %v567_v7  ;;  %v573_v22 = vrot.slane %v5757_v13, 1  ;;  %v5816_v56 = vld [vmem:[#allocation2 + $0xa0] sm:$0x3] }
  0x57   : > { %361 = vst.msk [vmem:[#allocation2 + $0xf1] sm:$0xff] %vm226_vm0, %v322_v6  ;;  %v572_v17 = vsel %vm542_vm1, %v569_v63, %v571_v3  ;;  %v5766_v20 = vld [vmem:[#allocation2 + $0xa8] sm:$0xff]  ;;  %v574_v23 = vrot.slane %v5759_v15, 1  ;;  %v570_v52 = vsel %vm542_vm1, %v568_v41, %v569_v63  ;;  %v576_v7 = vrot.slane %v5816_v56, 1  ;;  %v331_v41 = vld [vmem:[%s5595_s24 + $0xd8] sm:$0xff] }
  0x58   : > { %8472 = vst [vmem:[#allocation10_spill] sm:$0xff] %v5745_v4  ;;  %735 = vrot.lane.b32.xlu2 %v5745_v4, %s5461_s20  ;;  %v5768_v21 = vld [vmem:[#allocation2 + $0xb0] sm:$0xff]  ;;  %v5774_v25 = vpack.c.bf16 %v572_v17, %v572_v17  ;;  %v578_v27 = vrot.slane %v5766_v20, 1  ;;  %v5791_v36 = vld [vmem:[#allocation2 + $0xb8] sm:$0x3]  ;;  %v5822_v3 = vpack.c.bf16 %v570_v52, %v570_v52  ;;  %v332_v52 = vld [vmem:[%s5595_s24 + $0xe0] sm:$0xff] }
  0x59   : > { %8473 = vst [vmem:[#allocation11_spill] sm:$0xff] %v5753_v11  ;;  %v579_v28 = vrot.slane %v5768_v21, 1  ;;  %v575_v32 = vsel %vm542_vm1, %v573_v22, %v574_v23  ;;  %v581_v47 = vrot.slane %v5791_v36, 1 }
  0x5a   : > { %362 = vst.msk [vmem:[#allocation2 + $0xf9] sm:$0xff] %vm226_vm0, %v323_v8  ;;  %v5799_v44 = vpack.c.bf16 %v575_v32, %v575_v32  ;;  %v5801_v45 = vld [vmem:[#allocation2 + $0xc8] sm:$0xff]  ;;  %v5803_v46 = vld [vmem:[#allocation2 + $0xd0] sm:$0x3] }
  0x5b   : > { %8474 = vst [vmem:[#allocation12_spill] sm:$0xff] %v5764_v19  ;;  %v580_v43 = vsel %vm542_vm1, %v578_v27, %v579_v28  ;;  %v584_v54 = vrot.slane %v5801_v45, 1  ;;  %v586_v55 = vrot.slane %v5803_v46, 1  ;;  %v582_v62 = vsel %vm542_vm1, %v579_v28, %v581_v47  ;;  %v5826_v63 = vld [vmem:[#allocation2 + $0xd8] sm:$0xff] }
  0x5c   : > { %725 = vrot.lane.b32.xlu1 %v5753_v11, %s5461_s20  ;;  %8475 = vst [vmem:[#allocation13_spill] sm:$0xff] %v5774_v25  ;;  %v5809_v49 = vpack.c.bf16 %v580_v43, %v580_v43  ;;  %v5828_v6 = vld [vmem:[#allocation2 + $0xe0] sm:$0xff]  ;;  %v5833_v16 = vpack.c.bf16 %v582_v62, %v582_v62  ;;  %v588_v26 = vrot.slane %v5826_v63, 1 }
  0x5d   : > { %363 = vst.msk [vmem:[#allocation2 + $0x109] sm:$0xff] %vm226_vm0, %v324_v30  ;;  %v587_v8 = vsel %vm542_vm1, %v584_v54, %v586_v55  ;;  %v589_v27 = vrot.slane %v5828_v6, 1  ;;  %v577_v30 = vsel %vm542_vm1, %v574_v23, %v576_v7  ;;  %v333_v55 = vld [vmem:[%s5595_s24 + $0xe8] sm:$0xff] }
  0x5e   : > { %737 = vrot.lane.b32.xlu0 %v5764_v19, %s5461_s20  ;;  %8476 = vst [vmem:[#allocation14_spill] sm:$0xff] %v5787_v34  ;;  %v5835_v17 = vld [vmem:[#allocation2 + $0xf0] sm:$0xff]  ;;  %v5843_v28 = vpack.c.bf16 %v587_v8, %v587_v8  ;;  %v5856_v47 = vpack.c.bf16 %v577_v30, %v577_v30 }
  0x5f   : > { %364 = vst.msk [vmem:[#allocation2 + $0x111] sm:$0xff] %vm226_vm0, %v325_v31  ;;  %v593_v31 = vrot.slane %v5835_v17, 1  ;;  %v590_v43 = vsel %vm542_vm1, %v588_v26, %v589_v27 }
  0x60   : > { %741 = vrot.lane.b32.xlu2 %v5774_v25, %s5461_s20  ;;  %365 = vst.msk [vmem:[#allocation2 + $0x121] sm:$0xff] %vm226_vm0, %v326_v38  ;;  %v5850_v38 = vld [vmem:[#allocation2 + $0xc0] sm:$0xff]  ;;  %v5868_v62 = vpack.c.bf16 %v590_v43, %v590_v43  ;;  %v5885_v43 = vld [vmem:[#allocation2 + $0xe8] sm:$0x3] }
  0x61   : > { %8477 = vst [vmem:[#allocation15_spill] sm:$0xff] %v5799_v44  ;;  %v5837_v22 = vld [vmem:[#allocation2 + $0xf8] sm:$0xff]  ;;  %v5860_v23 = vld [vmem:[#allocation2 + $0x100] sm:$0x3] }
  0x62   : > { %366 = vst.msk [vmem:[#allocation2 + $0x129] sm:$0xff] %vm226_vm0, %v327_v39  ;;  %v594_v32 = vrot.slane %v5837_v22, 1  ;;  %v330_v39 = vld [vmem:[%s5595_s24 + $0xd0] sm:$0xff]  ;;  %v596_v26 = vrot.slane %v5860_v23, 1 }
  0x63   : > { %8478 = vst [vmem:[#allocation16_spill] sm:$0xff] %v5809_v49 }
  0x64   : > { %733 = vrot.lane.b32.xlu1 %v5787_v34, %s5461_s20  ;;  %367 = vst.msk [vmem:[#allocation2 + $0x139] sm:$0xff] %vm226_vm0, %v328_v57  ;;  %v583_v57 = vrot.slane %v5850_v38, 1 }
  0x65   : > { %8479 = vst [vmem:[#allocation17_spill] sm:$0xff] %v5822_v3 }
  0x66   : > { %743 = vrot.lane.b32.xlu0 %v5799_v44, %s5461_s20  ;;  %368 = vst.msk [vmem:[#allocation2 + $0x141] sm:$0xff] %vm226_vm0, %v329_v61  ;;  %v595_v61 = vsel %vm542_vm1, %v593_v31, %v594_v32  ;;  %v5870_v7 = vld [vmem:[#allocation2 + $0x110] sm:$0xff]  ;;  %v5872_v8 = vld [vmem:[#allocation2 + $0x118] sm:$0x3] }
  0x67   : > { %8480 = vst [vmem:[#allocation18_spill] sm:$0xff] %v5833_v16  ;;  %v5878_v30 = vpack.c.bf16 %v595_v61, %v595_v61  ;;  %v599_v31 = vrot.slane %v5870_v7, 1  ;;  %v5892_v61 = vld [vmem:[#allocation2 + $0x120] sm:$0xff] }
  0x68   : > { %747 = vrot.lane.b32.xlu2 %v5809_v49, %s5461_s20  ;;  %8481 = vst [vmem:[#allocation19_spill] sm:$0xff] %v5843_v28 }
  0x69   : > { %369 = vst.msk [vmem:[#allocation2 + $0x151] sm:$0xff] %vm226_vm0, %v330_v39  ;;  %v585_v39 = vsel %vm542_vm1, %v583_v57, %v584_v54  ;;  %v5894_v0 = vld [vmem:[#allocation2 + $0x128] sm:$0xff]  ;;  %v591_v54 = vrot.slane %v5885_v43, 1 }
  0x6a   : > { %8482 = vst [vmem:[#allocation20_spill] sm:$0xff] %v5856_v47 }
  0x6b   : > { %370 = vst.msk [vmem:[#allocation2 + $0x159] sm:$0xff] %vm226_vm0, %v331_v41  ;;  %v601_v41 = vrot.slane %v5872_v8, 1 }
  0x6c   : > { %739 = vrot.lane.b32.xlu1 %v5822_v3, %s5461_s20  ;;  %371 = vst.msk [vmem:[#allocation2 + $0x169] sm:$0xff] %vm226_vm0, %v332_v52  ;;  %v597_v52 = vsel %vm542_vm1, %v594_v32, %v596_v26  ;;  %v603_v32 = vrot.slane %v5892_v61, 1  ;;  %v604_v26 = vrot.slane %v5894_v0, 1 }
  0x6d   : > { %8483 = vst [vmem:[#allocation21_spill] sm:$0xff] %v5868_v62  ;;  %v602_v57 = vsel %vm542_vm1, %v599_v31, %v601_v41 }
  0x6e   : > { %749 = vrot.lane.b32.xlu0 %v5833_v16, %s5461_s20  ;;  %372 = vst.msk [vmem:[#allocation2 + $0x171] sm:$0xff] %vm226_vm0, %v333_v55  ;;  %v5888_v55 = vpack.c.bf16 %v585_v39, %v585_v39  ;;  %v5902_v16 = vld [vmem:[#allocation2 + $0x140] sm:$0xff]  ;;  %v5908_v39 = vpack.c.bf16 %v602_v57, %v602_v57  ;;  %v605_v49 = vsel %vm542_vm1, %v603_v32, %v604_v26  ;;  %v5922_v57 = vld [vmem:[#allocation2 + $0x148] sm:$0x3] }
  0x6f   : > { %8484 = vst [vmem:[#allocation22_spill] sm:$0xff] %v5878_v30  ;;  %v609_v41 = vrot.slane %v5902_v16, 1  ;;  %v611_v25 = vrot.slane %v5922_v57, 1 }
  0x70   : > { %753 = vrot.lane.b32.xlu2 %v5843_v28, %s5461_s20  ;;  %8485 = vst [vmem:[#allocation23_spill] sm:$0xff] %v5888_v55  ;;  %v5898_v28 = vpack.c.bf16 %v597_v52, %v597_v52  ;;  %v5915_v52 = vld [vmem:[#allocation2 + $0x108] sm:$0xff] }
  0x71   : > { %8487 = vst [vmem:[#allocation25_spill] sm:$0xff] %v5908_v39 }
  0x72   : > { %8486 = vst [vmem:[#allocation24_spill] sm:$0xff] %v5898_v28 }
  0x74   : > { %745 = vrot.lane.b32.xlu1 %v5856_v47, %s5461_s20  ;;  %v5928_v47 = vld [vmem:[#allocation2 + $0x158] sm:$0xff] }
  0x76   : > { %755 = vrot.lane.b32.xlu0 %v5868_v62, %s5461_s20  ;;  %v5900_v62 = vld [vmem:[#allocation2 + $0x138] sm:$0xff] }
  0x77   : > { %v608_v44 = vrot.slane %v5900_v62, 1 }
  0x78   : > { %759 = vrot.lane.b32.xlu2 %v5878_v30, %s5461_s20  ;;  %v592_v30 = vsel %vm542_vm1, %v589_v27, %v591_v54  ;;  %v598_v27 = vrot.slane %v5915_v52, 1 }
  0x79   : > { %v5918_v19 = vpack.c.bf16 %v592_v30, %v592_v30  ;;  %v610_v54 = vsel %vm542_vm1, %v608_v44, %v609_v41  ;;  %v5942_v44 = vld [vmem:[#allocation2 + $0x130] sm:$0x3] }
  0x7a   : > { %v5935_v30 = vpack.c.bf16 %v610_v54, %v610_v54  ;;  %v600_v32 = vsel %vm542_vm1, %v598_v27, %v599_v31  ;;  %v5949_v54 = vld [vmem:[#allocation2 + $0x168] sm:$0xff]  ;;  %v606_v31 = vrot.slane %v5942_v44, 1 }
  0x7b   : > { %8488 = vst [vmem:[#allocation26_spill] sm:$0xff] %v5918_v19  ;;  %v5945_v3 = vpack.c.bf16 %v600_v32, %v600_v32 }
  0x7c   : > { %751 = vrot.lane.b32.xlu1 %v5888_v55, %s5461_s20  ;;  %v5926_v55 = vpack.c.bf16 %v605_v49, %v605_v49  ;;  %8490 = vst [vmem:[#allocation28_spill] sm:$0xff] %v5935_v30  ;;  %v612_v49 = vsel %vm542_vm1, %v609_v41, %v611_v25  ;;  %v5965_v41 = vpack.c.bf16 %v5621_v9, %v5621_v9 }
  0x7d   : > { %8491 = vst [vmem:[#allocation29_spill] sm:$0xff] %v5945_v3  ;;  %v5955_v4 = vpack.c.bf16 %v612_v49, %v612_v49  ;;  %v607_v32 = vsel %vm542_vm1, %v604_v26, %v606_v31  ;;  %v5972_v49 = vld [vmem:[#allocation2 + $0x150] sm:$0xff] }
  0x7e   : > { %761 = vrot.lane.b32.xlu0 %v5898_v28, %s5461_s20  ;;  %8489 = vst [vmem:[#allocation27_spill] sm:$0xff] %v5926_v55  ;;  %v5930_v28 = vld [vmem:[#allocation2 + $0x160] sm:$0x3]  ;;  %v613_v26 = vrot.slane %v5972_v49, 1 }
  0x7f   : > { %v616_v58 = vrot.slane %v5930_v28, 1  ;;  %8492 = vst [vmem:[#allocation30_spill] sm:$0xff] %v5955_v4 }
  0x80   : > { %765 = vrot.lane.b32.xlu2 %v5908_v39, %s5461_s20  ;;  %v614_v39 = vrot.slane %v5928_v47, 1  ;;  %466 = vst.msk [vmem:[#allocation4 + $0x10] sm:$0xf] %vm461_vm3, %v5965_v41 }
  0x82   : > { %v617_v27 = vsel %vm542_vm1, %v614_v39, %v616_v58  ;;  %v850_v58 = vrot.slane %v5529_v2, 2 }
  0x83   : > { %v5961_v25 = vpack.c.bf16 %v617_v27, %v617_v27 }
  0x84   : > { %757 = vrot.lane.b32.xlu1 %v5918_v19, %s5461_s20  ;;  %v5951_v19 = vld [vmem:[#allocation2 + $0x170] sm:$0xff] }
  0x85   : > { %v619_v11 = vrot.slane %v5951_v19, 1  ;;  %8493 = vst [vmem:[#allocation31_spill] sm:$0xff] %v5961_v25 }
  0x86   : > { %767 = vrot.lane.b32.xlu0 %v5926_v55, %s5461_s20  ;;  %v618_v55 = vrot.slane %v5949_v54, 1 }
  0x88   : > { %771 = vrot.lane.b32.xlu2 %v5935_v30, %s5461_s20  ;;  %v849_v30 = vrot.slane %v5525_v1, 2  ;;  %v620_v27 = vsel %vm542_vm1, %v618_v55, %v619_v11  ;;  %v5990_v55 = vpack.c.bf16 %v5625_v10, %v5625_v10 }
  0x89   : > { %v5983_v34 = vpack.c.bf16 %v620_v27, %v620_v27 }
  0x8a   : > { %v851_v31 = vsel %vm848_vm4, %v849_v30, %v850_v58  ;;  %v5997_v30 = vld [vmem:[#allocation2 + $0x178] sm:$0x3]  ;;  %467 = vst.msk [vmem:[#allocation4 + $0x14] sm:$0xf] %vm461_vm3, %v5990_v55 }
  0x8b   : > { %8495 = vst [vmem:[#allocation33_spill] sm:$0xff] %v5983_v34  ;;  %v961_v24 = vpack.c.bf16 %v851_v31, %v851_v31  ;;  %v859_v31 = vrot.slane %v5621_v9, 2 }
  0x8c   : > { %763 = vrot.lane.b32.xlu1 %v5945_v3, %s5461_s20  ;;  %v5977_v3 = vpack.c.bf16 %v607_v32, %v607_v32  ;;  %v615_v32 = vsel %vm542_vm1, %v613_v26, %v614_v39  ;;  %v621_v39 = vrot.slane %v5997_v30, 1 }
  0x8d   : > { %v6002_v27 = vpack.c.bf16 %v615_v32, %v615_v32  ;;  %v720_v32 = vpop.permute.xlu0 %719 }
  0x8e   : > { %773 = vrot.lane.b32.xlu0 %v5955_v4, %s5461_s20  ;;  %8494 = vst [vmem:[#allocation32_spill] sm:$0xff] %v5977_v3  ;;  %v852_v4 = vrot.slane %v5635_v14, 2  ;;  %v622_v9 = vsel %vm542_vm1, %v619_v11, %v621_v39 }
  0x8f   : > { %8496 = vst [vmem:[#allocation34_spill] sm:$0xff] %v6002_v27 }
  0x90   : > { %777 = vrot.lane.b32.xlu2 %v5961_v25, %s5461_s20  ;;  %v855_v25 = vrot.slane %v5692_v35, 2  ;;  %v853_v14 = vsel %vm848_vm4, %v850_v58, %v852_v4  ;;  %v865_v58 = vrot.slane %v5704_v42, 2 }
  0x91   : > { %v962_v37 = vpack.c.bf16 %v853_v14, %v853_v14  ;;  %v6028_v14 = vpack.c.bf16 %v622_v9, %v622_v9  ;;  %v6049_v9 = vpack.c.bf16 %v5688_v33, %v5688_v33 }
  0x92   : > { %v858_v26 = vsel %vm848_vm4, %v855_v25, %v857_v18  ;;  %v429_v18 = vpack.c.bf16 %v5525_v1, %v5525_v1  ;;  %v854_v1 = vrot.slane %v5688_v33, 2  ;;  %v430_v33 = vpack.c.bf16 %v5529_v2, %v5529_v2 }
  0x93   : > { %v6011_v4 = vpack.c.bf16 %v858_v26, %v858_v26  ;;  %8497 = vst [vmem:[#allocation35_spill] sm:$0xff] %v6028_v14  ;;  %v867_v26 = vrot.slane %v5747_v5, 2  ;;  %v870_v5 = vrot.slane %v5718_v51, 2 }
  0x94   : > { %769 = vrot.lane.b32.xlu1 %v5977_v3, %s5461_s20  ;;  %462 = vst.msk [vmem:[#allocation4] sm:$0xf] %vm461_vm3, %v429_v18  ;;  %v6045_v18 = vpack.c.bf16 %v5733_v59, %v5733_v59 }
  0x95   : > { %816 = vst.msk [vmem:[#allocation4] sm:$0xf] %vm815_vm5, %v720_v32  ;;  %v868_v32 = vsel %vm848_vm4, %v865_v58, %v867_v26  ;;  %v875_v26 = vrot.slane %v5733_v59, 2 }
  0x96   : > { %779 = vrot.lane.b32.xlu0 %v5983_v34, %s5461_s20  ;;  %v860_v34 = vrot.slane %v5625_v10, 2  ;;  %v864_v10 = vrot.slane %v5700_v40, 2  ;;  %473 = vst.msk [vmem:[#allocation4 + $0x2c] sm:$0xf] %vm461_vm3, %v6045_v18 }
  0x97   : > { %464 = vst.msk [vmem:[#allocation4 + $0x8] sm:$0xf] %vm461_vm3, %v6049_v9 }
  0x98   : > { %1025 = vrot.lane.b32.xlu2 %v961_v24, %s5462_s25  ;;  %v6016_v24 = vpack.c.bf16 %v5712_v48, %v5712_v48  ;;  %v866_v11 = vsel %vm848_vm4, %v864_v10, %v865_v58  ;;  %v856_v10 = vsel %vm848_vm4, %v854_v1, %v855_v25  ;;  %463 = vst.msk [vmem:[#allocation4 + $0x4] sm:$0xf] %vm461_vm3, %v430_v33  ;;  %v874_v58 = vrot.slane %v5781_v29, 2 }
  0x99   : > { %v728_v3 = vpop.permute.xlu2 %727  ;;  %v6070_v1 = vpack.c.bf16 %v868_v32, %v868_v32  ;;  %v880_v32 = vrot.slane %v5759_v15, 2  ;;  %v869_v33 = vrot.slane %v5712_v48, 2  ;;  %v6118_v48 = vpack.c.bf16 %v5801_v45, %v5801_v45 }
  0x9a   : > { %820 = vst.msk [vmem:[#allocation4 + $0x10] sm:$0xf] %vm815_vm5, %v728_v3  ;;  %v861_v3 = vsel %vm848_vm4, %v859_v31, %v860_v34  ;;  %v6040_v31 = vpack.c.bf16 %v866_v11, %v866_v11  ;;  %v6063_v11 = vpack.c.bf16 %v856_v10, %v856_v10  ;;  %v876_v59 = vsel %vm848_vm4, %v874_v58, %v875_v26 }
  0x9b   : > { %470 = vst.msk [vmem:[#allocation4 + $0x20] sm:$0xf] %vm461_vm3, %v6016_v24  ;;  %v6035_v39 = vpack.c.bf16 %v861_v3, %v861_v3  ;;  %v872_v3 = vrot.slane %v5721_v53, 2  ;;  %v862_v53 = vrot.slane %v5630_v12, 2  ;;  %v6084_v12 = vpack.c.bf16 %v5692_v35, %v5692_v35 }
  0x9c   : > { %775 = vrot.lane.b32.xlu1 %v6002_v27, %s5461_s20  ;;  %v6098_v35 = vpack.c.bf16 %v5700_v40, %v5700_v40  ;;  %v882_v40 = vrot.slane %v5816_v56, 2  ;;  %v885_v56 = vrot.slane %v5768_v21, 2  ;;  %479 = vst.msk [vmem:[#allocation4 + $0x44] sm:$0xf] %vm461_vm3, %v6118_v48  ;;  %v895_v27 = vrot.slane %v5828_v6, 2 }
  0x9d   : > { %v873_v25 = vsel %vm848_vm4, %v870_v5, %v872_v3  ;;  %v863_v10 = vsel %vm848_vm4, %v860_v34, %v862_v53  ;;  %v879_v3 = vrot.slane %v5757_v13, 2  ;;  %465 = vst.msk [vmem:[#allocation4 + $0xc] sm:$0xf] %vm461_vm3, %v6084_v12 }
  0x9e   : > { %1027 = vrot.lane.b32.xlu0 %v962_v37, %s5462_s25  ;;  %v6076_v2 = vpack.c.bf16 %v873_v25, %v873_v25  ;;  %v6100_v34 = vpack.c.bf16 %v863_v10, %v863_v10  ;;  %468 = vst.msk [vmem:[#allocation4 + $0x18] sm:$0xf] %vm461_vm3, %v6098_v35  ;;  %v6108_v25 = vpack.c.bf16 %v876_v59, %v876_v59 }
  0x9f   : > { %v881_v53 = vsel %vm848_vm4, %v879_v3, %v880_v32  ;;  %v6122_v3 = vpack.c.bf16 %v5704_v42, %v5704_v42  ;;  %v871_v59 = vsel %vm848_vm4, %v869_v33, %v870_v5  ;;  %v6137_v42 = vpack.c.bf16 %v5718_v51, %v5718_v51 }
  0xa0   : > { %1031 = vrot.lane.b32.xlu2 %v6011_v4, %s5462_s25  ;;  %v6114_v10 = vpack.c.bf16 %v881_v53, %v881_v53  ;;  %v883_v53 = vsel %vm848_vm4, %v880_v32, %v882_v40  ;;  %v889_v51 = vrot.slane %v5850_v38, 2  ;;  %v890_v40 = vrot.slane %v5801_v45, 2 }
  0xa1   : > { %v730_v37 = vpop.permute.xlu2 %729  ;;  %469 = vst.msk [vmem:[#allocation4 + $0x1c] sm:$0xf] %vm461_vm3, %v6122_v3  ;;  %v6147_v32 = vpack.c.bf16 %v883_v53, %v883_v53 }
  0xa2   : > { %821 = vst.msk [vmem:[#allocation4 + $0x14] sm:$0xf] %vm815_vm5, %v730_v37  ;;  %v6080_v37 = vpack.c.bf16 %v5766_v20, %v5766_v20  ;;  %v891_v45 = vsel %vm848_vm4, %v889_v51, %v890_v40 }
  0xa3   : > { %8498 = vst [vmem:[#allocation36_spill] sm:$0xff] %v6114_v10  ;;  %v6186_v51 = vpack.c.bf16 %v891_v45, %v891_v45 }
  0xa4   : > { %781 = vrot.lane.b32.xlu1 %v6028_v14, %s5461_s20  ;;  %476 = vst.msk [vmem:[#allocation4 + $0x38] sm:$0xf] %vm461_vm3, %v6080_v37 }
  0xa5   : > { %471 = vst.msk [vmem:[#allocation4 + $0x24] sm:$0xf] %vm461_vm3, %v6137_v42 }
  0xa6   : > { %1033 = vrot.lane.b32.xlu0 %v6035_v39, %s5462_s25  ;;  %8500 = vst [vmem:[#allocation38_spill] sm:$0xff] %v6186_v51 }
  0xa8   : > { %1037 = vrot.lane.b32.xlu2 %v6040_v31, %s5462_s25 }
  0xac   : > { %1029 = vrot.lane.b32.xlu1 %v6063_v11, %s5462_s25 }
  0xae   : > { %1039 = vrot.lane.b32.xlu0 %v6070_v1, %s5462_s25 }
  0xb0   : > { %1043 = vrot.lane.b32.xlu2 %v6076_v2, %s5462_s25 }
  0xb2   : > { %v736_v58 = vpop.permute.xlu2 %735  ;;  %v722_v14 = vpop.permute.xlu0 %721 }
  0xb3   : > { %824 = vst.msk [vmem:[#allocation4 + $0x20] sm:$0xf] %vm815_vm5, %v736_v58  ;;  %v887_v58 = vrot.slane %v5791_v36, 2  ;;  %v877_v36 = vrot.slane %v5735_v60, 2  ;;  %v6158_v60 = vpack.c.bf16 %v5835_v17, %v5835_v17 }
  0xb4   : > { %1035 = vrot.lane.b32.xlu1 %v6100_v34, %s5462_s25  ;;  %817 = vst.msk [vmem:[#allocation4 + $0x4] sm:$0xf] %vm815_vm5, %v722_v14  ;;  %v6139_v14 = vpack.c.bf16 %v871_v59, %v871_v59 }
  0xb5   : > { %v888_v5 = vsel %vm848_vm4, %v885_v56, %v887_v58  ;;  %v6162_v58 = vpack.c.bf16 %v5781_v29, %v5781_v29  ;;  %v878_v53 = vsel %vm848_vm4, %v875_v26, %v877_v36  ;;  %482 = vst.msk [vmem:[#allocation4 + $0x50] sm:$0xf] %vm461_vm3, %v6158_v60  ;;  %v6176_v29 = vpack.c.bf16 %v5757_v13, %v5757_v13 }
  0xb6   : > { %1045 = vrot.lane.b32.xlu0 %v6108_v25, %s5462_s25  ;;  %v6154_v59 = vpack.c.bf16 %v888_v5, %v888_v5  ;;  %v6178_v26 = vpack.c.bf16 %v878_v53, %v878_v53  ;;  %v884_v36 = vrot.slane %v5766_v20, 2  ;;  %v897_v13 = vrot.slane %v5885_v43, 2 }
  0xb7   : > { %472 = vst.msk [vmem:[#allocation4 + $0x28] sm:$0xf] %vm461_vm3, %v6162_v58  ;;  %v6196_v20 = vpack.c.bf16 %v5870_v7, %v5870_v7 }
  0xb8   : > { %1049 = vrot.lane.b32.xlu2 %v6114_v10, %s5462_s25  ;;  %8499 = vst [vmem:[#allocation37_spill] sm:$0xff] %v6154_v59  ;;  %v886_v45 = vsel %vm848_vm4, %v884_v36, %v885_v56 }
  0xb9   : > { %474 = vst.msk [vmem:[#allocation4 + $0x30] sm:$0xf] %vm461_vm3, %v6176_v29  ;;  %v6215_v56 = vpack.c.bf16 %v886_v45, %v886_v45  ;;  %v905_v45 = vrot.slane %v5870_v7, 2 }
  0xba   : > { %v742_v33 = vpop.permute.xlu2 %741  ;;  %485 = vst.msk [vmem:[#allocation4 + $0x5c] sm:$0xf] %vm461_vm3, %v6196_v20 }
  0xbb   : > { %827 = vst.msk [vmem:[#allocation4 + $0x2c] sm:$0xf] %vm815_vm5, %v742_v33  ;;  %v894_v33 = vrot.slane %v5826_v63, 2 }
  0xbc   : > { %1041 = vrot.lane.b32.xlu1 %v6139_v14, %s5462_s25  ;;  %8502 = vst [vmem:[#allocation40_spill] sm:$0xff] %v6215_v56 }
  0xbd   : > { %v896_v5 = vsel %vm848_vm4, %v894_v33, %v895_v27  ;;  %v6200_v33 = vpack.c.bf16 %v5759_v15, %v5759_v15  ;;  %v6213_v15 = vpack.c.bf16 %v5768_v21, %v5768_v21  ;;  %v904_v21 = vrot.slane %v5915_v52, 2 }
  0xbe   : > { %1051 = vrot.lane.b32.xlu0 %v6147_v32, %s5462_s25  ;;  %v6192_v53 = vpack.c.bf16 %v896_v5, %v896_v5  ;;  %v898_v5 = vsel %vm848_vm4, %v895_v27, %v897_v13 }
  0xbf   : > { %475 = vst.msk [vmem:[#allocation4 + $0x34] sm:$0xf] %vm461_vm3, %v6200_v33  ;;  %v6224_v27 = vpack.c.bf16 %v898_v5, %v898_v5 }
  0xc0   : > { %1055 = vrot.lane.b32.xlu2 %v6154_v59, %s5462_s25  ;;  %8501 = vst [vmem:[#allocation39_spill] sm:$0xff] %v6192_v53  ;;  %v900_v59 = vrot.slane %v5837_v22, 2 }
  0xc1   : > { %8503 = vst [vmem:[#allocation41_spill] sm:$0xff] %v6224_v27 }
  0xc2   : > { %v748_v10 = vpop.permute.xlu2 %747  ;;  %477 = vst.msk [vmem:[#allocation4 + $0x3c] sm:$0xf] %vm461_vm3, %v6213_v15 }
  0xc3   : > { %830 = vst.msk [vmem:[#allocation4 + $0x38] sm:$0xf] %vm815_vm5, %v748_v10  ;;  %v902_v10 = vrot.slane %v5860_v23, 2  ;;  %v892_v23 = vrot.slane %v5803_v46, 2  ;;  %v6237_v46 = vpack.c.bf16 %v5900_v62, %v5900_v62 }
  0xc4   : > { %1047 = vrot.lane.b32.xlu1 %v6178_v26, %s5462_s25 }
  0xc5   : > { %v893_v5 = vsel %vm848_vm4, %v890_v40, %v892_v23  ;;  %488 = vst.msk [vmem:[#allocation4 + $0x68] sm:$0xf] %vm461_vm3, %v6237_v46 }
  0xc6   : > { %v724_v43 = vpop.permute.xlu1 %723  ;;  %1057 = vrot.lane.b32.xlu0 %v6186_v51, %s5462_s25  ;;  %v6256_v40 = vpack.c.bf16 %v893_v5, %v893_v5 }
  0xc7   : > { %818 = vst.msk [vmem:[#allocation4 + $0x8] sm:$0xf] %vm815_vm5, %v724_v43  ;;  %v903_v43 = vsel %vm848_vm4, %v900_v59, %v902_v10  ;;  %v6241_v10 = vpack.c.bf16 %v5850_v38, %v5850_v38  ;;  %v6254_v38 = vpack.c.bf16 %v5826_v63, %v5826_v63  ;;  %v912_v63 = vrot.slane %v5942_v44, 2 }
  0xc8   : > { %v732_v36 = vpop.permute.xlu0 %731  ;;  %1061 = vrot.lane.b32.xlu2 %v6192_v53, %s5462_s25  ;;  %v910_v53 = vrot.slane %v5894_v0, 2  ;;  %8504 = vst [vmem:[#allocation42_spill] sm:$0xff] %v6256_v40 }
  0xc9   : > { %822 = vst.msk [vmem:[#allocation4 + $0x18] sm:$0xf] %vm815_vm5, %v732_v36  ;;  %v6233_v36 = vpack.c.bf16 %v903_v43, %v903_v43  ;;  %v906_v43 = vsel %vm848_vm4, %v904_v21, %v905_v45 }
  0xca   : > { %v754_v13 = vpop.permute.xlu2 %753  ;;  %478 = vst.msk [vmem:[#allocation4 + $0x40] sm:$0xf] %vm461_vm3, %v6241_v10  ;;  %v6265_v21 = vpack.c.bf16 %v906_v43, %v906_v43 }
  0xcb   : > { %833 = vst.msk [vmem:[#allocation4 + $0x44] sm:$0xf] %vm815_vm5, %v754_v13  ;;  %v909_v13 = vrot.slane %v5892_v61, 2 }
  0xcc   : > { %1053 = vrot.lane.b32.xlu1 %v6215_v56, %s5462_s25  ;;  %480 = vst.msk [vmem:[#allocation4 + $0x48] sm:$0xf] %vm461_vm3, %v6254_v38 }
  0xce   : > { %v726_v7 = vpop.permute.xlu1 %725  ;;  %1063 = vrot.lane.b32.xlu0 %v6224_v27, %s5462_s25  ;;  %v899_v27 = vrot.slane %v5835_v17, 2  ;;  %v6277_v17 = vpack.c.bf16 %v5928_v47, %v5928_v47 }
  0xcf   : > { %819 = vst.msk [vmem:[#allocation4 + $0xc] sm:$0xf] %vm815_vm5, %v726_v7  ;;  %v911_v7 = vsel %vm848_vm4, %v909_v13, %v910_v53  ;;  %v6281_v13 = vpack.c.bf16 %v5828_v6, %v5828_v6  ;;  %v6294_v6 = vpack.c.bf16 %v5837_v22, %v5837_v22  ;;  %v919_v22 = vrot.slane %v5972_v49, 2 }
  0xd0   : > { %v738_v23 = vpop.permute.xlu0 %737  ;;  %1067 = vrot.lane.b32.xlu2 %v6233_v36, %s5462_s25  ;;  %v6273_v5 = vpack.c.bf16 %v911_v7, %v911_v7  ;;  %v901_v43 = vsel %vm848_vm4, %v899_v27, %v900_v59  ;;  %491 = vst.msk [vmem:[#allocation4 + $0x74] sm:$0xf] %vm461_vm3, %v6277_v17  ;;  %v913_v7 = vsel %vm848_vm4, %v910_v53, %v912_v63 }
  0xd1   : > { %825 = vst.msk [vmem:[#allocation4 + $0x24] sm:$0xf] %vm815_vm5, %v738_v23  ;;  %v915_v23 = vrot.slane %v5902_v16, 2  ;;  %v6296_v59 = vpack.c.bf16 %v901_v43, %v901_v43  ;;  %v6305_v53 = vpack.c.bf16 %v913_v7, %v913_v7  ;;  %v920_v43 = vrot.slane %v5928_v47, 2 }
  0xd2   : > { %v760_v51 = vpop.permute.xlu2 %759  ;;  %8505 = vst [vmem:[#allocation43_spill] sm:$0xff] %v6294_v6  ;;  %v924_v7 = vrot.slane %v5949_v54, 2 }
  0xd3   : > { %836 = vst.msk [vmem:[#allocation4 + $0x50] sm:$0xf] %vm815_vm5, %v760_v51  ;;  %v917_v51 = vrot.slane %v5922_v57, 2  ;;  %v907_v57 = vrot.slane %v5872_v8, 2  ;;  %v6318_v8 = vpack.c.bf16 %v5915_v52, %v5915_v52  ;;  %v921_v47 = vsel %vm848_vm4, %v919_v22, %v920_v43 }
  0xd4   : > { %1059 = vrot.lane.b32.xlu1 %v6256_v40, %s5462_s25  ;;  %481 = vst.msk [vmem:[#allocation4 + $0x4c] sm:$0xf] %vm461_vm3, %v6281_v13  ;;  %v925_v40 = vrot.slane %v5951_v19, 2  ;;  %v6331_v52 = vpack.c.bf16 %v5892_v61, %v5892_v61  ;;  %v927_v61 = vrot.slane %v5997_v30, 2 }
  0xd5   : > { %8506 = vst [vmem:[#allocation44_spill] sm:$0xff] %v6305_v53 }
  0xd6   : > { %v734_v44 = vpop.permute.xlu1 %733  ;;  %1069 = vrot.lane.b32.xlu0 %v6265_v21, %s5462_s25  ;;  %483 = vst.msk [vmem:[#allocation4 + $0x54] sm:$0xf] %vm461_vm3, %v6294_v6  ;;  %v926_v56 = vsel %vm848_vm4, %v924_v7, %v925_v40  ;;  %v928_v30 = vsel %vm848_vm4, %v925_v40, %v927_v61 }
  0xd7   : > { %823 = vst.msk [vmem:[#allocation4 + $0x1c] sm:$0xf] %vm815_vm5, %v734_v44  ;;  %v918_v44 = vsel %vm848_vm4, %v915_v23, %v917_v51  ;;  %v908_v51 = vsel %vm848_vm4, %v905_v45, %v907_v57  ;;  %v6348_v22 = vpack.c.bf16 %v926_v56, %v926_v56  ;;  %v6363_v56 = vpack.c.bf16 %v5902_v16, %v5902_v16 }
  0xd8   : > { %v744_v27 = vpop.permute.xlu0 %743  ;;  %1073 = vrot.lane.b32.xlu2 %v6273_v5, %s5462_s25  ;;  %484 = vst.msk [vmem:[#allocation4 + $0x58] sm:$0xf] %vm461_vm3, %v6318_v8  ;;  %v6333_v45 = vpack.c.bf16 %v908_v51, %v908_v51  ;;  %v6380_v16 = vpack.c.bf16 %v5972_v49, %v5972_v49 }
  0xd9   : > { %828 = vst.msk [vmem:[#allocation4 + $0x30] sm:$0xf] %vm815_vm5, %v744_v27  ;;  %v6314_v27 = vpack.c.bf16 %v918_v44, %v918_v44  ;;  %v914_v44 = vrot.slane %v5900_v62, 2  ;;  %v6352_v62 = vpack.c.bf16 %v5894_v0, %v5894_v0 }
  0xda   : > { %v766_v63 = vpop.permute.xlu2 %765  ;;  %486 = vst.msk [vmem:[#allocation4 + $0x60] sm:$0xf] %vm461_vm3, %v6331_v52 }
  0xdb   : > { %839 = vst.msk [vmem:[#allocation4 + $0x5c] sm:$0xf] %vm815_vm5, %v766_v63  ;;  %v916_v51 = vsel %vm848_vm4, %v914_v44, %v915_v23  ;;  %v922_v23 = vrot.slane %v5930_v28, 2  ;;  %v6390_v28 = vpack.c.bf16 %v5949_v54, %v5949_v54  ;;  %v6404_v54 = vpack.c.bf16 %v5951_v19, %v5951_v19 }
  0xdc   : > { %1065 = vrot.lane.b32.xlu1 %v6296_v59, %s5462_s25  ;;  %487 = vst.msk [vmem:[#allocation4 + $0x64] sm:$0xf] %vm461_vm3, %v6352_v62 }
  0xdd   : > { %489 = vst.msk [vmem:[#allocation4 + $0x6c] sm:$0xf] %vm461_vm3, %v6363_v56  ;;  %v923_v40 = vsel %vm848_vm4, %v920_v43, %v922_v23 }
  0xde   : > { %v740_v63 = vpop.permute.xlu1 %739  ;;  %1075 = vrot.lane.b32.xlu0 %v6305_v53, %s5462_s25  ;;  %v6340_v53 = vpack.c.bf16 %v921_v47, %v921_v47  ;;  %v6365_v47 = vpack.c.bf16 %v916_v51, %v916_v51  ;;  %490 = vst.msk [vmem:[#allocation4 + $0x70] sm:$0xf] %vm461_vm3, %v6380_v16  ;;  %v6392_v61 = vpack.c.bf16 %v923_v40, %v923_v40 }
  0xdf   : > { %826 = vst.msk [vmem:[#allocation4 + $0x28] sm:$0xf] %vm815_vm5, %v740_v63 }
  0xe0   : > { %v750_v57 = vpop.permute.xlu0 %749  ;;  %1079 = vrot.lane.b32.xlu2 %v6314_v27, %s5462_s25  ;;  %492 = vst.msk [vmem:[#allocation4 + $0x78] sm:$0xf] %vm461_vm3, %v6390_v28 }
  0xe1   : > { %831 = vst.msk [vmem:[#allocation4 + $0x3c] sm:$0xf] %vm815_vm5, %v750_v57  ;;  %v6371_v57 = vpack.c.bf16 %v928_v30, %v928_v30 }
  0xe2   : > { %v772_v63 = vpop.permute.xlu2 %771  ;;  %493 = vst.msk [vmem:[#allocation4 + $0x7c] sm:$0xf] %vm461_vm3, %v6404_v54  ;;  %vm2451_vm3 = vcmask 62469  }
  0xe3   : > { %842 = vst.msk [vmem:[#allocation4 + $0x68] sm:$0xf] %vm815_vm5, %v772_v63 }
  0xe4   : > { %1071 = vrot.lane.b32.xlu1 %v6333_v45, %s5462_s25 }
  0xe6   : > { %v746_v7 = vpop.permute.xlu1 %745  ;;  %1081 = vrot.lane.b32.xlu0 %v6340_v53, %s5462_s25 }
  0xe7   : > { %829 = vst.msk [vmem:[#allocation4 + $0x34] sm:$0xf] %vm815_vm5, %v746_v7 }
  0xe8   : > { %v756_v0 = vpop.permute.xlu0 %755  ;;  %1085 = vrot.lane.b32.xlu2 %v6348_v22, %s5462_s25 }
  0xe9   : > { %834 = vst.msk [vmem:[#allocation4 + $0x48] sm:$0xf] %vm815_vm5, %v756_v0 }
  0xea   : > { %v778_v44 = vpop.permute.xlu2 %777 }
  0xeb   : > { %845 = vst.msk [vmem:[#allocation4 + $0x74] sm:$0xf] %vm815_vm5, %v778_v44 }
  0xec   : > { %1077 = vrot.lane.b32.xlu1 %v6365_v47, %s5462_s25 }
  0xee   : > { %v752_v63 = vpop.permute.xlu1 %751  ;;  %1087 = vrot.lane.b32.xlu0 %v6371_v57, %s5462_s25 }
  0xef   : > { %832 = vst.msk [vmem:[#allocation4 + $0x40] sm:$0xf] %vm815_vm5, %v752_v63 }
  0xf0   : > { %v762_v51 = vpop.permute.xlu0 %761  ;;  %1190 = vrot.lane.b32.xlu2 %v6084_v12, %s5463_s26 }
  0xf1   : > { %837 = vst.msk [vmem:[#allocation4 + $0x54] sm:$0xf] %vm815_vm5, %v762_v51 }
  0xf2   : > { %v1026_v49 = vpop.permute.xlu2 %1025 }
  0xf3   : > { %1122 = vst.msk [vmem:[#allocation4] sm:$0xf] %vm1121_vm6, %v1026_v49 }
  0xf4   : > { %1083 = vrot.lane.b32.xlu1 %v6392_v61, %s5462_s25 }
  0xf6   : > { %v758_v43 = vpop.permute.xlu1 %757  ;;  %1192 = vrot.lane.b32.xlu0 %v5965_v41, %s5463_s26 }
  0xf7   : > { %835 = vst.msk [vmem:[#allocation4 + $0x4c] sm:$0xf] %vm815_vm5, %v758_v43 }
  0xf8   : > { %v768_v12 = vpop.permute.xlu0 %767  ;;  %1196 = vrot.lane.b32.xlu2 %v6098_v35, %s5463_s26 }
  0xf9   : > { %840 = vst.msk [vmem:[#allocation4 + $0x60] sm:$0xf] %vm815_vm5, %v768_v12 }
  0xfa   : > { %v1032_v7 = vpop.permute.xlu2 %1031 }
  0xfb   : > { %1125 = vst.msk [vmem:[#allocation4 + $0xc] sm:$0xf] %vm1121_vm6, %v1032_v7 }
  0xfc   : > { %1188 = vrot.lane.b32.xlu1 %v6049_v9, %s5463_s26 }
  0xfe   : > { %v764_v19 = vpop.permute.xlu1 %763  ;;  %1198 = vrot.lane.b32.xlu0 %v6122_v3, %s5463_s26 }
  0xff   : > { %838 = vst.msk [vmem:[#allocation4 + $0x58] sm:$0xf] %vm815_vm5, %v764_v19 }
 0x100   : > { %v774_v30 = vpop.permute.xlu0 %773  ;;  %1202 = vrot.lane.b32.xlu2 %v6137_v42, %s5463_s26 }
 0x101   : > { %843 = vst.msk [vmem:[#allocation4 + $0x6c] sm:$0xf] %vm815_vm5, %v774_v30  ;;  %v334_v30 = vld [vmem:[%s5595_s24 + $0xf0] sm:$0xff] }
 0x102   : > { %v1038_v0 = vpop.permute.xlu2 %1037  ;;  %373 = vst.msk [vmem:[#allocation2 + $0x181] sm:$0xff] %vm226_vm0, %v334_v30 }
 0x103   : > { %1128 = vst.msk [vmem:[#allocation4 + $0x18] sm:$0xf] %vm1121_vm6, %v1038_v0  ;;  %v335_v0 = vld [vmem:[%s5595_s24 + $0xf8] sm:$0xff] }
 0x104   : > { %1194 = vrot.lane.b32.xlu1 %v5990_v55, %s5463_s26  ;;  %374 = vst.msk [vmem:[#allocation2 + $0x189] sm:$0xff] %vm226_vm0, %v335_v0  ;;  %vm2417_vm0 = vcmask 58369  }
 0x106   : > { %v770_v23 = vpop.permute.xlu1 %769  ;;  %1204 = vrot.lane.b32.xlu0 %v6162_v58, %s5463_s26 }
 0x107   : > { %841 = vst.msk [vmem:[#allocation4 + $0x64] sm:$0xf] %vm815_vm5, %v770_v23 }
 0x108   : > { %v780_v9 = vpop.permute.xlu0 %779  ;;  %1208 = vrot.lane.b32.xlu2 %v6176_v29, %s5463_s26 }
 0x109   : > { %846 = vst.msk [vmem:[#allocation4 + $0x78] sm:$0xf] %vm815_vm5, %v780_v9 }
 0x10a   : > { %v1044_v44 = vpop.permute.xlu2 %1043 }
 0x10b   : > { %1131 = vst.msk [vmem:[#allocation4 + $0x24] sm:$0xf] %vm1121_vm6, %v1044_v44 }
 0x10c   : > { %1200 = vrot.lane.b32.xlu1 %v6016_v24, %s5463_s26 }
 0x10e   : > { %v776_v40 = vpop.permute.xlu1 %775  ;;  %1210 = vrot.lane.b32.xlu0 %v6200_v33, %s5463_s26 }
 0x10f   : > { %844 = vst.msk [vmem:[#allocation4 + $0x70] sm:$0xf] %vm815_vm5, %v776_v40 }
 0x110   : > { %v1028_v63 = vpop.permute.xlu0 %1027  ;;  %1214 = vrot.lane.b32.xlu2 %v6213_v15, %s5463_s26 }
 0x111   : > { %1123 = vst.msk [vmem:[#allocation4 + $0x4] sm:$0xf] %vm1121_vm6, %v1028_v63 }
 0x112   : > { %v1050_v51 = vpop.permute.xlu2 %1049 }
 0x113   : > { %1134 = vst.msk [vmem:[#allocation4 + $0x30] sm:$0xf] %vm1121_vm6, %v1050_v51 }
 0x114   : > { %1206 = vrot.lane.b32.xlu1 %v6045_v18, %s5463_s26 }
 0x116   : > { %v782_v49 = vpop.permute.xlu1 %781  ;;  %1216 = vrot.lane.b32.xlu0 %v6241_v10, %s5463_s26 }
 0x117   : > { %847 = vst.msk [vmem:[#allocation4 + $0x7c] sm:$0xf] %vm815_vm5, %v782_v49  ;;  %vm2580_vm5 = vcmask 64519  }
 0x118   : > { %v1034_v43 = vpop.permute.xlu0 %1033  ;;  %1220 = vrot.lane.b32.xlu2 %v6254_v38, %s5463_s26 }
 0x119   : > { %1126 = vst.msk [vmem:[#allocation4 + $0x10] sm:$0xf] %vm1121_vm6, %v1034_v43 }
 0x11a   : > { %v1056_v12 = vpop.permute.xlu2 %1055 }
 0x11b   : > { %1137 = vst.msk [vmem:[#allocation4 + $0x3c] sm:$0xf] %vm1121_vm6, %v1056_v12 }
 0x11c   : > { %1212 = vrot.lane.b32.xlu1 %v6080_v37, %s5463_s26 }
 0x11e   : > { %v1030_v7 = vpop.permute.xlu1 %1029  ;;  %1222 = vrot.lane.b32.xlu0 %v6281_v13, %s5463_s26 }
 0x11f   : > { %1124 = vst.msk [vmem:[#allocation4 + $0x8] sm:$0xf] %vm1121_vm6, %v1030_v7  ;;  %v424_v7 = vld [vmem:[#allocation2 + $0x188] sm:$0xff] }
 0x120   : > { %v1040_v19 = vpop.permute.xlu0 %1039  ;;  %1226 = vrot.lane.b32.xlu2 %v6294_v6, %s5463_s26  ;;  %v6493_v30 = vpack.c.bf16 %v424_v7, %v424_v7 }
 0x121   : > { %1129 = vst.msk [vmem:[#allocation4 + $0x1c] sm:$0xf] %vm1121_vm6, %v1040_v19 }
 0x122   : > { %v1062_v23 = vpop.permute.xlu2 %1061  ;;  %8507 = vst [vmem:[#allocation45_spill] sm:$0xff] %v6493_v30 }
 0x123   : > { %1140 = vst.msk [vmem:[#allocation4 + $0x48] sm:$0xf] %vm1121_vm6, %v1062_v23 }
 0x124   : > { %1218 = vrot.lane.b32.xlu1 %v6118_v48, %s5463_s26 }
 0x126   : > { %v1036_v9 = vpop.permute.xlu1 %1035  ;;  %1228 = vrot.lane.b32.xlu0 %v6318_v8, %s5463_s26 }
 0x127   : > { %1127 = vst.msk [vmem:[#allocation4 + $0x14] sm:$0xf] %vm1121_vm6, %v1036_v9 }
 0x128   : > { %v1046_v44 = vpop.permute.xlu0 %1045  ;;  %1232 = vrot.lane.b32.xlu2 %v6331_v52, %s5463_s26 }
 0x129   : > { %1132 = vst.msk [vmem:[#allocation4 + $0x28] sm:$0xf] %vm1121_vm6, %v1046_v44  ;;  %v423_v44 = vld [vmem:[#allocation2 + $0x180] sm:$0xff] }
 0x12a   : > { %v1068_v40 = vpop.permute.xlu2 %1067 }
 0x12b   : > { %1143 = vst.msk [vmem:[#allocation4 + $0x54] sm:$0xf] %vm1121_vm6, %v1068_v40 }
 0x12c   : > { %1224 = vrot.lane.b32.xlu1 %v6158_v60, %s5463_s26 }
 0x12e   : > { %v1042_v63 = vpop.permute.xlu1 %1041  ;;  %1234 = vrot.lane.b32.xlu0 %v6352_v62, %s5463_s26 }
 0x12f   : > { %1130 = vst.msk [vmem:[#allocation4 + $0x20] sm:$0xf] %vm1121_vm6, %v1042_v63  ;;  %v6507_v63 = vpack.c.bf16 %v423_v44, %v423_v44  ;;  %v8513_v44 = vld [vmem:[#allocation10_spill] sm:$0xff] }
 0x130   : > { %v1052_v51 = vpop.permute.xlu0 %1051  ;;  %1238 = vrot.lane.b32.xlu2 %v6363_v56, %s5463_s26 }
 0x131   : > { %1135 = vst.msk [vmem:[#allocation4 + $0x34] sm:$0xf] %vm1121_vm6, %v1052_v51 }
 0x132   : > { %v1074_v49 = vpop.permute.xlu2 %1073  ;;  %8508 = vst [vmem:[#allocation46_spill] sm:$0xff] %v6507_v63 }
 0x133   : > { %1146 = vst.msk [vmem:[#allocation4 + $0x60] sm:$0xf] %vm1121_vm6, %v1074_v49  ;;  %v8509_v49 = vld [vmem:[#allocation7_spill] sm:$0xff] }
 0x134   : > { %1230 = vrot.lane.b32.xlu1 %v6196_v20, %s5463_s26 }
 0x136   : > { %v1048_v43 = vpop.permute.xlu1 %1047  ;;  %1240 = vrot.lane.b32.xlu0 %v6380_v16, %s5463_s26 }
 0x137   : > { %1133 = vst.msk [vmem:[#allocation4 + $0x2c] sm:$0xf] %vm1121_vm6, %v1048_v43 }
 0x138   : > { %v1058_v12 = vpop.permute.xlu0 %1057  ;;  %1244 = vrot.lane.b32.xlu2 %v6390_v28, %s5463_s26 }
 0x139   : > { %1138 = vst.msk [vmem:[#allocation4 + $0x40] sm:$0xf] %vm1121_vm6, %v1058_v12 }
 0x13a   : > { %v1080_v19 = vpop.permute.xlu2 %1079 }
 0x13b   : > { %1149 = vst.msk [vmem:[#allocation4 + $0x6c] sm:$0xf] %vm1121_vm6, %v1080_v19  ;;  %v8511_v19 = vld [vmem:[#allocation14_spill] sm:$0xff] }
 0x13c   : > { %1236 = vrot.lane.b32.xlu1 %v6237_v46, %s5463_s26 }
 0x13e   : > { %v1054_v0 = vpop.permute.xlu1 %1053  ;;  %1246 = vrot.lane.b32.xlu0 %v6404_v54, %s5463_s26 }
 0x13f   : > { %1136 = vst.msk [vmem:[#allocation4 + $0x38] sm:$0xf] %vm1121_vm6, %v1054_v0 }
 0x140   : > { %v1064_v23 = vpop.permute.xlu0 %1063  ;;  %1250 = vrot.lane.b32.xlu2 %v6493_v30, %s5463_s26 }
 0x141   : > { %1141 = vst.msk [vmem:[#allocation4 + $0x4c] sm:$0xf] %vm1121_vm6, %v1064_v23  ;;  %v8512_v23 = vld [vmem:[#allocation11_spill] sm:$0xff] }
 0x142   : > { %v1086_v9 = vpop.permute.xlu2 %1085 }
 0x143   : > { %1152 = vst.msk [vmem:[#allocation4 + $0x78] sm:$0xf] %vm1121_vm6, %v1086_v9 }
 0x144   : > { %1242 = vrot.lane.b32.xlu1 %v6277_v17, %s5463_s26 }
 0x146   : > { %v1060_v40 = vpop.permute.xlu1 %1059  ;;  %1331 = vrot.lane.b32.xlu0 %v5716_v50, %s5464_s27  ;;  %v8510_v50 = vld [vmem:[#allocation8_spill] sm:$0xff] }
 0x147   : > { %1139 = vst.msk [vmem:[#allocation4 + $0x44] sm:$0xf] %vm1121_vm6, %v1060_v40 }
 0x148   : > { %v1070_v51 = vpop.permute.xlu0 %1069  ;;  %1335 = vrot.lane.b32.xlu2 %v8509_v49, %s5464_s27 }
 0x149   : > { %1144 = vst.msk [vmem:[#allocation4 + $0x58] sm:$0xf] %vm1121_vm6, %v1070_v51  ;;  %v8514_v51 = vld [vmem:[#allocation17_spill] sm:$0xff] }
 0x14a   : > { %v1191_v43 = vpop.permute.xlu2 %1190 }
 0x14b   : > { %1286 = vst.msk [vmem:[#allocation4 + $0x4] sm:$0xf] %vm1284_vm7, %v1191_v43 }
 0x14c   : > { %1248 = vrot.lane.b32.xlu1 %v6507_v63, %s5463_s26  ;;  %v8519_v63 = vld [vmem:[#allocation16_spill] sm:$0xff] }
 0x14e   : > { %v1066_v12 = vpop.permute.xlu1 %1065  ;;  %1337 = vrot.lane.b32.xlu0 %v8510_v50, %s5464_s27 }
 0x14f   : > { %1142 = vst.msk [vmem:[#allocation4 + $0x50] sm:$0xf] %vm1121_vm6, %v1066_v12  ;;  %v8515_v12 = vld [vmem:[#allocation9_spill] sm:$0xff] }
 0x150   : > { %v1076_v7 = vpop.permute.xlu0 %1075  ;;  %1341 = vrot.lane.b32.xlu2 %v8511_v19, %s5464_s27 }
 0x151   : > { %1147 = vst.msk [vmem:[#allocation4 + $0x64] sm:$0xf] %vm1121_vm6, %v1076_v7 }
 0x152   : > { %v1197_v0 = vpop.permute.xlu2 %1196 }
 0x153   : > { %1289 = vst.msk [vmem:[#allocation4 + $0x10] sm:$0xf] %vm1284_vm7, %v1197_v0  ;;  %v8516_v0 = vld [vmem:[#allocation13_spill] sm:$0xff] }
 0x154   : > { %1333 = vrot.lane.b32.xlu1 %v8512_v23, %s5464_s27 }
 0x156   : > { %v1072_v9 = vpop.permute.xlu1 %1071  ;;  %1343 = vrot.lane.b32.xlu0 %v8513_v44, %s5464_s27 }
 0x157   : > { %1145 = vst.msk [vmem:[#allocation4 + $0x5c] sm:$0xf] %vm1121_vm6, %v1072_v9  ;;  %v8517_v9 = vld [vmem:[#allocation20_spill] sm:$0xff] }
 0x158   : > { %v1082_v40 = vpop.permute.xlu0 %1081  ;;  %1347 = vrot.lane.b32.xlu2 %v8514_v51, %s5464_s27 }
 0x159   : > { %1150 = vst.msk [vmem:[#allocation4 + $0x70] sm:$0xf] %vm1121_vm6, %v1082_v40  ;;  %v8518_v40 = vld [vmem:[#allocation12_spill] sm:$0xff] }
 0x15a   : > { %v1203_v43 = vpop.permute.xlu2 %1202 }
 0x15b   : > { %1292 = vst.msk [vmem:[#allocation4 + $0x1c] sm:$0xf] %vm1284_vm7, %v1203_v43 }
 0x15c   : > { %1339 = vrot.lane.b32.xlu1 %v8515_v12, %s5464_s27 }
 0x15e   : > { %v1078_v7 = vpop.permute.xlu1 %1077  ;;  %1349 = vrot.lane.b32.xlu0 %v8516_v0, %s5464_s27 }
 0x15f   : > { %1148 = vst.msk [vmem:[#allocation4 + $0x68] sm:$0xf] %vm1121_vm6, %v1078_v7 }
 0x160   : > { %v1088_v23 = vpop.permute.xlu0 %1087  ;;  %1353 = vrot.lane.b32.xlu2 %v8517_v9, %s5464_s27 }
 0x161   : > { %1153 = vst.msk [vmem:[#allocation4 + $0x7c] sm:$0xf] %vm1121_vm6, %v1088_v23 }
 0x162   : > { %v1209_v30 = vpop.permute.xlu2 %1208 }
 0x163   : > { %1295 = vst.msk [vmem:[#allocation4 + $0x28] sm:$0xf] %vm1284_vm7, %v1209_v30  ;;  %v8520_v30 = vld [vmem:[#allocation15_spill] sm:$0xff] }
 0x164   : > { %1345 = vrot.lane.b32.xlu1 %v8518_v40, %s5464_s27 }
 0x166   : > { %v1084_v43 = vpop.permute.xlu1 %1083  ;;  %1355 = vrot.lane.b32.xlu0 %v8519_v63, %s5464_s27 }
 0x167   : > { %1151 = vst.msk [vmem:[#allocation4 + $0x74] sm:$0xf] %vm1121_vm6, %v1084_v43  ;;  %vm282_vm6 = vcmask 64512  }
 0x168   : > { %v1193_v6 = vpop.permute.xlu0 %1192  ;;  %1473 = vrot.lane.b32.xlu2 %v6011_v4, %s5465_s28 }
 0x169   : > { %1287 = vst.msk [vmem:[#allocation4 + $0x8] sm:$0xf] %vm1284_vm7, %v1193_v6 }
 0x16a   : > { %v1215_v7 = vpop.permute.xlu2 %1214 }
 0x16b   : > { %1298 = vst.msk [vmem:[#allocation4 + $0x34] sm:$0xf] %vm1284_vm7, %v1215_v7 }
 0x16c   : > { %1351 = vrot.lane.b32.xlu1 %v8520_v30, %s5464_s27 }
 0x16e   : > { %v1189_v23 = vpop.permute.xlu1 %1188  ;;  %1604 = vrot.lane.b32.xlu0 %v5965_v41, %s5466_s29 }
 0x16f   : > { %1285 = vst.msk [vmem:[#allocation4] sm:$0xf] %vm1284_vm7, %v1189_v23 }
 0x170   : > { %v1199_v43 = vpop.permute.xlu0 %1198  ;;  %1747 = vrot.lane.b32.xlu2 %v8509_v49, %s5467_s30 }
 0x171   : > { %1290 = vst.msk [vmem:[#allocation4 + $0x14] sm:$0xf] %vm1284_vm7, %v1199_v43 }
 0x172   : > { %v1221_v4 = vpop.permute.xlu2 %1220 }
 0x173   : > { %1301 = vst.msk [vmem:[#allocation4 + $0x40] sm:$0xf] %vm1284_vm7, %v1221_v4 }
 0x174   : > { %1471 = vrot.lane.b32.xlu1 %v6063_v11, %s5465_s28 }
 0x176   : > { %v1195_v6 = vpop.permute.xlu1 %1194  ;;  %1749 = vrot.lane.b32.xlu0 %v8510_v50, %s5467_s30 }
 0x177   : > { %1288 = vst.msk [vmem:[#allocation4 + $0xc] sm:$0xf] %vm1284_vm7, %v1195_v6 }
 0x178   : > { %v1205_v41 = vpop.permute.xlu0 %1204  ;;  %1889 = vrot.lane.b32.xlu2 %v6100_v34, %s5468_s6 }
 0x179   : > { %1293 = vst.msk [vmem:[#allocation4 + $0x20] sm:$0xf] %vm1284_vm7, %v1205_v41 }
 0x17a   : > { %v1227_v49 = vpop.permute.xlu2 %1226 }
 0x17b   : > { %1304 = vst.msk [vmem:[#allocation4 + $0x4c] sm:$0xf] %vm1284_vm7, %v1227_v49 }
 0x17c   : > { %1606 = vrot.lane.b32.xlu1 %v5990_v55, %s5466_s29 }
 0x17e   : > { %v1201_v11 = vpop.permute.xlu1 %1200  ;;  %1475 = vrot.lane.b32.xlu0 %v6035_v39, %s5465_s28 }
 0x17f   : > { %1291 = vst.msk [vmem:[#allocation4 + $0x18] sm:$0xf] %vm1284_vm7, %v1201_v11 }
 0x180   : > { %v1211_v50 = vpop.permute.xlu0 %1210  ;;  %1608 = vrot.lane.b32.xlu2 %v6098_v35, %s5466_s29 }
 0x181   : > { %1296 = vst.msk [vmem:[#allocation4 + $0x2c] sm:$0xf] %vm1284_vm7, %v1211_v50 }
 0x182   : > { %v1233_v7 = vpop.permute.xlu2 %1232 }
 0x183   : > { %1307 = vst.msk [vmem:[#allocation4 + $0x58] sm:$0xf] %vm1284_vm7, %v1233_v7 }
 0x184   : > { %1887 = vrot.lane.b32.xlu1 %v6035_v39, %s5468_s6 }
 0x186   : > { %v1207_v23 = vpop.permute.xlu1 %1206  ;;  %1610 = vrot.lane.b32.xlu0 %v6122_v3, %s5466_s29 }
 0x187   : > { %1294 = vst.msk [vmem:[#allocation4 + $0x24] sm:$0xf] %vm1284_vm7, %v1207_v23  ;;  %v8522_v23 = vld [vmem:[#allocation24_spill] sm:$0xff] }
 0x188   : > { %v1217_v55 = vpop.permute.xlu0 %1216  ;;  %1753 = vrot.lane.b32.xlu2 %v8511_v19, %s5467_s30 }
 0x189   : > { %1299 = vst.msk [vmem:[#allocation4 + $0x38] sm:$0xf] %vm1284_vm7, %v1217_v55 }
 0x18a   : > { %v1239_v35 = vpop.permute.xlu2 %1238 }
 0x18b   : > { %1310 = vst.msk [vmem:[#allocation4 + $0x64] sm:$0xf] %vm1284_vm7, %v1239_v35  ;;  %v8523_v35 = vld [vmem:[#allocation29_spill] sm:$0xff] }
 0x18c   : > { %1477 = vrot.lane.b32.xlu1 %v6100_v34, %s5465_s28 }
 0x18e   : > { %v1213_v43 = vpop.permute.xlu1 %1212  ;;  %1891 = vrot.lane.b32.xlu0 %v6040_v31, %s5468_s6 }
 0x18f   : > { %1297 = vst.msk [vmem:[#allocation4 + $0x30] sm:$0xf] %vm1284_vm7, %v1213_v43  ;;  %v340_v43 = vld [vmem:[%s8383_s1 + $0x10] sm:$0x3] }
 0x190   : > { %v1223_v39 = vpop.permute.xlu0 %1222  ;;  %1479 = vrot.lane.b32.xlu2 %v6040_v31, %s5465_s28 }
 0x191   : > { %1302 = vst.msk [vmem:[#allocation4 + $0x44] sm:$0xf] %vm1284_vm7, %v1223_v39 }
 0x192   : > { %v1245_v3 = vpop.permute.xlu2 %1244 }
 0x193   : > { %1313 = vst.msk [vmem:[#allocation4 + $0x70] sm:$0xf] %vm1284_vm7, %v1245_v3 }
 0x194   : > { %1751 = vrot.lane.b32.xlu1 %v8515_v12, %s5467_s30 }
 0x196   : > { %v1219_v19 = vpop.permute.xlu1 %1218  ;;  %1481 = vrot.lane.b32.xlu0 %v6070_v1, %s5465_s28 }
 0x197   : > { %1300 = vst.msk [vmem:[#allocation4 + $0x3c] sm:$0xf] %vm1284_vm7, %v1219_v19 }
 0x198   : > { %v1229_v34 = vpop.permute.xlu0 %1228  ;;  %1614 = vrot.lane.b32.xlu2 %v6137_v42, %s5466_s29 }
 0x199   : > { %1305 = vst.msk [vmem:[#allocation4 + $0x50] sm:$0xf] %vm1284_vm7, %v1229_v34 }
 0x19a   : > { %v1251_v31 = vpop.permute.xlu2 %1250 }
 0x19b   : > { %1316 = vst.msk [vmem:[#allocation4 + $0x7c] sm:$0xf] %vm1284_vm7, %v1251_v31 }
 0x19c   : > { %1893 = vrot.lane.b32.xlu1 %v6070_v1, %s5468_s6 }
 0x19e   : > { %v1225_v4 = vpop.permute.xlu1 %1224  ;;  %1755 = vrot.lane.b32.xlu0 %v8513_v44, %s5467_s30 }
 0x19f   : > { %1303 = vst.msk [vmem:[#allocation4 + $0x48] sm:$0xf] %vm1284_vm7, %v1225_v4  ;;  %v5365_v4 = vld [vmem:[%s8383_s1 + $0x8] sm:$0xff] }
 0x1a0   : > { %v1235_v12 = vpop.permute.xlu0 %1234  ;;  %1895 = vrot.lane.b32.xlu2 %v6139_v14, %s5468_s6 }
 0x1a1   : > { %1308 = vst.msk [vmem:[#allocation4 + $0x5c] sm:$0xf] %vm1284_vm7, %v1235_v12 }
 0x1a2   : > { %v1336_v42 = vpop.permute.xlu2 %1335 }
 0x1a3   : > { %1430 = vst.msk [vmem:[#allocation4 + $0x8] sm:$0xf] %vm1427_vm8, %v1336_v42  ;;  %v5364_v42 = vld [vmem:[%s8383_s1] sm:$0xff] }
 0x1a4   : > { %1612 = vrot.lane.b32.xlu1 %v6016_v24, %s5466_s29 }
 0x1a6   : > { %v1231_v1 = vpop.permute.xlu1 %1230  ;;  %1897 = vrot.lane.b32.xlu0 %v6076_v2, %s5468_s6 }
 0x1a7   : > { %1306 = vst.msk [vmem:[#allocation4 + $0x54] sm:$0xf] %vm1284_vm7, %v1231_v1  ;;  %v8524_v1 = vld [vmem:[#allocation25_spill] sm:$0xff] }
 0x1a8   : > { %v1241_v44 = vpop.permute.xlu0 %1240  ;;  %1485 = vrot.lane.b32.xlu2 %v6076_v2, %s5465_s28 }
 0x1a9   : > { %1311 = vst.msk [vmem:[#allocation4 + $0x68] sm:$0xf] %vm1284_vm7, %v1241_v44 }
 0x1aa   : > { %v1342_v6 = vpop.permute.xlu2 %1341 }
 0x1ab   : > { %1433 = vst.msk [vmem:[#allocation4 + $0x14] sm:$0xf] %vm1427_vm8, %v1342_v6 }
 0x1ac   : > { %1757 = vrot.lane.b32.xlu1 %v8518_v40, %s5467_s30 }
 0x1ae   : > { %v1237_v41 = vpop.permute.xlu1 %1236  ;;  %1616 = vrot.lane.b32.xlu0 %v6162_v58, %s5466_s29 }
 0x1af   : > { %1309 = vst.msk [vmem:[#allocation4 + $0x60] sm:$0xf] %vm1284_vm7, %v1237_v41 }
 0x1b0   : > { %v1247_v24 = vpop.permute.xlu0 %1246  ;;  %1759 = vrot.lane.b32.xlu2 %v8514_v51, %s5467_s30 }
 0x1b1   : > { %1314 = vst.msk [vmem:[#allocation4 + $0x74] sm:$0xf] %vm1284_vm7, %v1247_v24 }
 0x1b2   : > { %v1348_v2 = vpop.permute.xlu2 %1347 }
 0x1b3   : > { %1436 = vst.msk [vmem:[#allocation4 + $0x20] sm:$0xf] %vm1427_vm8, %v1348_v2 }
 0x1b4   : > { %1483 = vrot.lane.b32.xlu1 %v6139_v14, %s5465_s28  ;;  %v8521_v14 = vld [vmem:[#allocation22_spill] sm:$0xff] }
 0x1b6   : > { %v1243_v49 = vpop.permute.xlu1 %1242  ;;  %1761 = vrot.lane.b32.xlu0 %v8516_v0, %s5467_s30 }
 0x1b7   : > { %1312 = vst.msk [vmem:[#allocation4 + $0x6c] sm:$0xf] %vm1284_vm7, %v1243_v49 }
 0x1b8   : > { %v1332_v58 = vpop.permute.xlu0 %1331  ;;  %1901 = vrot.lane.b32.xlu2 %v6178_v26, %s5468_s6 }
 0x1b9   : > { %1428 = vst.msk [vmem:[#allocation4] sm:$0xf] %vm1427_vm8, %v1332_v58 }
 0x1ba   : > { %v1354_v51 = vpop.permute.xlu2 %1353 }
 0x1bb   : > { %1439 = vst.msk [vmem:[#allocation4 + $0x2c] sm:$0xf] %vm1427_vm8, %v1354_v51 }
 0x1bc   : > { %1618 = vrot.lane.b32.xlu1 %v6045_v18, %s5466_s29 }
 0x1be   : > { %v1249_v40 = vpop.permute.xlu1 %1248  ;;  %1367 = vrot.lane.b32.xlu0 %v8521_v14, %s5464_s27 }
 0x1bf   : > { %1315 = vst.msk [vmem:[#allocation4 + $0x78] sm:$0xf] %vm1284_vm7, %v1249_v40  ;;  %v8526_v40 = vld [vmem:[#allocation27_spill] sm:$0xff]  ;;  %vm284_vm7 = vcmask 58368  }
 0x1c0   : > { %v1338_v0 = vpop.permute.xlu0 %1337  ;;  %1507 = vrot.lane.b32.xlu2 %v6296_v59, %s5465_s28 }
 0x1c1   : > { %1431 = vst.msk [vmem:[#allocation4 + $0xc] sm:$0xf] %vm1427_vm8, %v1338_v0 }
 0x1c2   : > { %v1474_v11 = vpop.permute.xlu2 %1473 }
 0x1c4   : > { %1899 = vrot.lane.b32.xlu1 %v6108_v25, %s5468_s6 }
 0x1c6   : > { %v1334_v50 = vpop.permute.xlu1 %1333  ;;  %1509 = vrot.lane.b32.xlu0 %v6233_v36, %s5465_s28 }
 0x1c7   : > { %1429 = vst.msk [vmem:[#allocation4 + $0x4] sm:$0xf] %vm1427_vm8, %v1334_v50 }
 0x1c8   : > { %1569 = vst.msk [vmem:[#allocation4 + $0x4] sm:$0xf] %vm1567_vm9, %v1474_v11  ;;  %v1344_v18 = vpop.permute.xlu0 %1343  ;;  %1642 = vrot.lane.b32.xlu2 %v6196_v20, %s5466_s29  ;;  %v2140_v20 = vunpack.c.l.b16 %v340_v43  ;;  %v8527_v11 = vld [vmem:[#allocation44_spill] sm:$0xff] }
 0x1c9   : > { %1434 = vst.msk [vmem:[#allocation4 + $0x18] sm:$0xf] %vm1427_vm8, %v1344_v18 }
 0x1ca   : > { %v1748_v7 = vpop.permute.xlu2 %1747  ;;  %v2143_v19 = vpack.c.b16 %v2140_v20, %v2140_v20  ;;  %v8530_v20 = vld [vmem:[#allocation37_spill] sm:$0xff] }
 0x1cc   : > { %1369 = vrot.lane.b32.xlu1 %v8522_v23, %s5464_s27  ;;  %v2197_v34 = vsel %vm2195_vm10, %v2143_v19, 0  ;;  %vm2763_vm10 = vcmask 60416  }
 0x1cd   : > { %2204 = vmatpush.bf16.msra.mxu0 %v2197_v34  ;;  %5414 = vmatpush.bf16.msra.mxu2 %v2197_v34 }
 0x1ce   : > { %v1340_v55 = vpop.permute.xlu1 %1339  ;;  %1783 = vrot.lane.b32.xlu0 %v8523_v35, %s5467_s30 }
 0x1cf   : > { %1432 = vst.msk [vmem:[#allocation4 + $0x10] sm:$0xf] %vm1427_vm8, %v1340_v55 }
 0x1d0   : > { %v1350_v39 = vpop.permute.xlu0 %1349  ;;  %1923 = vrot.lane.b32.xlu2 %v6265_v21, %s5468_s6 }
 0x1d1   : > { %1437 = vst.msk [vmem:[#allocation4 + $0x24] sm:$0xf] %vm1427_vm8, %v1350_v39  ;;  %2205 = vmatpush.bf16.msra.mxu0 %v5365_v4  ;;  %5415 = vmatpush.bf16.msra.mxu2 %v5365_v4  ;;  %v8529_v39 = vld [vmem:[#allocation18_spill] sm:$0xff] }
 0x1d2   : > { %v1890_v3 = vpop.permute.xlu2 %1889 }
 0x1d4   : > { %1640 = vrot.lane.b32.xlu1 %v6318_v8, %s5466_s29 }
 0x1d5   : > { %2206 = vmatpush.bf16.msra.mxu0 %v5364_v42  ;;  %5416 = vmatpush.bf16.msra.mxu2 %v5364_v42  ;;  %v8532_v42 = vld [vmem:[#allocation28_spill] sm:$0xff] }
 0x1d6   : > { %v1346_v31 = vpop.permute.xlu1 %1345  ;;  %1925 = vrot.lane.b32.xlu0 %v6333_v45, %s5468_s6 }
 0x1d7   : > { %1435 = vst.msk [vmem:[#allocation4 + $0x1c] sm:$0xf] %vm1427_vm8, %v1346_v31  ;;  %v8531_v31 = vld [vmem:[#allocation40_spill] sm:$0xff] }
 0x1d8   : > { %v1356_v12 = vpop.permute.xlu0 %1355  ;;  %1489 = vrot.lane.b32.xlu2 %v6178_v26, %s5465_s28 }
 0x1d9   : > { %1440 = vst.msk [vmem:[#allocation4 + $0x30] sm:$0xf] %vm1427_vm8, %v1356_v12 }
 0x1da   : > { %v1609_v8 = vpop.permute.xlu2 %1608 }
 0x1dc   : > { %1785 = vrot.lane.b32.xlu1 %v8524_v1, %s5467_s30 }
 0x1de   : > { %v1352_v44 = vpop.permute.xlu1 %1351  ;;  %1620 = vrot.lane.b32.xlu0 %v6176_v29, %s5466_s29 }
 0x1df   : > { %1438 = vst.msk [vmem:[#allocation4 + $0x28] sm:$0xf] %vm1427_vm8, %v1352_v44 }
 0x1e0   : > { %v1605_v26 = vpop.permute.xlu0 %1604  ;;  %1763 = vrot.lane.b32.xlu2 %v8520_v30, %s5467_s30 }
 0x1e2   : > { %v1754_v6 = vpop.permute.xlu2 %1753 }
 0x1e4   : > { %1487 = vrot.lane.b32.xlu1 %v6108_v25, %s5465_s28 }
 0x1e6   : > { %v1472_v41 = vpop.permute.xlu1 %1471  ;;  %1765 = vrot.lane.b32.xlu0 %v8517_v9, %s5467_s30 }
 0x1e7   : > { %1568 = vst.msk [vmem:[#allocation4] sm:$0xf] %vm1567_vm9, %v1472_v41  ;;  %v8533_v41 = vld [vmem:[#allocation30_spill] sm:$0xff] }
 0x1e8   : > { %1701 = vst.msk [vmem:[#allocation4] sm:$0xf] %vm1700_vm11, %v1605_v26  ;;  %v1750_v29 = vpop.permute.xlu0 %1749  ;;  %1905 = vrot.lane.b32.xlu2 %v6147_v32, %s5468_s6 }
 0x1e9   : > { %1844 = vst.msk [vmem:[#allocation4] sm:$0xf] %vm1843_vm12, %v1748_v7  ;;  %v8528_v7 = vld [vmem:[#allocation32_spill] sm:$0xff] }
 0x1ea   : > { %v1480_v30 = vpop.permute.xlu2 %1479 }
 0x1eb   : > { %1572 = vst.msk [vmem:[#allocation4 + $0x10] sm:$0xf] %vm1567_vm9, %v1480_v30 }
 0x1ec   : > { %1622 = vrot.lane.b32.xlu1 %v6200_v33, %s5466_s29  ;;  %v8525_v33 = vld [vmem:[#allocation36_spill] sm:$0xff] }
 0x1ee   : > { %v1607_v25 = vpop.permute.xlu1 %1606  ;;  %1371 = vrot.lane.b32.xlu0 %v8523_v35, %s5464_s27 }
 0x1ef   : > { %1702 = vst.msk [vmem:[#allocation4 + $0x4] sm:$0xf] %vm1700_vm11, %v1607_v25 }
 0x1f0   : > { %1845 = vst.msk [vmem:[#allocation4 + $0x4] sm:$0xf] %vm1843_vm12, %v1750_v29  ;;  %v1476_v9 = vpop.permute.xlu0 %1475  ;;  %1511 = vrot.lane.b32.xlu2 %v6265_v21, %s5465_s28 }
 0x1f1   : > { %1985 = vst.msk [vmem:[#allocation4 + $0x4] sm:$0xf] %vm1983_vm13, %v1890_v3 }
 0x1f2   : > { %1570 = vst.msk [vmem:[#allocation4 + $0x8] sm:$0xf] %vm1567_vm9, %v1476_v9  ;;  %v1615_v24 = vpop.permute.xlu2 %1614 }
 0x1f3   : > { %1703 = vst.msk [vmem:[#allocation4 + $0x8] sm:$0xf] %vm1700_vm11, %v1609_v8 }
 0x1f4   : > { %1903 = vrot.lane.b32.xlu1 %v8525_v33, %s5468_s6 }
 0x1f6   : > { %v1888_v2 = vpop.permute.xlu1 %1887  ;;  %1513 = vrot.lane.b32.xlu0 %v6333_v45, %s5465_s28 }
 0x1f7   : > { %1984 = vst.msk [vmem:[#allocation4] sm:$0xf] %vm1983_vm13, %v1888_v2  ;;  %v8535_v2 = vld [vmem:[#allocation38_spill] sm:$0xff] }
 0x1f8   : > { %v1611_v49 = vpop.permute.xlu0 %1610  ;;  %1646 = vrot.lane.b32.xlu2 %v6352_v62, %s5466_s29 }
 0x1fa   : > { %v1896_v21 = vpop.permute.xlu2 %1895 }
 0x1fc   : > { %1373 = vrot.lane.b32.xlu1 %v8524_v1, %s5464_s27 }
 0x1fe   : > { %v1478_v58 = vpop.permute.xlu1 %1477  ;;  %v5366_v51 = vld [vmem:[#allocation4] sm:$0xff]  ;;  %1787 = vrot.lane.b32.xlu0 %v8526_v40, %s5467_s30 }
 0x1ff   : > { %1571 = vst.msk [vmem:[#allocation4 + $0xc] sm:$0xf] %vm1567_vm9, %v1478_v58  ;;  %5170 = vmatmul.msk.bf16.vlgmr.msra.gmra.mxu0 %vm2146_vm14, %v5366_v51 }
 0x200   : > { %1704 = vst.msk [vmem:[#allocation4 + $0xc] sm:$0xf] %vm1700_vm11, %v1611_v49  ;;  %v1892_v45 = vpop.permute.xlu0 %1891  ;;  %1927 = vrot.lane.b32.xlu2 %v6273_v5, %s5468_s6 }
 0x201   : > { %1847 = vst.msk [vmem:[#allocation4 + $0xc] sm:$0xf] %vm1843_vm12, %v1754_v6 }
 0x202   : > { %v1486_v62 = vpop.permute.xlu2 %1485 }
 0x203   : > { %1575 = vst.msk [vmem:[#allocation4 + $0x1c] sm:$0xf] %vm1567_vm9, %v1486_v62 }
 0x204   : > { %1644 = vrot.lane.b32.xlu1 %v6331_v52, %s5466_s29 }
 0x206   : > { %v1752_v0 = vpop.permute.xlu1 %1751  ;;  %1929 = vrot.lane.b32.xlu0 %v8527_v11, %s5468_s6 }
 0x207   : > { %1846 = vst.msk [vmem:[#allocation4 + $0x8] sm:$0xf] %vm1843_vm12, %v1752_v0 }
 0x208   : > { %1986 = vst.msk [vmem:[#allocation4 + $0x8] sm:$0xf] %vm1983_vm13, %v1892_v45  ;;  %v1482_v50 = vpop.permute.xlu0 %1481  ;;  %1493 = vrot.lane.b32.xlu2 %v6147_v32, %s5465_s28 }
 0x209   : > { %1573 = vst.msk [vmem:[#allocation4 + $0x14] sm:$0xf] %vm1567_vm9, %v1482_v50  ;;  %v8538_v50 = vld [vmem:[#allocation31_spill] sm:$0xff] }
 0x20a   : > { %1706 = vst.msk [vmem:[#allocation4 + $0x14] sm:$0xf] %vm1700_vm11, %v1615_v24  ;;  %v1760_v18 = vpop.permute.xlu2 %1759  ;;  %v8534_v24 = vld [vmem:[#allocation23_spill] sm:$0xff] }
 0x20c   : > { %1789 = vrot.lane.b32.xlu1 %v8528_v7, %s5467_s30 }
 0x20e   : > { %v1894_v52 = vpop.permute.xlu1 %1893  ;;  %1624 = vrot.lane.b32.xlu0 %v6080_v37, %s5466_s29 }
 0x20f   : > { %1987 = vst.msk [vmem:[#allocation4 + $0xc] sm:$0xf] %vm1983_vm13, %v1894_v52  ;;  %v8539_v52 = vld [vmem:[#allocation34_spill] sm:$0xff] }
 0x210   : > { %v1756_v55 = vpop.permute.xlu0 %1755  ;;  %1767 = vrot.lane.b32.xlu2 %v8519_v63, %s5467_s30 }
 0x212   : > { %v1902_v35 = vpop.permute.xlu2 %1901 }
 0x214   : > { %1491 = vrot.lane.b32.xlu1 %v8525_v33, %s5465_s28 }
 0x216   : > { %v1613_v32 = vpop.permute.xlu1 %1612  ;;  %v5367_v43 = vld [vmem:[#allocation4 + $0x8] sm:$0xff]  ;;  %1769 = vrot.lane.b32.xlu0 %v8529_v39, %s5467_s30 }
 0x217   : > { %1705 = vst.msk [vmem:[#allocation4 + $0x10] sm:$0xf] %vm1700_vm11, %v1613_v32  ;;  %5171 = vmatmul.msk.bf16.gmra.mxu0 %vm2146_vm14, %v5367_v43 }
 0x218   : > { %1848 = vst.msk [vmem:[#allocation4 + $0x10] sm:$0xf] %vm1843_vm12, %v1756_v55  ;;  %v1898_v37 = vpop.permute.xlu0 %1897  ;;  %1909 = vrot.lane.b32.xlu2 %v8530_v20, %s5468_s6 }
 0x219   : > { %1988 = vst.msk [vmem:[#allocation4 + $0x10] sm:$0xf] %vm1983_vm13, %v1896_v21  ;;  %v8536_v21 = vld [vmem:[#allocation42_spill] sm:$0xff] }
 0x21a   : > { %v1508_v63 = vpop.permute.xlu2 %1507 }
 0x21c   : > { %1626 = vrot.lane.b32.xlu1 %v6213_v15, %s5466_s29 }
 0x21e   : > { %v1758_v3 = vpop.permute.xlu1 %1757  ;;  %1375 = vrot.lane.b32.xlu0 %v8526_v40, %s5464_s27  ;;  %v8537_v40 = vld [vmem:[#allocation19_spill] sm:$0xff] }
 0x21f   : > { %1849 = vst.msk [vmem:[#allocation4 + $0x14] sm:$0xf] %vm1843_vm12, %v1758_v3 }
 0x220   : > { %1989 = vst.msk [vmem:[#allocation4 + $0x14] sm:$0xf] %vm1983_vm13, %v1898_v37  ;;  %v1617_v19 = vpop.permute.xlu0 %1616  ;;  %1515 = vrot.lane.b32.xlu2 %v6273_v5, %s5465_s28  ;;  %v8540_v37 = vld [vmem:[#allocation21_spill] sm:$0xff] }
 0x222   : > { %v1643_v34 = vpop.permute.xlu2 %1642 }
 0x224   : > { %1907 = vrot.lane.b32.xlu1 %v8531_v31, %s5468_s6 }
 0x226   : > { %v1484_v4 = vpop.permute.xlu1 %1483  ;;  %1517 = vrot.lane.b32.xlu0 %v8527_v11, %s5465_s28 }
 0x227   : > { %1574 = vst.msk [vmem:[#allocation4 + $0x18] sm:$0xf] %vm1567_vm9, %v1484_v4  ;;  %v5368_v15 = vld [vmem:[#allocation4 + $0x10] sm:$0xff] }
 0x228   : > { %1707 = vst.msk [vmem:[#allocation4 + $0x18] sm:$0xf] %vm1700_vm11, %v1617_v19  ;;  %v1762_v12 = vpop.permute.xlu0 %1761  ;;  %1650 = vrot.lane.b32.xlu2 %v6363_v56, %s5466_s29  ;;  %5172 = vmatmul.msk.bf16.gmra.mxu0 %vm2146_vm14, %v5368_v15  ;;  %v8542_v15 = vld [vmem:[#allocation41_spill] sm:$0xff] }
 0x229   : > { %1850 = vst.msk [vmem:[#allocation4 + $0x18] sm:$0xf] %vm1843_vm12, %v1760_v18 }
 0x22a   : > { %v1924_v5 = vpop.permute.xlu2 %1923 }
 0x22c   : > { %1377 = vrot.lane.b32.xlu1 %v8528_v7, %s5464_s27 }
 0x22e   : > { %v1619_v8 = vpop.permute.xlu1 %1618  ;;  %1791 = vrot.lane.b32.xlu0 %v8532_v42, %s5467_s30 }
 0x22f   : > { %1708 = vst.msk [vmem:[#allocation4 + $0x1c] sm:$0xf] %vm1700_vm11, %v1619_v8 }
 0x230   : > { %1851 = vst.msk [vmem:[#allocation4 + $0x1c] sm:$0xf] %vm1843_vm12, %v1762_v12  ;;  %v1368_v1 = vpop.permute.xlu0 %1367  ;;  %1931 = vrot.lane.b32.xlu2 %v6365_v47, %s5468_s6 }
 0x231   : > { %1991 = vst.msk [vmem:[#allocation4 + $0x1c] sm:$0xf] %vm1983_vm13, %v1902_v35 }
 0x232   : > { %1446 = vst.msk [vmem:[#allocation4 + $0x48] sm:$0xf] %vm1427_vm8, %v1368_v1  ;;  %v1490_v56 = vpop.permute.xlu2 %1489 }
 0x233   : > { %1586 = vst.msk [vmem:[#allocation4 + $0x48] sm:$0xf] %vm1567_vm9, %v1508_v63 }
 0x234   : > { %1648 = vrot.lane.b32.xlu1 %v6237_v46, %s5466_s29  ;;  %1577 = vst.msk [vmem:[#allocation4 + $0x24] sm:$0xf] %vm1567_vm9, %v1490_v56 }
 0x236   : > { %v1900_v44 = vpop.permute.xlu1 %1899  ;;  %1933 = vrot.lane.b32.xlu0 %v6314_v27, %s5468_s6 }
 0x237   : > { %1990 = vst.msk [vmem:[#allocation4 + $0x18] sm:$0xf] %vm1983_vm13, %v1900_v44 }
 0x238   : > { %v1510_v26 = vpop.permute.xlu0 %1509  ;;  %1495 = vrot.lane.b32.xlu2 %v8531_v31, %s5465_s28 }
 0x23a   : > { %v1764_v6 = vpop.permute.xlu2 %1763 }
 0x23c   : > { %1793 = vrot.lane.b32.xlu1 %v8533_v41, %s5467_s30 }
 0x23e   : > { %v1370_v29 = vpop.permute.xlu1 %1369  ;;  %v5369_v30 = vld [vmem:[#allocation4 + $0x18] sm:$0xff]  ;;  %1497 = vrot.lane.b32.xlu0 %v8530_v20, %s5465_s28  ;;  %v6871_v20 = vld [vmem:[%s8384_s2] ss:$0 sm:$0xff] }
 0x23f   : > { %1447 = vst.msk [vmem:[#allocation4 + $0x4c] sm:$0xf] %vm1427_vm8, %v1370_v29  ;;  %5173 = vmatmul.msk.bf16.gmra.mxu0 %vm2146_vm14, %v5369_v30 }
 0x240   : > { %1587 = vst.msk [vmem:[#allocation4 + $0x4c] sm:$0xf] %vm1567_vm9, %v1510_v26  ;;  %v1784_v46 = vpop.permute.xlu0 %1783  ;;  %1630 = vrot.lane.b32.xlu2 %v6118_v48, %s5466_s29 }
 0x241   : > { %1720 = vst.msk [vmem:[#allocation4 + $0x4c] sm:$0xf] %vm1700_vm11, %v1643_v34  ;;  %v8541_v34 = vld [vmem:[#allocation26_spill] sm:$0xff] }
 0x242   : > { %v1906_v25 = vpop.permute.xlu2 %1905 }
 0x244   : > { %1357 = vrot.lane.b32.xlu1 %v8529_v39, %s5464_s27 }
 0x246   : > { %v1641_v9 = vpop.permute.xlu1 %1640  ;;  %1771 = vrot.lane.b32.xlu0 %v8534_v24, %s5467_s30 }
 0x247   : > { %1719 = vst.msk [vmem:[#allocation4 + $0x48] sm:$0xf] %vm1700_vm11, %v1641_v9 }
 0x248   : > { %1862 = vst.msk [vmem:[#allocation4 + $0x48] sm:$0xf] %vm1843_vm12, %v1784_v46  ;;  %v1926_v33 = vpop.permute.xlu0 %1925  ;;  %1911 = vrot.lane.b32.xlu2 %v8535_v2, %s5468_s6 }
 0x249   : > { %2002 = vst.msk [vmem:[#allocation4 + $0x48] sm:$0xf] %vm1983_vm13, %v1924_v5 }
 0x24a   : > { %v1512_v48 = vpop.permute.xlu2 %1511 }
 0x24c   : > { %1628 = vrot.lane.b32.xlu1 %v6241_v10, %s5466_s29 }
 0x24e   : > { %v1786_v49 = vpop.permute.xlu1 %1785  ;;  %1913 = vrot.lane.b32.xlu0 %v8536_v21, %s5468_s6 }
 0x24f   : > { %1863 = vst.msk [vmem:[#allocation4 + $0x4c] sm:$0xf] %vm1843_vm12, %v1786_v49 }
 0x250   : > { %2003 = vst.msk [vmem:[#allocation4 + $0x4c] sm:$0xf] %vm1983_vm13, %v1926_v33  ;;  %v1621_v58 = vpop.permute.xlu0 %1620  ;;  %1381 = vrot.lane.b32.xlu2 %v8533_v41, %s5464_s27 }
 0x252   : > { %v1647_v51 = vpop.permute.xlu2 %1646 }
 0x254   : > { %1773 = vrot.lane.b32.xlu1 %v8537_v40, %s5467_s30 }
 0x256   : > { %v1488_v45 = vpop.permute.xlu1 %1487  ;;  %1519 = vrot.lane.b32.xlu0 %v6365_v47, %s5465_s28 }
 0x257   : > { %1576 = vst.msk [vmem:[#allocation4 + $0x20] sm:$0xf] %vm1567_vm9, %v1488_v45  ;;  %v5375_v10 = vld [vmem:[#allocation4 + $0x48] sm:$0xff] }
 0x258   : > { %1709 = vst.msk [vmem:[#allocation4 + $0x20] sm:$0xf] %vm1700_vm11, %v1621_v58  ;;  %v1766_v62 = vpop.permute.xlu0 %1765  ;;  %1652 = vrot.lane.b32.xlu2 %v6380_v16, %s5466_s29  ;;  %5179 = vmatmul.msk.bf16.vlgmr.msra.gmra.mxu2 %vm2146_vm14, %v5375_v10 }
 0x259   : > { %1852 = vst.msk [vmem:[#allocation4 + $0x20] sm:$0xf] %vm1843_vm12, %v1764_v6 }
 0x25a   : > { %v1928_v0 = vpop.permute.xlu2 %1927 }
 0x25c   : > { %1379 = vrot.lane.b32.xlu1 %v8532_v42, %s5464_s27 }
 0x25e   : > { %v1623_v11 = vpop.permute.xlu1 %1622  ;;  %1654 = vrot.lane.b32.xlu0 %v6277_v17, %s5466_s29 }
 0x25f   : > { %1710 = vst.msk [vmem:[#allocation4 + $0x24] sm:$0xf] %vm1700_vm11, %v1623_v11 }
 0x260   : > { %1853 = vst.msk [vmem:[#allocation4 + $0x24] sm:$0xf] %vm1843_vm12, %v1766_v62  ;;  %v1372_v47 = vpop.permute.xlu0 %1371  ;;  %1797 = vrot.lane.b32.xlu2 %v8538_v50, %s5467_s30 }
 0x261   : > { %1993 = vst.msk [vmem:[#allocation4 + $0x24] sm:$0xf] %vm1983_vm13, %v1906_v25 }
 0x262   : > { %1448 = vst.msk [vmem:[#allocation4 + $0x50] sm:$0xf] %vm1427_vm8, %v1372_v47  ;;  %v1494_v16 = vpop.permute.xlu2 %1493 }
 0x263   : > { %1588 = vst.msk [vmem:[#allocation4 + $0x50] sm:$0xf] %vm1567_vm9, %v1512_v48 }
 0x264   : > { %1521 = vrot.lane.b32.xlu1 %v6314_v27, %s5465_s28  ;;  %1579 = vst.msk [vmem:[#allocation4 + $0x2c] sm:$0xf] %vm1567_vm9, %v1494_v16 }
 0x266   : > { %v1904_v17 = vpop.permute.xlu1 %1903  ;;  %1935 = vrot.lane.b32.xlu0 %v6340_v53, %s5468_s6 }
 0x267   : > { %1992 = vst.msk [vmem:[#allocation4 + $0x20] sm:$0xf] %vm1983_vm13, %v1904_v17 }
 0x268   : > { %v1514_v18 = vpop.permute.xlu0 %1513  ;;  %1359 = vrot.lane.b32.xlu2 %v8534_v24, %s5464_s27  ;;  %v8543_v24 = vld [vmem:[#allocation39_spill] sm:$0xff] }
 0x26a   : > { %v1768_v7 = vpop.permute.xlu2 %1767 }
 0x26c   : > { %1795 = vrot.lane.b32.xlu1 %v8539_v52, %s5467_s30 }
 0x26e   : > { %v1374_v55 = vpop.permute.xlu1 %1373  ;;  %v5370_v35 = vld [vmem:[#allocation4 + $0x20] sm:$0xff]  ;;  %1361 = vrot.lane.b32.xlu0 %v8537_v40, %s5464_s27 }
 0x26f   : > { %1449 = vst.msk [vmem:[#allocation4 + $0x54] sm:$0xf] %vm1427_vm8, %v1374_v55  ;;  %5174 = vmatmul.msk.bf16.gmra.mxu0 %vm2146_vm14, %v5370_v35 }
 0x270   : > { %1589 = vst.msk [vmem:[#allocation4 + $0x54] sm:$0xf] %vm1567_vm9, %v1514_v18  ;;  %v1788_v27 = vpop.permute.xlu0 %1787  ;;  %1501 = vrot.lane.b32.xlu2 %v8536_v21, %s5465_s28 }
 0x271   : > { %1722 = vst.msk [vmem:[#allocation4 + $0x54] sm:$0xf] %vm1700_vm11, %v1647_v51  ;;  %v8545_v51 = vmov 0.0  }
 0x272   : > { %v6857_v32 = vpop.permute.xlu2 %1909  ;;  %283 = vst.msk [vmem:[#allocation3] sm:$0xff] %vm282_vm6, %v8545_v51 }
 0x273   : > { %285 = vst.msk [vmem:[#allocation3 + $0x8] sm:$0x3] %vm284_vm7, %v8545_v51 }
 0x274   : > { %1937 = vrot.lane.b32.xlu1 %v6392_v61, %s5468_s6  ;;  %286 = vst.msk [vmem:[#allocation3 + $0x10] sm:$0xff] %vm282_vm6, %v8545_v51 }
 0x275   : > { %287 = vst.msk [vmem:[#allocation3 + $0x18] sm:$0x3] %vm284_vm7, %v8545_v51 }
 0x276   : > { %v1645_v43 = vpop.permute.xlu1 %1644  ;;  %1632 = vrot.lane.b32.xlu0 %v6254_v38, %s5466_s29  ;;  %288 = vst.msk [vmem:[#allocation3 + $0x20] sm:$0xff] %vm282_vm6, %v8545_v51 }
 0x277   : > { %1721 = vst.msk [vmem:[#allocation4 + $0x50] sm:$0xf] %vm1700_vm11, %v1645_v43 }
 0x278   : > { %1864 = vst.msk [vmem:[#allocation4 + $0x50] sm:$0xf] %vm1843_vm12, %v1788_v27  ;;  %v1930_v39 = vpop.permute.xlu0 %1929  ;;  %1775 = vrot.lane.b32.xlu2 %v8540_v37, %s5467_s30  ;;  %v8546_v27 = vld [vmem:[#allocation35_spill] sm:$0xff] }
 0x279   : > { %2004 = vst.msk [vmem:[#allocation4 + $0x50] sm:$0xf] %vm1983_vm13, %v1928_v0 }
 0x27a   : > { %v1516_v63 = vpop.permute.xlu2 %1515  ;;  %289 = vst.msk [vmem:[#allocation3 + $0x28] sm:$0x3] %vm284_vm7, %v8545_v51 }
 0x27b   : > { %290 = vst.msk [vmem:[#allocation3 + $0x30] sm:$0xff] %vm282_vm6, %v8545_v51 }
 0x27c   : > { %1499 = vrot.lane.b32.xlu1 %v8535_v2, %s5465_s28  ;;  %v2208_v38 = vpop.f32.mrf.mxu0  ;;  %291 = vst.msk [vmem:[#allocation3 + $0x38] sm:$0x3] %vm284_vm7, %v8545_v51 }
 0x27d   : > { %v2209_v3 = vadd.f32 %v6871_v20, %v2208_v38  ;;  %292 = vst.msk [vmem:[#allocation3 + $0x40] sm:$0xff] %vm282_vm6, %v8545_v51 }
 0x27e   : > { %v1790_v19 = vpop.permute.xlu1 %1789  ;;  %1777 = vrot.lane.b32.xlu0 %v8541_v34, %s5467_s30  ;;  %293 = vst.msk [vmem:[#allocation3 + $0x48] sm:$0x3] %vm284_vm7, %v8545_v51 }
 0x27f   : > { %1865 = vst.msk [vmem:[#allocation4 + $0x54] sm:$0xf] %vm1843_vm12, %v1790_v19  ;;  %v2304_v31 = vrot.slane %v2209_v3, 1  ;;  %v2369_v5 = vrot.slane %v2209_v3, 2 }
 0x280   : > { %2005 = vst.msk [vmem:[#allocation4 + $0x54] sm:$0xf] %vm1983_vm13, %v1930_v39  ;;  %v1625_v4 = vpop.permute.xlu0 %1624  ;;  %1917 = vrot.lane.b32.xlu2 %v8542_v15, %s5468_s6 }
 0x281   : > { %v2336_v12 = vmax.f32 %v2209_v3, %v2304_v31  ;;  %294 = vst.msk [vmem:[#allocation3 + $0x50] sm:$0xff] %vm282_vm6, %v8545_v51 }
 0x282   : > { %v6882_v8 = vpop.permute.xlu2 %1650  ;;  %295 = vst.msk [vmem:[#allocation3 + $0x58] sm:$0x3] %vm284_vm7, %v8545_v51 }
 0x283   : > { %2353 = vst.msk [vmem:[#allocation6] sm:$0x1] %vm2352_vm15, %v2336_v12  ;;  %v2401_v42 = vmax.f32 %v2336_v12, %v2369_v5  ;;  %v8547_v12 = vld [vmem:[#allocation43_spill] sm:$0xff] }
 0x284   : > { %1634 = vrot.lane.b32.xlu1 %v6281_v13, %s5466_s29  ;;  %v2210_v1 = vpop.f32.mrf.mxu0  ;;  %296 = vst.msk [vmem:[#allocation3 + $0x60] sm:$0xff] %vm282_vm6, %v8545_v51 }
 0x285   : > { %2418 = vst.msk [vmem:[#allocation6] sm:$0x2] %vm2417_vm0, %v2401_v42  ;;  %v2211_v56 = vadd.f32 %v6871_v20, %v2210_v1  ;;  %v5449_v1 = vld [vmem:[#allocation2 + $0x180] sm:$0xff] }
 0x286   : > { %v1492_v44 = vpop.permute.xlu1 %1491  ;;  %1383 = vrot.lane.b32.xlu0 %v8539_v52, %s5464_s27  ;;  %2435 = vst.msk [vmem:[#allocation6 - $0x1] sm:$0x8] %vm2434_vm2, %v2401_v42 }
 0x287   : > { %v5376_v26 = vld [vmem:[#allocation4 + $0x50] sm:$0xff]  ;;  %2452 = vst.msk [vmem:[#allocation6 - $0x2] sm:$0x20] %vm2451_vm3, %v2401_v42  ;;  %v2484_v6 = vrot.slane %v2211_v56, 1  ;;  %v2532_v29 = vrot.slane %v2211_v56, 2 }
 0x288   : > { %v1770_v41 = vpop.permute.xlu0 %1769  ;;  %1523 = vrot.lane.b32.xlu2 %v6340_v53, %s5465_s28  ;;  %1578 = vst.msk [vmem:[#allocation4 + $0x28] sm:$0xf] %vm1567_vm9, %v1492_v44  ;;  %5180 = vmatmul.msk.bf16.gmra.mxu2 %vm2146_vm14, %v5376_v26 }
 0x289   : > { %v2516_v13 = vmax.f32 %v2209_v3, %v2484_v6  ;;  %v2597_v30 = vmax.f32 %v2211_v56, %v2484_v6  ;;  %1711 = vst.msk [vmem:[#allocation4 + $0x28] sm:$0xf] %vm1700_vm11, %v1625_v4  ;;  %v1320_v56 = vrot.slane %v5449_v1, 1 }
 0x28a   : > { %v6898_v46 = vpop.permute.xlu2 %1931  ;;  %1854 = vst.msk [vmem:[#allocation4 + $0x28] sm:$0xf] %vm1843_vm12, %v1768_v7 }
 0x28b   : > { %v2564_v25 = vmax.f32 %v2516_v13, %v2532_v29  ;;  %v2613_v9 = vmax.f32 %v2597_v30, %v2532_v29  ;;  %297 = vst.msk [vmem:[#allocation3 + $0x68] sm:$0x3] %vm284_vm7, %v8545_v51 }
 0x28c   : > { %1915 = vrot.lane.b32.xlu1 %v8543_v24, %s5468_s6  ;;  %298 = vst.msk [vmem:[#allocation3 + $0x70] sm:$0xff] %vm282_vm6, %v8545_v51 }
 0x28d   : > { %2581 = vst.msk [vmem:[#allocation6 - $0x3] sm:$0x80] %vm2580_vm5, %v2564_v25 }
 0x28e   : > { %v1627_v53 = vpop.permute.xlu1 %1626  ;;  %1525 = vrot.lane.b32.xlu0 %v6392_v61, %s5465_s28  ;;  %2629 = vst.msk [vmem:[#allocation6 + $0x4] sm:$0x2] %vm2417_vm0, %v2613_v9 }
 0x28f   : > { %2645 = vst.msk [vmem:[#allocation6 + $0x3] sm:$0x8] %vm2434_vm2, %v2613_v9 }
 0x290   : > { %v1376_v33 = vpop.permute.xlu0 %1375  ;;  %1658 = vrot.lane.b32.xlu2 %v6404_v54, %s5466_s29  ;;  %2661 = vst.msk [vmem:[#allocation6 + $0x2] sm:$0x20] %vm2451_vm3, %v2613_v9  ;;  %v8544_v54 = vld [vmem:[#allocation33_spill] sm:$0xff]  ;;  %v1460_v9 = vrot.slane %v5449_v1, 2 }
 0x291   : > { %1712 = vst.msk [vmem:[#allocation4 + $0x2c] sm:$0xf] %vm1700_vm11, %v1627_v53 }
 0x292   : > { %v1496_v2 = vpop.permute.xlu2 %1495  ;;  %1855 = vst.msk [vmem:[#allocation4 + $0x2c] sm:$0xf] %vm1843_vm12, %v1770_v41 }
 0x293   : > { %1995 = vst.msk [vmem:[#allocation4 + $0x2c] sm:$0xf] %vm1983_vm13, %v6857_v32 }
 0x294   : > { %1385 = vrot.lane.b32.xlu1 %v8538_v50, %s5464_s27  ;;  %v2213_v61 = vpop.f32.mrf.mxu0  ;;  %1450 = vst.msk [vmem:[#allocation4 + $0x58] sm:$0xf] %vm1427_vm8, %v1376_v33 }
 0x295   : > { %v2214_v49 = vadd.f32 %v6871_v20, %v2213_v61  ;;  %1590 = vst.msk [vmem:[#allocation4 + $0x58] sm:$0xf] %vm1567_vm9, %v1516_v63 }
 0x296   : > { %v1908_v48 = vpop.permute.xlu1 %1907  ;;  %1799 = vrot.lane.b32.xlu0 %v8544_v54, %s5467_s30  ;;  %1580 = vst.msk [vmem:[#allocation4 + $0x30] sm:$0xf] %vm1567_vm9, %v1496_v2 }
 0x297   : > { %1994 = vst.msk [vmem:[#allocation4 + $0x28] sm:$0xf] %vm1983_vm13, %v1908_v48  ;;  %v2305_v21 = vrot.slane %v2214_v49, 1  ;;  %v2370_v45 = vrot.slane %v2214_v49, 2 }
 0x298   : > { %v1518_v58 = vpop.permute.xlu0 %1517  ;;  %1939 = vrot.lane.b32.xlu2 %v6348_v22, %s5468_s6  ;;  %299 = vst.msk [vmem:[#allocation3 + $0x78] sm:$0x3] %vm284_vm7, %v8545_v51 }
 0x299   : > { %v2337_v40 = vmax.f32 %v2214_v49, %v2305_v21  ;;  %300 = vst.msk [vmem:[#allocation3 + $0x80] sm:$0xff] %vm282_vm6, %v8545_v51 }
 0x29a   : > { %v6928_v10 = vpop.permute.xlu2 %1630  ;;  %301 = vst.msk [vmem:[#allocation3 + $0x88] sm:$0x3] %vm284_vm7, %v8545_v51 }
 0x29b   : > { %2354 = vst.msk [vmem:[#allocation6 + $0x8] sm:$0x1] %vm2352_vm15, %v2337_v40  ;;  %v2402_v62 = vmax.f32 %v2337_v40, %v2370_v45 }
 0x29c   : > { %1656 = vrot.lane.b32.xlu1 %v6390_v28, %s5466_s29  ;;  %v2215_v0 = vpop.f32.mrf.mxu0  ;;  %302 = vst.msk [vmem:[#allocation3 + $0x90] sm:$0xff] %vm282_vm6, %v8545_v51 }
 0x29d   : > { %2419 = vst.msk [vmem:[#allocation6 + $0x8] sm:$0x2] %vm2417_vm0, %v2402_v62  ;;  %v2216_v47 = vadd.f32 %v6871_v20, %v2215_v0 }
 0x29e   : > { %v1378_v11 = vpop.permute.xlu1 %1377  ;;  %v5371_v50 = vld [vmem:[#allocation4 + $0x28] sm:$0xff]  ;;  %1941 = vrot.lane.b32.xlu0 %v6371_v57, %s5468_s6  ;;  %2436 = vst.msk [vmem:[#allocation6 + $0x7] sm:$0x8] %vm2434_vm2, %v2402_v62 }
 0x29f   : > { %2453 = vst.msk [vmem:[#allocation6 + $0x6] sm:$0x20] %vm2451_vm3, %v2402_v62  ;;  %v2485_v16 = vrot.slane %v2216_v47, 1  ;;  %5175 = vmatmul.msk.bf16.gmra.mxu0 %vm2146_vm14, %v5371_v50  ;;  %v2533_v18 = vrot.slane %v2216_v47, 2 }
 0x2a0   : > { %v1792_v28 = vpop.permute.xlu0 %1791  ;;  %1365 = vrot.lane.b32.xlu2 %v8541_v34, %s5464_s27  ;;  %1451 = vst.msk [vmem:[#allocation4 + $0x5c] sm:$0xf] %vm1427_vm8, %v1378_v11 }
 0x2a1   : > { %v2517_v17 = vmax.f32 %v2214_v49, %v2485_v16  ;;  %v2598_v7 = vmax.f32 %v2216_v47, %v2485_v16  ;;  %1591 = vst.msk [vmem:[#allocation4 + $0x5c] sm:$0xf] %vm1567_vm9, %v1518_v58  ;;  %v425_v49 = vld [vmem:[#allocation2 + $0x190] sm:$0x3]  ;;  %v8548_v47 = vld [vmem:[#allocation46_spill] sm:$0xff] }
 0x2a2   : > { %v6950_v52 = vpop.permute.xlu2 %1911  ;;  %1724 = vst.msk [vmem:[#allocation4 + $0x5c] sm:$0xf] %vm1700_vm11, %v6882_v8  ;;  %v1323_v40 = vrot.slane %v425_v49, 1  ;;  %v1463_v62 = vrot.slane %v425_v49, 2 }
 0x2a3   : > { %v2565_v55 = vmax.f32 %v2517_v17, %v2533_v18  ;;  %v2614_v35 = vmax.f32 %v2598_v7, %v2533_v18  ;;  %303 = vst.msk [vmem:[#allocation3 + $0x98] sm:$0x3] %vm284_vm7, %v8545_v51  ;;  %vm2860_vm7 = vcmask 126016  }
 0x2a4   : > { %1801 = vrot.lane.b32.xlu1 %v8546_v27, %s5467_s30 }
 0x2a5   : > { %2582 = vst.msk [vmem:[#allocation6 + $0x5] sm:$0x80] %vm2580_vm5, %v2565_v55  ;;  %v2218_v43 = vpop.f32.mrf.mxu0 }
 0x2a6   : > { %v1649_v32 = vpop.permute.xlu1 %1648  ;;  %1503 = vrot.lane.b32.xlu0 %v8543_v24, %s5465_s28  ;;  %2630 = vst.msk [vmem:[#allocation6 + $0xc] sm:$0x2] %vm2417_vm0, %v2614_v35  ;;  %v2219_v39 = vadd.f32 %v6871_v20, %v2218_v43 }
 0x2a7   : > { %2646 = vst.msk [vmem:[#allocation6 + $0xb] sm:$0x8] %vm2434_vm2, %v2614_v35 }
 0x2a8   : > { %v1934_v63 = vpop.permute.xlu0 %1933  ;;  %1636 = vrot.lane.b32.xlu2 %v6158_v60, %s5466_s29  ;;  %2662 = vst.msk [vmem:[#allocation6 + $0xa] sm:$0x20] %vm2451_vm3, %v2614_v35  ;;  %v2306_v38 = vrot.slane %v2219_v39, 1  ;;  %v2371_v3 = vrot.slane %v2219_v39, 2 }
 0x2a9   : > { %1723 = vst.msk [vmem:[#allocation4 + $0x58] sm:$0xf] %vm1700_vm11, %v1649_v32 }
 0x2aa   : > { %v1382_v19 = vpop.permute.xlu2 %1381  ;;  %1866 = vst.msk [vmem:[#allocation4 + $0x58] sm:$0xf] %vm1843_vm12, %v1792_v28  ;;  %v2338_v34 = vmax.f32 %v2219_v39, %v2306_v38 }
 0x2ab   : > { %2006 = vst.msk [vmem:[#allocation4 + $0x58] sm:$0xf] %vm1983_vm13, %v6898_v46 }
 0x2ac   : > { %1363 = vrot.lane.b32.xlu1 %v8540_v37, %s5464_s27  ;;  %2355 = vst.msk [vmem:[#allocation6 + $0x10] sm:$0x1] %vm2352_vm15, %v2338_v34  ;;  %v2403_v31 = vmax.f32 %v2338_v34, %v2371_v3  ;;  %v6984_v37 = vld [vmem:[#allocation2 + $0x188] sm:$0xff]  ;;  %v2677_v3 = vld [vmem:[#allocation6] sm:$0xff] }
 0x2ad   : > { %v2220_v4 = vpop.f32.mrf.mxu0  ;;  %1453 = vst.msk [vmem:[#allocation4 + $0x64] sm:$0xf] %vm1427_vm8, %v1382_v19  ;;  %v1321_v42 = vrot.slane %v6984_v37, 1  ;;  %v1461_v25 = vrot.slane %v6984_v37, 2  ;;  %v8549_v19 = vld [vmem:[#allocation45_spill] sm:$0xff]  ;;  %v7100_v37 = vld [vmem:[#allocation2 + $0x198] sm:$0xff] }
 0x2ae   : > { %v1794_v60 = vpop.permute.xlu1 %1793  ;;  %1638 = vrot.lane.b32.xlu0 %v8547_v12, %s5466_s29  ;;  %2420 = vst.msk [vmem:[#allocation6 + $0x10] sm:$0x2] %vm2417_vm0, %v2403_v31  ;;  %v2221_v5 = vadd.f32 %v6871_v20, %v2220_v4 }
 0x2af   : > { %2437 = vst.msk [vmem:[#allocation6 + $0xf] sm:$0x8] %vm2434_vm2, %v2403_v31  ;;  %v1322_v30 = vsel %vm542_vm1, %v1320_v56, %v1321_v42  ;;  %v7022_v33 = vsel %vm848_vm4, %v1460_v9, %v1461_v25  ;;  %v1464_v28 = vsel %vm848_vm4, %v1461_v25, %v1463_v62 }
 0x2b0   : > { %v1498_v8 = vpop.permute.xlu0 %1497  ;;  %1781 = vrot.lane.b32.xlu2 %v8522_v23, %s5467_s30  ;;  %2454 = vst.msk [vmem:[#allocation6 + $0xe] sm:$0x20] %vm2451_vm3, %v2403_v31  ;;  %v2486_v44 = vrot.slane %v2221_v5, 1  ;;  %v2534_v41 = vrot.slane %v2221_v5, 2  ;;  %v1468_v32 = vpack.c.bf16 %v1464_v28, %v1464_v28 }
 0x2b1   : > { %1867 = vst.msk [vmem:[#allocation4 + $0x5c] sm:$0xf] %vm1843_vm12, %v1794_v60  ;;  %v1467_v60 = vpack.c.bf16 %v7022_v33, %v7022_v33 }
 0x2b2   : > { %v6989_v26 = vpop.permute.xlu2 %1652  ;;  %2007 = vst.msk [vmem:[#allocation4 + $0x5c] sm:$0xf] %vm1983_vm13, %v1934_v63  ;;  %v2518_v6 = vmax.f32 %v2219_v39, %v2486_v44  ;;  %v2599_v13 = vmax.f32 %v2221_v5, %v2486_v44  ;;  %v2678_v63 = vld [vmem:[#allocation6 + $0x8] sm:$0xff] }
 0x2b3   : > { %v7084_v34 = vmax.f32 %v2677_v3, %v2678_v63 }
 0x2b4   : > { %1505 = vrot.lane.b32.xlu1 %v8542_v15, %s5465_s28  ;;  %v2566_v23 = vmax.f32 %v2518_v6, %v2534_v41  ;;  %v2615_v29 = vmax.f32 %v2599_v13, %v2534_v41 }
 0x2b6   : > { %v1358_v46 = vpop.permute.xlu1 %1357  ;;  %1919 = vrot.lane.b32.xlu0 %v6296_v59, %s5468_s6  ;;  %2583 = vst.msk [vmem:[#allocation6 + $0xd] sm:$0x80] %vm2580_vm5, %v2566_v23 }
 0x2b7   : > { %2631 = vst.msk [vmem:[#allocation6 + $0x14] sm:$0x2] %vm2417_vm0, %v2615_v29 }
 0x2b8   : > { %v1772_v15 = vpop.permute.xlu0 %1771  ;;  %1387 = vrot.lane.b32.xlu2 %v8544_v54, %s5464_s27  ;;  %2647 = vst.msk [vmem:[#allocation6 + $0x13] sm:$0x8] %vm2434_vm2, %v2615_v29 }
 0x2b9   : > { %2663 = vst.msk [vmem:[#allocation6 + $0x12] sm:$0x20] %vm2451_vm3, %v2615_v29  ;;  %v5377_v24 = vld [vmem:[#allocation4 + $0x58] sm:$0xff] }
 0x2ba   : > { %v7012_v59 = vpop.permute.xlu2 %1797  ;;  %1441 = vst.msk [vmem:[#allocation4 + $0x34] sm:$0xf] %vm1427_vm8, %v1358_v46  ;;  %5181 = vmatmul.msk.bf16.gmra.mxu2 %vm2146_vm14, %v5377_v24 }
 0x2bb   : > { %1581 = vst.msk [vmem:[#allocation4 + $0x34] sm:$0xf] %vm1567_vm9, %v1498_v8  ;;  %v7098_v8 = vld [vmem:[#allocation2 + $0x1a0] sm:$0xff] }
 0x2bc   : > { %1779 = vrot.lane.b32.xlu1 %v8521_v14, %s5467_s30  ;;  %1714 = vst.msk [vmem:[#allocation4 + $0x34] sm:$0xf] %vm1700_vm11, %v6928_v10  ;;  %v2223_v53 = vpop.f32.mrf.mxu0  ;;  %v1737_v44 = vrot.slane %v7098_v8, 1  ;;  %v1601_v13 = vpack.c.bf16 %v7098_v8, %v7098_v8  ;;  %v1877_v29 = vrot.slane %v7098_v8, 2 }
 0x2bd   : > { %v2224_v61 = vadd.f32 %v6871_v20, %v2223_v53 }
 0x2be   : > { %v1629_v2 = vpop.permute.xlu1 %1628  ;;  %1389 = vrot.lane.b32.xlu0 %v8546_v27, %s5464_s27 }
 0x2bf   : > { %1713 = vst.msk [vmem:[#allocation4 + $0x30] sm:$0xf] %vm1700_vm11, %v1629_v2  ;;  %v2307_v48 = vrot.slane %v2224_v61, 1  ;;  %v2372_v21 = vrot.slane %v2224_v61, 2 }
 0x2c0   : > { %1856 = vst.msk [vmem:[#allocation4 + $0x30] sm:$0xf] %vm1843_vm12, %v1772_v15  ;;  %v1914_v14 = vpop.permute.xlu0 %1913  ;;  %1529 = vrot.lane.b32.xlu2 %v6371_v57, %s5465_s28  ;;  %v1327_v57 = vpack.c.bf16 %v1322_v30, %v1322_v30  ;;  %v2679_v4 = vld [vmem:[#allocation6 + $0x10] sm:$0xff]  ;;  %v1876_v30 = vrot.slane %v7100_v37, 2 }
 0x2c1   : > { %1996 = vst.msk [vmem:[#allocation4 + $0x30] sm:$0xf] %vm1983_vm13, %v6950_v52  ;;  %v2339_v54 = vmax.f32 %v2224_v61, %v2307_v48 }
 0x2c2   : > { %v1360_v58 = vpop.permute.xlu2 %1359  ;;  %v1878_v53 = vsel %vm848_vm4, %v1876_v30, %v1877_v29 }
 0x2c3   : > { %1442 = vst.msk [vmem:[#allocation4 + $0x38] sm:$0xf] %vm1427_vm8, %v1360_v58  ;;  %v2404_v45 = vmax.f32 %v2339_v54, %v2372_v21 }
 0x2c4   : > { %2356 = vst.msk [vmem:[#allocation6 + $0x18] sm:$0x1] %vm2352_vm15, %v2339_v54  ;;  %1921 = vrot.lane.b32.xlu1 %v6233_v36, %s5468_s6  ;;  %v2225_v10 = vpop.f32.mrf.mxu0  ;;  %v1324_v36 = vsel %vm542_vm1, %v1321_v42, %v1323_v40  ;;  %v2718_v42 = vmax.f32 %v7084_v34, 0.0  ;;  %v1883_v54 = vpack.c.bf16 %v1878_v53, %v1878_v53 }
 0x2c5   : > { %2421 = vst.msk [vmem:[#allocation6 + $0x18] sm:$0x2] %vm2417_vm0, %v2404_v45  ;;  %v2226_v11 = vadd.f32 %v6871_v20, %v2225_v10  ;;  %v7058_v55 = vpack.c.bf16 %v1324_v36, %v1324_v36 }
 0x2c6   : > { %v1774_v0 = vpop.permute.xlu1 %1773  ;;  %1660 = vrot.lane.b32.xlu0 %v8548_v47, %s5466_s29  ;;  %2438 = vst.msk [vmem:[#allocation6 + $0x17] sm:$0x8] %vm2434_vm2, %v2404_v45  ;;  %v1600_v47 = vpack.c.bf16 %v7100_v37, %v7100_v37 }
 0x2c7   : > { %2455 = vst.msk [vmem:[#allocation6 + $0x16] sm:$0x20] %vm2451_vm3, %v2404_v45  ;;  %v2487_v50 = vrot.slane %v2226_v11, 1  ;;  %v2535_v18 = vrot.slane %v2226_v11, 2 }
 0x2c8   : > { %v1520_v16 = vpop.permute.xlu0 %1519  ;;  %1803 = vrot.lane.b32.xlu2 %v1327_v57, %s5467_s30  ;;  %1857 = vst.msk [vmem:[#allocation4 + $0x34] sm:$0xf] %vm1843_vm12, %v1774_v0 }
 0x2c9   : > { %v2519_v17 = vmax.f32 %v2224_v61, %v2487_v50  ;;  %v2600_v7 = vmax.f32 %v2226_v11, %v2487_v50  ;;  %1997 = vst.msk [vmem:[#allocation4 + $0x34] sm:$0xf] %vm1983_vm13, %v1914_v14  ;;  %v428_v61 = vld [vmem:[#allocation2 + $0x1a8] sm:$0x3] }
 0x2ca   : > { %v7056_v52 = vpop.permute.xlu2 %1501  ;;  %2727 = vst.msk [vmem:[#allocation3 + $0x11] sm:$0xff] %vm282_vm6, %v2718_v42  ;;  %v1879_v14 = vrot.slane %v428_v61, 2 }
 0x2cb   : > { %v2567_v35 = vmax.f32 %v2519_v17, %v2535_v18  ;;  %v2616_v27 = vmax.f32 %v2600_v7, %v2535_v18  ;;  %v1739_v17 = vrot.slane %v428_v61, 1 }
 0x2cc   : > { %1527 = vrot.lane.b32.xlu1 %v6348_v22, %s5465_s28  ;;  %v1880_v11 = vsel %vm848_vm4, %v1877_v29, %v1879_v14 }
 0x2cd   : > { %2584 = vst.msk [vmem:[#allocation6 + $0x15] sm:$0x80] %vm2580_vm5, %v2567_v35  ;;  %v1884_v7 = vpack.c.bf16 %v1880_v11, %v1880_v11 }
 0x2ce   : > { %v1380_v43 = vpop.permute.xlu1 %1379  ;;  %1805 = vrot.lane.b32.xlu0 %v7058_v55, %s5467_s30  ;;  %2632 = vst.msk [vmem:[#allocation6 + $0x1c] sm:$0x2] %vm2417_vm0, %v2616_v27 }
 0x2cf   : > { %2648 = vst.msk [vmem:[#allocation6 + $0x1b] sm:$0x8] %vm2434_vm2, %v2616_v27 }
 0x2d0   : > { %v1655_v39 = vpop.permute.xlu0 %1654  ;;  %1945 = vrot.lane.b32.xlu2 %v1468_v32, %s5468_s6  ;;  %2664 = vst.msk [vmem:[#allocation6 + $0x1a] sm:$0x20] %vm2451_vm3, %v2616_v27  ;;  %v5372_v22 = vld [vmem:[#allocation4 + $0x30] sm:$0xff] }
 0x2d1   : > { %1452 = vst.msk [vmem:[#allocation4 + $0x60] sm:$0xf] %vm1427_vm8, %v1380_v43  ;;  %5176 = vmatmul.msk.bf16.gmra.mxu0 %vm2146_vm14, %v5372_v22  ;;  %v7142_v21 = vld [vmem:[#allocation3 + $0x10] sm:$0xff]  ;;  %v7144_v58 = vld [vmem:[#allocation3 + $0x18] sm:$0x3] }
 0x2d2   : > { %v7076_v38 = vpop.permute.xlu2 %1775  ;;  %1592 = vst.msk [vmem:[#allocation4 + $0x60] sm:$0xf] %vm1567_vm9, %v1520_v16  ;;  %v2792_v10 = vrot.slane %v7144_v58, 1  ;;  %v7155_v62 = vpack.c.bf16 %v7142_v21, %v7142_v21 }
 0x2d3   : > { %1725 = vst.msk [vmem:[#allocation4 + $0x60] sm:$0xf] %vm1700_vm11, %v6989_v26  ;;  %v1736_v26 = vrot.slane %v7100_v37, 1 }
 0x2d4   : > { %1662 = vrot.lane.b32.xlu1 %v8549_v19, %s5466_s29  ;;  %2765 = vst.msk [vmem:[#allocation5 + $0x4] sm:$0xf] %vm2763_vm10, %v7155_v62 }
 0x2d5   : > { %v1738_v9 = vsel %vm542_vm1, %v1736_v26, %v1737_v44 }
 0x2d6   : > { %v1522_v31 = vpop.permute.xlu1 %1521  ;;  %1391 = vrot.lane.b32.xlu0 %v1327_v57, %s5464_s27  ;;  %v1743_v2 = vpack.c.bf16 %v1738_v9, %v1738_v9  ;;  %v2791_v57 = vrot.slane %v7142_v21, 1 }
 0x2d7   : > { %1593 = vst.msk [vmem:[#allocation4 + $0x64] sm:$0xf] %vm1567_vm9, %v1522_v31  ;;  %v7094_v12 = vld [vmem:[#allocation6 + $0x18] sm:$0xff] }
 0x2d8   : > { %1726 = vst.msk [vmem:[#allocation4 + $0x64] sm:$0xf] %vm1700_vm11, %v1655_v39  ;;  %v1936_v5 = vpop.permute.xlu0 %1935  ;;  %1531 = vrot.lane.b32.xlu2 %v1467_v60, %s5465_s28  ;;  %v2694_v1 = vmax.f32 %v2679_v4, %v7094_v12  ;;  %v2793_v35 = vsel %vm542_vm1, %v2791_v57, %v2792_v10 }
 0x2d9   : > { %1869 = vst.msk [vmem:[#allocation4 + $0x64] sm:$0xf] %vm1843_vm12, %v7012_v59  ;;  %v7179_v31 = vpack.c.bf16 %v2793_v35, %v2793_v35 }
 0x2da   : > { %v7106_v56 = vpop.permute.xlu2 %1917  ;;  %v7114_v6 = vmax.f32 %v2694_v1, %v2678_v63  ;;  %v1740_v63 = vsel %vm542_vm1, %v1737_v44, %v1739_v17 }
 0x2db   : > { %v2253_v41 = vpop.f32.mrf.mxu2  ;;  %v1744_v37 = vpack.c.bf16 %v1740_v63, %v1740_v63 }
 0x2dc   : > { %1943 = vrot.lane.b32.xlu1 %v1467_v60, %s5468_s6  ;;  %v2254_v23 = vadd.f32 %v6871_v20, %v2253_v41  ;;  %v2719_v51 = vmax.f32 %v7114_v6, 0.0 }
 0x2de   : > { %v1796_v46 = vpop.permute.xlu1 %1795  ;;  %1533 = vrot.lane.b32.xlu0 %v1468_v32, %s5465_s28  ;;  %v2313_v15 = vrot.slane %v2254_v23, 1  ;;  %v2378_v25 = vrot.slane %v2254_v23, 2  ;;  %2728 = vst.msk [vmem:[#allocation3 + $0x21] sm:$0xff] %vm282_vm6, %v2719_v51 }
 0x2df   : > { %1868 = vst.msk [vmem:[#allocation4 + $0x60] sm:$0xf] %vm1843_vm12, %v1796_v46 }
 0x2e0   : > { %2008 = vst.msk [vmem:[#allocation4 + $0x60] sm:$0xf] %vm1983_vm13, %v1936_v5  ;;  %v1362_v24 = vpop.permute.xlu0 %1361  ;;  %1666 = vrot.lane.b32.xlu2 %v1601_v13, %s5466_s29  ;;  %v2345_v59 = vmax.f32 %v2254_v23, %v2313_v15 }
 0x2e1   : > { %1443 = vst.msk [vmem:[#allocation4 + $0x3c] sm:$0xf] %vm1427_vm8, %v1362_v24 }
 0x2e2   : > { %1583 = vst.msk [vmem:[#allocation4 + $0x3c] sm:$0xf] %vm1567_vm9, %v7056_v52  ;;  %v7137_v33 = vpop.permute.xlu2 %1523  ;;  %v2410_v48 = vmax.f32 %v2345_v59, %v2378_v25  ;;  %v7167_v52 = vld [vmem:[#allocation3] sm:$0xff] }
 0x2e3   : > { %2362 = vst.msk [vmem:[#allocation6 + $0x48] sm:$0x1] %vm2352_vm15, %v2345_v59  ;;  %v2255_v49 = vpop.f32.mrf.mxu2  ;;  %v2869_v43 = vrot.slane %v7167_v52, 2  ;;  %v2788_v1 = vrot.slane %v7167_v52, 1 }
 0x2e4   : > { %1393 = vrot.lane.b32.xlu1 %v7058_v55, %s5464_s27  ;;  %2427 = vst.msk [vmem:[#allocation6 + $0x48] sm:$0x2] %vm2417_vm0, %v2410_v48  ;;  %v2256_v40 = vadd.f32 %v6871_v20, %v2255_v49  ;;  %v2736_v55 = vld [vmem:[#allocation3 + $0x8] sm:$0x3] }
 0x2e5   : > { %2444 = vst.msk [vmem:[#allocation6 + $0x47] sm:$0x8] %vm2434_vm2, %v2410_v48  ;;  %v2870_v39 = vrot.slane %v2736_v55, 2  ;;  %v7181_v60 = vld [vmem:[#allocation3 + $0x20] sm:$0xff]  ;;  %v2789_v44 = vrot.slane %v2736_v55, 1 }
 0x2e6   : > { %v1938_v45 = vpop.permute.xlu1 %1937  ;;  %1807 = vrot.lane.b32.xlu0 %v1743_v2, %s5467_s30  ;;  %2461 = vst.msk [vmem:[#allocation6 + $0x46] sm:$0x20] %vm2451_vm3, %v2410_v48  ;;  %v2493_v0 = vrot.slane %v2256_v40, 1  ;;  %v2541_v16 = vrot.slane %v2256_v40, 2  ;;  %v2757_v26 = vpack.c.bf16 %v7181_v60, %v7181_v60  ;;  %v7200_v46 = vld [vmem:[#allocation3 + $0x28] sm:$0x3] }
 0x2e7   : > { %2009 = vst.msk [vmem:[#allocation4 + $0x64] sm:$0xf] %vm1983_vm13, %v1938_v45  ;;  %v2871_v5 = vsel %vm848_vm4, %v2869_v43, %v2870_v39  ;;  %v2790_v25 = vsel %vm542_vm1, %v2788_v1, %v2789_v44  ;;  %v2795_v24 = vrot.slane %v7200_v46, 1 }
 0x2e8   : > { %v1633_v36 = vpop.permute.xlu0 %1632  ;;  %1947 = vrot.lane.b32.xlu2 %v1883_v54, %s5468_s6  ;;  %v2525_v50 = vmax.f32 %v2254_v23, %v2493_v0  ;;  %v2606_v28 = vmax.f32 %v2256_v40, %v2493_v0  ;;  %v2901_v29 = vpack.c.bf16 %v2871_v5, %v2871_v5  ;;  %2766 = vst.msk [vmem:[#allocation5 + $0x8] sm:$0xf] %vm2763_vm10, %v2757_v26  ;;  %v2872_v54 = vrot.slane %v7142_v21, 2 }
 0x2e9   : > { %v2820_v53 = vpack.c.bf16 %v2790_v25, %v2790_v25  ;;  %v2873_v40 = vrot.slane %v7144_v58, 2 }
 0x2ea   : > { %v7165_v18 = vpop.permute.xlu2 %1658  ;;  %v2573_v27 = vmax.f32 %v2525_v50, %v2541_v16  ;;  %v2622_v32 = vmax.f32 %v2606_v28, %v2541_v16  ;;  %v2875_v16 = vrot.slane %v7181_v60, 2  ;;  %v2876_v28 = vrot.slane %v7200_v46, 2 }
 0x2eb   : > { %v2874_v21 = vsel %vm848_vm4, %v2872_v54, %v2873_v40 }
 0x2ec   : > { %1664 = vrot.lane.b32.xlu1 %v1600_v47, %s5466_s29  ;;  %2590 = vst.msk [vmem:[#allocation6 + $0x45] sm:$0x80] %vm2580_vm5, %v2573_v27  ;;  %v2228_v22 = vpop.f32.mrf.mxu0 }
 0x2ed   : > { %2638 = vst.msk [vmem:[#allocation6 + $0x4c] sm:$0x2] %vm2417_vm0, %v2622_v32  ;;  %v2229_v19 = vadd.f32 %v6871_v20, %v2228_v22 }
 0x2ee   : > { %v1500_v3 = vpop.permute.xlu1 %1499  ;;  %1949 = vrot.lane.b32.xlu0 %v1884_v7, %s5468_s6  ;;  %2654 = vst.msk [vmem:[#allocation6 + $0x4b] sm:$0x8] %vm2434_vm2, %v2622_v32  ;;  %v5378_v4 = vld [vmem:[#allocation4 + $0x60] sm:$0xff] }
 0x2ef   : > { %2670 = vst.msk [vmem:[#allocation6 + $0x4a] sm:$0x20] %vm2451_vm3, %v2622_v32  ;;  %v2308_v8 = vrot.slane %v2229_v19, 1  ;;  %5182 = vmatmul.msk.bf16.gmra.mxu2 %vm2146_vm14, %v5378_v4  ;;  %v2373_v13 = vrot.slane %v2229_v19, 2 }
 0x2f0   : > { %v1778_v42 = vpop.permute.xlu0 %1777  ;;  %2838 = vrot.lane.b32.xlu2 %v7179_v31, %s5462_s25  ;;  %1582 = vst.msk [vmem:[#allocation4 + $0x38] sm:$0xf] %vm1567_vm9, %v1500_v3 }
 0x2f1   : > { %v2340_v41 = vmax.f32 %v2229_v19, %v2308_v8  ;;  %1715 = vst.msk [vmem:[#allocation4 + $0x38] sm:$0xf] %vm1700_vm11, %v1633_v36 }
 0x2f2   : > { %v7194_v23 = vpop.permute.xlu2 %1939  ;;  %1858 = vst.msk [vmem:[#allocation4 + $0x38] sm:$0xf] %vm1843_vm12, %v7076_v38  ;;  %v2794_v38 = vrot.slane %v7181_v60, 1 }
 0x2f3   : > { %2357 = vst.msk [vmem:[#allocation6 + $0x20] sm:$0x1] %vm2352_vm15, %v2340_v41  ;;  %v2405_v30 = vmax.f32 %v2340_v41, %v2373_v13 }
 0x2f4   : > { %1809 = vrot.lane.b32.xlu1 %v1744_v37, %s5467_s30  ;;  %v2230_v15 = vpop.f32.mrf.mxu0  ;;  %v2796_v45 = vsel %vm542_vm1, %v2794_v38, %v2795_v24 }
 0x2f5   : > { %2422 = vst.msk [vmem:[#allocation6 + $0x20] sm:$0x2] %vm2417_vm0, %v2405_v30  ;;  %v2231_v51 = vadd.f32 %v6871_v20, %v2230_v15 }
 0x2f6   : > { %v1635_v9 = vpop.permute.xlu1 %1634  ;;  %2917 = vrot.lane.b32.xlu0 %v2901_v29, %s5464_s27  ;;  %2439 = vst.msk [vmem:[#allocation6 + $0x1f] sm:$0x8] %vm2434_vm2, %v2405_v30 }
 0x2f7   : > { %2456 = vst.msk [vmem:[#allocation6 + $0x1e] sm:$0x20] %vm2451_vm3, %v2405_v30  ;;  %v2488_v59 = vrot.slane %v2231_v51, 1  ;;  %v2536_v48 = vrot.slane %v2231_v51, 2 }
 0x2f8   : > { %v1384_v2 = vpop.permute.xlu0 %1383  ;;  %2959 = vrot.lane.b32.xlu2 %v7155_v62, %s5466_s29  ;;  %1716 = vst.msk [vmem:[#allocation4 + $0x3c] sm:$0xf] %vm1700_vm11, %v1635_v9 }
 0x2f9   : > { %v2520_v61 = vmax.f32 %v2229_v19, %v2488_v59  ;;  %v2601_v14 = vmax.f32 %v2231_v51, %v2488_v59  ;;  %1859 = vst.msk [vmem:[#allocation4 + $0x3c] sm:$0xf] %vm1843_vm12, %v1778_v42 }
 0x2fa   : > { %v1366_v49 = vpop.permute.xlu2 %1365  ;;  %1999 = vst.msk [vmem:[#allocation4 + $0x3c] sm:$0xf] %vm1983_vm13, %v7106_v56  ;;  %v7226_v56 = vpack.c.bf16 %v2796_v45, %v2796_v45 }
 0x2fb   : > { %v2568_v57 = vmax.f32 %v2520_v61, %v2536_v48  ;;  %v2617_v10 = vmax.f32 %v2601_v14, %v2536_v48  ;;  %1454 = vst.msk [vmem:[#allocation4 + $0x68] sm:$0xf] %vm1427_vm8, %v1384_v2 }
 0x2fc   : > { %2836 = vrot.lane.b32.xlu1 %v2820_v53, %s5462_s25  ;;  %1594 = vst.msk [vmem:[#allocation4 + $0x68] sm:$0xf] %vm1567_vm9, %v7137_v33  ;;  %v2902_v33 = vpack.c.bf16 %v2874_v21, %v2874_v21 }
 0x2fd   : > { %2585 = vst.msk [vmem:[#allocation6 + $0x1d] sm:$0x80] %vm2580_vm5, %v2568_v57 }
 0x2fe   : > { %v1916_v62 = vpop.permute.xlu1 %1915  ;;  %2961 = vrot.lane.b32.xlu0 %v2757_v26, %s5466_s29  ;;  %2633 = vst.msk [vmem:[#allocation6 + $0x24] sm:$0x2] %vm2417_vm0, %v2617_v10 }
 0x2ff   : > { %2649 = vst.msk [vmem:[#allocation6 + $0x23] sm:$0x8] %vm2434_vm2, %v2617_v10 }
 0x300   : > { %v1526_v58 = vpop.permute.xlu0 %1525  ;;  %3002 = vrot.lane.b32.xlu2 %v7226_v56, %s5468_s6  ;;  %2665 = vst.msk [vmem:[#allocation6 + $0x22] sm:$0x20] %vm2451_vm3, %v2617_v10 }
 0x301   : > { %1998 = vst.msk [vmem:[#allocation4 + $0x38] sm:$0xf] %vm1983_vm13, %v1916_v62 }
 0x302   : > { %v7235_v0 = vpop.permute.xlu2 %1636  ;;  %1445 = vst.msk [vmem:[#allocation4 + $0x44] sm:$0xf] %vm1427_vm8, %v1366_v49 }
 0x304   : > { %2919 = vrot.lane.b32.xlu1 %v2902_v33, %s5464_s27 }
 0x306   : > { %v1386_v11 = vpop.permute.xlu1 %1385  ;;  %3039 = vrot.lane.b32.xlu0 %v2902_v33, %s5469_s15 }
 0x307   : > { %1455 = vst.msk [vmem:[#allocation4 + $0x6c] sm:$0xf] %vm1427_vm8, %v1386_v11  ;;  %v2681_v62 = vld [vmem:[#allocation6 + $0x20] sm:$0xff] }
 0x308   : > { %1595 = vst.msk [vmem:[#allocation4 + $0x6c] sm:$0xf] %vm1567_vm9, %v1526_v58  ;;  %v1800_v47 = vpop.permute.xlu0 %1799  ;;  %3074 = vrot.lane.b32.xlu2 %v2757_v26, %s5470_s16  ;;  %v5373_v36 = vld [vmem:[#allocation4 + $0x38] sm:$0xff] }
 0x309   : > { %1728 = vst.msk [vmem:[#allocation4 + $0x6c] sm:$0xf] %vm1700_vm11, %v7165_v18  ;;  %5177 = vmatmul.msk.bf16.gmra.mxu0 %vm2146_vm14, %v5373_v36  ;;  %v2877_v18 = vsel %vm848_vm4, %v2875_v16, %v2876_v28 }
 0x30a   : > { %v7245_v50 = vpop.permute.xlu2 %1781  ;;  %v7258_v39 = vpack.c.bf16 %v2877_v18, %v2877_v18 }
 0x30b   : > { %v2258_v17 = vpop.f32.mrf.mxu2 }
 0x30c   : > { %3000 = vrot.lane.b32.xlu1 %v7179_v31, %s5468_s6  ;;  %v2259_v7 = vadd.f32 %v6871_v20, %v2258_v17 }
 0x30e   : > { %v1657_v55 = vpop.permute.xlu1 %1656  ;;  %v2314_v35 = vrot.slane %v2259_v7, 1  ;;  %v2379_v27 = vrot.slane %v2259_v7, 2 }
 0x30f   : > { %1727 = vst.msk [vmem:[#allocation4 + $0x68] sm:$0xf] %vm1700_vm11, %v1657_v55 }
 0x310   : > { %1870 = vst.msk [vmem:[#allocation4 + $0x68] sm:$0xf] %vm1843_vm12, %v1800_v47  ;;  %v1942_v32 = vpop.permute.xlu0 %1941  ;;  %v2346_v43 = vmax.f32 %v2259_v7, %v2314_v35 }
 0x311   : > { %2010 = vst.msk [vmem:[#allocation4 + $0x68] sm:$0xf] %vm1983_vm13, %v7194_v23 }
 0x312   : > { %v1388_v22 = vpop.permute.xlu2 %1387  ;;  %2363 = vst.msk [vmem:[#allocation6 + $0x50] sm:$0x1] %vm2352_vm15, %v2346_v43  ;;  %v2411_v63 = vmax.f32 %v2346_v43, %v2379_v27 }
 0x313   : > { %v2260_v3 = vpop.f32.mrf.mxu2  ;;  %1456 = vst.msk [vmem:[#allocation4 + $0x70] sm:$0xf] %vm1427_vm8, %v1388_v22 }
 0x314   : > { %3041 = vrot.lane.b32.xlu1 %v7258_v39, %s5469_s15  ;;  %2428 = vst.msk [vmem:[#allocation6 + $0x50] sm:$0x2] %vm2417_vm0, %v2411_v63  ;;  %v2261_v19 = vadd.f32 %v6871_v20, %v2260_v3 }
 0x315   : > { %2445 = vst.msk [vmem:[#allocation6 + $0x4f] sm:$0x8] %vm2434_vm2, %v2411_v63 }
 0x316   : > { %v1802_v31 = vpop.permute.xlu1 %1801  ;;  %2462 = vst.msk [vmem:[#allocation6 + $0x4e] sm:$0x20] %vm2451_vm3, %v2411_v63  ;;  %v2494_v60 = vrot.slane %v2261_v19, 1  ;;  %v2542_v8 = vrot.slane %v2261_v19, 2 }
 0x317   : > { %1871 = vst.msk [vmem:[#allocation4 + $0x6c] sm:$0xf] %vm1843_vm12, %v1802_v31  ;;  %v7327_v31 = vld [vmem:[%s8384_s2] ss:$0 sm:$0xff] }
 0x318   : > { %v1504_v4 = vpop.permute.xlu0 %1503  ;;  %v2526_v5 = vmax.f32 %v2259_v7, %v2494_v60  ;;  %v2607_v37 = vmax.f32 %v2261_v19, %v2494_v60  ;;  %2011 = vst.msk [vmem:[#allocation4 + $0x6c] sm:$0xf] %vm1983_vm13, %v1942_v32 }
 0x31a   : > { %v1530_v42 = vpop.permute.xlu2 %1529  ;;  %v2574_v1 = vmax.f32 %v2526_v5, %v2542_v8  ;;  %v2623_v44 = vmax.f32 %v2607_v37, %v2542_v8 }
 0x31c   : > { %3115 = vrot.lane.b32.xlu1 %v7226_v56, %s5471_s17  ;;  %2591 = vst.msk [vmem:[#allocation6 + $0x4d] sm:$0x80] %vm2580_vm5, %v2574_v1  ;;  %v2233_v26 = vpop.f32.mrf.mxu0 }
 0x31d   : > { %2639 = vst.msk [vmem:[#allocation6 + $0x54] sm:$0x2] %vm2417_vm0, %v2623_v44  ;;  %v2234_v13 = vadd.f32 %v6871_v20, %v2233_v26 }
 0x31e   : > { %v1364_v41 = vpop.permute.xlu1 %1363  ;;  %2655 = vst.msk [vmem:[#allocation6 + $0x53] sm:$0x8] %vm2434_vm2, %v2623_v44 }
 0x31f   : > { %2671 = vst.msk [vmem:[#allocation6 + $0x52] sm:$0x20] %vm2451_vm3, %v2623_v44  ;;  %v2309_v23 = vrot.slane %v2234_v13, 1  ;;  %v5379_v29 = vld [vmem:[#allocation4 + $0x68] sm:$0xff]  ;;  %v2374_v15 = vrot.slane %v2234_v13, 2 }
 0x320   : > { %v1639_v30 = vpop.permute.xlu0 %1638  ;;  %1444 = vst.msk [vmem:[#allocation4 + $0x40] sm:$0xf] %vm1427_vm8, %v1364_v41  ;;  %5183 = vmatmul.msk.bf16.gmra.mxu2 %vm2146_vm14, %v5379_v29 }
 0x321   : > { %v2341_v46 = vmax.f32 %v2234_v13, %v2309_v23  ;;  %1584 = vst.msk [vmem:[#allocation4 + $0x40] sm:$0xf] %vm1567_vm9, %v1504_v4 }
 0x322   : > { %v1804_v25 = vpop.permute.xlu2 %1803  ;;  %1717 = vst.msk [vmem:[#allocation4 + $0x40] sm:$0xf] %vm1700_vm11, %v7235_v0 }
 0x323   : > { %2358 = vst.msk [vmem:[#allocation6 + $0x28] sm:$0x1] %vm2352_vm15, %v2341_v46  ;;  %v2406_v9 = vmax.f32 %v2341_v46, %v2374_v15 }
 0x324   : > { %v2235_v51 = vpop.f32.mrf.mxu0 }
 0x325   : > { %2423 = vst.msk [vmem:[#allocation6 + $0x28] sm:$0x2] %vm2417_vm0, %v2406_v9  ;;  %v2236_v24 = vadd.f32 %v6871_v20, %v2235_v51  ;;  %v7358_v51 = vpack.c.bf16 %v7167_v52, %v7167_v52 }
 0x326   : > { %v1506_v38 = vpop.permute.xlu1 %1505  ;;  %2440 = vst.msk [vmem:[#allocation6 + $0x27] sm:$0x8] %vm2434_vm2, %v2406_v9 }
 0x327   : > { %2457 = vst.msk [vmem:[#allocation6 + $0x26] sm:$0x20] %vm2451_vm3, %v2406_v9  ;;  %v2489_v59 = vrot.slane %v2236_v24, 1  ;;  %v2537_v61 = vrot.slane %v2236_v24, 2 }
 0x328   : > { %v1920_v53 = vpop.permute.xlu0 %1919  ;;  %1585 = vst.msk [vmem:[#allocation4 + $0x44] sm:$0xf] %vm1567_vm9, %v1506_v38 }
 0x329   : > { %v2521_v2 = vmax.f32 %v2234_v13, %v2489_v59  ;;  %v2602_v48 = vmax.f32 %v2236_v24, %v2489_v59  ;;  %1718 = vst.msk [vmem:[#allocation4 + $0x44] sm:$0xf] %vm1700_vm11, %v1639_v30 }
 0x32a   : > { %v7289_v14 = vpop.permute.xlu2 %1945  ;;  %1861 = vst.msk [vmem:[#allocation4 + $0x44] sm:$0xf] %vm1843_vm12, %v7245_v50 }
 0x32b   : > { %v2569_v49 = vmax.f32 %v2521_v2, %v2537_v61  ;;  %v2618_v54 = vmax.f32 %v2602_v48, %v2537_v61  ;;  %2764 = vst.msk [vmem:[#allocation5] sm:$0xf] %vm2763_vm10, %v7358_v51  ;;  %v2687_v48 = vld [vmem:[#allocation6 + $0x50] sm:$0xff] }
 0x32d   : > { %2586 = vst.msk [vmem:[#allocation6 + $0x25] sm:$0x80] %vm2580_vm5, %v2569_v49 }
 0x32e   : > { %v1780_v40 = vpop.permute.xlu1 %1779  ;;  %2634 = vst.msk [vmem:[#allocation6 + $0x2c] sm:$0x2] %vm2417_vm0, %v2618_v54 }
 0x32f   : > { %2650 = vst.msk [vmem:[#allocation6 + $0x2b] sm:$0x8] %vm2434_vm2, %v2618_v54 }
 0x330   : > { %v1390_v45 = vpop.permute.xlu0 %1389  ;;  %2666 = vst.msk [vmem:[#allocation6 + $0x2a] sm:$0x20] %vm2451_vm3, %v2618_v54 }
 0x331   : > { %1860 = vst.msk [vmem:[#allocation4 + $0x40] sm:$0xf] %vm1843_vm12, %v1780_v40  ;;  %v7382_v40 = vld [vmem:[#allocation6 + $0x48] sm:$0xff] }
 0x332   : > { %2000 = vst.msk [vmem:[#allocation4 + $0x40] sm:$0xf] %vm1983_vm13, %v1920_v53  ;;  %v1532_v57 = vpop.permute.xlu2 %1531 }
 0x333   : > { %1457 = vst.msk [vmem:[#allocation4 + $0x74] sm:$0xf] %vm1427_vm8, %v1390_v45 }
 0x334   : > { %1597 = vst.msk [vmem:[#allocation4 + $0x74] sm:$0xf] %vm1567_vm9, %v1530_v42 }
 0x336   : > { %v1922_v10 = vpop.permute.xlu1 %1921 }
 0x337   : > { %2001 = vst.msk [vmem:[#allocation4 + $0x44] sm:$0xf] %vm1983_vm13, %v1922_v10  ;;  %v7302_v21 = vld [vmem:[#allocation6 + $0x28] sm:$0xff] }
 0x338   : > { %v1661_v58 = vpop.permute.xlu0 %1660  ;;  %v2695_v33 = vmax.f32 %v2681_v62, %v7302_v21 }
 0x33a   : > { %v7306_v0 = vmax.f32 %v2695_v33, %v7094_v12  ;;  %v7309_v47 = vpop.permute.xlu2 %1666 }
 0x33c   : > { %v2720_v11 = vmax.f32 %v7306_v0, 0.0 }
 0x33d   : > { %v2263_v16 = vpop.f32.mrf.mxu2 }
 0x33e   : > { %v1528_v36 = vpop.permute.xlu1 %1527  ;;  %v5374_v50 = vld [vmem:[#allocation4 + $0x40] sm:$0xff]  ;;  %2729 = vst.msk [vmem:[#allocation3 + $0x31] sm:$0xff] %vm282_vm6, %v2720_v11  ;;  %v2264_v28 = vadd.f32 %v6871_v20, %v2263_v16 }
 0x33f   : > { %1596 = vst.msk [vmem:[#allocation4 + $0x70] sm:$0xf] %vm1567_vm9, %v1528_v36  ;;  %5178 = vmatmul.msk.bf16.gmra.mxu0 %vm2146_vm14, %v5374_v50 }
 0x340   : > { %1729 = vst.msk [vmem:[#allocation4 + $0x70] sm:$0xf] %vm1700_vm11, %v1661_v58  ;;  %v1806_v17 = vpop.permute.xlu0 %1805  ;;  %v2315_v12 = vrot.slane %v2264_v28, 1  ;;  %v2380_v7 = vrot.slane %v2264_v28, 2 }
 0x341   : > { %1872 = vst.msk [vmem:[#allocation4 + $0x70] sm:$0xf] %vm1843_vm12, %v1804_v25 }
 0x342   : > { %v2347_v55 = vmax.f32 %v2264_v28, %v2315_v12  ;;  %v7321_v19 = vpop.permute.xlu2 %1947 }
 0x344   : > { %2364 = vst.msk [vmem:[#allocation6 + $0x58] sm:$0x1] %vm2352_vm15, %v2347_v55  ;;  %v2412_v35 = vmax.f32 %v2347_v55, %v2380_v7 }
 0x345   : > { %v2741_v18 = vld [vmem:[#allocation3 + $0x30] sm:$0xff]  ;;  %v2742_v32 = vld [vmem:[#allocation3 + $0x38] sm:$0x3]  ;;  %v2265_v43 = vpop.f32.mrf.mxu2 }
 0x346   : > { %v1663_v27 = vpop.permute.xlu1 %1662  ;;  %v7319_v20 = vpack.c.bf16 %v2741_v18, %v2741_v18  ;;  %v2878_v22 = vrot.slane %v2741_v18, 2  ;;  %v2879_v63 = vrot.slane %v2742_v32, 2  ;;  %v2797_v3 = vrot.slane %v2741_v18, 1  ;;  %2429 = vst.msk [vmem:[#allocation6 + $0x58] sm:$0x2] %vm2417_vm0, %v2412_v35 }
 0x347   : > { %1730 = vst.msk [vmem:[#allocation4 + $0x74] sm:$0xf] %vm1700_vm11, %v1663_v27  ;;  %v2266_v60 = vadd.f32 %v7327_v31, %v2265_v43  ;;  %v2798_v4 = vrot.slane %v2742_v32, 1 }
 0x348   : > { %2446 = vst.msk [vmem:[#allocation6 + $0x57] sm:$0x8] %vm2434_vm2, %v2412_v35  ;;  %3076 = vrot.lane.b32.xlu0 %v7319_v20, %s5470_s16  ;;  %v2880_v5 = vsel %vm848_vm4, %v2878_v22, %v2879_v63  ;;  %v1392_v8 = vpop.permute.xlu0 %1391 }
 0x349   : > { %2463 = vst.msk [vmem:[#allocation6 + $0x56] sm:$0x20] %vm2451_vm3, %v2412_v35  ;;  %v2495_v37 = vrot.slane %v2266_v60, 1  ;;  %v7335_v42 = vpack.c.bf16 %v2880_v5, %v2880_v5  ;;  %v2799_v1 = vsel %vm542_vm1, %v2797_v3, %v2798_v4  ;;  %v2543_v41 = vrot.slane %v2266_v60, 2 }
 0x34a   : > { %1873 = vst.msk [vmem:[#allocation4 + $0x74] sm:$0xf] %vm1843_vm12, %v1806_v17  ;;  %v7339_v44 = vpack.c.bf16 %v2799_v1, %v2799_v1  ;;  %v2839_v25 = vpop.permute.xlu2 %2838 }
 0x34b   : > { %v2527_v26 = vmax.f32 %v2264_v28, %v2495_v37  ;;  %v2608_v13 = vmax.f32 %v2266_v60, %v2495_v37  ;;  %2013 = vst.msk [vmem:[#allocation4 + $0x74] sm:$0xf] %vm1983_vm13, %v7289_v14  ;;  %3156 = vrot.lane.b32.xlu1 %v7335_v42, %s5472_s22 }
 0x34c   : > { %3117 = vrot.lane.b32.xlu2 %v7339_v44, %s5471_s17  ;;  %1458 = vst.msk [vmem:[#allocation4 + $0x78] sm:$0xf] %vm1427_vm8, %v1392_v8 }
 0x34d   : > { %v2575_v23 = vmax.f32 %v2527_v26, %v2543_v41  ;;  %v2624_v29 = vmax.f32 %v2608_v13, %v2543_v41  ;;  %1598 = vst.msk [vmem:[#allocation4 + $0x78] sm:$0xf] %vm1567_vm9, %v1532_v57 }
 0x34e   : > { %v1944_v30 = vpop.permute.xlu1 %1943  ;;  %v2238_v46 = vpop.f32.mrf.mxu0  ;;  %2862 = vst.msk [vmem:[#allocation5 + $0x4] sm:$0xf] %vm2860_vm7, %v2839_v25 }
 0x34f   : > { %2012 = vst.msk [vmem:[#allocation4 + $0x70] sm:$0xf] %vm1983_vm13, %v1944_v30  ;;  %v2239_v15 = vadd.f32 %v7327_v31, %v2238_v46 }
 0x350   : > { %2592 = vst.msk [vmem:[#allocation6 + $0x55] sm:$0x80] %vm2580_vm5, %v2575_v23  ;;  %3154 = vrot.lane.b32.xlu0 %v7258_v39, %s5472_s22  ;;  %v1534_v9 = vpop.permute.xlu0 %1533 }
 0x351   : > { %2640 = vst.msk [vmem:[#allocation6 + $0x5c] sm:$0x2] %vm2417_vm0, %v2624_v29  ;;  %v2310_v38 = vrot.slane %v2239_v15, 1  ;;  %v2375_v24 = vrot.slane %v2239_v15, 2 }
 0x352   : > { %2656 = vst.msk [vmem:[#allocation6 + $0x5b] sm:$0x8] %vm2434_vm2, %v2624_v29  ;;  %v2960_v28 = vpop.permute.xlu2 %2959 }
 0x353   : > { %2672 = vst.msk [vmem:[#allocation6 + $0x5a] sm:$0x20] %vm2451_vm3, %v2624_v29  ;;  %2921 = vrot.lane.b32.xlu1 %v7258_v39, %s5464_s27  ;;  %v2342_v59 = vmax.f32 %v2239_v15, %v2310_v38 }
 0x354   : > { %2840 = vrot.lane.b32.xlu2 %v7226_v56, %s5462_s25  ;;  %2767 = vst.msk [vmem:[#allocation5 + $0xc] sm:$0xf] %vm2763_vm10, %v7319_v20 }
 0x355   : > { %2359 = vst.msk [vmem:[#allocation6 + $0x30] sm:$0x1] %vm2352_vm15, %v2342_v59  ;;  %v2407_v52 = vmax.f32 %v2342_v59, %v2375_v24 }
 0x356   : > { %v1394_v53 = vpop.permute.xlu1 %1393  ;;  %v5380_v2 = vld [vmem:[#allocation4 + $0x70] sm:$0xff]  ;;  %v2240_v39 = vpop.f32.mrf.mxu0 }
 0x357   : > { %1459 = vst.msk [vmem:[#allocation4 + $0x7c] sm:$0xf] %vm1427_vm8, %v1394_v53  ;;  %5184 = vmatmul.msk.bf16.gmra.mxu2 %vm2146_vm14, %v5380_v2  ;;  %v2241_v56 = vadd.f32 %v7327_v31, %v2240_v39  ;;  %vm2941_vm8 = vcmask 191616  }
 0x358   : > { %2424 = vst.msk [vmem:[#allocation6 + $0x30] sm:$0x2] %vm2417_vm0, %v2407_v52  ;;  %2842 = vrot.lane.b32.xlu0 %v7339_v44, %s5462_s25  ;;  %v1808_v61 = vpop.permute.xlu0 %1807 }
 0x359   : > { %2441 = vst.msk [vmem:[#allocation6 + $0x2f] sm:$0x8] %vm2434_vm2, %v2407_v52  ;;  %v2490_v54 = vrot.slane %v2241_v56, 1  ;;  %v2538_v10 = vrot.slane %v2241_v56, 2 }
 0x35a   : > { %v7377_v14 = vld [vmem:[#allocation6 + $0x58] sm:$0xff]  ;;  %2458 = vst.msk [vmem:[#allocation6 + $0x2e] sm:$0x20] %vm2451_vm3, %v2407_v52 }
 0x35b   : > { %v2698_v49 = vmax.f32 %v2687_v48, %v7377_v14  ;;  %1599 = vst.msk [vmem:[#allocation4 + $0x7c] sm:$0xf] %vm1567_vm9, %v1534_v9  ;;  %v2522_v57 = vmax.f32 %v2239_v15, %v2490_v54  ;;  %v2603_v62 = vmax.f32 %v2241_v56, %v2490_v54  ;;  %vm2983_vm9 = vcmask 257216  }
 0x35c   : > { %1732 = vst.msk [vmem:[#allocation4 + $0x7c] sm:$0xf] %vm1700_vm11, %v7309_v47  ;;  %2923 = vrot.lane.b32.xlu2 %v7335_v42, %s5464_s27 }
 0x35d   : > { %v7386_v45 = vmax.f32 %v2698_v49, %v7382_v40  ;;  %v2570_v11 = vmax.f32 %v2522_v57, %v2538_v10  ;;  %v2619_v36 = vmax.f32 %v2603_v62, %v2538_v10 }
 0x35e   : > { %v1665_v58 = vpop.permute.xlu1 %1664 }
 0x35f   : > { %v2723_v33 = vmax.f32 %v7386_v45, 0.0  ;;  %1731 = vst.msk [vmem:[#allocation4 + $0x78] sm:$0xf] %vm1700_vm11, %v1665_v58  ;;  %vm3024_vm11 = vcmask 322816  }
 0x360   : > { %1874 = vst.msk [vmem:[#allocation4 + $0x78] sm:$0xf] %vm1843_vm12, %v1808_v61  ;;  %2963 = vrot.lane.b32.xlu0 %v7319_v20, %s5466_s29  ;;  %v1950_v47 = vpop.permute.xlu0 %1949  ;;  %v3003_v20 = vpop.permute.xlu2 %3002 }
 0x361   : > { %2732 = vst.msk [vmem:[#allocation3 + $0x61] sm:$0xff] %vm282_vm6, %v2723_v33  ;;  %v2716_v33 = vld [vmem:[%s8385_s3 + $0x20] sm:$0xf] }
 0x362   : > { %2587 = vst.msk [vmem:[#allocation6 + $0x2d] sm:$0x80] %vm2580_vm5, %v2570_v11 }
 0x363   : > { %2635 = vst.msk [vmem:[#allocation6 + $0x34] sm:$0x2] %vm2417_vm0, %v2619_v36 }
 0x364   : > { %2651 = vst.msk [vmem:[#allocation6 + $0x33] sm:$0x8] %vm2434_vm2, %v2619_v36  ;;  %3004 = vrot.lane.b32.xlu2 %v7339_v44, %s5468_s6 }
 0x365   : > { %2667 = vst.msk [vmem:[#allocation6 + $0x32] sm:$0x20] %vm2451_vm3, %v2619_v36 }
 0x366   : > { %2014 = vst.msk [vmem:[#allocation4 + $0x78] sm:$0xf] %vm1983_vm13, %v7321_v19  ;;  %v1810_v50 = vpop.permute.xlu1 %1809 }
 0x367   : > { %1875 = vst.msk [vmem:[#allocation4 + $0x7c] sm:$0xf] %vm1843_vm12, %v1810_v50  ;;  %vm8466_vm12 = vcmask 388416   ;;  %v3235_v50 = vunpack.c.l.b16 %v2716_v33 }
 0x368   : > { %2015 = vst.msk [vmem:[#allocation4 + $0x7c] sm:$0xf] %vm1983_vm13, %v1950_v47  ;;  %v2918_v16 = vpop.permute.xlu0 %2917  ;;  %v7410_v7 = vld [vmem:[#allocation3 + $0x60] sm:$0xff]  ;;  %v3075_v30 = vpop.permute.xlu2 %3074  ;;  %vm3098_vm13 = vcmask 454016  }
 0x369   : > { %v7416_v55 = vpack.c.bf16 %v7410_v7, %v7410_v7 }
 0x36b   : > { %2770 = vst.msk [vmem:[#allocation5 + $0x18] sm:$0xf] %vm2763_vm10, %v7416_v55 }
 0x36c   : > { %v2683_v48 = vld [vmem:[#allocation6 + $0x30] sm:$0xff] }
 0x36e   : > { %v2837_v17 = vpop.permute.xlu1 %2836 }
 0x36f   : > { %2861 = vst.msk [vmem:[#allocation5] sm:$0xf] %vm2860_vm7, %v2837_v17  ;;  %v5381_v12 = vld [vmem:[#allocation4 + $0x78] sm:$0xff] }
 0x370   : > { %2942 = vst.msk [vmem:[#allocation5] sm:$0xf] %vm2941_vm8, %v2918_v16  ;;  %5185 = vmatmul.msk.bf16.gmra.mxu2 %vm2146_vm14, %v5381_v12  ;;  %v2962_v27 = vpop.permute.xlu0 %2961  ;;  %vm3139_vm14 = vcmask 519616  }
 0x371   : > { %2984 = vst.msk [vmem:[#allocation5] sm:$0xf] %vm2983_vm9, %v2960_v28  ;;  %v3240_v28 = vpack.c.b16 %v3235_v50, %v3235_v50 }
 0x372   : > { %v2268_v35 = vpop.f32.mrf.mxu2 }
 0x373   : > { %v2269_v18 = vadd.f32 %v7327_v31, %v2268_v35  ;;  %v5385_v35 = vld [vmem:[%s8385_s3 + $0x18] sm:$0xff] }
 0x375   : > { %v2316_v43 = vrot.slane %v2269_v18, 1  ;;  %v2381_v63 = vrot.slane %v2269_v18, 2 }
 0x376   : > { %v2920_v32 = vpop.permute.xlu1 %2919 }
 0x377   : > { %2943 = vst.msk [vmem:[#allocation5 + $0x4] sm:$0xf] %vm2941_vm8, %v2920_v32  ;;  %v2348_v22 = vmax.f32 %v2269_v18, %v2316_v43  ;;  %v5384_v43 = vld [vmem:[%s8385_s3 + $0x10] sm:$0xff] }
 0x378   : > { %2985 = vst.msk [vmem:[#allocation5 + $0x4] sm:$0xf] %vm2983_vm9, %v2962_v27  ;;  %v3040_v5 = vpop.permute.xlu0 %3039 }
 0x379   : > { %3026 = vst.msk [vmem:[#allocation5 + $0x4] sm:$0xf] %vm3024_vm11, %v3003_v20  ;;  %v2413_v3 = vmax.f32 %v2348_v22, %v2381_v63 }
 0x37a   : > { %2365 = vst.msk [vmem:[#allocation6 + $0x60] sm:$0x1] %vm2352_vm15, %v2348_v22  ;;  %v2270_v19 = vpop.f32.mrf.mxu2 }
 0x37b   : > { %2430 = vst.msk [vmem:[#allocation6 + $0x60] sm:$0x2] %vm2417_vm0, %v2413_v3  ;;  %v2271_v60 = vadd.f32 %v7327_v31, %v2270_v19 }
 0x37c   : > { %2447 = vst.msk [vmem:[#allocation6 + $0x5f] sm:$0x8] %vm2434_vm2, %v2413_v3 }
 0x37d   : > { %2464 = vst.msk [vmem:[#allocation6 + $0x5e] sm:$0x20] %vm2451_vm3, %v2413_v3  ;;  %v2496_v8 = vrot.slane %v2271_v60, 1  ;;  %v2544_v1 = vrot.slane %v2271_v60, 2 }
 0x37e   : > { %v3001_v4 = vpop.permute.xlu1 %3000 }
 0x37f   : > { %3025 = vst.msk [vmem:[#allocation5] sm:$0xf] %vm3024_vm11, %v3001_v4  ;;  %v2528_v37 = vmax.f32 %v2269_v18, %v2496_v8  ;;  %v2609_v44 = vmax.f32 %v2271_v60, %v2496_v8 }
 0x380   : > { %3064 = vst.msk [vmem:[#allocation5] sm:$0xf] %vm8466_vm12, %v3040_v5 }
 0x381   : > { %v2576_v26 = vmax.f32 %v2528_v37, %v2544_v1  ;;  %v2625_v41 = vmax.f32 %v2609_v44, %v2544_v1  ;;  %3099 = vst.msk [vmem:[#allocation5] sm:$0xf] %vm3098_vm13, %v3075_v30 }
 0x383   : > { %2593 = vst.msk [vmem:[#allocation6 + $0x5d] sm:$0x80] %vm2580_vm5, %v2576_v26 }
 0x384   : > { %2641 = vst.msk [vmem:[#allocation6 + $0x64] sm:$0x2] %vm2417_vm0, %v2625_v41 }
 0x385   : > { %2657 = vst.msk [vmem:[#allocation6 + $0x63] sm:$0x8] %vm2434_vm2, %v2625_v41 }
 0x386   : > { %v3042_v13 = vpop.permute.xlu1 %3041  ;;  %2673 = vst.msk [vmem:[#allocation6 + $0x62] sm:$0x20] %vm2451_vm3, %v2625_v41  ;;  %v2243_v23 = vpop.f32.mrf.mxu0 }
 0x387   : > { %v2244_v29 = vadd.f32 %v7327_v31, %v2243_v23  ;;  %3065 = vst.msk [vmem:[#allocation5 + $0x4] sm:$0xf] %vm8466_vm12, %v3042_v13  ;;  %vm8467_vm12 = vcmask 1043456   ;;  %v5383_v13 = vld [vmem:[%s8385_s3 + $0x8] sm:$0xff] }
 0x388   : > { %v3260_v17 = vsel %vm8467_vm12, %v3240_v28, 0  ;;  %vm8468_vm12 = vcmask 585216  }
 0x389   : > { %v2311_v46 = vrot.slane %v2244_v29, 1  ;;  %v2376_v25 = vrot.slane %v2244_v29, 2  ;;  %3265 = vmatpush.bf16.msra.mxu1 %v3260_v17 }
 0x38b   : > { %v2343_v15 = vmax.f32 %v2244_v29, %v2311_v46 }
 0x38d   : > { %2360 = vst.msk [vmem:[#allocation6 + $0x38] sm:$0x1] %vm2352_vm15, %v2343_v15  ;;  %v2408_v38 = vmax.f32 %v2343_v15, %v2376_v25  ;;  %3266 = vmatpush.bf16.msra.mxu1 %v5385_v35 }
 0x38e   : > { %v3116_v9 = vpop.permute.xlu1 %3115  ;;  %v2245_v24 = vpop.f32.mrf.mxu0 }
 0x38f   : > { %3140 = vst.msk [vmem:[#allocation5] sm:$0xf] %vm3139_vm14, %v3116_v9  ;;  %v2246_v59 = vadd.f32 %v7327_v31, %v2245_v24  ;;  %v5382_v9 = vld [vmem:[%s8385_s3] sm:$0xff] }
 0x390   : > { %2425 = vst.msk [vmem:[#allocation6 + $0x38] sm:$0x2] %vm2417_vm0, %v2408_v38 }
 0x391   : > { %2442 = vst.msk [vmem:[#allocation6 + $0x37] sm:$0x8] %vm2434_vm2, %v2408_v38  ;;  %v2491_v53 = vrot.slane %v2246_v59, 1  ;;  %v2539_v52 = vrot.slane %v2246_v59, 2  ;;  %3267 = vmatpush.bf16.msra.mxu1 %v5384_v43 }
 0x392   : > { %2459 = vst.msk [vmem:[#allocation6 + $0x36] sm:$0x20] %vm2451_vm3, %v2408_v38  ;;  %v2689_v38 = vld [vmem:[#allocation6 + $0x60] sm:$0xff] }
 0x393   : > { %v2523_v2 = vmax.f32 %v2244_v29, %v2491_v53  ;;  %v2604_v39 = vmax.f32 %v2246_v59, %v2491_v53 }
 0x395   : > { %v2571_v56 = vmax.f32 %v2523_v2, %v2539_v52  ;;  %v2620_v61 = vmax.f32 %v2604_v39, %v2539_v52  ;;  %3268 = vmatpush.bf16.msra.mxu1 %v5383_v13 }
 0x397   : > { %2588 = vst.msk [vmem:[#allocation6 + $0x35] sm:$0x80] %vm2580_vm5, %v2571_v56 }
 0x398   : > { %2636 = vst.msk [vmem:[#allocation6 + $0x3c] sm:$0x2] %vm2417_vm0, %v2620_v61 }
 0x399   : > { %2652 = vst.msk [vmem:[#allocation6 + $0x3b] sm:$0x8] %vm2434_vm2, %v2620_v61  ;;  %3269 = vmatpush.bf16.msra.mxu1 %v5382_v9 }
 0x39a   : > { %2668 = vst.msk [vmem:[#allocation6 + $0x3a] sm:$0x20] %vm2451_vm3, %v2620_v61 }
 0x3a1   : > { %v7448_v49 = vld [vmem:[#allocation6 + $0x38] sm:$0xff] }
 0x3a2   : > { %v2696_v54 = vmax.f32 %v2683_v48, %v7448_v49 }
 0x3a3   : > { %v2273_v57 = vpop.f32.mrf.mxu2 }
 0x3a4   : > { %v7452_v10 = vmax.f32 %v2696_v54, %v7302_v21  ;;  %v2274_v62 = vadd.f32 %v7327_v31, %v2273_v57 }
 0x3a6   : > { %v3118_v58 = vpop.permute.xlu2 %3117  ;;  %v2721_v11 = vmax.f32 %v7452_v10, 0.0  ;;  %v2317_v36 = vrot.slane %v2274_v62, 1  ;;  %v2382_v47 = vrot.slane %v2274_v62, 2 }
 0x3a8   : > { %2730 = vst.msk [vmem:[#allocation3 + $0x41] sm:$0xff] %vm282_vm6, %v2721_v11  ;;  %v2349_v16 = vmax.f32 %v2274_v62, %v2317_v36 }
 0x3aa   : > { %2366 = vst.msk [vmem:[#allocation6 + $0x68] sm:$0x1] %vm2352_vm15, %v2349_v16  ;;  %v2414_v21 = vmax.f32 %v2349_v16, %v2382_v47 }
 0x3ab   : > { %v2275_v12 = vpop.f32.mrf.mxu2 }
 0x3ac   : > { %2431 = vst.msk [vmem:[#allocation6 + $0x68] sm:$0x2] %vm2417_vm0, %v2414_v21  ;;  %v2276_v27 = vadd.f32 %v7327_v31, %v2275_v12 }
 0x3ad   : > { %2448 = vst.msk [vmem:[#allocation6 + $0x67] sm:$0x8] %vm2434_vm2, %v2414_v21 }
 0x3ae   : > { %v2841_v18 = vpop.permute.xlu2 %2840  ;;  %2465 = vst.msk [vmem:[#allocation6 + $0x66] sm:$0x20] %vm2451_vm3, %v2414_v21  ;;  %v2497_v32 = vrot.slane %v2276_v27, 1  ;;  %v2545_v20 = vrot.slane %v2276_v27, 2 }
 0x3af   : > { %2863 = vst.msk [vmem:[#allocation5 + $0x8] sm:$0xf] %vm2860_vm7, %v2841_v18  ;;  %v2743_v22 = vld [vmem:[#allocation3 + $0x40] sm:$0xff]  ;;  %v2744_v63 = vld [vmem:[#allocation3 + $0x48] sm:$0x3] }
 0x3b0   : > { %v2529_v3 = vmax.f32 %v2274_v62, %v2497_v32  ;;  %v2610_v19 = vmax.f32 %v2276_v27, %v2497_v32  ;;  %v2759_v60 = vpack.c.bf16 %v2743_v22, %v2743_v22  ;;  %v2800_v4 = vrot.slane %v2743_v22, 1 }
 0x3b1   : > { %v2801_v5 = vrot.slane %v2744_v63, 1  ;;  %v2881_v8 = vrot.slane %v2743_v22, 2  ;;  %v2882_v37 = vrot.slane %v2744_v63, 2 }
 0x3b2   : > { %v2577_v1 = vmax.f32 %v2529_v3, %v2545_v20  ;;  %v2626_v44 = vmax.f32 %v2610_v19, %v2545_v20  ;;  %2965 = vrot.lane.b32.xlu1 %v2759_v60, %s5466_s29  ;;  %2768 = vst.msk [vmem:[#allocation5 + $0x10] sm:$0xf] %vm2763_vm10, %v2759_v60 }
 0x3b3   : > { %v2802_v26 = vsel %vm542_vm1, %v2800_v4, %v2801_v5  ;;  %v2883_v41 = vsel %vm848_vm4, %v2881_v8, %v2882_v37 }
 0x3b4   : > { %2594 = vst.msk [vmem:[#allocation6 + $0x65] sm:$0x80] %vm2580_vm5, %v2577_v1  ;;  %v7481_v23 = vpack.c.bf16 %v2802_v26, %v2802_v26  ;;  %v7483_v29 = vpack.c.bf16 %v2883_v41, %v2883_v41 }
 0x3b5   : > { %2642 = vst.msk [vmem:[#allocation6 + $0x6c] sm:$0x2] %vm2417_vm0, %v2626_v44 }
 0x3b6   : > { %2658 = vst.msk [vmem:[#allocation6 + $0x6b] sm:$0x8] %vm2434_vm2, %v2626_v44  ;;  %3006 = vrot.lane.b32.xlu0 %v7481_v23, %s5468_s6  ;;  %3045 = vrot.lane.b32.xlu2 %v7483_v29, %s5469_s15  ;;  %v2924_v62 = vpop.permute.xlu2 %2923 }
 0x3b7   : > { %2674 = vst.msk [vmem:[#allocation6 + $0x6a] sm:$0x20] %vm2451_vm3, %v2626_v44 }
 0x3ba   : > { %v3077_v30 = vpop.permute.xlu0 %3076  ;;  %3043 = vrot.lane.b32.xlu1 %v7335_v42, %s5469_s15 }
 0x3bb   : > { %3100 = vst.msk [vmem:[#allocation5 + $0x4] sm:$0xf] %vm3098_vm13, %v3077_v30 }
 0x3bc   : > { %3141 = vst.msk [vmem:[#allocation5 + $0x4] sm:$0xf] %vm3139_vm14, %v3118_v58  ;;  %v2248_v46 = vpop.f32.mrf.mxu0 }
 0x3bd   : > { %v3157_v15 = vpop.permute.xlu1 %3156  ;;  %v2249_v25 = vadd.f32 %v7327_v31, %v2248_v46 }
 0x3be   : > { %3180 = vst.msk [vmem:[#allocation5 + $0x4] sm:$0xf] %vm8468_vm12, %v3157_v15  ;;  %v7501_v24 = vld [vmem:[#allocation6 + $0x68] sm:$0xff]  ;;  %3078 = vrot.lane.b32.xlu0 %v2759_v60, %s5470_s16  ;;  %3119 = vrot.lane.b32.xlu2 %v7481_v23, %s5471_s17  ;;  %v3005_v12 = vpop.permute.xlu2 %3004 }
 0x3bf   : > { %v2312_v42 = vrot.slane %v2249_v25, 1  ;;  %v2699_v59 = vmax.f32 %v2689_v38, %v7501_v24  ;;  %v2377_v2 = vrot.slane %v2249_v25, 2 }
 0x3c1   : > { %v2344_v53 = vmax.f32 %v2249_v25, %v2312_v42  ;;  %v7508_v52 = vmax.f32 %v2699_v59, %v7377_v14 }
 0x3c2   : > { %v3155_v39 = vpop.permute.xlu0 %3154 }
 0x3c3   : > { %2361 = vst.msk [vmem:[#allocation6 + $0x40] sm:$0x1] %vm2352_vm15, %v2344_v53  ;;  %v2409_v56 = vmax.f32 %v2344_v53, %v2377_v2  ;;  %v2724_v61 = vmax.f32 %v7508_v52, 0.0 }
 0x3c4   : > { %3179 = vst.msk [vmem:[#allocation5] sm:$0xf] %vm8468_vm12, %v3155_v39  ;;  %v2250_v48 = vpop.f32.mrf.mxu0  ;;  %vm3245_vm12 = vcmask 588800  }
 0x3c5   : > { %2426 = vst.msk [vmem:[#allocation6 + $0x40] sm:$0x2] %vm2417_vm0, %v2409_v56  ;;  %v2251_v54 = vadd.f32 %v7327_v31, %v2250_v48  ;;  %v2922_v57 = vpop.permute.xlu1 %2921  ;;  %v5386_v47 = vld [vmem:[#allocation5] sm:$0xf0] }
 0x3c6   : > { %2733 = vst.msk [vmem:[#allocation3 + $0x71] sm:$0xff] %vm282_vm6, %v2724_v61 }
 0x3c7   : > { %2443 = vst.msk [vmem:[#allocation6 + $0x3f] sm:$0x8] %vm2434_vm2, %v2409_v56  ;;  %v2492_v14 = vrot.slane %v2251_v54, 1  ;;  %v2540_v33 = vrot.slane %v2251_v54, 2 }
 0x3c8   : > { %2460 = vst.msk [vmem:[#allocation6 + $0x3e] sm:$0x20] %vm2451_vm3, %v2409_v56 }
 0x3c9   : > { %2944 = vst.msk [vmem:[#allocation5 + $0x8] sm:$0xf] %vm2941_vm8, %v2922_v57  ;;  %v2524_v58 = vmax.f32 %v2249_v25, %v2492_v14  ;;  %v2605_v11 = vmax.f32 %v2251_v54, %v2492_v14 }
 0x3ca   : > { %v2843_v36 = vpop.permute.xlu0 %2842 }
 0x3cb   : > { %v5188_v50 = vld [vmem:[#allocation5] sm:$0xf]  ;;  %v2572_v16 = vmax.f32 %v2524_v58, %v2540_v33  ;;  %v2621_v28 = vmax.f32 %v2605_v11, %v2540_v33  ;;  %2864 = vst.msk [vmem:[#allocation5 + $0xc] sm:$0xf] %vm2860_vm7, %v2843_v36 }
 0x3cc   : > { %3347 = vst.msk [vmem:[#allocation5] sm:$0xf] %vm2763_vm10, %v7358_v51  ;;  %v5189_v21 = vor.u32 %v5386_v47, %v5188_v50 }
 0x3cd   : > { %2589 = vst.msk [vmem:[#allocation6 + $0x3d] sm:$0x80] %vm2580_vm5, %v2572_v16  ;;  %v7530_v35 = vld [vmem:[#allocation3 + $0x70] sm:$0xff] }
 0x3ce   : > { %2637 = vst.msk [vmem:[#allocation6 + $0x44] sm:$0x2] %vm2417_vm0, %v2621_v28  ;;  %5218 = vmatmul.msk.bf16.vlgmr.msra.gmra.mxu1 %vm3245_vm12, %v5189_v21  ;;  %v7535_v18 = vpack.c.bf16 %v7530_v35, %v7530_v35 }
 0x3cf   : > { %2653 = vst.msk [vmem:[#allocation6 + $0x43] sm:$0x8] %vm2434_vm2, %v2621_v28 }
 0x3d0   : > { %2669 = vst.msk [vmem:[#allocation6 + $0x42] sm:$0x20] %vm2451_vm3, %v2621_v28 }
 0x3d1   : > { %2945 = vst.msk [vmem:[#allocation5 + $0xc] sm:$0xf] %vm2941_vm8, %v2924_v62  ;;  %v2806_v62 = vrot.slane %v7410_v7, 1 }
 0x3d2   : > { %v2964_v17 = vpop.permute.xlu0 %2963  ;;  %2771 = vst.msk [vmem:[#allocation5 + $0x1c] sm:$0xf] %vm2763_vm10, %v7535_v18 }
 0x3d3   : > { %2986 = vst.msk [vmem:[#allocation5 + $0x8] sm:$0xf] %vm2983_vm9, %v2964_v17 }
 0x3d4   : > { %3027 = vst.msk [vmem:[#allocation5 + $0x8] sm:$0xf] %vm3024_vm11, %v3005_v12 }
 0x3d7   : > { %v2685_v51 = vld [vmem:[#allocation6 + $0x40] sm:$0xff] }
 0x3d8   : > { %v2697_v27 = vmax.f32 %v2685_v51, %v7382_v40 }
 0x3da   : > { %v7538_v32 = vmax.f32 %v2697_v27, %v7448_v49  ;;  %v2278_v43 = vpop.f32.mrf.mxu2 }
 0x3db   : > { %v2279_v20 = vadd.f32 %v7327_v31, %v2278_v43  ;;  %v2809_v43 = vrot.slane %v7530_v35, 1 }
 0x3dc   : > { %v2722_v22 = vmax.f32 %v7538_v32, 0.0 }
 0x3dd   : > { %v2318_v63 = vrot.slane %v2279_v20, 1  ;;  %v2383_v3 = vrot.slane %v2279_v20, 2 }
 0x3de   : > { %2731 = vst.msk [vmem:[#allocation3 + $0x51] sm:$0xff] %vm282_vm6, %v2722_v22 }
 0x3df   : > { %v2350_v40 = vmax.f32 %v2279_v20, %v2318_v63 }
 0x3e1   : > { %2367 = vst.msk [vmem:[#allocation6 + $0x70] sm:$0x1] %vm2352_vm15, %v2350_v40  ;;  %v2415_v19 = vmax.f32 %v2350_v40, %v2383_v3  ;;  %v2890_v40 = vrot.slane %v7530_v35, 2 }
 0x3e2   : > { %v2280_v60 = vpop.f32.mrf.mxu2 }
 0x3e3   : > { %2432 = vst.msk [vmem:[#allocation6 + $0x70] sm:$0x2] %vm2417_vm0, %v2415_v19  ;;  %v2281_v49 = vadd.f32 %v7327_v31, %v2280_v60 }
 0x3e4   : > { %2449 = vst.msk [vmem:[#allocation6 + $0x6f] sm:$0x8] %vm2434_vm2, %v2415_v19 }
 0x3e5   : > { %2466 = vst.msk [vmem:[#allocation6 + $0x6e] sm:$0x20] %vm2451_vm3, %v2415_v19  ;;  %v2745_v4 = vld [vmem:[#allocation3 + $0x50] sm:$0xff]  ;;  %v2498_v5 = vrot.slane %v2281_v49, 1  ;;  %v2546_v8 = vrot.slane %v2281_v49, 2 }
 0x3e6   : > { %v2760_v37 = vpack.c.bf16 %v2745_v4, %v2745_v4  ;;  %v2746_v1 = vld [vmem:[#allocation3 + $0x58] sm:$0x3]  ;;  %v2803_v44 = vrot.slane %v2745_v4, 1  ;;  %v2884_v26 = vrot.slane %v2745_v4, 2 }
 0x3e7   : > { %v2530_v41 = vmax.f32 %v2279_v20, %v2498_v5  ;;  %v2611_v13 = vmax.f32 %v2281_v49, %v2498_v5  ;;  %v2804_v30 = vrot.slane %v2746_v1, 1  ;;  %v2885_v46 = vrot.slane %v2746_v1, 2 }
 0x3e8   : > { %3080 = vrot.lane.b32.xlu1 %v2760_v37, %s5470_s16  ;;  %2769 = vst.msk [vmem:[#allocation5 + $0x14] sm:$0xf] %vm2763_vm10, %v2760_v37 }
 0x3e9   : > { %v2578_v15 = vmax.f32 %v2530_v41, %v2546_v8  ;;  %v2627_v25 = vmax.f32 %v2611_v13, %v2546_v8  ;;  %v2805_v9 = vsel %vm542_vm1, %v2803_v44, %v2804_v30  ;;  %v2886_v38 = vsel %vm848_vm4, %v2884_v26, %v2885_v46  ;;  %v7620_v46 = vld [vmem:[#allocation3 + $0x90] sm:$0xff] }
 0x3ea   : > { %v2825_v42 = vpack.c.bf16 %v2805_v9, %v2805_v9  ;;  %v2906_v59 = vpack.c.bf16 %v2886_v38, %v2886_v38  ;;  %v3109_v9 = vrot.slane %v7620_v46, 1 }
 0x3eb   : > { %2595 = vst.msk [vmem:[#allocation6 + $0x6d] sm:$0x80] %vm2580_vm5, %v2578_v15  ;;  %v2754_v15 = vld [vmem:[#allocation3 + $0x98] sm:$0x3] }
 0x3ec   : > { %2643 = vst.msk [vmem:[#allocation6 + $0x74] sm:$0x2] %vm2417_vm0, %v2627_v25  ;;  %3121 = vrot.lane.b32.xlu0 %v2825_v42, %s5471_s17  ;;  %3160 = vrot.lane.b32.xlu2 %v2906_v59, %s5472_s22  ;;  %v3110_v38 = vrot.slane %v2754_v15, 1 }
 0x3ed   : > { %2659 = vst.msk [vmem:[#allocation6 + $0x73] sm:$0x8] %vm2434_vm2, %v2627_v25 }
 0x3ee   : > { %2675 = vst.msk [vmem:[#allocation6 + $0x72] sm:$0x20] %vm2451_vm3, %v2627_v25 }
 0x3f0   : > { %3158 = vrot.lane.b32.xlu1 %v7483_v29, %s5472_s22 }
 0x3f3   : > { %v2283_v53 = vpop.f32.mrf.mxu2 }
 0x3f4   : > { %2844 = vrot.lane.b32.xlu0 %v7481_v23, %s5462_s25  ;;  %2925 = vrot.lane.b32.xlu2 %v7483_v29, %s5464_s27  ;;  %v2284_v2 = vadd.f32 %v7327_v31, %v2283_v53  ;;  %v2748_v29 = vld [vmem:[#allocation3 + $0x68] sm:$0x3]  ;;  %v3111_v53 = vsel %vm542_vm1, %v3109_v9, %v3110_v38 }
 0x3f5   : > { %v2807_v58 = vrot.slane %v2748_v29, 1  ;;  %v2888_v16 = vrot.slane %v2748_v29, 2  ;;  %v2691_v12 = vld [vmem:[#allocation6 + $0x70] sm:$0xff]  ;;  %v3148_v29 = vrot.slane %v7620_v46, 2 }
 0x3f6   : > { %v2319_v39 = vrot.slane %v2284_v2, 1  ;;  %v2384_v56 = vrot.slane %v2284_v2, 2 }
 0x3f7   : > { %v2808_v50 = vsel %vm542_vm1, %v2806_v62, %v2807_v58 }
 0x3f8   : > { %v2351_v61 = vmax.f32 %v2284_v2, %v2319_v39  ;;  %2846 = vrot.lane.b32.xlu1 %v2825_v42, %s5462_s25  ;;  %v2826_v28 = vpack.c.bf16 %v2808_v50, %v2808_v50  ;;  %v7634_v39 = vpack.c.bf16 %v7620_v46, %v7620_v46  ;;  %v7651_v50 = vld [vmem:[%s8386_s4] ss:$0 sm:$0xff] }
 0x3fa   : > { %2368 = vst.msk [vmem:[#allocation6 + $0x78] sm:$0x1] %vm2352_vm15, %v2351_v61  ;;  %v2416_v48 = vmax.f32 %v2351_v61, %v2384_v56  ;;  %vm8550_vm15 = vcmask 388416   ;;  %v3113_v56 = vpack.c.bf16 %v3111_v53, %v3111_v53  ;;  %v3320_v61 = vld [vmem:[#allocation3 + $0x8] sm:$0x3] }
 0x3fb   : > { %v2285_v54 = vpop.f32.mrf.mxu2 }
 0x3fc   : > { %2433 = vst.msk [vmem:[#allocation6 + $0x78] sm:$0x2] %vm2417_vm0, %v2416_v48  ;;  %2927 = vrot.lane.b32.xlu0 %v2906_v59, %s5464_s27  ;;  %2969 = vrot.lane.b32.xlu2 %v7416_v55, %s5466_s29  ;;  %v2286_v23 = vadd.f32 %v7327_v31, %v2285_v54  ;;  %v2887_v31 = vrot.slane %v7410_v7, 2  ;;  %v2750_v7 = vld [vmem:[#allocation3 + $0x78] sm:$0x3] }
 0x3fd   : > { %2450 = vst.msk [vmem:[#allocation6 + $0x77] sm:$0x8] %vm2434_vm2, %v2416_v48  ;;  %v2810_v20 = vrot.slane %v2750_v7, 1  ;;  %v2891_v19 = vrot.slane %v2750_v7, 2 }
 0x3fe   : > { %2467 = vst.msk [vmem:[#allocation6 + $0x76] sm:$0x20] %vm2451_vm3, %v2416_v48  ;;  %v2499_v57 = vrot.slane %v2286_v23, 1  ;;  %v2547_v14 = vrot.slane %v2286_v23, 2  ;;  %v2889_v21 = vsel %vm848_vm4, %v2887_v31, %v2888_v16  ;;  %v5451_v48 = vld [vmem:[#allocation3] sm:$0xff] }
 0x3ff   : > { %v2907_v17 = vpack.c.bf16 %v2889_v21, %v2889_v21  ;;  %v2811_v3 = vsel %vm542_vm1, %v2809_v43, %v2810_v20  ;;  %v2892_v49 = vsel %vm848_vm4, %v2890_v40, %v2891_v19  ;;  %v3371_v54 = vrot.slane %v5451_v48, 1 }
 0x400   : > { %v2531_v33 = vmax.f32 %v2284_v2, %v2499_v57  ;;  %v2612_v11 = vmax.f32 %v2286_v23, %v2499_v57  ;;  %2967 = vrot.lane.b32.xlu1 %v2760_v37, %s5466_s29  ;;  %v2827_v60 = vpack.c.bf16 %v2811_v3, %v2811_v3  ;;  %v3372_v23 = vrot.slane %v3320_v61, 1 }
 0x401   : > { %v3149_v57 = vrot.slane %v2754_v15, 2 }
 0x402   : > { %v2579_v36 = vmax.f32 %v2531_v33, %v2547_v14  ;;  %v2628_v47 = vmax.f32 %v2612_v11, %v2547_v14  ;;  %v3373_v14 = vsel %vm542_vm1, %v3371_v54, %v3372_v23  ;;  %v3451_v11 = vrot.slane %v5451_v48, 2 }
 0x403   : > { %v3403_v62 = vpack.c.bf16 %v3373_v14, %v3373_v14  ;;  %v3150_v58 = vsel %vm848_vm4, %v3148_v29, %v3149_v57 }
 0x404   : > { %2596 = vst.msk [vmem:[#allocation6 + $0x75] sm:$0x80] %vm2580_vm5, %v2579_v36  ;;  %3008 = vrot.lane.b32.xlu0 %v2825_v42, %s5468_s6  ;;  %3047 = vrot.lane.b32.xlu2 %v2906_v59, %s5469_s15  ;;  %v3152_v33 = vpack.c.bf16 %v3150_v58, %v3150_v58  ;;  %v3452_v36 = vrot.slane %v3320_v61, 2 }
 0x405   : > { %2644 = vst.msk [vmem:[#allocation6 + $0x7c] sm:$0x2] %vm2417_vm0, %v2628_v47  ;;  %vm8551_vm0 = vmmov %vm8550_vm15 }
 0x406   : > { %2660 = vst.msk [vmem:[#allocation6 + $0x7b] sm:$0x8] %vm2434_vm2, %v2628_v47  ;;  %v3453_v31 = vsel %vm848_vm4, %v3451_v11, %v3452_v36  ;;  %vm8552_vm2 = vcmask 585216   ;;  %vm8554_vm5 = vmmov %vm8551_vm0 }
 0x407   : > { %2676 = vst.msk [vmem:[#allocation6 + $0x7a] sm:$0x20] %vm2451_vm3, %v2628_v47  ;;  %v3483_v21 = vpack.c.bf16 %v3453_v31, %v3453_v31  ;;  %vm8553_vm3 = vmmov %vm8552_vm2 }
 0x408   : > { %3010 = vrot.lane.b32.xlu1 %v2826_v28, %s5468_s6 }
 0x40c   : > { %3049 = vrot.lane.b32.xlu0 %v2907_v17, %s5469_s15  ;;  %3084 = vrot.lane.b32.xlu2 %v7535_v18, %s5470_s16 }
 0x40e   : > { %v2692_v51 = vld [vmem:[#allocation6 + $0x78] sm:$0xff] }
 0x40f   : > { %v2700_v27 = vmax.f32 %v2691_v12, %v2692_v51 }
 0x410   : > { %3082 = vrot.lane.b32.xlu1 %v7416_v55, %s5470_s16  ;;  %v2908_v55 = vpack.c.bf16 %v2892_v49, %v2892_v49  ;;  %v3046_v1 = vpop.permute.xlu2 %3045 }
 0x411   : > { %v7595_v22 = vmax.f32 %v2700_v27, %v7501_v24 }
 0x413   : > { %v2725_v63 = vmax.f32 %v7595_v22, 0.0 }
 0x414   : > { %3123 = vrot.lane.b32.xlu0 %v2826_v28, %s5471_s17  ;;  %3162 = vrot.lane.b32.xlu2 %v2907_v17, %s5472_s22 }
 0x415   : > { %2734 = vst.msk [vmem:[#allocation3 + $0x81] sm:$0xff] %vm282_vm6, %v2725_v63 }
 0x418   : > { %3125 = vrot.lane.b32.xlu1 %v2827_v60, %s5471_s17  ;;  %v3120_v42 = vpop.permute.xlu2 %3119 }
 0x41c   : > { %3164 = vrot.lane.b32.xlu0 %v2908_v55, %s5472_s22  ;;  %2850 = vrot.lane.b32.xlu2 %v2827_v60, %s5462_s25  ;;  %v2751_v24 = vld [vmem:[#allocation3 + $0x80] sm:$0xff]  ;;  %v2752_v35 = vld [vmem:[#allocation3 + $0x88] sm:$0x3] }
 0x41d   : > { %v2994_v4 = vrot.slane %v2751_v24, 1  ;;  %v2995_v5 = vrot.slane %v2752_v35, 1  ;;  %v2950_v26 = vpack.c.bf16 %v2751_v24, %v2751_v24  ;;  %v3033_v13 = vrot.slane %v2751_v24, 2 }
 0x41e   : > { %v3034_v30 = vrot.slane %v2752_v35, 2 }
 0x41f   : > { %v2996_v37 = vsel %vm542_vm1, %v2994_v4, %v2995_v5 }
 0x420   : > { %2848 = vrot.lane.b32.xlu1 %v2826_v28, %s5462_s25  ;;  %v2998_v41 = vpack.c.bf16 %v2996_v37, %v2996_v37  ;;  %v3035_v59 = vsel %vm848_vm4, %v3033_v13, %v3034_v30 }
 0x421   : > { %v3037_v2 = vpack.c.bf16 %v3035_v59, %v3035_v59 }
 0x424   : > { %2929 = vrot.lane.b32.xlu0 %v2907_v17, %s5464_s27  ;;  %2971 = vrot.lane.b32.xlu2 %v7535_v18, %s5466_s29  ;;  %v2966_v8 = vpop.permute.xlu1 %2965 }
 0x425   : > { %2987 = vst.msk [vmem:[#allocation5 + $0xc] sm:$0xf] %vm2983_vm9, %v2966_v8 }
 0x428   : > { %2931 = vrot.lane.b32.xlu1 %v2908_v55, %s5464_s27  ;;  %v3007_v44 = vpop.permute.xlu0 %3006 }
 0x429   : > { %3028 = vst.msk [vmem:[#allocation5 + $0xc] sm:$0xf] %vm3024_vm11, %v3007_v44 }
 0x42a   : > { %3067 = vst.msk [vmem:[#allocation5 + $0xc] sm:$0xf] %vm8550_vm15, %v3046_v1  ;;  %vm8555_vm15 = vmmov %vm8551_vm0 }
 0x42c   : > { %2973 = vrot.lane.b32.xlu0 %v2950_v26, %s5466_s29  ;;  %3014 = vrot.lane.b32.xlu2 %v2998_v41, %s5468_s6  ;;  %v3044_v18 = vpop.permute.xlu1 %3043 }
 0x42d   : > { %3066 = vst.msk [vmem:[#allocation5 + $0x8] sm:$0xf] %vm8551_vm0, %v3044_v18  ;;  %vm8556_vm0 = vmmov %vm8552_vm2 }
 0x430   : > { %3012 = vrot.lane.b32.xlu1 %v2827_v60, %s5468_s6  ;;  %v3079_v25 = vpop.permute.xlu0 %3078 }
 0x431   : > { %3101 = vst.msk [vmem:[#allocation5 + $0x8] sm:$0xf] %vm3098_vm13, %v3079_v25 }
 0x432   : > { %3142 = vst.msk [vmem:[#allocation5 + $0x8] sm:$0xf] %vm3139_vm14, %v3120_v42 }
 0x434   : > { %3051 = vrot.lane.b32.xlu0 %v2908_v55, %s5469_s15  ;;  %3086 = vrot.lane.b32.xlu2 %v2950_v26, %s5470_s16 }
 0x438   : > { %3053 = vrot.lane.b32.xlu1 %v3037_v2, %s5469_s15 }
 0x43c   : > { %3088 = vrot.lane.b32.xlu0 %v7634_v39, %s5470_s16  ;;  %3129 = vrot.lane.b32.xlu2 %v3113_v56, %s5471_s17 }
 0x440   : > { %3127 = vrot.lane.b32.xlu1 %v2998_v41, %s5471_s17 }
 0x444   : > { %3166 = vrot.lane.b32.xlu0 %v3037_v2, %s5472_s22  ;;  %3419 = vrot.lane.b32.xlu2 %v3403_v62, %s5462_s25 }
 0x446   : > { %v3161_v47 = vpop.permute.xlu2 %3160 }
 0x448   : > { %3168 = vrot.lane.b32.xlu1 %v3152_v33, %s5472_s22 }
 0x44b   : > { %v3271_v16 = vpop.f32.mrf.mxu1 }
 0x44c   : > { %v3272_v28 = vadd.f32 %v7651_v50, %v3271_v16 }
 0x44e   : > { %v3291_v17 = vmax.f32 %v3272_v28, 0.0  ;;  %v2926_v7 = vpop.permute.xlu2 %2925 }
 0x450   : > { %3311 = vst.msk [vmem:[#allocation3 + $0x11] sm:$0xff] %vm282_vm6, %v3291_v17  ;;  %3499 = vrot.lane.b32.xlu1 %v3483_v21, %s5464_s27 }
 0x453   : > { %v3273_v12 = vpop.f32.mrf.mxu1 }
 0x454   : > { %v3274_v51 = vadd.f32 %v7651_v50, %v3273_v12 }
 0x456   : > { %v3292_v27 = vmax.f32 %v3274_v51, 0.0  ;;  %v2970_v43 = vpop.permute.xlu2 %2969 }
 0x457   : > { %v3321_v20 = vld [vmem:[#allocation3 + $0x10] sm:$0xff]  ;;  %v3322_v63 = vld [vmem:[#allocation3 + $0x18] sm:$0x3] }
 0x458   : > { %3312 = vst.msk [vmem:[#allocation3 + $0x21] sm:$0xff] %vm282_vm6, %v3292_v27  ;;  %v3454_v3 = vrot.slane %v3321_v20, 2  ;;  %v3455_v40 = vrot.slane %v3322_v63, 2  ;;  %v3374_v19 = vrot.slane %v3321_v20, 1  ;;  %v3375_v60 = vrot.slane %v3322_v63, 1 }
 0x459   : > { %v3340_v49 = vpack.c.bf16 %v3321_v20, %v3321_v20 }
 0x45a   : > { %v3081_v55 = vpop.permute.xlu1 %3080  ;;  %v3456_v24 = vsel %vm848_vm4, %v3454_v3, %v3455_v40  ;;  %v3376_v35 = vsel %vm542_vm1, %v3374_v19, %v3375_v60 }
 0x45b   : > { %3102 = vst.msk [vmem:[#allocation5 + $0xc] sm:$0xf] %vm3098_vm13, %v3081_v55  ;;  %v3484_v4 = vpack.c.bf16 %v3456_v24, %v3456_v24  ;;  %v3404_v5 = vpack.c.bf16 %v3376_v35, %v3376_v35 }
 0x45c   : > { %3348 = vst.msk [vmem:[#allocation5 + $0x4] sm:$0xf] %vm2763_vm10, %v3340_v49 }
 0x45d   : > { %3501 = vrot.lane.b32.xlu2 %v3484_v4, %s5464_s27  ;;  %3421 = vrot.lane.b32.xlu0 %v3404_v5, %s5462_s25 }
 0x45e   : > { %v3122_v8 = vpop.permute.xlu0 %3121  ;;  %v3048_v37 = vpop.permute.xlu2 %3047 }
 0x45f   : > { %3143 = vst.msk [vmem:[#allocation5 + $0xc] sm:$0xf] %vm3139_vm14, %v3122_v8  ;;  %v3323_v1 = vld [vmem:[#allocation3 + $0x20] sm:$0xff]  ;;  %v3324_v26 = vld [vmem:[#allocation3 + $0x28] sm:$0x3] }
 0x460   : > { %3182 = vst.msk [vmem:[#allocation5 + $0xc] sm:$0xf] %vm8552_vm2, %v3161_v47  ;;  %v3341_v44 = vpack.c.bf16 %v3323_v1, %v3323_v1  ;;  %v3457_v18 = vrot.slane %v3323_v1, 2  ;;  %v3458_v13 = vrot.slane %v3324_v26, 2  ;;  %v3377_v30 = vrot.slane %v3323_v1, 1  ;;  %vm8557_vm2 = vmmov %vm8556_vm0 }
 0x461   : > { %v3378_v15 = vrot.slane %v3324_v26, 1 }
 0x462   : > { %3542 = vrot.lane.b32.xlu1 %v3341_v44, %s5466_s29  ;;  %v3159_v41 = vpop.permute.xlu1 %3158  ;;  %v3459_v42 = vsel %vm848_vm4, %v3457_v18, %v3458_v13 }
 0x463   : > { %3181 = vst.msk [vmem:[#allocation5 + $0x8] sm:$0xf] %vm8553_vm3, %v3159_v41  ;;  %v3379_v59 = vsel %vm542_vm1, %v3377_v30, %v3378_v15  ;;  %v7677_v61 = vpack.c.bf16 %v3459_v42, %v3459_v42  ;;  %vm8558_vm3 = vmmov %vm8554_vm5 }
 0x464   : > { %v7679_v48 = vpack.c.bf16 %v3379_v59, %v3379_v59 }
 0x465   : > { %3580 = vrot.lane.b32.xlu2 %v3404_v5, %s5468_s6  ;;  %3540 = vrot.lane.b32.xlu0 %v3340_v49, %s5466_s29 }
 0x466   : > { %v2845_v25 = vpop.permute.xlu0 %2844  ;;  %v3085_v38 = vpop.permute.xlu2 %3084 }
 0x467   : > { %2865 = vst.msk [vmem:[#allocation5 + $0x10] sm:$0xf] %vm2860_vm7, %v2845_v25  ;;  %v5387_v53 = vld [vmem:[#allocation5 + $0x8] sm:$0xf0] }
 0x468   : > { %2946 = vst.msk [vmem:[#allocation5 + $0x10] sm:$0xf] %vm2941_vm8, %v2926_v7 }
 0x46a   : > { %v5192_v2 = vld [vmem:[#allocation5 + $0x8] sm:$0xf]  ;;  %3618 = vrot.lane.b32.xlu1 %v3484_v4, %s5469_s15  ;;  %v2847_v56 = vpop.permute.xlu1 %2846 }
 0x46b   : > { %3349 = vst.msk [vmem:[#allocation5 + $0x8] sm:$0xf] %vm2763_vm10, %v3341_v44  ;;  %v5193_v54 = vor.u32 %v5387_v53, %v5192_v2 }
 0x46c   : > { %2866 = vst.msk [vmem:[#allocation5 + $0x14] sm:$0xf] %vm2860_vm7, %v2847_v56 }
 0x46d   : > { %3620 = vrot.lane.b32.xlu2 %v7677_v61, %s5469_s15  ;;  %3582 = vrot.lane.b32.xlu0 %v7679_v48, %s5468_s6 }
 0x46e   : > { %v2928_v23 = vpop.permute.xlu0 %2927  ;;  %v3163_v57 = vpop.permute.xlu2 %3162  ;;  %5219 = vmatmul.msk.bf16.gmra.mxu1 %vm3245_vm12, %v5193_v54 }
 0x46f   : > { %2947 = vst.msk [vmem:[#allocation5 + $0x14] sm:$0xf] %vm2941_vm8, %v2928_v23 }
 0x470   : > { %2989 = vst.msk [vmem:[#allocation5 + $0x14] sm:$0xf] %vm2983_vm9, %v2970_v43 }
 0x472   : > { %v2968_v14 = vpop.permute.xlu1 %2967 }
 0x473   : > { %2988 = vst.msk [vmem:[#allocation5 + $0x10] sm:$0xf] %vm2983_vm9, %v2968_v14 }
 0x475   : > { %3692 = vrot.lane.b32.xlu2 %v7679_v48, %s5471_s17  ;;  %3652 = vrot.lane.b32.xlu0 %v3341_v44, %s5470_s16 }
 0x476   : > { %v3009_v62 = vpop.permute.xlu0 %3008  ;;  %v2851_v58 = vpop.permute.xlu2 %2850 }
 0x477   : > { %3029 = vst.msk [vmem:[#allocation5 + $0x10] sm:$0xf] %vm3024_vm11, %v3009_v62 }
 0x478   : > { %3068 = vst.msk [vmem:[#allocation5 + $0x10] sm:$0xf] %vm8554_vm5, %v3048_v37  ;;  %vm8559_vm5 = vmmov %vm8558_vm3 }
 0x479   : > { %2868 = vst.msk [vmem:[#allocation5 + $0x1c] sm:$0xf] %vm2860_vm7, %v2851_v58 }
 0x47a   : > { %v3011_v33 = vpop.permute.xlu1 %3010 }
 0x47b   : > { %3030 = vst.msk [vmem:[#allocation5 + $0x14] sm:$0xf] %vm3024_vm11, %v3011_v33 }
 0x47e   : > { %v3050_v11 = vpop.permute.xlu0 %3049  ;;  %v2972_v36 = vpop.permute.xlu2 %2971 }
 0x47f   : > { %3069 = vst.msk [vmem:[#allocation5 + $0x14] sm:$0xf] %vm8555_vm15, %v3050_v11  ;;  %vm8560_vm15 = vmmov %vm8556_vm0 }
 0x480   : > { %3104 = vst.msk [vmem:[#allocation5 + $0x14] sm:$0xf] %vm3098_vm13, %v3085_v38 }
 0x482   : > { %v3083_v47 = vpop.permute.xlu1 %3082 }
 0x483   : > { %3103 = vst.msk [vmem:[#allocation5 + $0x10] sm:$0xf] %vm3098_vm13, %v3083_v47 }
 0x486   : > { %v3124_v31 = vpop.permute.xlu0 %3123  ;;  %v3015_v16 = vpop.permute.xlu2 %3014 }
 0x487   : > { %3144 = vst.msk [vmem:[#allocation5 + $0x10] sm:$0xf] %vm3139_vm14, %v3124_v31 }
 0x488   : > { %3183 = vst.msk [vmem:[#allocation5 + $0x10] sm:$0xf] %vm8556_vm0, %v3163_v57 }
 0x48a   : > { %v3126_v28 = vpop.permute.xlu1 %3125 }
 0x48b   : > { %3145 = vst.msk [vmem:[#allocation5 + $0x14] sm:$0xf] %vm3139_vm14, %v3126_v28 }
 0x48e   : > { %v3165_v21 = vpop.permute.xlu0 %3164  ;;  %v3087_v17 = vpop.permute.xlu2 %3086 }
 0x48f   : > { %3184 = vst.msk [vmem:[#allocation5 + $0x14] sm:$0xf] %vm8557_vm2, %v3165_v21  ;;  %v5196_v12 = vld [vmem:[#allocation5 + $0x10] sm:$0xf]  ;;  %vm8561_vm2 = vmmov %vm8558_vm3 }
 0x492   : > { %v2849_v7 = vpop.permute.xlu1 %2848 }
 0x493   : > { %2867 = vst.msk [vmem:[#allocation5 + $0x18] sm:$0xf] %vm2860_vm7, %v2849_v7  ;;  %v5230_v7 = vld [vmem:[%s8385_s3 + $0x44] sm:$0xf] }
 0x496   : > { %v5388_v51 = vld [vmem:[#allocation5 + $0x10] sm:$0xf0]  ;;  %v2930_v27 = vpop.permute.xlu0 %2929  ;;  %v3130_v43 = vpop.permute.xlu2 %3129 }
 0x497   : > { %2948 = vst.msk [vmem:[#allocation5 + $0x18] sm:$0xf] %vm2941_vm8, %v2930_v27  ;;  %v5197_v20 = vor.u32 %v5388_v51, %v5196_v12  ;;  %v3810_v12 = vunpack.c.l.b16 %v5230_v7 }
 0x498   : > { %2990 = vst.msk [vmem:[#allocation5 + $0x18] sm:$0xf] %vm2983_vm9, %v2972_v36 }
 0x499   : > { %5220 = vmatmul.msk.bf16.gmra.mxu1 %vm3245_vm12, %v5197_v20  ;;  %v3815_v51 = vpack.c.b16 %v3810_v12, %v3810_v12 }
 0x49a   : > { %v2932_v63 = vpop.permute.xlu1 %2931 }
 0x49b   : > { %2949 = vst.msk [vmem:[#allocation5 + $0x1c] sm:$0xf] %vm2941_vm8, %v2932_v63 }
 0x49e   : > { %v2974_v3 = vpop.permute.xlu0 %2973  ;;  %v3420_v40 = vpop.permute.xlu2 %3419 }
 0x49f   : > { %2991 = vst.msk [vmem:[#allocation5 + $0x1c] sm:$0xf] %vm2983_vm9, %v2974_v3 }
 0x4a0   : > { %3032 = vst.msk [vmem:[#allocation5 + $0x1c] sm:$0xf] %vm3024_vm11, %v3015_v16 }
 0x4a1   : > { %3443 = vst.msk [vmem:[#allocation5] sm:$0xf] %vm2860_vm7, %v3420_v40 }
 0x4a2   : > { %v3013_v19 = vpop.permute.xlu1 %3012 }
 0x4a3   : > { %3031 = vst.msk [vmem:[#allocation5 + $0x18] sm:$0xf] %vm3024_vm11, %v3013_v19  ;;  %v5393_v19 = vld [vmem:[%s8385_s3 + $0x3c] sm:$0xff] }
 0x4a6   : > { %v3052_v60 = vpop.permute.xlu0 %3051 }
 0x4a7   : > { %3070 = vst.msk [vmem:[#allocation5 + $0x18] sm:$0xf] %vm8558_vm3, %v3052_v60  ;;  %vm8562_vm3 = vmmov %vm8561_vm2 }
 0x4a8   : > { %3105 = vst.msk [vmem:[#allocation5 + $0x18] sm:$0xf] %vm3098_vm13, %v3087_v17 }
 0x4aa   : > { %v3054_v49 = vpop.permute.xlu1 %3053 }
 0x4ab   : > { %3071 = vst.msk [vmem:[#allocation5 + $0x1c] sm:$0xf] %vm8559_vm5, %v3054_v49  ;;  %vm8563_vm5 = vcmask 1043456  }
 0x4ac   : > { %v3833_v27 = vsel %vm8563_vm5, %v3815_v51, 0  ;;  %vm8566_vm5 = vmmov %vm8556_vm0 }
 0x4ad   : > { %3838 = vmatpush.bf16.msrb.mxu2 %v3833_v27  ;;  %5417 = vmatpush.bf16.msra.mxu3 %v3833_v27 }
 0x4ae   : > { %v3089_v55 = vpop.permute.xlu0 %3088 }
 0x4af   : > { %3106 = vst.msk [vmem:[#allocation5 + $0x1c] sm:$0xf] %vm3098_vm13, %v3089_v55 }
 0x4b0   : > { %3147 = vst.msk [vmem:[#allocation5 + $0x1c] sm:$0xf] %vm3139_vm14, %v3130_v43 }
 0x4b1   : > { %3839 = vmatpush.bf16.msrb.mxu2 %v5393_v19  ;;  %5418 = vmatpush.bf16.msra.mxu3 %v5393_v19 }
 0x4b2   : > { %v3128_v24 = vpop.permute.xlu1 %3127 }
 0x4b3   : > { %3146 = vst.msk [vmem:[#allocation5 + $0x18] sm:$0xf] %vm3139_vm14, %v3128_v24 }
 0x4b6   : > { %v3167_v35 = vpop.permute.xlu0 %3166 }
 0x4b7   : > { %3185 = vst.msk [vmem:[#allocation5 + $0x18] sm:$0xf] %vm8560_vm15, %v3167_v35  ;;  %v3502_v44 = vpop.permute.xlu2 %3501  ;;  %vm8564_vm15 = vmmov %vm8556_vm0 }
 0x4ba   : > { %v3169_v4 = vpop.permute.xlu1 %3168 }
 0x4bb   : > { %3186 = vst.msk [vmem:[#allocation5 + $0x1c] sm:$0xf] %vm8556_vm0, %v3169_v4 }
 0x4be   : > { %v5200_v5 = vld [vmem:[#allocation5 + $0x18] sm:$0xf] }
 0x4bf   : > { %v3581_v41 = vpop.permute.xlu2 %3580 }
 0x4c2   : > { %v5389_v8 = vld [vmem:[#allocation5 + $0x18] sm:$0xf0]  ;;  %v3500_v37 = vpop.permute.xlu1 %3499 }
 0x4c3   : > { %v5201_v1 = vor.u32 %v5389_v8, %v5200_v5  ;;  %3523 = vst.msk [vmem:[#allocation5] sm:$0xf] %vm2941_vm8, %v3500_v37 }
 0x4c5   : > { %5221 = vmatmul.msk.bf16.gmra.mxu1 %vm3245_vm12, %v5201_v1 }
 0x4c7   : > { %v3621_v15 = vpop.permute.xlu2 %3620 }
 0x4cf   : > { %v3422_v26 = vpop.permute.xlu0 %3421  ;;  %v3693_v42 = vpop.permute.xlu2 %3692 }
 0x4d0   : > { %3444 = vst.msk [vmem:[#allocation5 + $0x4] sm:$0xf] %vm2860_vm7, %v3422_v26 }
 0x4d1   : > { %3524 = vst.msk [vmem:[#allocation5 + $0x4] sm:$0xf] %vm2941_vm8, %v3502_v44 }
 0x4d4   : > { %v3543_v18 = vpop.permute.xlu1 %3542 }
 0x4d5   : > { %3565 = vst.msk [vmem:[#allocation5 + $0x4] sm:$0xf] %vm2983_vm9, %v3543_v18 }
 0x4d7   : > { %v3541_v13 = vpop.permute.xlu0 %3540 }
 0x4d8   : > { %3564 = vst.msk [vmem:[#allocation5] sm:$0xf] %vm2983_vm9, %v3541_v13 }
 0x4d9   : > { %3604 = vst.msk [vmem:[#allocation5] sm:$0xf] %vm3024_vm11, %v3581_v41 }
 0x4dc   : > { %v3619_v30 = vpop.permute.xlu1 %3618 }
 0x4dd   : > { %3642 = vst.msk [vmem:[#allocation5] sm:$0xf] %vm8561_vm2, %v3619_v30 }
 0x4df   : > { %v3583_v25 = vpop.permute.xlu0 %3582 }
 0x4e0   : > { %3605 = vst.msk [vmem:[#allocation5 + $0x4] sm:$0xf] %vm3024_vm11, %v3583_v25 }
 0x4e1   : > { %3643 = vst.msk [vmem:[#allocation5 + $0x4] sm:$0xf] %vm8562_vm3, %v3621_v15  ;;  %vm8565_vm3 = vmmov %vm8561_vm2 }
 0x4e7   : > { %v3653_v38 = vpop.permute.xlu0 %3652 }
 0x4e8   : > { %3676 = vst.msk [vmem:[#allocation5] sm:$0xf] %vm3098_vm13, %v3653_v38 }
 0x4e9   : > { %3716 = vst.msk [vmem:[#allocation5] sm:$0xf] %vm3139_vm14, %v3693_v42 }
 0x4eb   : > { %v3276_v59 = vpop.f32.mrf.mxu1 }
 0x4ec   : > { %v3277_v53 = vadd.f32 %v7651_v50, %v3276_v59 }
 0x4ee   : > { %v3293_v2 = vmax.f32 %v3277_v53, 0.0  ;;  %v5392_v53 = vld [vmem:[%s8385_s3 + $0x34] sm:$0xff] }
 0x4ef   : > { %3840 = vmatpush.bf16.msrb.mxu2 %v5392_v53  ;;  %5419 = vmatpush.bf16.msra.mxu3 %v5392_v53 }
 0x4f0   : > { %3313 = vst.msk [vmem:[#allocation3 + $0x31] sm:$0xff] %vm282_vm6, %v3293_v2 }
 0x4f3   : > { %v3278_v56 = vpop.f32.mrf.mxu1 }
 0x4f4   : > { %v3279_v54 = vadd.f32 %v7651_v50, %v3278_v56 }
 0x4f6   : > { %v3294_v23 = vmax.f32 %v3279_v54, 0.0 }
 0x4f7   : > { %v3325_v57 = vld [vmem:[#allocation3 + $0x30] sm:$0xff]  ;;  %v3326_v14 = vld [vmem:[#allocation3 + $0x38] sm:$0x3] }
 0x4f8   : > { %3314 = vst.msk [vmem:[#allocation3 + $0x41] sm:$0xff] %vm282_vm6, %v3294_v23  ;;  %v3342_v62 = vpack.c.bf16 %v3325_v57, %v3325_v57  ;;  %v3460_v58 = vrot.slane %v3325_v57, 2  ;;  %v3461_v33 = vrot.slane %v3326_v14, 2  ;;  %v3380_v11 = vrot.slane %v3325_v57, 1 }
 0x4f9   : > { %v3381_v36 = vrot.slane %v3326_v14, 1 }
 0x4fa   : > { %3654 = vrot.lane.b32.xlu1 %v3342_v62, %s5470_s16  ;;  %3350 = vst.msk [vmem:[#allocation5 + $0xc] sm:$0xf] %vm2763_vm10, %v3342_v62  ;;  %v3462_v47 = vsel %vm848_vm4, %v3460_v58, %v3461_v33  ;;  %v5391_v58 = vld [vmem:[%s8385_s3 + $0x2c] sm:$0xff] }
 0x4fb   : > { %v3486_v31 = vpack.c.bf16 %v3462_v47, %v3462_v47  ;;  %v3382_v16 = vsel %vm542_vm1, %v3380_v11, %v3381_v36  ;;  %3841 = vmatpush.bf16.msrb.mxu2 %v5391_v58  ;;  %5420 = vmatpush.bf16.msra.mxu3 %v5391_v58 }
 0x4fc   : > { %v3406_v28 = vpack.c.bf16 %v3382_v16, %v3382_v16 }
 0x4fd   : > { %3732 = vrot.lane.b32.xlu2 %v3486_v31, %s5472_s22 }
 0x4fe   : > { %3694 = vrot.lane.b32.xlu0 %v3406_v28, %s5471_s17 }
 0x4ff   : > { %v3327_v21 = vld [vmem:[#allocation3 + $0x40] sm:$0xff]  ;;  %v3328_v43 = vld [vmem:[#allocation3 + $0x48] sm:$0x3] }
 0x500   : > { %v3343_v17 = vpack.c.bf16 %v3327_v21, %v3327_v21  ;;  %v3383_v20 = vrot.slane %v3327_v21, 1  ;;  %v3384_v63 = vrot.slane %v3328_v43, 1  ;;  %v3464_v3 = vrot.slane %v3328_v43, 2 }
 0x502   : > { %3730 = vrot.lane.b32.xlu1 %v7677_v61, %s5472_s22  ;;  %3351 = vst.msk [vmem:[#allocation5 + $0x10] sm:$0xf] %vm2763_vm10, %v3343_v17 }
 0x505   : > { %3503 = vrot.lane.b32.xlu2 %v7677_v61, %s5464_s27  ;;  %v3385_v61 = vsel %vm542_vm1, %v3383_v20, %v3384_v63 }
 0x506   : > { %3423 = vrot.lane.b32.xlu0 %v7679_v48, %s5462_s25  ;;  %v3463_v48 = vrot.slane %v3327_v21, 2  ;;  %v3407_v49 = vpack.c.bf16 %v3385_v61, %v3385_v61 }
 0x508   : > { %v3465_v24 = vsel %vm848_vm4, %v3463_v48, %v3464_v3 }
 0x509   : > { %v3487_v35 = vpack.c.bf16 %v3465_v24, %v3465_v24 }
 0x50a   : > { %3425 = vrot.lane.b32.xlu1 %v3406_v28, %s5462_s25 }
 0x50d   : > { %3546 = vrot.lane.b32.xlu2 %v3343_v17, %s5466_s29 }
 0x50e   : > { %3505 = vrot.lane.b32.xlu0 %v3486_v31, %s5464_s27 }
 0x512   : > { %3544 = vrot.lane.b32.xlu1 %v3342_v62, %s5466_s29 }
 0x515   : > { %3622 = vrot.lane.b32.xlu2 %v3486_v31, %s5469_s15 }
 0x516   : > { %3584 = vrot.lane.b32.xlu0 %v3406_v28, %s5468_s6  ;;  %v3281_v40 = vpop.f32.mrf.mxu1 }
 0x517   : > { %v3282_v60 = vadd.f32 %v7651_v50, %v3281_v40  ;;  %v5390_v40 = vld [vmem:[%s8385_s3 + $0x24] sm:$0xff] }
 0x518   : > { %3842 = vmatpush.bf16.msrb.mxu2 %v5390_v40  ;;  %5421 = vmatpush.bf16.msra.mxu3 %v5390_v40 }
 0x519   : > { %v3295_v55 = vmax.f32 %v3282_v60, 0.0 }
 0x51a   : > { %3586 = vrot.lane.b32.xlu1 %v3407_v49, %s5468_s6 }
 0x51b   : > { %3315 = vst.msk [vmem:[#allocation3 + $0x51] sm:$0xff] %vm282_vm6, %v3295_v55 }
 0x51e   : > { %3624 = vrot.lane.b32.xlu0 %v3487_v35, %s5469_s15  ;;  %v3283_v4 = vpop.f32.mrf.mxu1 }
 0x51f   : > { %v3284_v5 = vadd.f32 %v7651_v50, %v3283_v4 }
 0x521   : > { %v3296_v8 = vmax.f32 %v3284_v5, 0.0 }
 0x522   : > { %3656 = vrot.lane.b32.xlu1 %v3343_v17, %s5470_s16  ;;  %v3329_v37 = vld [vmem:[#allocation3 + $0x50] sm:$0xff]  ;;  %v3330_v1 = vld [vmem:[#allocation3 + $0x58] sm:$0x3] }
 0x523   : > { %3316 = vst.msk [vmem:[#allocation3 + $0x61] sm:$0xff] %vm282_vm6, %v3296_v8  ;;  %v3344_v44 = vpack.c.bf16 %v3329_v37, %v3329_v37  ;;  %v3386_v26 = vrot.slane %v3329_v37, 1  ;;  %v3387_v41 = vrot.slane %v3330_v1, 1  ;;  %v3466_v13 = vrot.slane %v3329_v37, 2 }
 0x524   : > { %v3467_v30 = vrot.slane %v3330_v1, 2 }
 0x525   : > { %3658 = vrot.lane.b32.xlu2 %v3344_v44, %s5470_s16  ;;  %3352 = vst.msk [vmem:[#allocation5 + $0x14] sm:$0xf] %vm2763_vm10, %v3344_v44  ;;  %v3388_v18 = vsel %vm542_vm1, %v3386_v26, %v3387_v41 }
 0x526   : > { %3696 = vrot.lane.b32.xlu0 %v3407_v49, %s5471_s17  ;;  %v3408_v15 = vpack.c.bf16 %v3388_v18, %v3388_v18  ;;  %v3468_v25 = vsel %vm848_vm4, %v3466_v13, %v3467_v30  ;;  %v3338_v13 = vld [vmem:[#allocation3 + $0x98] sm:$0x3] }
 0x527   : > { %v3488_v59 = vpack.c.bf16 %v3468_v25, %v3468_v25 }
 0x52a   : > { %3698 = vrot.lane.b32.xlu1 %v3408_v15, %s5471_s17  ;;  %v3331_v38 = vld [vmem:[#allocation3 + $0x60] sm:$0xff]  ;;  %v3332_v2 = vld [vmem:[#allocation3 + $0x68] sm:$0x3] }
 0x52b   : > { %v3345_v42 = vpack.c.bf16 %v3331_v38, %v3331_v38  ;;  %v3389_v56 = vrot.slane %v3331_v38, 1  ;;  %v3390_v54 = vrot.slane %v3332_v2, 1  ;;  %v3469_v57 = vrot.slane %v3331_v38, 2  ;;  %v7831_v38 = vld [vmem:[#allocation3] sm:$0xff] }
 0x52c   : > { %v3470_v14 = vrot.slane %v3332_v2, 2 }
 0x52d   : > { %3734 = vrot.lane.b32.xlu2 %v3487_v35, %s5472_s22  ;;  %3353 = vst.msk [vmem:[#allocation5 + $0x18] sm:$0xf] %vm2763_vm10, %v3345_v42  ;;  %v3391_v23 = vsel %vm542_vm1, %v3389_v56, %v3390_v54 }
 0x52e   : > { %3736 = vrot.lane.b32.xlu0 %v3488_v59, %s5472_s22  ;;  %v3409_v11 = vpack.c.bf16 %v3391_v23, %v3391_v23  ;;  %v3471_v47 = vsel %vm848_vm4, %v3469_v57, %v3470_v14 }
 0x52f   : > { %v3489_v31 = vpack.c.bf16 %v3471_v47, %v3471_v47 }
 0x532   : > { %3427 = vrot.lane.b32.xlu1 %v3407_v49, %s5462_s25 }
 0x535   : > { %3429 = vrot.lane.b32.xlu2 %v3408_v15, %s5462_s25 }
 0x536   : > { %3507 = vrot.lane.b32.xlu0 %v3487_v35, %s5464_s27 }
 0x53a   : > { %3509 = vrot.lane.b32.xlu1 %v3488_v59, %s5464_s27 }
 0x53d   : > { %3548 = vrot.lane.b32.xlu2 %v3344_v44, %s5466_s29 }
 0x53e   : > { %3550 = vrot.lane.b32.xlu0 %v3345_v42, %s5466_s29 }
 0x542   : > { %3588 = vrot.lane.b32.xlu1 %v3408_v15, %s5468_s6  ;;  %v3286_v62 = vpop.f32.mrf.mxu1  ;;  %v3687_v15 = vrot.slane %v3338_v13, 1 }
 0x543   : > { %v3287_v33 = vadd.f32 %v7651_v50, %v3286_v62 }
 0x544   : > { %v3688_v53 = vsel %vm542_vm1, %v3109_v9, %v3687_v15  ;;  %v3725_v9 = vrot.slane %v3338_v13, 2 }
 0x545   : > { %v3297_v36 = vmax.f32 %v3287_v33, 0.0  ;;  %3590 = vrot.lane.b32.xlu2 %v3409_v11, %s5468_s6  ;;  %v3690_v57 = vpack.c.bf16 %v3688_v53, %v3688_v53  ;;  %v3901_v53 = vld [vmem:[#allocation3 + $0x8] sm:$0x3] }
 0x546   : > { %3626 = vrot.lane.b32.xlu0 %v3488_v59, %s5469_s15  ;;  %v3920_v59 = vpack.c.bf16 %v7831_v38, %v7831_v38 }
 0x547   : > { %3317 = vst.msk [vmem:[#allocation3 + $0x71] sm:$0xff] %vm282_vm6, %v3297_v36 }
 0x54a   : > { %3628 = vrot.lane.b32.xlu1 %v3489_v31, %s5469_s15  ;;  %v3288_v16 = vpop.f32.mrf.mxu1 }
 0x54b   : > { %v3289_v28 = vadd.f32 %v7651_v50, %v3288_v16 }
 0x54d   : > { %v3298_v21 = vmax.f32 %v3289_v28, 0.0  ;;  %3660 = vrot.lane.b32.xlu2 %v3345_v42, %s5470_s16 }
 0x54e   : > { %v3333_v17 = vld [vmem:[#allocation3 + $0x70] sm:$0xff]  ;;  %v3334_v7 = vld [vmem:[#allocation3 + $0x78] sm:$0x3] }
 0x54f   : > { %3318 = vst.msk [vmem:[#allocation3 + $0x81] sm:$0xff] %vm282_vm6, %v3298_v21  ;;  %v3346_v12 = vpack.c.bf16 %v3333_v17, %v3333_v17  ;;  %v3392_v51 = vrot.slane %v3333_v17, 1  ;;  %v3393_v27 = vrot.slane %v3334_v7, 1  ;;  %v3472_v20 = vrot.slane %v3333_v17, 2 }
 0x550   : > { %v3473_v63 = vrot.slane %v3334_v7, 2 }
 0x551   : > { %3662 = vrot.lane.b32.xlu0 %v3346_v12, %s5470_s16  ;;  %3354 = vst.msk [vmem:[#allocation5 + $0x1c] sm:$0xf] %vm2763_vm10, %v3346_v12  ;;  %v3394_v43 = vsel %vm542_vm1, %v3392_v51, %v3393_v27 }
 0x552   : > { %3700 = vrot.lane.b32.xlu1 %v3409_v11, %s5471_s17  ;;  %v3410_v50 = vpack.c.bf16 %v3394_v43, %v3394_v43  ;;  %v3474_v61 = vsel %vm848_vm4, %v3472_v20, %v3473_v63 }
 0x553   : > { %v3490_v48 = vpack.c.bf16 %v3474_v61, %v3474_v61 }
 0x555   : > { %3702 = vrot.lane.b32.xlu2 %v3410_v50, %s5471_s17 }
 0x556   : > { %v3335_v60 = vld [vmem:[#allocation3 + $0x80] sm:$0xff]  ;;  %v3336_v49 = vld [vmem:[#allocation3 + $0x88] sm:$0x3] }
 0x557   : > { %v3733_v3 = vpop.permute.xlu2 %3732  ;;  %v3531_v55 = vpack.c.bf16 %v3335_v60, %v3335_v60  ;;  %v3574_v24 = vrot.slane %v3335_v60, 1  ;;  %v3575_v35 = vrot.slane %v3336_v49, 1  ;;  %v3612_v8 = vrot.slane %v3335_v60, 2 }
 0x558   : > { %v3613_v37 = vrot.slane %v3336_v49, 2 }
 0x559   : > { %3738 = vrot.lane.b32.xlu0 %v3489_v31, %s5472_s22  ;;  %v3576_v5 = vsel %vm542_vm1, %v3574_v24, %v3575_v35 }
 0x55a   : > { %3740 = vrot.lane.b32.xlu1 %v3490_v48, %s5472_s22  ;;  %v3578_v44 = vpack.c.bf16 %v3576_v5, %v3576_v5  ;;  %v3614_v41 = vsel %vm848_vm4, %v3612_v8, %v3613_v37 }
 0x55b   : > { %v3616_v18 = vpack.c.bf16 %v3614_v41, %v3614_v41 }
 0x55d   : > { %3431 = vrot.lane.b32.xlu2 %v3409_v11, %s5462_s25 }
 0x55f   : > { %v3504_v19 = vpop.permute.xlu2 %3503 }
 0x561   : > { %3433 = vrot.lane.b32.xlu0 %v3410_v50, %s5462_s25 }
 0x562   : > { %3511 = vrot.lane.b32.xlu1 %v3489_v31, %s5464_s27 }
 0x565   : > { %3513 = vrot.lane.b32.xlu2 %v3490_v48, %s5464_s27 }
 0x567   : > { %v3547_v1 = vpop.permute.xlu2 %3546 }
 0x569   : > { %3552 = vrot.lane.b32.xlu0 %v3346_v12, %s5466_s29 }
 0x56a   : > { %3554 = vrot.lane.b32.xlu1 %v3531_v55, %s5466_s29 }
 0x56c   : > { %v3655_v4 = vpop.permute.xlu1 %3654 }
 0x56d   : > { %3677 = vst.msk [vmem:[#allocation5 + $0x4] sm:$0xf] %vm3098_vm13, %v3655_v4  ;;  %3592 = vrot.lane.b32.xlu2 %v3410_v50, %s5468_s6 }
 0x56f   : > { %v3623_v25 = vpop.permute.xlu2 %3622 }
 0x570   : > { %v3695_v26 = vpop.permute.xlu0 %3694 }
 0x571   : > { %3717 = vst.msk [vmem:[#allocation5 + $0x4] sm:$0xf] %vm3139_vm14, %v3695_v26  ;;  %3594 = vrot.lane.b32.xlu0 %v3578_v44, %s5468_s6 }
 0x572   : > { %3755 = vst.msk [vmem:[#allocation5 + $0x4] sm:$0xf] %vm8564_vm15, %v3733_v3  ;;  %3630 = vrot.lane.b32.xlu1 %v3490_v48, %s5469_s15  ;;  %vm8567_vm15 = vmmov %vm8556_vm0 }
 0x574   : > { %v3731_v30 = vpop.permute.xlu1 %3730 }
 0x575   : > { %3754 = vst.msk [vmem:[#allocation5] sm:$0xf] %vm8556_vm0, %v3731_v30  ;;  %3632 = vrot.lane.b32.xlu2 %v3616_v18, %s5469_s15  ;;  %vm8568_vm0 = vmmov %vm8561_vm2 }
 0x578   : > { %v3424_v42 = vpop.permute.xlu0 %3423 }
 0x579   : > { %3445 = vst.msk [vmem:[#allocation5 + $0x8] sm:$0xf] %vm2860_vm7, %v3424_v42  ;;  %3664 = vrot.lane.b32.xlu0 %v3531_v55, %s5470_s16  ;;  %v5394_v2 = vld [vmem:[#allocation5] sm:$0xf0] }
 0x57a   : > { %3525 = vst.msk [vmem:[#allocation5 + $0x8] sm:$0xf] %vm2941_vm8, %v3504_v19  ;;  %3666 = vrot.lane.b32.xlu1 %v7634_v39, %s5470_s16  ;;  %v3726_v39 = vsel %vm848_vm4, %v3148_v29, %v3725_v9 }
 0x57b   : > { %v3728_v33 = vpack.c.bf16 %v3726_v39, %v3726_v39 }
 0x57c   : > { %v5234_v56 = vld [vmem:[#allocation5] sm:$0xf]  ;;  %v3426_v54 = vpop.permute.xlu1 %3425 }
 0x57d   : > { %3928 = vst.msk [vmem:[#allocation5] sm:$0xf] %vm2763_vm10, %v3920_v59  ;;  %3704 = vrot.lane.b32.xlu2 %v3578_v44, %s5471_s17  ;;  %v5235_v23 = vor.u32 %v5394_v2, %v5234_v56  ;;  %v3952_v2 = vrot.slane %v7831_v38, 1  ;;  %v4032_v56 = vrot.slane %v7831_v38, 2 }
 0x57e   : > { %3446 = vst.msk [vmem:[#allocation5 + $0xc] sm:$0xf] %vm2860_vm7, %v3426_v54  ;;  %v3953_v54 = vrot.slane %v3901_v53, 1 }
 0x57f   : > { %v3659_v14 = vpop.permute.xlu2 %3658  ;;  %5264 = vmatmul.msk.bf16.vlgmr.msrb.gmra.mxu2 %vm3245_vm12, %v5235_v23  ;;  %v4033_v23 = vrot.slane %v3901_v53, 2 }
 0x580   : > { %v3506_v62 = vpop.permute.xlu0 %3505  ;;  %v3954_v9 = vsel %vm542_vm1, %v3952_v2, %v3953_v54 }
 0x581   : > { %3526 = vst.msk [vmem:[#allocation5 + $0xc] sm:$0xf] %vm2941_vm8, %v3506_v62  ;;  %3706 = vrot.lane.b32.xlu0 %v3690_v57, %s5471_s17  ;;  %v4034_v39 = vsel %vm848_vm4, %v4032_v56, %v4033_v23 }
 0x582   : > { %3567 = vst.msk [vmem:[#allocation5 + $0xc] sm:$0xf] %vm2983_vm9, %v3547_v1  ;;  %3742 = vrot.lane.b32.xlu1 %v3616_v18, %s5472_s22 }
 0x584   : > { %v3545_v58 = vpop.permute.xlu1 %3544 }
 0x585   : > { %3566 = vst.msk [vmem:[#allocation5 + $0x8] sm:$0xf] %vm2983_vm9, %v3545_v58  ;;  %3744 = vrot.lane.b32.xlu2 %v3728_v33, %s5472_s22  ;;  %v3984_v58 = vpack.c.bf16 %v3954_v9, %v3954_v9  ;;  %v4064_v33 = vpack.c.bf16 %v4034_v39, %v4034_v39 }
 0x587   : > { %v3735_v11 = vpop.permute.xlu2 %3734 }
 0x588   : > { %v3585_v36 = vpop.permute.xlu0 %3584 }
 0x589   : > { %3606 = vst.msk [vmem:[#allocation5 + $0x8] sm:$0xf] %vm3024_vm11, %v3585_v36  ;;  %4000 = vrot.lane.b32.xlu0 %v3984_v58, %s5462_s25 }
 0x58a   : > { %3644 = vst.msk [vmem:[#allocation5 + $0x8] sm:$0xf] %vm8561_vm2, %v3623_v25  ;;  %vm8569_vm2 = vmmov %vm8568_vm0 }
 0x58c   : > { %v3587_v47 = vpop.permute.xlu1 %3586 }
 0x58d   : > { %3607 = vst.msk [vmem:[#allocation5 + $0xc] sm:$0xf] %vm3024_vm11, %v3587_v47  ;;  %4080 = vrot.lane.b32.xlu2 %v4064_v33, %s5464_s27  ;;  %v7909_v47 = vld [vmem:[%s8386_s4 + $0x1] ss:$0 sm:$0xff] }
 0x58f   : > { %v3430_v31 = vpop.permute.xlu2 %3429 }
 0x590   : > { %3448 = vst.msk [vmem:[#allocation5 + $0x14] sm:$0xf] %vm2860_vm7, %v3430_v31  ;;  %v3625_v46 = vpop.permute.xlu0 %3624 }
 0x591   : > { %3645 = vst.msk [vmem:[#allocation5 + $0xc] sm:$0xf] %vm8565_vm3, %v3625_v46  ;;  %vm8570_vm3 = vmmov %vm8566_vm5 }
 0x592   : > { %3679 = vst.msk [vmem:[#allocation5 + $0xc] sm:$0xf] %vm3098_vm13, %v3659_v14 }
 0x594   : > { %v3657_v29 = vpop.permute.xlu1 %3656 }
 0x595   : > { %3678 = vst.msk [vmem:[#allocation5 + $0x8] sm:$0xf] %vm3098_vm13, %v3657_v29 }
 0x597   : > { %v3549_v16 = vpop.permute.xlu2 %3548 }
 0x598   : > { %v3697_v28 = vpop.permute.xlu0 %3696 }
 0x599   : > { %3718 = vst.msk [vmem:[#allocation5 + $0x8] sm:$0xf] %vm3139_vm14, %v3697_v28 }
 0x59a   : > { %3756 = vst.msk [vmem:[#allocation5 + $0x8] sm:$0xf] %vm8566_vm5, %v3735_v11  ;;  %vm8571_vm5 = vmmov %vm8570_vm3 }
 0x59c   : > { %v3699_v21 = vpop.permute.xlu1 %3698 }
 0x59d   : > { %3719 = vst.msk [vmem:[#allocation5 + $0xc] sm:$0xf] %vm3139_vm14, %v3699_v21 }
 0x59f   : > { %v3591_v17 = vpop.permute.xlu2 %3590 }
 0x5a0   : > { %v3737_v7 = vpop.permute.xlu0 %3736 }
 0x5a1   : > { %3757 = vst.msk [vmem:[#allocation5 + $0xc] sm:$0xf] %vm8567_vm15, %v3737_v7  ;;  %v5238_v27 = vld [vmem:[#allocation5 + $0x8] sm:$0xf]  ;;  %vm8572_vm15 = vmmov %vm8568_vm0 }
 0x5a4   : > { %v3428_v12 = vpop.permute.xlu1 %3427 }
 0x5a5   : > { %3447 = vst.msk [vmem:[#allocation5 + $0x10] sm:$0xf] %vm2860_vm7, %v3428_v12 }
 0x5a7   : > { %v3661_v51 = vpop.permute.xlu2 %3660 }
 0x5a8   : > { %v5395_v43 = vld [vmem:[#allocation5 + $0x8] sm:$0xf0]  ;;  %v3508_v20 = vpop.permute.xlu0 %3507 }
 0x5a9   : > { %3527 = vst.msk [vmem:[#allocation5 + $0x10] sm:$0xf] %vm2941_vm8, %v3508_v20  ;;  %v5239_v63 = vor.u32 %v5395_v43, %v5238_v27 }
 0x5aa   : > { %3568 = vst.msk [vmem:[#allocation5 + $0x10] sm:$0xf] %vm2983_vm9, %v3549_v16 }
 0x5ab   : > { %5265 = vmatmul.msk.bf16.vlgmr.msra.gmra.mxu3 %vm3245_vm12, %v5239_v63 }
 0x5ac   : > { %v3510_v50 = vpop.permute.xlu1 %3509 }
 0x5ad   : > { %3528 = vst.msk [vmem:[#allocation5 + $0x14] sm:$0xf] %vm2941_vm8, %v3510_v50 }
 0x5af   : > { %v3703_v61 = vpop.permute.xlu2 %3702 }
 0x5b0   : > { %v3551_v48 = vpop.permute.xlu0 %3550 }
 0x5b1   : > { %3569 = vst.msk [vmem:[#allocation5 + $0x14] sm:$0xf] %vm2983_vm9, %v3551_v48 }
 0x5b2   : > { %3609 = vst.msk [vmem:[#allocation5 + $0x14] sm:$0xf] %vm3024_vm11, %v3591_v17 }
 0x5b4   : > { %v3589_v3 = vpop.permute.xlu1 %3588 }
 0x5b5   : > { %3608 = vst.msk [vmem:[#allocation5 + $0x10] sm:$0xf] %vm3024_vm11, %v3589_v3 }
 0x5b7   : > { %v3432_v40 = vpop.permute.xlu2 %3431 }
 0x5b8   : > { %3449 = vst.msk [vmem:[#allocation5 + $0x18] sm:$0xf] %vm2860_vm7, %v3432_v40  ;;  %v3627_v19 = vpop.permute.xlu0 %3626 }
 0x5b9   : > { %3646 = vst.msk [vmem:[#allocation5 + $0x10] sm:$0xf] %vm8568_vm0, %v3627_v19 }
 0x5ba   : > { %3680 = vst.msk [vmem:[#allocation5 + $0x10] sm:$0xf] %vm3098_vm13, %v3661_v51 }
 0x5bc   : > { %v3629_v60 = vpop.permute.xlu1 %3628 }
 0x5bd   : > { %3647 = vst.msk [vmem:[#allocation5 + $0x14] sm:$0xf] %vm8569_vm2, %v3629_v60  ;;  %vm8573_vm2 = vmmov %vm8570_vm3 }
 0x5bf   : > { %v3514_v4 = vpop.permute.xlu2 %3513 }
 0x5c3   : > { %v3663_v49 = vpop.permute.xlu0 %3662 }
 0x5c4   : > { %v3701_v55 = vpop.permute.xlu1 %3700  ;;  %3681 = vst.msk [vmem:[#allocation5 + $0x14] sm:$0xf] %vm3098_vm13, %v3663_v49 }
 0x5c5   : > { %3720 = vst.msk [vmem:[#allocation5 + $0x10] sm:$0xf] %vm3139_vm14, %v3701_v55 }
 0x5c6   : > { %3721 = vst.msk [vmem:[#allocation5 + $0x14] sm:$0xf] %vm3139_vm14, %v3703_v61 }
 0x5c7   : > { %v3593_v26 = vpop.permute.xlu2 %3592 }
 0x5cb   : > { %v3739_v24 = vpop.permute.xlu0 %3738 }
 0x5cc   : > { %v3741_v35 = vpop.permute.xlu1 %3740  ;;  %3758 = vst.msk [vmem:[#allocation5 + $0x10] sm:$0xf] %vm8570_vm3, %v3739_v24  ;;  %vm8574_vm3 = vmmov %vm8573_vm2 }
 0x5cd   : > { %3759 = vst.msk [vmem:[#allocation5 + $0x14] sm:$0xf] %vm8571_vm5, %v3741_v35  ;;  %vm8575_vm5 = vcmask 1043456  }
 0x5cf   : > { %v3633_v13 = vpop.permute.xlu2 %3632 }
 0x5d3   : > { %v5242_v5 = vld [vmem:[#allocation5 + $0x10] sm:$0xf]  ;;  %v3434_v8 = vpop.permute.xlu0 %3433 }
 0x5d4   : > { %v5396_v37 = vld [vmem:[#allocation5 + $0x10] sm:$0xf0]  ;;  %v3512_v1 = vpop.permute.xlu1 %3511  ;;  %3450 = vst.msk [vmem:[#allocation5 + $0x1c] sm:$0xf] %vm2860_vm7, %v3434_v8 }
 0x5d5   : > { %3529 = vst.msk [vmem:[#allocation5 + $0x18] sm:$0xf] %vm2941_vm8, %v3512_v1  ;;  %v5243_v44 = vor.u32 %v5396_v37, %v5242_v5 }
 0x5d6   : > { %3530 = vst.msk [vmem:[#allocation5 + $0x1c] sm:$0xf] %vm2941_vm8, %v3514_v4 }
 0x5d7   : > { %5266 = vmatmul.msk.bf16.gmra.mxu3 %vm3245_vm12, %v5243_v44  ;;  %v3705_v25 = vpop.permute.xlu2 %3704 }
 0x5db   : > { %v3553_v41 = vpop.permute.xlu0 %3552 }
 0x5dc   : > { %v3555_v18 = vpop.permute.xlu1 %3554  ;;  %3570 = vst.msk [vmem:[#allocation5 + $0x18] sm:$0xf] %vm2983_vm9, %v3553_v41 }
 0x5dd   : > { %3571 = vst.msk [vmem:[#allocation5 + $0x1c] sm:$0xf] %vm2983_vm9, %v3555_v18 }
 0x5de   : > { %3610 = vst.msk [vmem:[#allocation5 + $0x18] sm:$0xf] %vm3024_vm11, %v3593_v26 }
 0x5df   : > { %v3745_v14 = vpop.permute.xlu2 %3744 }
 0x5e3   : > { %v3595_v30 = vpop.permute.xlu0 %3594 }
 0x5e4   : > { %v3631_v15 = vpop.permute.xlu1 %3630  ;;  %3611 = vst.msk [vmem:[#allocation5 + $0x1c] sm:$0xf] %vm3024_vm11, %v3595_v30 }
 0x5e5   : > { %3648 = vst.msk [vmem:[#allocation5 + $0x18] sm:$0xf] %vm8572_vm15, %v3631_v15  ;;  %vm8576_vm15 = vmmov %vm8568_vm0 }
 0x5e6   : > { %3649 = vst.msk [vmem:[#allocation5 + $0x1c] sm:$0xf] %vm8568_vm0, %v3633_v13 }
 0x5eb   : > { %v3665_v42 = vpop.permute.xlu0 %3664 }
 0x5ec   : > { %v3667_v59 = vpop.permute.xlu1 %3666  ;;  %3682 = vst.msk [vmem:[#allocation5 + $0x18] sm:$0xf] %vm3098_vm13, %v3665_v42 }
 0x5ed   : > { %3683 = vst.msk [vmem:[#allocation5 + $0x1c] sm:$0xf] %vm3098_vm13, %v3667_v59 }
 0x5ee   : > { %3722 = vst.msk [vmem:[#allocation5 + $0x18] sm:$0xf] %vm3139_vm14, %v3705_v25 }
 0x5f3   : > { %v3707_v57 = vpop.permute.xlu0 %3706 }
 0x5f4   : > { %v3743_v62 = vpop.permute.xlu1 %3742  ;;  %3723 = vst.msk [vmem:[#allocation5 + $0x1c] sm:$0xf] %vm3139_vm14, %v3707_v57 }
 0x5f5   : > { %3760 = vst.msk [vmem:[#allocation5 + $0x18] sm:$0xf] %vm8573_vm2, %v3743_v62 }
 0x5f6   : > { %3761 = vst.msk [vmem:[#allocation5 + $0x1c] sm:$0xf] %vm8574_vm3, %v3745_v14  ;;  %vm8577_vm3 = vmmov %vm8573_vm2 }
 0x5fc   : > { %v5246_v38 = vld [vmem:[#allocation5 + $0x18] sm:$0xf] }
 0x5fd   : > { %v5397_v11 = vld [vmem:[#allocation5 + $0x18] sm:$0xf0] }
 0x5fe   : > { %v5247_v36 = vor.u32 %v5397_v11, %v5246_v38 }
 0x600   : > { %5267 = vmatmul.msk.bf16.gmra.mxu3 %vm3245_vm12, %v5247_v36 }
 0x602   : > { %v3844_v31 = vpop.f32.mrf.mxu2 }
 0x603   : > { %v3845_v46 = vadd.f32 %v7909_v47, %v3844_v31 }
 0x605   : > { %v7914_v29 = vadd.f32 %v3845_v46, %v7084_v34 }
 0x607   : > { %v3884_v16 = vmax.f32 %v7914_v29, 0.0 }
 0x609   : > { %3892 = vst.msk [vmem:[#allocation3 + $0x11] sm:$0xff] %vm282_vm6, %v3884_v16 }
 0x60a   : > { %v3846_v28 = vpop.f32.mrf.mxu2 }
 0x60b   : > { %v3847_v21 = vadd.f32 %v7909_v47, %v3846_v28 }
 0x60d   : > { %v7920_v17 = vadd.f32 %v3847_v21, %v7114_v6 }
 0x60f   : > { %v3885_v7 = vmax.f32 %v7920_v17, 0.0 }
 0x610   : > { %v3902_v12 = vld [vmem:[#allocation3 + $0x10] sm:$0xff]  ;;  %v3903_v51 = vld [vmem:[#allocation3 + $0x18] sm:$0x3] }
 0x611   : > { %3893 = vst.msk [vmem:[#allocation3 + $0x21] sm:$0xff] %vm282_vm6, %v3885_v7  ;;  %v4035_v27 = vrot.slane %v3902_v12, 2  ;;  %v4036_v43 = vrot.slane %v3903_v51, 2  ;;  %v3955_v34 = vrot.slane %v3902_v12, 1  ;;  %v3956_v20 = vrot.slane %v3903_v51, 1 }
 0x612   : > { %v3921_v63 = vpack.c.bf16 %v3902_v12, %v3902_v12 }
 0x613   : > { %v4037_v50 = vsel %vm848_vm4, %v4035_v27, %v4036_v43  ;;  %v3957_v61 = vsel %vm542_vm1, %v3955_v34, %v3956_v20 }
 0x614   : > { %v4065_v48 = vpack.c.bf16 %v4037_v50, %v4037_v50  ;;  %v3985_v3 = vpack.c.bf16 %v3957_v61, %v3957_v61  ;;  %3929 = vst.msk [vmem:[#allocation5 + $0x4] sm:$0xf] %vm2763_vm10, %v3921_v63  ;;  %v4001_v50 = vpop.permute.xlu0 %4000 }
 0x615   : > { %4024 = vst.msk [vmem:[#allocation5] sm:$0xf] %vm2860_vm7, %v4001_v50 }
 0x616   : > { %4082 = vrot.lane.b32.xlu0 %v4065_v48, %s5464_s27  ;;  %4002 = vrot.lane.b32.xlu1 %v3985_v3, %s5462_s25 }
 0x618   : > { %v3904_v6 = vld [vmem:[#allocation3 + $0x20] sm:$0xff]  ;;  %v3905_v19 = vld [vmem:[#allocation3 + $0x28] sm:$0x3] }
 0x619   : > { %v3922_v40 = vpack.c.bf16 %v3904_v6, %v3904_v6  ;;  %v4038_v60 = vrot.slane %v3904_v6, 2  ;;  %v4039_v49 = vrot.slane %v3905_v19, 2  ;;  %v3958_v55 = vrot.slane %v3904_v6, 1 }
 0x61a   : > { %v3959_v24 = vrot.slane %v3905_v19, 1 }
 0x61b   : > { %4123 = vrot.lane.b32.xlu2 %v3922_v40, %s5466_s29  ;;  %3930 = vst.msk [vmem:[#allocation5 + $0x8] sm:$0xf] %vm2763_vm10, %v3922_v40  ;;  %v4040_v35 = vsel %vm848_vm4, %v4038_v60, %v4039_v49 }
 0x61c   : > { %v3960_v4 = vsel %vm542_vm1, %v3958_v55, %v3959_v24  ;;  %v4066_v5 = vpack.c.bf16 %v4040_v35, %v4040_v35  ;;  %v5276_v24 = vld [vmem:[%s8385_s3 + $0x68] sm:$0xf] }
 0x61d   : > { %v3986_v8 = vpack.c.bf16 %v3960_v4, %v3960_v4  ;;  %v4391_v35 = vunpack.c.l.b16 %v5276_v24 }
 0x61e   : > { %4161 = vrot.lane.b32.xlu0 %v3985_v3, %s5468_s6  ;;  %4121 = vrot.lane.b32.xlu1 %v3921_v63, %s5466_s29 }
 0x623   : > { %4199 = vrot.lane.b32.xlu2 %v4065_v48, %s5469_s15 }
 0x626   : > { %4201 = vrot.lane.b32.xlu0 %v4066_v5, %s5469_s15  ;;  %4163 = vrot.lane.b32.xlu1 %v3986_v8, %s5468_s6 }
 0x62e   : > { %v3849_v37 = vpop.f32.mrf.mxu3  ;;  %4273 = vrot.lane.b32.xlu0 %v3986_v8, %s5471_s17  ;;  %4233 = vrot.lane.b32.xlu1 %v3922_v40, %s5470_s16 }
 0x62f   : > { %v3850_v1 = vadd.f32 %v7909_v47, %v3849_v37 }
 0x631   : > { %v7942_v44 = vadd.f32 %v3850_v1, %v7306_v0 }
 0x633   : > { %v3886_v26 = vmax.f32 %v7942_v44, 0.0 }
 0x635   : > { %3894 = vst.msk [vmem:[#allocation3 + $0x31] sm:$0xff] %vm282_vm6, %v3886_v26 }
 0x636   : > { %v3851_v41 = vpop.f32.mrf.mxu3 }
 0x637   : > { %v3852_v18 = vadd.f32 %v7909_v47, %v3851_v41 }
 0x639   : > { %v7948_v13 = vadd.f32 %v3852_v18, %v7452_v10 }
 0x63b   : > { %v3887_v30 = vmax.f32 %v7948_v13, 0.0 }
 0x63c   : > { %v3906_v15 = vld [vmem:[#allocation3 + $0x30] sm:$0xff]  ;;  %v3907_v25 = vld [vmem:[#allocation3 + $0x38] sm:$0x3] }
 0x63d   : > { %3895 = vst.msk [vmem:[#allocation3 + $0x41] sm:$0xff] %vm282_vm6, %v3887_v30  ;;  %v3923_v42 = vpack.c.bf16 %v3906_v15, %v3906_v15  ;;  %v4041_v59 = vrot.slane %v3906_v15, 2  ;;  %v4042_v0 = vrot.slane %v3907_v25, 2  ;;  %v3961_v53 = vrot.slane %v3906_v15, 1 }
 0x63e   : > { %v3962_v2 = vrot.slane %v3907_v25, 1 }
 0x63f   : > { %4235 = vrot.lane.b32.xlu2 %v3923_v42, %s5470_s16  ;;  %3931 = vst.msk [vmem:[#allocation5 + $0xc] sm:$0xf] %vm2763_vm10, %v3923_v42  ;;  %v4043_v56 = vsel %vm848_vm4, %v4041_v59, %v4042_v0 }
 0x640   : > { %v4067_v54 = vpack.c.bf16 %v4043_v56, %v4043_v56  ;;  %v3963_v10 = vsel %vm542_vm1, %v3961_v53, %v3962_v2 }
 0x641   : > { %v3987_v23 = vpack.c.bf16 %v3963_v10, %v3963_v10 }
 0x642   : > { %4313 = vrot.lane.b32.xlu0 %v4067_v54, %s5472_s22 }
 0x643   : > { %4275 = vrot.lane.b32.xlu1 %v3987_v23, %s5471_s17 }
 0x644   : > { %v3908_v57 = vld [vmem:[#allocation3 + $0x40] sm:$0xff]  ;;  %v3909_v62 = vld [vmem:[#allocation3 + $0x48] sm:$0x3] }
 0x645   : > { %v3924_v14 = vpack.c.bf16 %v3908_v57, %v3908_v57  ;;  %v3964_v9 = vrot.slane %v3908_v57, 1  ;;  %v3965_v39 = vrot.slane %v3909_v62, 1  ;;  %v4044_v38 = vrot.slane %v3908_v57, 2 }
 0x646   : > { %v4045_v11 = vrot.slane %v3909_v62, 2 }
 0x647   : > { %4311 = vrot.lane.b32.xlu2 %v4066_v5, %s5472_s22  ;;  %3932 = vst.msk [vmem:[#allocation5 + $0x10] sm:$0xf] %vm2763_vm10, %v3924_v14  ;;  %v3966_v33 = vsel %vm542_vm1, %v3964_v9, %v3965_v39 }
 0x648   : > { %v3988_v46 = vpack.c.bf16 %v3966_v33, %v3966_v33  ;;  %v4046_v16 = vsel %vm848_vm4, %v4044_v38, %v4045_v11 }
 0x649   : > { %v4068_v21 = vpack.c.bf16 %v4046_v16, %v4046_v16 }
 0x64a   : > { %4084 = vrot.lane.b32.xlu0 %v4066_v5, %s5464_s27 }
 0x64b   : > { %4004 = vrot.lane.b32.xlu1 %v3986_v8, %s5462_s25  ;;  %v4396_v8 = vpack.c.b16 %v4391_v35, %v4391_v35 }
 0x64d   : > { %v4414_v26 = vsel %vm8575_vm5, %v4396_v8, 0  ;;  %v8071_v8 = vld [vmem:[#allocation3 + $0x90] sm:$0xff]  ;;  %vm8578_vm5 = vmmov %vm8568_vm0 }
 0x64e   : > { %4419 = vmatpush.bf16.msrb.mxu3 %v4414_v26  ;;  %v4267_v26 = vrot.slane %v8071_v8, 1 }
 0x64f   : > { %4006 = vrot.lane.b32.xlu2 %v3987_v23, %s5462_s25 }
 0x652   : > { %4127 = vrot.lane.b32.xlu0 %v3924_v14, %s5466_s29 }
 0x653   : > { %4086 = vrot.lane.b32.xlu1 %v4067_v54, %s5464_s27 }
 0x657   : > { %4125 = vrot.lane.b32.xlu2 %v3923_v42, %s5466_s29 }
 0x65a   : > { %4203 = vrot.lane.b32.xlu0 %v4067_v54, %s5469_s15  ;;  %v3854_v58 = vpop.f32.mrf.mxu3 }
 0x65b   : > { %4165 = vrot.lane.b32.xlu1 %v3987_v23, %s5468_s6  ;;  %v3855_v36 = vadd.f32 %v7909_v47, %v3854_v58 }
 0x65d   : > { %v7971_v31 = vadd.f32 %v3855_v36, %v7538_v32 }
 0x65f   : > { %v3888_v28 = vmax.f32 %v7971_v31, 0.0  ;;  %4167 = vrot.lane.b32.xlu2 %v3988_v46, %s5468_s6 }
 0x661   : > { %3896 = vst.msk [vmem:[#allocation3 + $0x51] sm:$0xff] %vm282_vm6, %v3888_v28 }
 0x662   : > { %v3856_v7 = vpop.f32.mrf.mxu3 }
 0x663   : > { %4205 = vrot.lane.b32.xlu1 %v4068_v21, %s5469_s15  ;;  %v3857_v12 = vadd.f32 %v7909_v47, %v3856_v7 }
 0x665   : > { %v7980_v51 = vadd.f32 %v3857_v12, %v7386_v45  ;;  %v4081_v45 = vpop.permute.xlu2 %4080  ;;  %v5399_v12 = vld [vmem:[%s8385_s3 + $0x50] sm:$0xff] }
 0x666   : > { %4104 = vst.msk [vmem:[#allocation5] sm:$0xf] %vm2941_vm8, %v4081_v45 }
 0x667   : > { %v3889_v32 = vmax.f32 %v7980_v51, 0.0  ;;  %4237 = vrot.lane.b32.xlu2 %v3924_v14, %s5470_s16 }
 0x668   : > { %v3910_v27 = vld [vmem:[#allocation3 + $0x50] sm:$0xff]  ;;  %v3911_v43 = vld [vmem:[#allocation3 + $0x58] sm:$0x3] }
 0x669   : > { %3897 = vst.msk [vmem:[#allocation3 + $0x61] sm:$0xff] %vm282_vm6, %v3889_v32  ;;  %v3925_v34 = vpack.c.bf16 %v3910_v27, %v3910_v27  ;;  %v3967_v20 = vrot.slane %v3910_v27, 1  ;;  %v3968_v63 = vrot.slane %v3911_v43, 1  ;;  %v4047_v61 = vrot.slane %v3910_v27, 2 }
 0x66a   : > { %v4048_v48 = vrot.slane %v3911_v43, 2 }
 0x66b   : > { %4277 = vrot.lane.b32.xlu1 %v3988_v46, %s5471_s17  ;;  %4239 = vrot.lane.b32.xlu0 %v3925_v34, %s5470_s16  ;;  %3933 = vst.msk [vmem:[#allocation5 + $0x14] sm:$0xf] %vm2763_vm10, %v3925_v34  ;;  %v3969_v3 = vsel %vm542_vm1, %v3967_v20, %v3968_v63  ;;  %v5398_v20 = vld [vmem:[%s8385_s3 + $0x48] sm:$0xff] }
 0x66c   : > { %v3989_v6 = vpack.c.bf16 %v3969_v3, %v3969_v3  ;;  %v4049_v40 = vsel %vm848_vm4, %v4047_v61, %v4048_v48 }
 0x66d   : > { %v4069_v60 = vpack.c.bf16 %v4049_v40, %v4049_v40 }
 0x66f   : > { %4279 = vrot.lane.b32.xlu2 %v3989_v6, %s5471_s17 }
 0x670   : > { %v3912_v19 = vld [vmem:[#allocation3 + $0x60] sm:$0xff]  ;;  %v3913_v55 = vld [vmem:[#allocation3 + $0x68] sm:$0x3] }
 0x671   : > { %v3926_v49 = vpack.c.bf16 %v3912_v19, %v3912_v19  ;;  %v3970_v4 = vrot.slane %v3912_v19, 1  ;;  %v3971_v5 = vrot.slane %v3913_v55, 1  ;;  %v4050_v30 = vrot.slane %v3912_v19, 2 }
 0x672   : > { %v4051_v15 = vrot.slane %v3913_v55, 2 }
 0x673   : > { %4317 = vrot.lane.b32.xlu1 %v4069_v60, %s5472_s22  ;;  %4315 = vrot.lane.b32.xlu0 %v4068_v21, %s5472_s22  ;;  %3934 = vst.msk [vmem:[#allocation5 + $0x18] sm:$0xf] %vm2763_vm10, %v3926_v49  ;;  %v3972_v18 = vsel %vm542_vm1, %v3970_v4, %v3971_v5  ;;  %v3919_v5 = vld [vmem:[#allocation3 + $0x98] sm:$0x3] }
 0x674   : > { %v3990_v53 = vpack.c.bf16 %v3972_v18, %v3972_v18  ;;  %v4052_v2 = vsel %vm848_vm4, %v4050_v30, %v4051_v15  ;;  %v4268_v18 = vrot.slane %v3919_v5, 1  ;;  %v8077_v30 = vpack.c.bf16 %v8071_v8, %v8071_v8 }
 0x675   : > { %v4124_v25 = vpop.permute.xlu2 %4123  ;;  %v4070_v10 = vpack.c.bf16 %v4052_v2, %v4052_v2  ;;  %v4306_v2 = vrot.slane %v3919_v5, 2 }
 0x677   : > { %4008 = vrot.lane.b32.xlu2 %v3988_v46, %s5462_s25  ;;  %v5400_v46 = vld [vmem:[%s8385_s3 + $0x58] sm:$0xff] }
 0x67b   : > { %4088 = vrot.lane.b32.xlu1 %v4068_v21, %s5464_s27  ;;  %4010 = vrot.lane.b32.xlu0 %v3989_v6, %s5462_s25 }
 0x67d   : > { %v4200_v9 = vpop.permute.xlu2 %4199 }
 0x67f   : > { %4090 = vrot.lane.b32.xlu2 %v4069_v60, %s5464_s27 }
 0x683   : > { %4131 = vrot.lane.b32.xlu1 %v3926_v49, %s5466_s29  ;;  %v3859_v37 = vpop.f32.mrf.mxu3  ;;  %4129 = vrot.lane.b32.xlu0 %v3925_v34, %s5466_s29 }
 0x684   : > { %v3860_v1 = vadd.f32 %v7909_v47, %v3859_v37 }
 0x686   : > { %v8008_v41 = vadd.f32 %v3860_v1, %v7508_v52  ;;  %v5401_v52 = vld [vmem:[%s8385_s3 + $0x60] sm:$0xff] }
 0x687   : > { %4169 = vrot.lane.b32.xlu2 %v3989_v6, %s5468_s6  ;;  %4420 = vmatpush.bf16.msrb.mxu3 %v5401_v52 }
 0x688   : > { %v3890_v42 = vmax.f32 %v8008_v41, 0.0  ;;  %v4083_v59 = vpop.permute.xlu0 %4082  ;;  %v4003_v0 = vpop.permute.xlu1 %4002 }
 0x689   : > { %4025 = vst.msk [vmem:[#allocation5 + $0x4] sm:$0xf] %vm2860_vm7, %v4003_v0  ;;  %v4305_v0 = vrot.slane %v8071_v8, 2 }
 0x68a   : > { %3898 = vst.msk [vmem:[#allocation3 + $0x71] sm:$0xff] %vm282_vm6, %v3890_v42  ;;  %v4269_v42 = vsel %vm542_vm1, %v4267_v26, %v4268_v18 }
 0x68b   : > { %4105 = vst.msk [vmem:[#allocation5 + $0x4] sm:$0xf] %vm2941_vm8, %v4083_v59  ;;  %4207 = vrot.lane.b32.xlu1 %v4069_v60, %s5469_s15  ;;  %v3861_v56 = vpop.f32.mrf.mxu3  ;;  %4171 = vrot.lane.b32.xlu0 %v3990_v53, %s5468_s6 }
 0x68c   : > { %4146 = vst.msk [vmem:[#allocation5 + $0x4] sm:$0xf] %vm2983_vm9, %v4124_v25  ;;  %v3862_v54 = vadd.f32 %v7909_v47, %v3861_v56  ;;  %4421 = vmatpush.bf16.msrb.mxu3 %v5400_v46 }
 0x68e   : > { %v8025_v23 = vadd.f32 %v3862_v54, %v7595_v22  ;;  %v4307_v54 = vsel %vm848_vm4, %v4305_v0, %v4306_v2 }
 0x68f   : > { %4209 = vrot.lane.b32.xlu2 %v4070_v10, %s5469_s15 }
 0x690   : > { %v3891_v57 = vmax.f32 %v8025_v23, 0.0  ;;  %v4162_v14 = vpop.permute.xlu0 %4161  ;;  %v4122_v62 = vpop.permute.xlu1 %4121  ;;  %4422 = vmatpush.bf16.msrb.mxu3 %v5399_v12 }
 0x691   : > { %4145 = vst.msk [vmem:[#allocation5] sm:$0xf] %vm2983_vm9, %v4122_v62  ;;  %v3914_v39 = vld [vmem:[#allocation3 + $0x70] sm:$0xff]  ;;  %v3915_v58 = vld [vmem:[#allocation3 + $0x78] sm:$0x3] }
 0x692   : > { %3899 = vst.msk [vmem:[#allocation3 + $0x81] sm:$0xff] %vm282_vm6, %v3891_v57  ;;  %v3927_v33 = vpack.c.bf16 %v3914_v39, %v3914_v39  ;;  %v3973_v47 = vrot.slane %v3914_v39, 1  ;;  %v3974_v38 = vrot.slane %v3915_v58, 1  ;;  %v4053_v11 = vrot.slane %v3914_v39, 2 }
 0x693   : > { %4185 = vst.msk [vmem:[#allocation5] sm:$0xf] %vm3024_vm11, %v4162_v14  ;;  %4241 = vrot.lane.b32.xlu0 %v3926_v49, %s5470_s16  ;;  %v4054_v36 = vrot.slane %v3915_v58, 2  ;;  %v4309_v57 = vpack.c.bf16 %v4307_v54, %v4307_v54 }
 0x694   : > { %4223 = vst.msk [vmem:[#allocation5] sm:$0xf] %vm8576_vm15, %v4200_v9  ;;  %4243 = vrot.lane.b32.xlu1 %v3927_v33, %s5470_s16  ;;  %v3975_v22 = vsel %vm542_vm1, %v3973_v47, %v3974_v38  ;;  %4423 = vmatpush.bf16.msrb.mxu3 %v5398_v20  ;;  %vm8579_vm15 = vmmov %vm8568_vm0 }
 0x695   : > { %3935 = vst.msk [vmem:[#allocation5 + $0x1c] sm:$0xf] %vm2763_vm10, %v3927_v33  ;;  %v3991_v7 = vpack.c.bf16 %v3975_v22, %v3975_v22  ;;  %v4055_v32 = vsel %vm848_vm4, %v4053_v11, %v4054_v36 }
 0x696   : > { %v4071_v27 = vpack.c.bf16 %v4055_v32, %v4055_v32 }
 0x697   : > { %4281 = vrot.lane.b32.xlu2 %v3990_v53, %s5471_s17 }
 0x698   : > { %v4202_v16 = vpop.permute.xlu0 %4201  ;;  %v4164_v28 = vpop.permute.xlu1 %4163 }
 0x699   : > { %v4236_v21 = vpop.permute.xlu2 %4235  ;;  %4186 = vst.msk [vmem:[#allocation5 + $0x4] sm:$0xf] %vm3024_vm11, %v4164_v28  ;;  %v3916_v50 = vld [vmem:[#allocation3 + $0x80] sm:$0xff]  ;;  %v3917_v61 = vld [vmem:[#allocation3 + $0x88] sm:$0x3] }
 0x69a   : > { %4224 = vst.msk [vmem:[#allocation5 + $0x4] sm:$0xf] %vm8568_vm0, %v4202_v16  ;;  %v4155_v45 = vrot.slane %v3916_v50, 1  ;;  %v4156_v3 = vrot.slane %v3917_v61, 1  ;;  %v4112_v6 = vpack.c.bf16 %v3916_v50, %v3916_v50  ;;  %v4193_v49 = vrot.slane %v3916_v50, 2  ;;  %vm8580_vm0 = vmmov %vm8573_vm2 }
 0x69b   : > { %4258 = vst.msk [vmem:[#allocation5 + $0x4] sm:$0xf] %vm3098_vm13, %v4236_v21  ;;  %4283 = vrot.lane.b32.xlu0 %v3991_v7, %s5471_s17  ;;  %v4194_v55 = vrot.slane %v3917_v61, 2 }
 0x69c   : > { %4319 = vrot.lane.b32.xlu1 %v4070_v10, %s5472_s22  ;;  %v4157_v40 = vsel %vm542_vm1, %v4155_v45, %v4156_v3 }
 0x69d   : > { %v4159_v60 = vpack.c.bf16 %v4157_v40, %v4157_v40  ;;  %v4195_v4 = vsel %vm848_vm4, %v4193_v49, %v4194_v55  ;;  %v4473_v40 = vld [vmem:[#allocation3] sm:$0xff] }
 0x69e   : > { %v4197_v1 = vpack.c.bf16 %v4195_v4, %v4195_v4  ;;  %v4493_v49 = vpack.c.bf16 %v4473_v40, %v4473_v40  ;;  %v4525_v55 = vrot.slane %v4473_v40, 1 }
 0x69f   : > { %4321 = vrot.lane.b32.xlu2 %v4071_v27, %s5472_s22 }
 0x6a0   : > { %v4274_v43 = vpop.permute.xlu0 %4273  ;;  %v4234_v34 = vpop.permute.xlu1 %4233 }
 0x6a1   : > { %v4312_v63 = vpop.permute.xlu2 %4311  ;;  %4257 = vst.msk [vmem:[#allocation5] sm:$0xf] %vm3098_vm13, %v4234_v34 }
 0x6a2   : > { %4297 = vst.msk [vmem:[#allocation5] sm:$0xf] %vm3139_vm14, %v4274_v43 }
 0x6a3   : > { %4335 = vst.msk [vmem:[#allocation5] sm:$0xf] %vm8573_vm2, %v4312_v63  ;;  %4012 = vrot.lane.b32.xlu0 %v3990_v53, %s5462_s25  ;;  %v4271_v53 = vpack.c.bf16 %v4269_v42, %v4269_v42  ;;  %vm8581_vm2 = vmmov %vm8580_vm0 }
 0x6a4   : > { %4014 = vrot.lane.b32.xlu1 %v3991_v7, %s5462_s25 }
 0x6a7   : > { %4092 = vrot.lane.b32.xlu2 %v4070_v10, %s5464_s27 }
 0x6a9   : > { %v4007_v48 = vpop.permute.xlu2 %4006 }
 0x6aa   : > { %4027 = vst.msk [vmem:[#allocation5 + $0xc] sm:$0xf] %vm2860_vm7, %v4007_v48 }
 0x6ab   : > { %4094 = vrot.lane.b32.xlu0 %v4071_v27, %s5464_s27 }
 0x6ac   : > { %4133 = vrot.lane.b32.xlu1 %v3927_v33, %s5466_s29 }
 0x6af   : > { %4135 = vrot.lane.b32.xlu2 %v4112_v6, %s5466_s29 }
 0x6b1   : > { %v4126_v19 = vpop.permute.xlu2 %4125 }
 0x6b3   : > { %4173 = vrot.lane.b32.xlu0 %v3991_v7, %s5468_s6 }
 0x6b4   : > { %v4314_v24 = vpop.permute.xlu0 %4313  ;;  %4175 = vrot.lane.b32.xlu1 %v4159_v60, %s5468_s6 }
 0x6b5   : > { %v4276_v35 = vpop.permute.xlu1 %4275 }
 0x6b6   : > { %4298 = vst.msk [vmem:[#allocation5 + $0x4] sm:$0xf] %vm3139_vm14, %v4276_v35  ;;  %v4605_v35 = vrot.slane %v4473_v40, 2 }
 0x6b7   : > { %4336 = vst.msk [vmem:[#allocation5 + $0x4] sm:$0xf] %vm8577_vm3, %v4314_v24  ;;  %4211 = vrot.lane.b32.xlu2 %v4071_v27, %s5469_s15  ;;  %vm8582_vm3 = vmmov %vm8578_vm5 }
 0x6b9   : > { %v4168_v37 = vpop.permute.xlu2 %4167 }
 0x6bb   : > { %4213 = vrot.lane.b32.xlu0 %v4197_v1, %s5469_s15 }
 0x6bc   : > { %v4085_v15 = vpop.permute.xlu0 %4084  ;;  %4245 = vrot.lane.b32.xlu1 %v4112_v6, %s5470_s16 }
 0x6bd   : > { %v4005_v25 = vpop.permute.xlu1 %4004 }
 0x6be   : > { %4026 = vst.msk [vmem:[#allocation5 + $0x8] sm:$0xf] %vm2860_vm7, %v4005_v25  ;;  %v5402_v59 = vld [vmem:[#allocation5] sm:$0xff] }
 0x6bf   : > { %4106 = vst.msk [vmem:[#allocation5 + $0x8] sm:$0xf] %vm2941_vm8, %v4085_v15  ;;  %4247 = vrot.lane.b32.xlu2 %v8077_v30, %s5470_s16  ;;  %5310 = vmatmul.msk.bf16.vlgmr.msrb.gmra.mxu3 %vm3245_vm12, %v5402_v59 }
 0x6c0   : > { %4147 = vst.msk [vmem:[#allocation5 + $0x8] sm:$0xf] %vm2983_vm9, %v4126_v19  ;;  %v4474_v19 = vld [vmem:[#allocation3 + $0x8] sm:$0x3] }
 0x6c1   : > { %v4238_v52 = vpop.permute.xlu2 %4237  ;;  %v4526_v24 = vrot.slane %v4474_v19, 1  ;;  %v4606_v4 = vrot.slane %v4474_v19, 2  ;;  %4501 = vst.msk [vmem:[#allocation5] sm:$0xf] %vm2763_vm10, %v4493_v49 }
 0x6c3   : > { %4285 = vrot.lane.b32.xlu0 %v4159_v60, %s5471_s17  ;;  %v4527_v5 = vsel %vm542_vm1, %v4525_v55, %v4526_v24 }
 0x6c4   : > { %v4128_v56 = vpop.permute.xlu0 %4127  ;;  %4287 = vrot.lane.b32.xlu1 %v4271_v53, %s5471_s17 }
 0x6c5   : > { %v4087_v10 = vpop.permute.xlu1 %4086 }
 0x6c6   : > { %4107 = vst.msk [vmem:[#allocation5 + $0xc] sm:$0xf] %vm2941_vm8, %v4087_v10 }
 0x6c7   : > { %4148 = vst.msk [vmem:[#allocation5 + $0xc] sm:$0xf] %vm2983_vm9, %v4128_v56  ;;  %4323 = vrot.lane.b32.xlu2 %v4197_v1, %s5472_s22  ;;  %v4607_v1 = vsel %vm848_vm4, %v4605_v35, %v4606_v4 }
 0x6c8   : > { %4188 = vst.msk [vmem:[#allocation5 + $0xc] sm:$0xf] %vm3024_vm11, %v4168_v37  ;;  %v4557_v37 = vpack.c.bf16 %v4527_v5, %v4527_v5  ;;  %v4637_v18 = vpack.c.bf16 %v4607_v1, %v4607_v1 }
 0x6c9   : > { %v4280_v14 = vpop.permute.xlu2 %4279 }
 0x6cb   : > { %4325 = vrot.lane.b32.xlu0 %v4309_v57, %s5472_s22 }
 0x6cc   : > { %v4204_v62 = vpop.permute.xlu0 %4203  ;;  %4573 = vrot.lane.b32.xlu1 %v4557_v37, %s5462_s25 }
 0x6cd   : > { %v4166_v9 = vpop.permute.xlu1 %4165 }
 0x6ce   : > { %4187 = vst.msk [vmem:[#allocation5 + $0x8] sm:$0xf] %vm3024_vm11, %v4166_v9 }
 0x6cf   : > { %4225 = vst.msk [vmem:[#allocation5 + $0x8] sm:$0xf] %vm8578_vm5, %v4204_v62  ;;  %vm8583_vm5 = vmmov %vm8582_vm3  ;;  %v8151_v62 = vld [vmem:[%s8386_s4 + $0x2] ss:$0 sm:$0xff] }
 0x6d0   : > { %4259 = vst.msk [vmem:[#allocation5 + $0x8] sm:$0xf] %vm3098_vm13, %v4238_v52 }
 0x6d1   : > { %v4009_v39 = vpop.permute.xlu2 %4008 }
 0x6d2   : > { %4028 = vst.msk [vmem:[#allocation5 + $0x10] sm:$0xf] %vm2860_vm7, %v4009_v39 }
 0x6d3   : > { %4653 = vrot.lane.b32.xlu0 %v4637_v18, %s5464_s27 }
 0x6d5   : > { %v4206_v58 = vpop.permute.xlu1 %4205 }
 0x6d6   : > { %4226 = vst.msk [vmem:[#allocation5 + $0xc] sm:$0xf] %vm8579_vm15, %v4206_v58  ;;  %vm8584_vm15 = vmmov %vm8580_vm0 }
 0x6d9   : > { %v4091_v33 = vpop.permute.xlu2 %4090 }
 0x6dd   : > { %v4278_v47 = vpop.permute.xlu1 %4277  ;;  %v4240_v38 = vpop.permute.xlu0 %4239 }
 0x6de   : > { %4299 = vst.msk [vmem:[#allocation5 + $0x8] sm:$0xf] %vm3139_vm14, %v4278_v47 }
 0x6df   : > { %4260 = vst.msk [vmem:[#allocation5 + $0xc] sm:$0xf] %vm3098_vm13, %v4240_v38 }
 0x6e0   : > { %4300 = vst.msk [vmem:[#allocation5 + $0xc] sm:$0xf] %vm3139_vm14, %v4280_v14 }
 0x6e1   : > { %v4170_v36 = vpop.permute.xlu2 %4169 }
 0x6e5   : > { %v4318_v22 = vpop.permute.xlu1 %4317  ;;  %v4316_v11 = vpop.permute.xlu0 %4315 }
 0x6e6   : > { %4338 = vst.msk [vmem:[#allocation5 + $0xc] sm:$0xf] %vm8580_vm0, %v4318_v22 }
 0x6e7   : > { %4337 = vst.msk [vmem:[#allocation5 + $0x8] sm:$0xf] %vm8581_vm2, %v4316_v11  ;;  %vm8585_vm2 = vmmov %vm8582_vm3 }
 0x6e9   : > { %v4210_v21 = vpop.permute.xlu2 %4209 }
 0x6ed   : > { %v4089_v46 = vpop.permute.xlu1 %4088  ;;  %v4011_v16 = vpop.permute.xlu0 %4010 }
 0x6ee   : > { %4108 = vst.msk [vmem:[#allocation5 + $0x10] sm:$0xf] %vm2941_vm8, %v4089_v46  ;;  %v5403_v28 = vld [vmem:[#allocation5 + $0x8] sm:$0xff] }
 0x6ef   : > { %4029 = vst.msk [vmem:[#allocation5 + $0x14] sm:$0xf] %vm2860_vm7, %v4011_v16  ;;  %5311 = vmatmul.msk.bf16.gmra.mxu3 %vm3245_vm12, %v5403_v28 }
 0x6f0   : > { %4109 = vst.msk [vmem:[#allocation5 + $0x14] sm:$0xf] %vm2941_vm8, %v4091_v33 }
 0x6f1   : > { %v4282_v32 = vpop.permute.xlu2 %4281 }
 0x6f5   : > { %v4132_v7 = vpop.permute.xlu1 %4131  ;;  %v4130_v12 = vpop.permute.xlu0 %4129 }
 0x6f6   : > { %4150 = vst.msk [vmem:[#allocation5 + $0x14] sm:$0xf] %vm2983_vm9, %v4132_v7 }
 0x6f7   : > { %4149 = vst.msk [vmem:[#allocation5 + $0x10] sm:$0xf] %vm2983_vm9, %v4130_v12 }
 0x6f8   : > { %4189 = vst.msk [vmem:[#allocation5 + $0x10] sm:$0xf] %vm3024_vm11, %v4170_v36 }
 0x6f9   : > { %v4322_v34 = vpop.permute.xlu2 %4321 }
 0x6fd   : > { %v4208_v27 = vpop.permute.xlu1 %4207  ;;  %v4172_v43 = vpop.permute.xlu0 %4171 }
 0x6fe   : > { %4227 = vst.msk [vmem:[#allocation5 + $0x10] sm:$0xf] %vm8582_vm3, %v4208_v27  ;;  %vm8586_vm3 = vmmov %vm8585_vm2 }
 0x6ff   : > { %4190 = vst.msk [vmem:[#allocation5 + $0x14] sm:$0xf] %vm3024_vm11, %v4172_v43 }
 0x700   : > { %4228 = vst.msk [vmem:[#allocation5 + $0x14] sm:$0xf] %vm8583_vm5, %v4210_v21  ;;  %vm8587_vm5 = vmmov %vm8580_vm0 }
 0x701   : > { %v4093_v61 = vpop.permute.xlu2 %4092 }
 0x705   : > { %v4242_v20 = vpop.permute.xlu0 %4241 }
 0x706   : > { %4261 = vst.msk [vmem:[#allocation5 + $0x10] sm:$0xf] %vm3098_vm13, %v4242_v20  ;;  %v4244_v63 = vpop.permute.xlu1 %4243 }
 0x707   : > { %4301 = vst.msk [vmem:[#allocation5 + $0x10] sm:$0xf] %vm3139_vm14, %v4282_v32 }
 0x708   : > { %4262 = vst.msk [vmem:[#allocation5 + $0x14] sm:$0xf] %vm3098_vm13, %v4244_v63 }
 0x709   : > { %v4136_v60 = vpop.permute.xlu2 %4135 }
 0x70d   : > { %v4284_v50 = vpop.permute.xlu0 %4283 }
 0x70e   : > { %4302 = vst.msk [vmem:[#allocation5 + $0x14] sm:$0xf] %vm3139_vm14, %v4284_v50  ;;  %v4320_v48 = vpop.permute.xlu1 %4319 }
 0x70f   : > { %4340 = vst.msk [vmem:[#allocation5 + $0x14] sm:$0xf] %vm8584_vm15, %v4322_v34  ;;  %vm8588_vm15 = vmmov %vm8580_vm0 }
 0x710   : > { %4339 = vst.msk [vmem:[#allocation5 + $0x10] sm:$0xf] %vm8580_vm0, %v4320_v48  ;;  %vm8589_vm0 = vcmask 1043456  }
 0x711   : > { %v4212_v42 = vpop.permute.xlu2 %4211 }
 0x715   : > { %v4013_v45 = vpop.permute.xlu0 %4012 }
 0x716   : > { %4030 = vst.msk [vmem:[#allocation5 + $0x18] sm:$0xf] %vm2860_vm7, %v4013_v45  ;;  %v4015_v3 = vpop.permute.xlu1 %4014 }
 0x717   : > { %4110 = vst.msk [vmem:[#allocation5 + $0x18] sm:$0xf] %vm2941_vm8, %v4093_v61  ;;  %v5404_v6 = vld [vmem:[#allocation5 + $0x10] sm:$0xff] }
 0x718   : > { %4031 = vst.msk [vmem:[#allocation5 + $0x1c] sm:$0xf] %vm2860_vm7, %v4015_v3  ;;  %5312 = vmatmul.msk.bf16.gmra.mxu3 %vm3245_vm12, %v5404_v6 }
 0x719   : > { %v4248_v2 = vpop.permute.xlu2 %4247 }
 0x71d   : > { %v4095_v15 = vpop.permute.xlu0 %4094 }
 0x71e   : > { %4111 = vst.msk [vmem:[#allocation5 + $0x1c] sm:$0xf] %vm2941_vm8, %v4095_v15  ;;  %v4134_v25 = vpop.permute.xlu1 %4133 }
 0x71f   : > { %4152 = vst.msk [vmem:[#allocation5 + $0x1c] sm:$0xf] %vm2983_vm9, %v4136_v60 }
 0x720   : > { %4151 = vst.msk [vmem:[#allocation5 + $0x18] sm:$0xf] %vm2983_vm9, %v4134_v25 }
 0x721   : > { %v4324_v10 = vpop.permute.xlu2 %4323 }
 0x725   : > { %v4174_v59 = vpop.permute.xlu0 %4173 }
 0x726   : > { %4191 = vst.msk [vmem:[#allocation5 + $0x18] sm:$0xf] %vm3024_vm11, %v4174_v59  ;;  %v4176_v53 = vpop.permute.xlu1 %4175 }
 0x727   : > { %4229 = vst.msk [vmem:[#allocation5 + $0x18] sm:$0xf] %vm8585_vm2, %v4212_v42 }
 0x728   : > { %4192 = vst.msk [vmem:[#allocation5 + $0x1c] sm:$0xf] %vm3024_vm11, %v4176_v53 }
 0x72d   : > { %v4214_v52 = vpop.permute.xlu0 %4213 }
 0x72e   : > { %4230 = vst.msk [vmem:[#allocation5 + $0x1c] sm:$0xf] %vm8586_vm3, %v4214_v52  ;;  %v4246_v56 = vpop.permute.xlu1 %4245  ;;  %vm8590_vm3 = vmmov %vm8585_vm2 }
 0x72f   : > { %4264 = vst.msk [vmem:[#allocation5 + $0x1c] sm:$0xf] %vm3098_vm13, %v4248_v2 }
 0x730   : > { %4263 = vst.msk [vmem:[#allocation5 + $0x18] sm:$0xf] %vm3098_vm13, %v4246_v56 }
 0x735   : > { %v4286_v54 = vpop.permute.xlu0 %4285 }
 0x736   : > { %4303 = vst.msk [vmem:[#allocation5 + $0x18] sm:$0xf] %vm3139_vm14, %v4286_v54  ;;  %v4288_v57 = vpop.permute.xlu1 %4287 }
 0x737   : > { %4341 = vst.msk [vmem:[#allocation5 + $0x18] sm:$0xf] %vm8587_vm5, %v4324_v10 }
 0x738   : > { %4304 = vst.msk [vmem:[#allocation5 + $0x1c] sm:$0xf] %vm3139_vm14, %v4288_v57 }
 0x73d   : > { %v4326_v14 = vpop.permute.xlu0 %4325 }
 0x73e   : > { %4342 = vst.msk [vmem:[#allocation5 + $0x1c] sm:$0xf] %vm8588_vm15, %v4326_v14  ;;  %v4574_v10 = vpop.permute.xlu1 %4573  ;;  %vm8592_vm15 = vmmov %vm8585_vm2 }
 0x73f   : > { %4597 = vst.msk [vmem:[#allocation5] sm:$0xf] %vm2860_vm7, %v4574_v10 }
 0x742   : > { %v4425_v9 = vpop.f32.mrf.mxu3 }
 0x743   : > { %v4426_v39 = vadd.f32 %v8151_v62, %v4425_v9 }
 0x745   : > { %v5405_v58 = vld [vmem:[#allocation5 + $0x18] sm:$0xff]  ;;  %v4445_v33 = vmax.f32 %v4426_v39, 0.0  ;;  %v4654_v57 = vpop.permute.xlu0 %4653 }
 0x746   : > { %5313 = vmatmul.msk.bf16.gmra.mxu3 %vm3245_vm12, %v5405_v58  ;;  %4677 = vst.msk [vmem:[#allocation5] sm:$0xf] %vm2941_vm8, %v4654_v57 }
 0x747   : > { %4465 = vst.msk [vmem:[#allocation3 + $0x11] sm:$0xff] %vm282_vm6, %v4445_v33 }
 0x74a   : > { %v4427_v47 = vpop.f32.mrf.mxu3 }
 0x74b   : > { %v4428_v38 = vadd.f32 %v8151_v62, %v4427_v47 }
 0x74d   : > { %v4446_v22 = vmax.f32 %v4428_v38, 0.0 }
 0x74e   : > { %v4475_v11 = vld [vmem:[#allocation3 + $0x10] sm:$0xff]  ;;  %v4476_v36 = vld [vmem:[#allocation3 + $0x18] sm:$0x3] }
 0x74f   : > { %4466 = vst.msk [vmem:[#allocation3 + $0x21] sm:$0xff] %vm282_vm6, %v4446_v22  ;;  %v4494_v46 = vpack.c.bf16 %v4475_v11, %v4475_v11  ;;  %v4608_v16 = vrot.slane %v4475_v11, 2  ;;  %v4609_v28 = vrot.slane %v4476_v36, 2  ;;  %v4528_v21 = vrot.slane %v4475_v11, 1 }
 0x750   : > { %v4529_v7 = vrot.slane %v4476_v36, 1 }
 0x751   : > { %4694 = vrot.lane.b32.xlu2 %v4494_v46, %s5466_s29  ;;  %4502 = vst.msk [vmem:[#allocation5 + $0x4] sm:$0xf] %vm2763_vm10, %v4494_v46  ;;  %v4610_v12 = vsel %vm848_vm4, %v4608_v16, %v4609_v28 }
 0x752   : > { %v4638_v32 = vpack.c.bf16 %v4610_v12, %v4610_v12  ;;  %v4530_v27 = vsel %vm542_vm1, %v4528_v21, %v4529_v7 }
 0x753   : > { %v4558_v34 = vpack.c.bf16 %v4530_v27, %v4530_v27 }
 0x754   : > { %4772 = vrot.lane.b32.xlu0 %v4638_v32, %s5469_s15  ;;  %4655 = vrot.lane.b32.xlu1 %v4638_v32, %s5464_s27 }
 0x756   : > { %v4477_v43 = vld [vmem:[#allocation3 + $0x20] sm:$0xff]  ;;  %v4478_v63 = vld [vmem:[#allocation3 + $0x28] sm:$0x3] }
 0x757   : > { %v4495_v20 = vpack.c.bf16 %v4477_v43, %v4477_v43  ;;  %v4611_v50 = vrot.slane %v4477_v43, 2  ;;  %v4612_v61 = vrot.slane %v4478_v63, 2  ;;  %v4531_v45 = vrot.slane %v4477_v43, 1 }
 0x758   : > { %v4532_v3 = vrot.slane %v4478_v63, 1 }
 0x759   : > { %4575 = vrot.lane.b32.xlu2 %v4558_v34, %s5462_s25  ;;  %4503 = vst.msk [vmem:[#allocation5 + $0x8] sm:$0xf] %vm2763_vm10, %v4495_v20  ;;  %v4613_v48 = vsel %vm848_vm4, %v4611_v50, %v4612_v61 }
 0x75a   : > { %v4639_v6 = vpack.c.bf16 %v4613_v48, %v4613_v48  ;;  %v4533_v40 = vsel %vm542_vm1, %v4531_v45, %v4532_v3 }
 0x75b   : > { %v4559_v19 = vpack.c.bf16 %v4533_v40, %v4533_v40 }
 0x75c   : > { %4696 = vrot.lane.b32.xlu0 %v4495_v20, %s5466_s29  ;;  %4734 = vrot.lane.b32.xlu1 %v4558_v34, %s5468_s6 }
 0x761   : > { %4806 = vrot.lane.b32.xlu2 %v4495_v20, %s5470_s16 }
 0x764   : > { %4884 = vrot.lane.b32.xlu0 %v4639_v6, %s5472_s22  ;;  %4774 = vrot.lane.b32.xlu1 %v4639_v6, %s5469_s15 }
 0x769   : > { %4736 = vrot.lane.b32.xlu2 %v4559_v19, %s5468_s6 }
 0x76c   : > { %4846 = vrot.lane.b32.xlu1 %v4559_v19, %s5471_s17 }
 0x771   : > { %4577 = vrot.lane.b32.xlu2 %v4559_v19, %s5462_s25 }
 0x772   : > { %v4430_v60 = vpop.f32.mrf.mxu3 }
 0x773   : > { %v4431_v49 = vadd.f32 %v8151_v62, %v4430_v60 }
 0x774   : > { %4657 = vrot.lane.b32.xlu1 %v4639_v6, %s5464_s27 }
 0x775   : > { %v4447_v55 = vmax.f32 %v4431_v49, 0.0 }
 0x777   : > { %4467 = vst.msk [vmem:[#allocation3 + $0x31] sm:$0xff] %vm282_vm6, %v4447_v55 }
 0x77a   : > { %v4432_v24 = vpop.f32.mrf.mxu3 }
 0x77b   : > { %v4433_v35 = vadd.f32 %v8151_v62, %v4432_v24 }
 0x77d   : > { %v4448_v4 = vmax.f32 %v4433_v35, 0.0 }
 0x77e   : > { %v4479_v5 = vld [vmem:[#allocation3 + $0x30] sm:$0xff]  ;;  %v4480_v37 = vld [vmem:[#allocation3 + $0x38] sm:$0x3] }
 0x77f   : > { %4468 = vst.msk [vmem:[#allocation3 + $0x41] sm:$0xff] %vm282_vm6, %v4448_v4  ;;  %v4496_v1 = vpack.c.bf16 %v4479_v5, %v4479_v5  ;;  %v4534_v18 = vrot.slane %v4479_v5, 1  ;;  %v4614_v15 = vrot.slane %v4479_v5, 2  ;;  %v4615_v25 = vrot.slane %v4480_v37, 2 }
 0x780   : > { %v4535_v42 = vrot.slane %v4480_v37, 1 }
 0x781   : > { %4808 = vrot.lane.b32.xlu0 %v4496_v1, %s5470_s16  ;;  %4504 = vst.msk [vmem:[#allocation5 + $0xc] sm:$0xf] %vm2763_vm10, %v4496_v1  ;;  %v4616_v59 = vsel %vm848_vm4, %v4614_v15, %v4615_v25 }
 0x782   : > { %v4640_v53 = vpack.c.bf16 %v4616_v59, %v4616_v59  ;;  %v4536_v2 = vsel %vm542_vm1, %v4534_v18, %v4535_v42 }
 0x783   : > { %v4560_v52 = vpack.c.bf16 %v4536_v2, %v4536_v2 }
 0x784   : > { %4886 = vrot.lane.b32.xlu1 %v4640_v53, %s5472_s22 }
 0x785   : > { %4848 = vrot.lane.b32.xlu2 %v4560_v52, %s5471_s17 }
 0x786   : > { %v4481_v56 = vld [vmem:[#allocation3 + $0x40] sm:$0xff]  ;;  %v4482_v14 = vld [vmem:[#allocation3 + $0x48] sm:$0x3] }
 0x787   : > { %v4497_v54 = vpack.c.bf16 %v4481_v56, %v4481_v56  ;;  %v4617_v9 = vrot.slane %v4481_v56, 2  ;;  %v4618_v39 = vrot.slane %v4482_v14, 2  ;;  %v4537_v33 = vrot.slane %v4481_v56, 1 }
 0x788   : > { %v4538_v47 = vrot.slane %v4482_v14, 1 }
 0x789   : > { %4698 = vrot.lane.b32.xlu0 %v4496_v1, %s5466_s29  ;;  %4505 = vst.msk [vmem:[#allocation5 + $0x10] sm:$0xf] %vm2763_vm10, %v4497_v54  ;;  %v4619_v58 = vsel %vm848_vm4, %v4617_v9, %v4618_v39 }
 0x78a   : > { %v4641_v38 = vpack.c.bf16 %v4619_v58, %v4619_v58  ;;  %v4539_v36 = vsel %vm542_vm1, %v4537_v33, %v4538_v47  ;;  %v5409_v58 = vld [vmem:[%s8385_s3 + $0x84] sm:$0xff] }
 0x78b   : > { %v4561_v16 = vpack.c.bf16 %v4539_v36, %v4539_v36 }
 0x78c   : > { %4776 = vrot.lane.b32.xlu1 %v4640_v53, %s5469_s15 }
 0x78d   : > { %4659 = vrot.lane.b32.xlu2 %v4640_v53, %s5464_s27 }
 0x791   : > { %4579 = vrot.lane.b32.xlu0 %v4560_v52, %s5462_s25 }
 0x794   : > { %4700 = vrot.lane.b32.xlu1 %v4497_v54, %s5466_s29 }
 0x795   : > { %4738 = vrot.lane.b32.xlu2 %v4560_v52, %s5468_s6  ;;  %v5322_v52 = vld [vmem:[%s8385_s3 + $0x8c] sm:$0xf] }
 0x799   : > { %4810 = vrot.lane.b32.xlu0 %v4497_v54, %s5470_s16  ;;  %v4964_v54 = vunpack.c.l.b16 %v5322_v52 }
 0x79b   : > { %v4435_v22 = vpop.f32.mrf.mxu3  ;;  %v4969_v14 = vpack.c.b16 %v4964_v54, %v4964_v54 }
 0x79c   : > { %v4436_v11 = vadd.f32 %v8151_v62, %v4435_v22  ;;  %4888 = vrot.lane.b32.xlu1 %v4641_v38, %s5472_s22 }
 0x79d   : > { %4778 = vrot.lane.b32.xlu2 %v4641_v38, %s5469_s15  ;;  %v4987_v9 = vsel %vm8589_vm0, %v4969_v14, 0 }
 0x79e   : > { %v4449_v46 = vmax.f32 %v4436_v11, 0.0  ;;  %4992 = vmatpush.bf16.msrb.mxu1 %v4987_v9  ;;  %v5408_v11 = vld [vmem:[%s8385_s3 + $0x7c] sm:$0xff] }
 0x7a0   : > { %4469 = vst.msk [vmem:[#allocation3 + $0x51] sm:$0xff] %vm282_vm6, %v4449_v46 }
 0x7a1   : > { %4740 = vrot.lane.b32.xlu0 %v4561_v16, %s5468_s6 }
 0x7a2   : > { %4993 = vmatpush.bf16.msrb.mxu1 %v5409_v58 }
 0x7a3   : > { %v4437_v28 = vpop.f32.mrf.mxu3 }
 0x7a4   : > { %v4438_v21 = vadd.f32 %v8151_v62, %v4437_v28 }
 0x7a5   : > { %4850 = vrot.lane.b32.xlu2 %v4561_v16, %s5471_s17 }
 0x7a6   : > { %v4450_v7 = vmax.f32 %v4438_v21, 0.0  ;;  %4994 = vmatpush.bf16.msrb.mxu1 %v5408_v11 }
 0x7a7   : > { %v4483_v12 = vld [vmem:[#allocation3 + $0x50] sm:$0xff]  ;;  %v4484_v32 = vld [vmem:[#allocation3 + $0x58] sm:$0x3] }
 0x7a8   : > { %4470 = vst.msk [vmem:[#allocation3 + $0x61] sm:$0xff] %vm282_vm6, %v4450_v7  ;;  %v4498_v27 = vpack.c.bf16 %v4483_v12, %v4483_v12  ;;  %v4540_v43 = vrot.slane %v4483_v12, 1  ;;  %v4541_v34 = vrot.slane %v4484_v32, 1  ;;  %v4620_v63 = vrot.slane %v4483_v12, 2 }
 0x7a9   : > { %4581 = vrot.lane.b32.xlu0 %v4561_v16, %s5462_s25  ;;  %v4621_v61 = vrot.slane %v4484_v32, 2  ;;  %v5407_v32 = vld [vmem:[%s8385_s3 + $0x74] sm:$0xff] }
 0x7aa   : > { %4812 = vrot.lane.b32.xlu1 %v4498_v27, %s5470_s16  ;;  %4506 = vst.msk [vmem:[#allocation5 + $0x14] sm:$0xf] %vm2763_vm10, %v4498_v27  ;;  %v4542_v50 = vsel %vm542_vm1, %v4540_v43, %v4541_v34  ;;  %4995 = vmatpush.bf16.msrb.mxu1 %v5407_v32  ;;  %v5406_v43 = vld [vmem:[%s8385_s3 + $0x6c] sm:$0xff] }
 0x7ab   : > { %v4695_v20 = vpop.permute.xlu2 %4694  ;;  %v4562_v48 = vpack.c.bf16 %v4542_v50, %v4542_v50  ;;  %v4622_v3 = vsel %vm848_vm4, %v4620_v63, %v4621_v61 }
 0x7ac   : > { %4718 = vst.msk [vmem:[#allocation5] sm:$0xf] %vm2983_vm9, %v4695_v20  ;;  %v4642_v19 = vpack.c.bf16 %v4622_v3, %v4622_v3 }
 0x7ad   : > { %4661 = vrot.lane.b32.xlu2 %v4641_v38, %s5464_s27 }
 0x7ae   : > { %4996 = vmatpush.bf16.msrb.mxu1 %v5406_v43 }
 0x7af   : > { %v4485_v45 = vld [vmem:[#allocation3 + $0x60] sm:$0xff]  ;;  %v4486_v49 = vld [vmem:[#allocation3 + $0x68] sm:$0x3] }
 0x7b0   : > { %v4499_v6 = vpack.c.bf16 %v4485_v45, %v4485_v45  ;;  %v4623_v55 = vrot.slane %v4485_v45, 2  ;;  %v4624_v24 = vrot.slane %v4486_v49, 2  ;;  %v4543_v35 = vrot.slane %v4485_v45, 1 }
 0x7b1   : > { %4852 = vrot.lane.b32.xlu0 %v4562_v48, %s5471_s17  ;;  %v4544_v4 = vrot.slane %v4486_v49, 1 }
 0x7b2   : > { %4702 = vrot.lane.b32.xlu1 %v4498_v27, %s5466_s29  ;;  %4507 = vst.msk [vmem:[#allocation5 + $0x18] sm:$0xf] %vm2763_vm10, %v4499_v6  ;;  %v4625_v37 = vsel %vm848_vm4, %v4623_v55, %v4624_v24 }
 0x7b3   : > { %v4576_v40 = vpop.permute.xlu2 %4575  ;;  %v4545_v1 = vsel %vm542_vm1, %v4543_v35, %v4544_v4  ;;  %v4643_v25 = vpack.c.bf16 %v4625_v37, %v4625_v37 }
 0x7b4   : > { %4598 = vst.msk [vmem:[#allocation5 + $0x4] sm:$0xf] %vm2860_vm7, %v4576_v40  ;;  %v4563_v42 = vpack.c.bf16 %v4545_v1, %v4545_v1  ;;  %v4492_v1 = vld [vmem:[#allocation3 + $0x98] sm:$0x3] }
 0x7b5   : > { %4890 = vrot.lane.b32.xlu2 %v4642_v19, %s5472_s22 }
 0x7b9   : > { %4663 = vrot.lane.b32.xlu0 %v4642_v19, %s5464_s27 }
 0x7ba   : > { %4583 = vrot.lane.b32.xlu1 %v4562_v48, %s5462_s25 }
 0x7bb   : > { %v4807_v60 = vpop.permute.xlu2 %4806 }
 0x7bd   : > { %4780 = vrot.lane.b32.xlu2 %v4642_v19, %s5469_s15 }
 0x7c1   : > { %4742 = vrot.lane.b32.xlu0 %v4562_v48, %s5468_s6 }
 0x7c2   : > { %4814 = vrot.lane.b32.xlu1 %v4499_v6, %s5470_s16 }
 0x7c3   : > { %v4737_v5 = vpop.permute.xlu2 %4736 }
 0x7c5   : > { %4704 = vrot.lane.b32.xlu2 %v4499_v6, %s5466_s29 }
 0x7c6   : > { %v4773_v18 = vpop.permute.xlu0 %4772  ;;  %v4656_v15 = vpop.permute.xlu1 %4655 }
 0x7c7   : > { %4678 = vst.msk [vmem:[#allocation5 + $0x4] sm:$0xf] %vm2941_vm8, %v4656_v15 }
 0x7c9   : > { %4782 = vrot.lane.b32.xlu0 %v4643_v25, %s5469_s15  ;;  %v4440_v59 = vpop.f32.mrf.mxu3 }
 0x7ca   : > { %v4441_v53 = vadd.f32 %v8151_v62, %v4440_v59  ;;  %4744 = vrot.lane.b32.xlu1 %v4563_v42, %s5468_s6 }
 0x7cb   : > { %v4578_v2 = vpop.permute.xlu2 %4577 }
 0x7cc   : > { %v4451_v56 = vmax.f32 %v4441_v53, 0.0  ;;  %4599 = vst.msk [vmem:[#allocation5 + $0x8] sm:$0xf] %vm2860_vm7, %v4578_v2  ;;  %v4841_v53 = vrot.slane %v4492_v1, 1 }
 0x7cd   : > { %4892 = vrot.lane.b32.xlu2 %v4643_v25, %s5472_s22 }
 0x7ce   : > { %4471 = vst.msk [vmem:[#allocation3 + $0x71] sm:$0xff] %vm282_vm6, %v4451_v56  ;;  %v4697_v10 = vpop.permute.xlu0 %4696  ;;  %v4735_v57 = vpop.permute.xlu1 %4734 }
 0x7cf   : > { %4719 = vst.msk [vmem:[#allocation5 + $0x4] sm:$0xf] %vm2983_vm9, %v4697_v10 }
 0x7d0   : > { %4759 = vst.msk [vmem:[#allocation5 + $0x4] sm:$0xf] %vm3024_vm11, %v4737_v5 }
 0x7d1   : > { %4758 = vst.msk [vmem:[#allocation5] sm:$0xf] %vm3024_vm11, %v4735_v57  ;;  %4854 = vrot.lane.b32.xlu0 %v4563_v42, %s5471_s17  ;;  %v4442_v39 = vpop.f32.mrf.mxu3 }
 0x7d2   : > { %4796 = vst.msk [vmem:[#allocation5] sm:$0xf] %vm8585_vm2, %v4773_v18  ;;  %v4443_v33 = vadd.f32 %v8151_v62, %v4442_v39  ;;  %4585 = vrot.lane.b32.xlu1 %v4563_v42, %s5462_s25 }
 0x7d3   : > { %4830 = vst.msk [vmem:[#allocation5] sm:$0xf] %vm3098_vm13, %v4807_v60 }
 0x7d4   : > { %v4452_v47 = vmax.f32 %v4443_v33, 0.0 }
 0x7d5   : > { %v4487_v38 = vld [vmem:[#allocation3 + $0x70] sm:$0xff]  ;;  %v4488_v22 = vld [vmem:[#allocation3 + $0x78] sm:$0x3] }
 0x7d6   : > { %4472 = vst.msk [vmem:[#allocation3 + $0x81] sm:$0xff] %vm282_vm6, %v4452_v47  ;;  %v4775_v36 = vpop.permute.xlu1 %4774  ;;  %v4500_v46 = vpack.c.bf16 %v4487_v38, %v4487_v38  ;;  %v4546_v16 = vrot.slane %v4487_v38, 1  ;;  %v4547_v28 = vrot.slane %v4488_v22, 1  ;;  %v4626_v62 = vrot.slane %v4487_v38, 2  ;;  %v4885_v20 = vpop.permute.xlu0 %4884 }
 0x7d7   : > { %4797 = vst.msk [vmem:[#allocation5 + $0x4] sm:$0xf] %vm8590_vm3, %v4775_v36  ;;  %v4627_v7 = vrot.slane %v4488_v22, 2  ;;  %vm8596_vm3 = vmmov %vm8585_vm2 }
 0x7d8   : > { %4816 = vrot.lane.b32.xlu2 %v4500_v46, %s5470_s16  ;;  %4508 = vst.msk [vmem:[#allocation5 + $0x1c] sm:$0xf] %vm2763_vm10, %v4500_v46  ;;  %v4548_v21 = vsel %vm542_vm1, %v4546_v16, %v4547_v28  ;;  %vm8591_vm10 = vmmov %vm8587_vm5 }
 0x7d9   : > { %4665 = vrot.lane.b32.xlu0 %v4643_v25, %s5464_s27  ;;  %v4564_v12 = vpack.c.bf16 %v4548_v21, %v4548_v21  ;;  %v4628_v27 = vsel %vm848_vm4, %v4626_v62, %v4627_v7  ;;  %v4879_v25 = vrot.slane %v4492_v1, 2 }
 0x7da   : > { %v4644_v50 = vpack.c.bf16 %v4628_v27, %v4628_v27 }
 0x7db   : > { %4856 = vrot.lane.b32.xlu1 %v4564_v12, %s5471_s17  ;;  %v4880_v59 = vsel %vm848_vm4, %v4305_v0, %v4879_v25 }
 0x7dc   : > { %v4882_v54 = vpack.c.bf16 %v4880_v59, %v4880_v59 }
 0x7dd   : > { %v4489_v61 = vld [vmem:[#allocation3 + $0x80] sm:$0xff]  ;;  %v4490_v48 = vld [vmem:[#allocation3 + $0x88] sm:$0x3] }
 0x7de   : > { %v4847_v34 = vpop.permute.xlu1 %4846  ;;  %v4685_v6 = vpack.c.bf16 %v4489_v61, %v4489_v61  ;;  %v4728_v40 = vrot.slane %v4489_v61, 1  ;;  %v4729_v19 = vrot.slane %v4490_v48, 1  ;;  %v4766_v60 = vrot.slane %v4489_v61, 2 }
 0x7df   : > { %4870 = vst.msk [vmem:[#allocation5] sm:$0xf] %vm3139_vm14, %v4847_v34  ;;  %v4849_v63 = vpop.permute.xlu2 %4848  ;;  %v4767_v49 = vrot.slane %v4490_v48, 2 }
 0x7e0   : > { %4908 = vst.msk [vmem:[#allocation5] sm:$0xf] %vm8591_vm10, %v4885_v20  ;;  %4706 = vrot.lane.b32.xlu2 %v4500_v46, %s5466_s29  ;;  %v4730_v55 = vsel %vm542_vm1, %v4728_v40, %v4729_v19 }
 0x7e1   : > { %4894 = vrot.lane.b32.xlu0 %v4644_v50, %s5472_s22  ;;  %v4732_v24 = vpack.c.bf16 %v4730_v55, %v4730_v55  ;;  %v4768_v35 = vsel %vm848_vm4, %v4766_v60, %v4767_v49  ;;  %vm8594_vm4 = vmmov %vm8585_vm2 }
 0x7e2   : > { %v4770_v5 = vpack.c.bf16 %v4768_v35, %v4768_v35 }
 0x7e3   : > { %4667 = vrot.lane.b32.xlu1 %v4644_v50, %s5464_s27 }
 0x7e6   : > { %v4658_v45 = vpop.permute.xlu1 %4657 }
 0x7e7   : > { %4679 = vst.msk [vmem:[#allocation5 + $0x8] sm:$0xf] %vm2941_vm8, %v4658_v45  ;;  %v4660_v3 = vpop.permute.xlu2 %4659 }
 0x7e8   : > { %4587 = vrot.lane.b32.xlu2 %v4564_v12, %s5462_s25 }
 0x7e9   : > { %4708 = vrot.lane.b32.xlu0 %v4685_v6, %s5466_s29  ;;  %s5363_s29 = sshll.u32 %s8604_s19, 6 }
 0x7eb   : > { %4746 = vrot.lane.b32.xlu1 %v4564_v12, %s5468_s6 }
 0x7ef   : > { %v4739_v4 = vpop.permute.xlu2 %4738 }
 0x7f0   : > { %4748 = vrot.lane.b32.xlu2 %v4732_v24, %s5468_s6 }
 0x7f1   : > { %4784 = vrot.lane.b32.xlu0 %v4644_v50, %s5469_s15 }
 0x7f3   : > { %v4809_v37 = vpop.permute.xlu0 %4808  ;;  %4786 = vrot.lane.b32.xlu1 %v4770_v5, %s5469_s15 }
 0x7f4   : > { %4831 = vst.msk [vmem:[#allocation5 + $0x4] sm:$0xf] %vm3098_vm13, %v4809_v37  ;;  %v5447_v37 = vld [vmem:[%s8386_s4 + $0x3] ss:$0 sm:$0xff] }
 0x7f5   : > { %4871 = vst.msk [vmem:[#allocation5 + $0x4] sm:$0xf] %vm3139_vm14, %v4849_v63 }
 0x7f6   : > { %v4887_v18 = vpop.permute.xlu1 %4886 }
 0x7f7   : > { %4909 = vst.msk [vmem:[#allocation5 + $0x4] sm:$0xf] %vm8587_vm5, %v4887_v18  ;;  %v4779_v15 = vpop.permute.xlu2 %4778 }
 0x7f8   : > { %4818 = vrot.lane.b32.xlu2 %v4685_v6, %s5470_s16 }
 0x7f9   : > { %4820 = vrot.lane.b32.xlu0 %v8077_v30, %s5470_s16  ;;  %v4842_v30 = vsel %vm542_vm1, %v4267_v26, %v4841_v53  ;;  %vm8593_vm1 = vmmov %vm8587_vm5  ;;  %s8352_s16 = scalar_lea.vmem %s8387_s5, %s5363_s29 }
 0x7fa   : > { %v4844_v10 = vpack.c.bf16 %v4842_v30, %v4842_v30  ;;  %vm8595_vm0 = vmmov %vm8593_vm1 }
 0x7fb   : > { %v4699_v42 = vpop.permute.xlu0 %4698  ;;  %4858 = vrot.lane.b32.xlu1 %v4732_v24, %s5471_s17  ;;  %vm8597_vm10 = vmmov %vm8595_vm0 }
 0x7fc   : > { %4720 = vst.msk [vmem:[#allocation5 + $0x8] sm:$0xf] %vm2983_vm9, %v4699_v42  ;;  %vm8598_vm5 = vmmov %vm8595_vm0 }
 0x7fd   : > { %4760 = vst.msk [vmem:[#allocation5 + $0x8] sm:$0xf] %vm3024_vm11, %v4739_v4 }
 0x7fe   : > { %v4777_v2 = vpop.permute.xlu1 %4776  ;;  %v5410_v52 = vld [vmem:[#allocation5] sm:$0xff] }
 0x7ff   : > { %4798 = vst.msk [vmem:[#allocation5 + $0x8] sm:$0xf] %vm8592_vm15, %v4777_v2  ;;  %v4851_v56 = vpop.permute.xlu2 %4850  ;;  %5356 = vmatmul.msk.bf16.vlgmr.msrb.gmra.mxu1 %vm3245_vm12, %v5410_v52 }
 0x800   : > { %4860 = vrot.lane.b32.xlu2 %v4844_v10, %s5471_s17 }
 0x801   : > { %4896 = vrot.lane.b32.xlu0 %v4770_v5, %s5472_s22 }
 0x803   : > { %v4580_v0 = vpop.permute.xlu0 %4579  ;;  %4898 = vrot.lane.b32.xlu1 %v4882_v54, %s5472_s22 }
 0x804   : > { %4600 = vst.msk [vmem:[#allocation5 + $0xc] sm:$0xf] %vm2860_vm7, %v4580_v0 }
 0x805   : > { %4680 = vst.msk [vmem:[#allocation5 + $0xc] sm:$0xf] %vm2941_vm8, %v4660_v3 }
 0x806   : > { %v4701_v57 = vpop.permute.xlu1 %4700 }
 0x807   : > { %4721 = vst.msk [vmem:[#allocation5 + $0xc] sm:$0xf] %vm2983_vm9, %v4701_v57  ;;  %v4662_v8 = vpop.permute.xlu2 %4661 }
 0x80b   : > { %v4811_v14 = vpop.permute.xlu0 %4810 }
 0x80c   : > { %4832 = vst.msk [vmem:[#allocation5 + $0x8] sm:$0xf] %vm3098_vm13, %v4811_v14 }
 0x80d   : > { %4872 = vst.msk [vmem:[#allocation5 + $0x8] sm:$0xf] %vm3139_vm14, %v4851_v56 }
 0x80e   : > { %v4889_v26 = vpop.permute.xlu1 %4888 }
 0x80f   : > { %4910 = vst.msk [vmem:[#allocation5 + $0x8] sm:$0xf] %vm8593_vm1, %v4889_v26  ;;  %v4891_v9 = vpop.permute.xlu2 %4890 }
 0x813   : > { %v4741_v39 = vpop.permute.xlu0 %4740 }
 0x814   : > { %4761 = vst.msk [vmem:[#allocation5 + $0xc] sm:$0xf] %vm3024_vm11, %v4741_v39 }
 0x815   : > { %4799 = vst.msk [vmem:[#allocation5 + $0xc] sm:$0xf] %vm8594_vm4, %v4779_v15 }
 0x817   : > { %v4781_v58 = vpop.permute.xlu2 %4780 }
 0x81b   : > { %v4582_v33 = vpop.permute.xlu0 %4581 }
 0x81c   : > { %4601 = vst.msk [vmem:[#allocation5 + $0x10] sm:$0xf] %vm2860_vm7, %v4582_v33  ;;  %v4813_v47 = vpop.permute.xlu1 %4812 }
 0x81d   : > { %4681 = vst.msk [vmem:[#allocation5 + $0x10] sm:$0xf] %vm2941_vm8, %v4662_v8 }
 0x81e   : > { %4833 = vst.msk [vmem:[#allocation5 + $0xc] sm:$0xf] %vm3098_vm13, %v4813_v47 }
 0x81f   : > { %v4705_v38 = vpop.permute.xlu2 %4704 }
 0x823   : > { %v4853_v22 = vpop.permute.xlu0 %4852 }
 0x824   : > { %4873 = vst.msk [vmem:[#allocation5 + $0xc] sm:$0xf] %vm3139_vm14, %v4853_v22  ;;  %v4703_v11 = vpop.permute.xlu1 %4702 }
 0x825   : > { %4911 = vst.msk [vmem:[#allocation5 + $0xc] sm:$0xf] %vm8595_vm0, %v4891_v9 }
 0x826   : > { %4722 = vst.msk [vmem:[#allocation5 + $0x10] sm:$0xf] %vm2983_vm9, %v4703_v11 }
 0x827   : > { %v4893_v36 = vpop.permute.xlu2 %4892 }
 0x82b   : > { %v4664_v46 = vpop.permute.xlu0 %4663 }
 0x82c   : > { %v4584_v16 = vpop.permute.xlu1 %4583  ;;  %v5411_v28 = vld [vmem:[#allocation5 + $0x8] sm:$0xff] }
 0x82d   : > { %4602 = vst.msk [vmem:[#allocation5 + $0x14] sm:$0xf] %vm2860_vm7, %v4584_v16  ;;  %5357 = vmatmul.msk.bf16.gmra.mxu1 %vm3245_vm12, %v5411_v28 }
 0x82e   : > { %4682 = vst.msk [vmem:[#allocation5 + $0x14] sm:$0xf] %vm2941_vm8, %v4664_v46 }
 0x82f   : > { %4723 = vst.msk [vmem:[#allocation5 + $0x14] sm:$0xf] %vm2983_vm9, %v4705_v38 }
 0x832   : > { %v4817_v62 = vpop.permute.xlu2 %4816 }
 0x833   : > { %v4743_v21 = vpop.permute.xlu0 %4742 }
 0x834   : > { %4762 = vst.msk [vmem:[#allocation5 + $0x10] sm:$0xf] %vm3024_vm11, %v4743_v21  ;;  %v4815_v7 = vpop.permute.xlu1 %4814 }
 0x835   : > { %4800 = vst.msk [vmem:[#allocation5 + $0x10] sm:$0xf] %vm8585_vm2, %v4781_v58 }
 0x836   : > { %4834 = vst.msk [vmem:[#allocation5 + $0x10] sm:$0xf] %vm3098_vm13, %v4815_v7 }
 0x83a   : > { %v4707_v12 = vpop.permute.xlu2 %4706 }
 0x83b   : > { %v4783_v32 = vpop.permute.xlu0 %4782 }
 0x83c   : > { %v4745_v27 = vpop.permute.xlu1 %4744 }
 0x83d   : > { %4763 = vst.msk [vmem:[#allocation5 + $0x14] sm:$0xf] %vm3024_vm11, %v4745_v27 }
 0x83e   : > { %4801 = vst.msk [vmem:[#allocation5 + $0x14] sm:$0xf] %vm8596_vm3, %v4783_v32 }
 0x83f   : > { %4835 = vst.msk [vmem:[#allocation5 + $0x14] sm:$0xf] %vm3098_vm13, %v4817_v62 }
 0x842   : > { %v4588_v43 = vpop.permute.xlu2 %4587 }
 0x843   : > { %v4855_v34 = vpop.permute.xlu0 %4854  ;;  %4604 = vst.msk [vmem:[#allocation5 + $0x1c] sm:$0xf] %vm2860_vm7, %v4588_v43 }
 0x844   : > { %4874 = vst.msk [vmem:[#allocation5 + $0x10] sm:$0xf] %vm3139_vm14, %v4855_v34  ;;  %v4586_v20 = vpop.permute.xlu1 %4585 }
 0x845   : > { %4912 = vst.msk [vmem:[#allocation5 + $0x10] sm:$0xf] %vm8597_vm10, %v4893_v36 }
 0x846   : > { %4603 = vst.msk [vmem:[#allocation5 + $0x18] sm:$0xf] %vm2860_vm7, %v4586_v20  ;;  %vm8599_vm7 = vmmov %vm8585_vm2 }
 0x84a   : > { %v4749_v45 = vpop.permute.xlu2 %4748 }
 0x84b   : > { %v4666_v63 = vpop.permute.xlu0 %4665 }
 0x84c   : > { %4683 = vst.msk [vmem:[#allocation5 + $0x18] sm:$0xf] %vm2941_vm8, %v4666_v63 }
 0x84d   : > { %4724 = vst.msk [vmem:[#allocation5 + $0x18] sm:$0xf] %vm2983_vm9, %v4707_v12  ;;  %v4857_v50 = vpop.permute.xlu1 %4856 }
 0x84e   : > { %4875 = vst.msk [vmem:[#allocation5 + $0x14] sm:$0xf] %vm3139_vm14, %v4857_v50 }
 0x852   : > { %v4819_v19 = vpop.permute.xlu2 %4818 }
 0x853   : > { %v4895_v61 = vpop.permute.xlu0 %4894 }
 0x854   : > { %4913 = vst.msk [vmem:[#allocation5 + $0x14] sm:$0xf] %vm8598_vm5, %v4895_v61 }
 0x855   : > { %v4668_v48 = vpop.permute.xlu1 %4667 }
 0x856   : > { %4684 = vst.msk [vmem:[#allocation5 + $0x1c] sm:$0xf] %vm2941_vm8, %v4668_v48  ;;  %vm8600_vm8 = vmmov %vm8585_vm2 }
 0x85a   : > { %v4861_v55 = vpop.permute.xlu2 %4860 }
 0x85b   : > { %v4709_v3 = vpop.permute.xlu0 %4708  ;;  %v5412_v6 = vld [vmem:[#allocation5 + $0x10] sm:$0xff] }
 0x85c   : > { %4725 = vst.msk [vmem:[#allocation5 + $0x1c] sm:$0xf] %vm2983_vm9, %v4709_v3  ;;  %5358 = vmatmul.msk.bf16.gmra.mxu1 %vm3245_vm12, %v5412_v6  ;;  %vm8601_vm9 = vmmov %vm8595_vm0 }
 0x85d   : > { %4765 = vst.msk [vmem:[#allocation5 + $0x1c] sm:$0xf] %vm3024_vm11, %v4749_v45  ;;  %v4747_v40 = vpop.permute.xlu1 %4746 }
 0x85e   : > { %4764 = vst.msk [vmem:[#allocation5 + $0x18] sm:$0xf] %vm3024_vm11, %v4747_v40  ;;  %vm8602_vm11 = vmmov %vm8595_vm0 }
 0x863   : > { %v4785_v60 = vpop.permute.xlu0 %4784 }
 0x864   : > { %4802 = vst.msk [vmem:[#allocation5 + $0x18] sm:$0xf] %vm8599_vm7, %v4785_v60 }
 0x865   : > { %4836 = vst.msk [vmem:[#allocation5 + $0x18] sm:$0xf] %vm3098_vm13, %v4819_v19  ;;  %v4787_v49 = vpop.permute.xlu1 %4786 }
 0x866   : > { %4803 = vst.msk [vmem:[#allocation5 + $0x1c] sm:$0xf] %vm8600_vm8, %v4787_v49 }
 0x86b   : > { %v4821_v24 = vpop.permute.xlu0 %4820 }
 0x86c   : > { %4837 = vst.msk [vmem:[#allocation5 + $0x1c] sm:$0xf] %vm3098_vm13, %v4821_v24 }
 0x86d   : > { %v4859_v35 = vpop.permute.xlu1 %4858  ;;  %4877 = vst.msk [vmem:[#allocation5 + $0x1c] sm:$0xf] %vm3139_vm14, %v4861_v55 }
 0x86e   : > { %4876 = vst.msk [vmem:[#allocation5 + $0x18] sm:$0xf] %vm3139_vm14, %v4859_v35 }
 0x873   : > { %v4897_v4 = vpop.permute.xlu0 %4896 }
 0x874   : > { %4914 = vst.msk [vmem:[#allocation5 + $0x18] sm:$0xf] %vm8601_vm9, %v4897_v4 }
 0x875   : > { %v4899_v5 = vpop.permute.xlu1 %4898 }
 0x876   : > { %4915 = vst.msk [vmem:[#allocation5 + $0x1c] sm:$0xf] %vm8602_vm11, %v4899_v5 }
 0x87c   : > { %v4998_v1 = vpop.f32.mrf.mxu1 }
 0x87d   : > { %v5413_v18 = vld [vmem:[#allocation5 + $0x18] sm:$0xff]  ;;  %v4999_v15 = vadd.f32 %v5447_v37, %v4998_v1 }
 0x87e   : > { %5359 = vmatmul.msk.bf16.gmra.mxu1 %vm3245_vm12, %v5413_v18 }
 0x87f   : > { %v5018_v25 = vadd.f32 %v4999_v15, %v7914_v29 }
 0x881   : > { %5026 = vst.msk [vmem:[%s8352_s16] sm:$0xff] %vm282_vm6, %v5018_v25 }
 0x884   : > { %v5000_v42 = vpop.f32.mrf.mxu1 }
 0x885   : > { %v5001_v59 = vadd.f32 %v5447_v37, %v5000_v42 }
 0x887   : > { %v5019_v53 = vadd.f32 %v5001_v59, %v7920_v17 }
 0x889   : > { %5027 = vst.msk [vmem:[%s8352_s16 + $0x8] sm:$0xff] %vm282_vm6, %v5019_v53 }
 0x8aa   : > { %v5003_v2 = vpop.f32.mrf.mxu1 }
 0x8ab   : > { %v5004_v52 = vadd.f32 %v5447_v37, %v5003_v2 }
 0x8ad   : > { %v5020_v56 = vadd.f32 %v5004_v52, %v7942_v44 }
 0x8af   : > { %5028 = vst.msk [vmem:[%s8352_s16 + $0x10] sm:$0xff] %vm282_vm6, %v5020_v56 }
 0x8b2   : > { %v5005_v54 = vpop.f32.mrf.mxu1 }
 0x8b3   : > { %v5006_v30 = vadd.f32 %v5447_v37, %v5005_v54 }
 0x8b5   : > { %v5021_v29 = vadd.f32 %v5006_v30, %v7948_v13 }
 0x8b7   : > { %5029 = vst.msk [vmem:[%s8352_s16 + $0x18] sm:$0xff] %vm282_vm6, %v5021_v29 }
 0x8d9   : > { %v5008_v10 = vpop.f32.mrf.mxu1 }
 0x8da   : > { %v5009_v0 = vadd.f32 %v5447_v37, %v5008_v10 }
 0x8dc   : > { %v5022_v17 = vadd.f32 %v5009_v0, %v7971_v31 }
 0x8de   : > { %5030 = vst.msk [vmem:[%s8352_s16 + $0x20] sm:$0xff] %vm282_vm6, %v5022_v17 }
 0x8e1   : > { %v5010_v57 = vpop.f32.mrf.mxu1 }
 0x8e2   : > { %v5011_v8 = vadd.f32 %v5447_v37, %v5010_v57 }
 0x8e4   : > { %v5023_v44 = vadd.f32 %v5011_v8, %v7980_v51 }
 0x8e6   : > { %5031 = vst.msk [vmem:[%s8352_s16 + $0x28] sm:$0xff] %vm282_vm6, %v5023_v44 }
 0x8fb   : > { %v5013_v14 = vpop.f32.mrf.mxu1 }
 0x8fc   : > { %v5014_v26 = vadd.f32 %v5447_v37, %v5013_v14 }
 0x8fe   : > { %v5024_v9 = vadd.f32 %v5014_v26, %v8008_v41 }
 0x900   : > { %5032 = vst.msk [vmem:[%s8352_s16 + $0x30] sm:$0xff] %vm282_vm6, %v5024_v9 }
 0x903   : > { %v5015_v13 = vpop.f32.mrf.mxu1 }
 0x904   : > { %v5016_v39 = vadd.f32 %v5447_v37, %v5015_v13 }
 0x906   : > { %v5025_v58 = vadd.f32 %v5016_v39, %v8025_v23 }
 0x908   : > { %5033 = vst.msk [vmem:[%s8352_s16 + $0x38] sm:$0xff] %vm282_vm6, %v5025_v58 }
 0x909 PF: > { %s15_s18 = sadd.s32 1, %s5458_s18  }
 0x90a   : > { %p12_p4 = scmp.ge.s32.totalorder %s15_s18, 4  }
 0x90c   :  { %14 = sbr.rel (!%p12_p4) target bundleno = 1 (0x1), region = 78 }

</bundles_post_ra>
